<compile_context>
chip_gen: v7x
topology: tpu7x:2x2x1
jax: 0.10.0
libtpu: 0.0.40
codegen_flags: <defaults>
</compile_context>

<pallas_src>
import functools

import jax
import jax.numpy as jnp
from jax import lax
from jax.experimental import pallas as pl
from jax.experimental.pallas import tpu as pltpu


# --------------------------- in-kernel math helpers ---------------------------

def _ln(x, g, b):
    """LayerNorm over the last axis, eps=1e-5.  x: (S, D) f32, g/b: (1, D) f32."""
    mu = jnp.mean(x, axis=-1, keepdims=True)
    var = jnp.mean((x - mu) ** 2, axis=-1, keepdims=True)
    return (x - mu) * lax.rsqrt(var + 1e-5) * g + b


def _ffn(x, w1, b1, w2, b2):
    """x: (S, D) f32; w1/w2 bf16 (D, D); b1/b2 (1, D) f32."""
    h = jnp.dot(x.astype(jnp.bfloat16), w1,
                preferred_element_type=jnp.float32) + b1
    h = jnp.maximum(h, 0.0)
    return jnp.dot(h.astype(jnp.bfloat16), w2,
                   preferred_element_type=jnp.float32) + b2


def _mha(xq, xkv, wq, bq, wk, bk, wv, bv, wo, bo, heads, mask):
    """Multi-head attention with head-major stacked weights.

    xq: (Sq, D) f32 query source; xkv: (Sk, D) f32 key/value source.
    wq/wk/wv: (H, D, dh) bf16; bq/bk/bv: (H, 1, dh) f32.
    wo: (H, dh, D) bf16; bo: (1, D) f32.
    mask: (Sq, Sk) bool (hoisted, shared across heads/layers) or None.
    """
    xqb = xq.astype(jnp.bfloat16)          # cast once, reused for all heads
    xkb = xkv.astype(jnp.bfloat16)
    dh = wq.shape[-1]
    scale = 1.0 / float(dh) ** 0.5
    out = None
    for h in range(heads):                  # static unrolled head loop
        # per-head projections: weight slices (static major-dim index), no
        # activation lane-slicing anywhere.
        q = jnp.dot(xqb, wq[h], preferred_element_type=jnp.float32) + bq[h]
        k = jnp.dot(xkb, wk[h], preferred_element_type=jnp.float32) + bk[h]
        v = jnp.dot(xkb, wv[h], preferred_element_type=jnp.float32) + bv[h]
        s = jnp.einsum('qe,ke->qk', q.astype(jnp.bfloat16),
                       k.astype(jnp.bfloat16),
                       preferred_element_type=jnp.float32) * scale
        if mask is not None:
            s = jnp.where(mask, s, -1e30)
        m = jnp.max(s, axis=-1, keepdims=True)
        p = jnp.exp(s - m)
        p = p * (1.0 / jnp.sum(p, axis=-1, keepdims=True))   # exact reciprocal
        o = jnp.dot(p.astype(jnp.bfloat16), v.astype(jnp.bfloat16),
                    preferred_element_type=jnp.float32)
        contrib = jnp.dot(o.astype(jnp.bfloat16), wo[h],
                          preferred_element_type=jnp.float32)
        out = contrib if out is None else out + contrib
    return out + bo


# ------------------------------- Pallas kernels -------------------------------

def _encoder_stack_kernel(data_ref, teach_ref,
                          fe_w_ref, fe_b_ref,
                          embf_w_ref, embt_w_ref, emb_b_ref, pos_ref,
                          wq_ref, bq_ref, wk_ref, bk_ref, wv_ref, bv_ref,
                          wo_ref, bo_ref, ln1g_ref, ln1b_ref,
                          w1_ref, b1_ref, w2_ref, b2_ref, ln2g_ref, ln2b_ref,
                          feats_ref, out_ref, *, heads, num_layers):
    data = data_ref[0]                                   # (S, Fin) f32
    teach = teach_ref[0]                                 # (S, R)   f32

    # fused feature extractor (flatten + Linear)
    feats = jnp.dot(data.astype(jnp.bfloat16), fe_w_ref[...],
                    preferred_element_type=jnp.float32) + fe_b_ref[...]
    feats_ref[0] = feats

    # fused concat([feats, teach]) + input embedding + positional embedding
    x = (jnp.dot(feats.astype(jnp.bfloat16), embf_w_ref[...],
                 preferred_element_type=jnp.float32)
         + jnp.dot(teach.astype(jnp.bfloat16), embt_w_ref[...],
                   preferred_element_type=jnp.float32)
         + emb_b_ref[...] + pos_ref[...])                # (S, D)

    s_len = x.shape[0]
    # hoisted causal mask, shared across layers and heads
    row = lax.broadcasted_iota(jnp.int32, (s_len, s_len), 0)
    col = lax.broadcasted_iota(jnp.int32, (s_len, s_len), 1)
    causal = col <= row

    for l in range(num_layers):                          # static layer loop
        attn = _mha(x, x,
                    wq_ref[l], bq_ref[l], wk_ref[l], bk_ref[l],
                    wv_ref[l], bv_ref[l], wo_ref[l], bo_ref[l],
                    heads, causal)
        x = _ln(attn + x, ln1g_ref[l], ln1b_ref[l])
        f = _ffn(x, w1_ref[l], b1_ref[l], w2_ref[l], b2_ref[l])
        x = _ln(f + x, ln2g_ref[l], ln2b_ref[l])

    out_ref[0] = x


def _decoder_stack_kernel(dec_ref, enc_ref,
                          emb_w_ref, emb_b_ref, pos_ref,
                          swq_ref, sbq_ref, swk_ref, sbk_ref, swv_ref, sbv_ref,
                          swo_ref, sbo_ref, ln1g_ref, ln1b_ref,
                          cwq_ref, cbq_ref, cwk_ref, cbk_ref, cwv_ref, cbv_ref,
                          cwo_ref, cbo_ref, ln2g_ref, ln2b_ref,
                          w1_ref, b1_ref, w2_ref, b2_ref, ln3g_ref, ln3b_ref,
                          outw_ref, outb_ref,
                          resp_ref, *, heads, num_layers):
    dec = dec_ref[0]                                     # (S, R) f32
    enc = enc_ref[0]                                     # (S, D) f32

    # input embedding + positional embedding (first block only)
    x = (jnp.dot(dec.astype(jnp.bfloat16), emb_w_ref[...],
                 preferred_element_type=jnp.float32)
         + emb_b_ref[...] + pos_ref[...])                # (S, D)

    s_len = x.shape[0]
    row = lax.broadcasted_iota(jnp.int32, (s_len, s_len), 0)
    col = lax.broadcasted_iota(jnp.int32, (s_len, s_len), 1)
    causal = col <= row

    for l in range(num_layers):                          # static layer loop
        # causal self-attention
        attn = _mha(x, x,
                    swq_ref[l], sbq_ref[l], swk_ref[l], sbk_ref[l],
                    swv_ref[l], sbv_ref[l], swo_ref[l], sbo_ref[l],
                    heads, causal)
        x = _ln(attn + x, ln1g_ref[l], ln1b_ref[l])

        # cross-attention over the encoder output
        # TODO(synk): SAINT-style causal mask kept (vanilla enc-dec would be unmasked).
        cattn = _mha(x, enc,
                     cwq_ref[l], cbq_ref[l], cwk_ref[l], cbk_ref[l],
                     cwv_ref[l], cbv_ref[l], cwo_ref[l], cbo_ref[l],
                     heads, causal)
        x = _ln(cattn + x, ln2g_ref[l], ln2b_ref[l])

        f = _ffn(x, w1_ref[l], b1_ref[l], w2_ref[l], b2_ref[l])
        x = _ln(f + x, ln3g_ref[l], ln3b_ref[l])

    # fused final output projection
    resp_ref[0] = (jnp.dot(x.astype(jnp.bfloat16), outw_ref[...],
                           preferred_element_type=jnp.float32) + outb_ref[...])


# ---------------------------- host-side wrappers ----------------------------

def _rep(arr):
    """Full-array block, replicated (constant index map) across the batch grid."""
    zeros = (0,) * arr.ndim
    shape = arr.shape
    return pl.BlockSpec(shape, lambda b: zeros)


_ENC_WEIGHT_ORDER = ('fe_w', 'fe_b', 'embf_w', 'embt_w', 'emb_b', 'pos',
                     'wq', 'bq', 'wk', 'bk', 'wv', 'bv', 'wo', 'bo',
                     'ln1_g', 'ln1_b', 'w1', 'b1', 'w2', 'b2', 'ln2_g', 'ln2_b')

_DEC_WEIGHT_ORDER = ('emb_w', 'emb_b', 'pos',
                     'swq', 'sbq', 'swk', 'sbk', 'swv', 'sbv', 'swo', 'sbo',
                     'ln1_g', 'ln1_b',
                     'cwq', 'cbq', 'cwk', 'cbk', 'cwv', 'cbv', 'cwo', 'cbo',
                     'ln2_g', 'ln2_b',
                     'w1', 'b1', 'w2', 'b2', 'ln3_g', 'ln3_b',
                     'out_w', 'out_b')

_CPARAMS = pltpu.CompilerParams(dimension_semantics=("parallel",),
                                vmem_limit_bytes=32 * 1024 * 1024)


def encoder_stack(data_flat, teach, p, heads, num_layers):
    """data_flat: (B, S, Fin) f32, teach: (B, S, R) f32 -> (feats, enc_out)."""
    B, S, Fin = data_flat.shape
    R = teach.shape[-1]
    Fd = p['fe_w'].shape[1]
    D = p['embf_w'].shape[1]
    weights = [p[k] for k in _ENC_WEIGHT_ORDER]
    in_specs = ([pl.BlockSpec((1, S, Fin), lambda b: (b, 0, 0)),
                 pl.BlockSpec((1, S, R), lambda b: (b, 0, 0))]
                + [_rep(w) for w in weights])
    out_specs = (pl.BlockSpec((1, S, Fd), lambda b: (b, 0, 0)),
                 pl.BlockSpec((1, S, D), lambda b: (b, 0, 0)))
    out_shape = (jax.ShapeDtypeStruct((B, S, Fd), jnp.float32),
                 jax.ShapeDtypeStruct((B, S, D), jnp.float32))
    return pl.pallas_call(
        functools.partial(_encoder_stack_kernel, heads=heads,
                          num_layers=num_layers),
        out_shape=out_shape,
        grid=(B,),
        in_specs=in_specs,
        out_specs=out_specs,
        compiler_params=_CPARAMS,
    )(data_flat, teach, *weights)


def decoder_stack(dec_in, enc_out, p, heads, num_layers):
    """dec_in: (B, S, R) f32, enc_out: (B, S, D) f32 -> responses (B, S, R)."""
    B, S, R = dec_in.shape
    D = enc_out.shape[-1]
    Ro = p['out_w'].shape[1]
    weights = [p[k] for k in _DEC_WEIGHT_ORDER]
    in_specs = ([pl.BlockSpec((1, S, R), lambda b: (b, 0, 0)),
                 pl.BlockSpec((1, S, D), lambda b: (b, 0, 0))]
                + [_rep(w) for w in weights])
    return pl.pallas_call(
        functools.partial(_decoder_stack_kernel, heads=heads,
                          num_layers=num_layers),
        out_shape=jax.ShapeDtypeStruct((B, S, Ro), jnp.float32),
        grid=(B,),
        in_specs=in_specs,
        out_specs=pl.BlockSpec((1, S, Ro), lambda b: (b, 0, 0)),
        compiler_params=_CPARAMS,
    )(dec_in, enc_out, *weights)


# -------------------------------- parameter init --------------------------------

class _KeyGen:
    def __init__(self, key):
        self._key = key
        self._i = 0

    def __call__(self):
        self._i += 1
        return jax.random.fold_in(self._key, self._i)


def init_params(key, *, feat_in, feat_dim, resp_dim, seq_len, hidden,
                enc_heads, dec_heads, num_enc, num_dec):
    # Weights are stored in bf16 (MXU operands) with f32 biases/LN params; this
    # is a deliberate precision choice vs the fp32 PyTorch reference.
    assert hidden % enc_heads == 0 and hidden % dec_heads == 0
    dhe = hidden // enc_heads
    dhd = hidden // dec_heads
    kg = _KeyGen(key)

    def w(shape, scale=0.05):
        return (scale * jax.random.normal(kg(), shape, jnp.float32)
                ).astype(jnp.bfloat16)

    def bz(shape):
        return jnp.zeros(shape, jnp.float32)

    def ones(shape):
        return jnp.ones(shape, jnp.float32)

    Le, Ld = num_enc, num_dec
    enc = dict(
        fe_w=w((feat_in, feat_dim)), fe_b=bz((1, feat_dim)),
        embf_w=w((feat_dim, hidden)), embt_w=w((resp_dim, hidden)),
        emb_b=bz((1, hidden)),
        pos=0.05 * jax.random.normal(kg(), (seq_len, hidden), jnp.float32),
        wq=w((Le, enc_heads, hidden, dhe)), bq=bz((Le, enc_heads, 1, dhe)),
        wk=w((Le, enc_heads, hidden, dhe)), bk=bz((Le, enc_heads, 1, dhe)),
        wv=w((Le, enc_heads, hidden, dhe)), bv=bz((Le, enc_heads, 1, dhe)),
        wo=w((Le, enc_heads, dhe, hidden)), bo=bz((Le, 1, hidden)),
        ln1_g=ones((Le, 1, hidden)), ln1_b=bz((Le, 1, hidden)),
        w1=w((Le, hidden, hidden)), b1=bz((Le, 1, hidden)),
        w2=w((Le, hidden, hidden)), b2=bz((Le, 1, hidden)),
        ln2_g=ones((Le, 1, hidden)), ln2_b=bz((Le, 1, hidden)),
    )
    dec = dict(
        emb_w=w((resp_dim, hidden)), emb_b=bz((1, hidden)),
        pos=0.05 * jax.random.normal(kg(), (seq_len, hidden), jnp.float32),
        swq=w((Ld, dec_heads, hidden, dhd)), sbq=bz((Ld, dec_heads, 1, dhd)),
        swk=w((Ld, dec_heads, hidden, dhd)), sbk=bz((Ld, dec_heads, 1, dhd)),
        swv=w((Ld, dec_heads, hidden, dhd)), sbv=bz((Ld, dec_heads, 1, dhd)),
        swo=w((Ld, dec_heads, dhd, hidden)), sbo=bz((Ld, 1, hidden)),
        ln1_g=ones((Ld, 1, hidden)), ln1_b=bz((Ld, 1, hidden)),
        cwq=w((Ld, dec_heads, hidden, dhd)), cbq=bz((Ld, dec_heads, 1, dhd)),
        cwk=w((Ld, dec_heads, hidden, dhd)), cbk=bz((Ld, dec_heads, 1, dhd)),
        cwv=w((Ld, dec_heads, hidden, dhd)), cbv=bz((Ld, dec_heads, 1, dhd)),
        cwo=w((Ld, dec_heads, dhd, hidden)), cbo=bz((Ld, 1, hidden)),
        ln2_g=ones((Ld, 1, hidden)), ln2_b=bz((Ld, 1, hidden)),
        w1=w((Ld, hidden, hidden)), b1=bz((Ld, 1, hidden)),
        w2=w((Ld, hidden, hidden)), b2=bz((Ld, 1, hidden)),
        ln3_g=ones((Ld, 1, hidden)), ln3_b=bz((Ld, 1, hidden)),
        out_w=w((hidden, resp_dim)), out_b=bz((1, resp_dim)),
    )
    return dict(enc=enc, dec=dec)


# ------------------------------------ forward ------------------------------------

def forward(params, responses_t, data_t, teaching_signal_t, *,
            enc_heads, dec_heads, num_enc, num_dec):
    B, S = data_t.shape[:2]

    # feature extraction is fused into the encoder kernel; only flatten here.
    data_flat = data_t.reshape(B, S, -1)

    feats, encoder_out = encoder_stack(data_flat, teaching_signal_t,
                                       params['enc'], enc_heads, num_enc)
    feats4 = feats[:, :, None, :]                                   # (B,S,1,Fd)
    encoder_first = jnp.concatenate([feats, teaching_signal_t], axis=-1)

    dec_in = responses_t.astype(jnp.float32)[:, :, 0, :]            # squeeze(-2)
    zeros_row = jnp.zeros_like(dec_in[:, :1, :])
    decoder_first = jnp.concatenate([zeros_row, dec_in], axis=1)    # (B, S+1, R)
    dec_shift = decoder_first[:, :-1]                               # shifted right

    resp = decoder_stack(dec_shift, encoder_out, params['dec'],
                         dec_heads, num_dec)                        # (B, S, R)
    responses = resp[:, :, None, :]                                 # unsqueeze(-2)
    init_responses = responses[:, 0]

    return dict(init_responses=init_responses, feats=feats4,
                encoder_first=encoder_first, decoder_first=decoder_first,
                responses=responses)


# ------------------------------------- main --------------------------------------

if __name__ == "__main__":
    key = jax.random.PRNGKey(0)

    # small shapes consistent with the module's forward
    B, S = 2, 8                       # batch, seq_len
    C, H, W = 1, 8, 8                 # per-step image (NCHW)
    feat_dim = 16                     # == input_dimension[1]
    R = 4                             # np.prod(response_dimension)
    hidden = 32
    enc_heads = dec_heads = 4
    num_enc = num_dec = 2

    k_param, k_data, k_resp, k_teach = jax.random.split(key, 4)
    params = init_params(k_param, feat_in=C * H * W, feat_dim=feat_dim,
                         resp_dim=R, seq_len=S, hidden=hidden,
                         enc_heads=enc_heads, dec_heads=dec_heads,
                         num_enc=num_enc, num_dec=num_dec)

    data_t = jax.random.normal(k_data, (B, S, C, H, W), jnp.float32)
    responses_t = jax.random.normal(k_resp, (B, S, 1, R), jnp.float32)
    teaching_signal_t = jax.random.normal(k_teach, (B, S, R), jnp.float32)

    fwd = jax.jit(functools.partial(forward, enc_heads=enc_heads,
                                    dec_heads=dec_heads,
                                    num_enc=num_enc, num_dec=num_dec))
    out = fwd(params, responses_t, data_t, teaching_signal_t)
    jax.block_until_ready(out)

    assert out['responses'].shape == (B, S, 1, R)
    assert out['init_responses'].shape == (B, 1, R)
    assert out['feats'].shape == (B, S, 1, feat_dim)
    assert out['encoder_first'].shape == (B, S, feat_dim + R)
    assert out['decoder_first'].shape == (B, S + 1, R)
    assert all(jnp.isfinite(out[k]).all() for k in
               ('responses', 'init_responses', 'feats'))

    print("KERNEL_OK")
</pallas_src>

<mosaic_0001>
module attributes {stable_mosaic.version = 11 : i64} {
  func.func @_encoder_stack_kernel(%arg0: i32, %arg1: memref<1x8x64xf32, #tpu.memory_space<vmem>>, %arg2: memref<1x8x4xf32, #tpu.memory_space<vmem>>, %arg3: memref<64x16xbf16, #tpu.memory_space<vmem>>, %arg4: memref<1x16xf32, #tpu.memory_space<vmem>>, %arg5: memref<16x32xbf16, #tpu.memory_space<vmem>>, %arg6: memref<4x32xbf16, #tpu.memory_space<vmem>>, %arg7: memref<1x32xf32, #tpu.memory_space<vmem>>, %arg8: memref<8x32xf32, #tpu.memory_space<vmem>>, %arg9: memref<2x4x32x8xbf16, #tpu.memory_space<vmem>>, %arg10: memref<2x4x1x8xf32, #tpu.memory_space<vmem>>, %arg11: memref<2x4x32x8xbf16, #tpu.memory_space<vmem>>, %arg12: memref<2x4x1x8xf32, #tpu.memory_space<vmem>>, %arg13: memref<2x4x32x8xbf16, #tpu.memory_space<vmem>>, %arg14: memref<2x4x1x8xf32, #tpu.memory_space<vmem>>, %arg15: memref<2x4x8x32xbf16, #tpu.memory_space<vmem>>, %arg16: memref<2x1x32xf32, #tpu.memory_space<vmem>>, %arg17: memref<2x1x32xf32, #tpu.memory_space<vmem>>, %arg18: memref<2x1x32xf32, #tpu.memory_space<vmem>>, %arg19: memref<2x32x32xbf16, #tpu.memory_space<vmem>>, %arg20: memref<2x1x32xf32, #tpu.memory_space<vmem>>, %arg21: memref<2x32x32xbf16, #tpu.memory_space<vmem>>, %arg22: memref<2x1x32xf32, #tpu.memory_space<vmem>>, %arg23: memref<2x1x32xf32, #tpu.memory_space<vmem>>, %arg24: memref<2x1x32xf32, #tpu.memory_space<vmem>>, %arg25: memref<1x8x16xf32, #tpu.memory_space<vmem>>, %arg26: memref<1x8x32xf32, #tpu.memory_space<vmem>>) attributes {dimension_semantics = [#tpu.dimension_semantics<parallel>], iteration_bounds = array<i64: 2>, scalar_prefetch = 0 : i64, scratch_operands = 0 : i64, tpu.core_type = #tpu.core_type<tc>, window_params = [{transform_indices = @transform_0, window_bounds = array<i64: 1, 8, 64>}, {transform_indices = @transform_1, window_bounds = array<i64: 1, 8, 4>}, {pipeline_mode = #tpu.pipeline_mode<synchronous>, transform_indices = @transform_2, window_bounds = array<i64: 64, 16>}, {pipeline_mode = #tpu.pipeline_mode<synchronous>, transform_indices = @transform_3, window_bounds = array<i64: 1, 16>}, {pipeline_mode = #tpu.pipeline_mode<synchronous>, transform_indices = @transform_4, window_bounds = array<i64: 16, 32>}, {pipeline_mode = #tpu.pipeline_mode<synchronous>, transform_indices = @transform_5, window_bounds = array<i64: 4, 32>}, {pipeline_mode = #tpu.pipeline_mode<synchronous>, transform_indices = @transform_6, window_bounds = array<i64: 1, 32>}, {pipeline_mode = #tpu.pipeline_mode<synchronous>, transform_indices = @transform_7, window_bounds = array<i64: 8, 32>}, {pipeline_mode = #tpu.pipeline_mode<synchronous>, transform_indices = @transform_8, window_bounds = array<i64: 2, 4, 32, 8>}, {pipeline_mode = #tpu.pipeline_mode<synchronous>, transform_indices = @transform_9, window_bounds = array<i64: 2, 4, 1, 8>}, {pipeline_mode = #tpu.pipeline_mode<synchronous>, transform_indices = @transform_10, window_bounds = array<i64: 2, 4, 32, 8>}, {pipeline_mode = #tpu.pipeline_mode<synchronous>, transform_indices = @transform_11, window_bounds = array<i64: 2, 4, 1, 8>}, {pipeline_mode = #tpu.pipeline_mode<synchronous>, transform_indices = @transform_12, window_bounds = array<i64: 2, 4, 32, 8>}, {pipeline_mode = #tpu.pipeline_mode<synchronous>, transform_indices = @transform_13, window_bounds = array<i64: 2, 4, 1, 8>}, {pipeline_mode = #tpu.pipeline_mode<synchronous>, transform_indices = @transform_14, window_bounds = array<i64: 2, 4, 8, 32>}, {pipeline_mode = #tpu.pipeline_mode<synchronous>, transform_indices = @transform_15, window_bounds = array<i64: 2, 1, 32>}, {pipeline_mode = #tpu.pipeline_mode<synchronous>, transform_indices = @transform_16, window_bounds = array<i64: 2, 1, 32>}, {pipeline_mode = #tpu.pipeline_mode<synchronous>, transform_indices = @transform_17, window_bounds = array<i64: 2, 1, 32>}, {pipeline_mode = #tpu.pipeline_mode<synchronous>, transform_indices = @transform_18, window_bounds = array<i64: 2, 32, 32>}, {pipeline_mode = #tpu.pipeline_mode<synchronous>, transform_indices = @transform_19, window_bounds = array<i64: 2, 1, 32>}, {pipeline_mode = #tpu.pipeline_mode<synchronous>, transform_indices = @transform_20, window_bounds = array<i64: 2, 32, 32>}, {pipeline_mode = #tpu.pipeline_mode<synchronous>, transform_indices = @transform_21, window_bounds = array<i64: 2, 1, 32>}, {pipeline_mode = #tpu.pipeline_mode<synchronous>, transform_indices = @transform_22, window_bounds = array<i64: 2, 1, 32>}, {pipeline_mode = #tpu.pipeline_mode<synchronous>, transform_indices = @transform_23, window_bounds = array<i64: 2, 1, 32>}, {transform_indices = @transform_24, window_bounds = array<i64: 1, 8, 16>}, {transform_indices = @transform_25, window_bounds = array<i64: 1, 8, 32>}]} {
    %c0 = arith.constant 0 : index
    %c0_0 = arith.constant 0 : index
    %c0_1 = arith.constant 0 : index
    %0 = vector.load %arg1[%c0, %c0_0, %c0_1] : memref<1x8x64xf32, #tpu.memory_space<vmem>>, vector<1x8x64xf32>
    %1 = vector.shape_cast %0 : vector<1x8x64xf32> to vector<8x64xf32>
    %c0_2 = arith.constant 0 : index
    %c0_3 = arith.constant 0 : index
    %c0_4 = arith.constant 0 : index
    %2 = vector.load %arg2[%c0_2, %c0_3, %c0_4] : memref<1x8x4xf32, #tpu.memory_space<vmem>>, vector<1x8x4xf32>
    %3 = vector.shape_cast %2 : vector<1x8x4xf32> to vector<8x4xf32>
    %4 = arith.truncf %1 : vector<8x64xf32> to vector<8x64xbf16>
    %c0_5 = arith.constant 0 : index
    %c0_6 = arith.constant 0 : index
    %5 = vector.load %arg3[%c0_5, %c0_6] : memref<64x16xbf16, #tpu.memory_space<vmem>>, vector<64x16xbf16>
    %cst = arith.constant dense<0.000000e+00> : vector<8x16xf32>
    %6 = tpu.matmul %4, %5, %cst {dimension_numbers = #tpu.dot_dimension_numbers<[1], [0], [0], [1], [0, 0, 1, 1], [], []>} : vector<8x64xbf16>, vector<64x16xbf16>, vector<8x16xf32> -> vector<8x16xf32>
    %c0_7 = arith.constant 0 : index
    %c0_8 = arith.constant 0 : index
    %7 = vector.load %arg4[%c0_7, %c0_8] : memref<1x16xf32, #tpu.memory_space<vmem>>, vector<1x16xf32>
    %8 = vector.broadcast %7 : vector<1x16xf32> to vector<8x16xf32>
    %9 = arith.addf %6, %8 : vector<8x16xf32>
    %c0_9 = arith.constant 0 : index
    %c0_10 = arith.constant 0 : index
    %c0_11 = arith.constant 0 : index
    %10 = vector.load %arg25[%c0_9, %c0_10, %c0_11] : memref<1x8x16xf32, #tpu.memory_space<vmem>>, vector<1x8x16xf32>
    %11 = vector.shape_cast %10 : vector<1x8x16xf32> to vector<8x16xf32>
    %12 = vector.shape_cast %9 : vector<8x16xf32> to vector<1x8x16xf32>
    tpu.vector_store %arg25[%c0_9, %c0_10, %c0_11], %12 {strides = array<i32>} : memref<1x8x16xf32, #tpu.memory_space<vmem>>, vector<1x8x16xf32>,
    %13 = arith.truncf %9 : vector<8x16xf32> to vector<8x16xbf16>
    %c0_12 = arith.constant 0 : index
    %c0_13 = arith.constant 0 : index
    %14 = vector.load %arg5[%c0_12, %c0_13] : memref<16x32xbf16, #tpu.memory_space<vmem>>, vector<16x32xbf16>
    %cst_14 = arith.constant dense<0.000000e+00> : vector<8x32xf32>
    %15 = tpu.matmul %13, %14, %cst_14 {dimension_numbers = #tpu.dot_dimension_numbers<[1], [0], [0], [1], [0, 0, 1, 1], [], []>} : vector<8x16xbf16>, vector<16x32xbf16>, vector<8x32xf32> -> vector<8x32xf32>
    %16 = arith.truncf %3 : vector<8x4xf32> to vector<8x4xbf16>
    %c0_15 = arith.constant 0 : index
    %c0_16 = arith.constant 0 : index
    %17 = vector.load %arg6[%c0_15, %c0_16] : memref<4x32xbf16, #tpu.memory_space<vmem>>, vector<4x32xbf16>
    %cst_17 = arith.constant dense<0.000000e+00> : vector<8x32xf32>
    %18 = tpu.matmul %16, %17, %cst_17 {dimension_numbers = #tpu.dot_dimension_numbers<[1], [0], [0], [1], [0, 0, 1, 1], [], []>} : vector<8x4xbf16>, vector<4x32xbf16>, vector<8x32xf32> -> vector<8x32xf32>
    %19 = arith.addf %15, %18 : vector<8x32xf32>
    %c0_18 = arith.constant 0 : index
    %c0_19 = arith.constant 0 : index
    %20 = vector.load %arg7[%c0_18, %c0_19] : memref<1x32xf32, #tpu.memory_space<vmem>>, vector<1x32xf32>
    %21 = vector.broadcast %20 : vector<1x32xf32> to vector<8x32xf32>
    %22 = arith.addf %19, %21 : vector<8x32xf32>
    %c0_20 = arith.constant 0 : index
    %c0_21 = arith.constant 0 : index
    %23 = vector.load %arg8[%c0_20, %c0_21] : memref<8x32xf32, #tpu.memory_space<vmem>>, vector<8x32xf32>
    %24 = arith.addf %22, %23 : vector<8x32xf32>
    %25 = tpu.iota {dimensions = array<i32: 0>} : vector<8x8xi32>
    %26 = tpu.iota {dimensions = array<i32: 1>} : vector<8x8xi32>
    %27 = arith.cmpi sle, %26, %25 : vector<8x8xi32>
    %c0_22 = arith.constant 0 : index
    %c0_23 = arith.constant 0 : index
    %c0_24 = arith.constant 0 : index
    %c0_25 = arith.constant 0 : index
    %28 = vector.load %arg9[%c0_22, %c0_23, %c0_24, %c0_25] : memref<2x4x32x8xbf16, #tpu.memory_space<vmem>>, vector<1x4x32x8xbf16>
    %29 = vector.shape_cast %28 : vector<1x4x32x8xbf16> to vector<4x32x8xbf16>
    %c0_26 = arith.constant 0 : index
    %c0_27 = arith.constant 0 : index
    %c0_28 = arith.constant 0 : index
    %c0_29 = arith.constant 0 : index
    %30 = vector.load %arg10[%c0_26, %c0_27, %c0_28, %c0_29] : memref<2x4x1x8xf32, #tpu.memory_space<vmem>>, vector<1x4x1x8xf32>
    %31 = vector.shape_cast %30 : vector<1x4x1x8xf32> to vector<4x1x8xf32>
    %c0_30 = arith.constant 0 : index
    %c0_31 = arith.constant 0 : index
    %c0_32 = arith.constant 0 : index
    %c0_33 = arith.constant 0 : index
    %32 = vector.load %arg11[%c0_30, %c0_31, %c0_32, %c0_33] : memref<2x4x32x8xbf16, #tpu.memory_space<vmem>>, vector<1x4x32x8xbf16>
    %33 = vector.shape_cast %32 : vector<1x4x32x8xbf16> to vector<4x32x8xbf16>
    %c0_34 = arith.constant 0 : index
    %c0_35 = arith.constant 0 : index
    %c0_36 = arith.constant 0 : index
    %c0_37 = arith.constant 0 : index
    %34 = vector.load %arg12[%c0_34, %c0_35, %c0_36, %c0_37] : memref<2x4x1x8xf32, #tpu.memory_space<vmem>>, vector<1x4x1x8xf32>
    %35 = vector.shape_cast %34 : vector<1x4x1x8xf32> to vector<4x1x8xf32>
    %c0_38 = arith.constant 0 : index
    %c0_39 = arith.constant 0 : index
    %c0_40 = arith.constant 0 : index
    %c0_41 = arith.constant 0 : index
    %36 = vector.load %arg13[%c0_38, %c0_39, %c0_40, %c0_41] : memref<2x4x32x8xbf16, #tpu.memory_space<vmem>>, vector<1x4x32x8xbf16>
    %37 = vector.shape_cast %36 : vector<1x4x32x8xbf16> to vector<4x32x8xbf16>
    %c0_42 = arith.constant 0 : index
    %c0_43 = arith.constant 0 : index
    %c0_44 = arith.constant 0 : index
    %c0_45 = arith.constant 0 : index
    %38 = vector.load %arg14[%c0_42, %c0_43, %c0_44, %c0_45] : memref<2x4x1x8xf32, #tpu.memory_space<vmem>>, vector<1x4x1x8xf32>
    %39 = vector.shape_cast %38 : vector<1x4x1x8xf32> to vector<4x1x8xf32>
    %c0_46 = arith.constant 0 : index
    %c0_47 = arith.constant 0 : index
    %c0_48 = arith.constant 0 : index
    %c0_49 = arith.constant 0 : index
    %40 = vector.load %arg15[%c0_46, %c0_47, %c0_48, %c0_49] : memref<2x4x8x32xbf16, #tpu.memory_space<vmem>>, vector<1x4x8x32xbf16>
    %41 = vector.shape_cast %40 : vector<1x4x8x32xbf16> to vector<4x8x32xbf16>
    %c0_50 = arith.constant 0 : index
    %c0_51 = arith.constant 0 : index
    %c0_52 = arith.constant 0 : index
    %42 = vector.load %arg16[%c0_50, %c0_51, %c0_52] : memref<2x1x32xf32, #tpu.memory_space<vmem>>, vector<1x1x32xf32>
    %43 = vector.shape_cast %42 : vector<1x1x32xf32> to vector<1x32xf32>
    %44 = arith.truncf %24 : vector<8x32xf32> to vector<8x32xbf16>
    %45 = arith.truncf %24 : vector<8x32xf32> to vector<8x32xbf16>
    %46 = vector.extract_strided_slice %29 {offsets = [0, 0, 0], sizes = [1, 32, 8], strides = [1, 1, 1]} : vector<4x32x8xbf16> to vector<1x32x8xbf16>
    %47 = vector.shape_cast %46 : vector<1x32x8xbf16> to vector<32x8xbf16>
    %cst_53 = arith.constant dense<0.000000e+00> : vector<8x8xf32>
    %48 = tpu.matmul %44, %47, %cst_53 {dimension_numbers = #tpu.dot_dimension_numbers<[1], [0], [0], [1], [0, 0, 1, 1], [], []>} : vector<8x32xbf16>, vector<32x8xbf16>, vector<8x8xf32> -> vector<8x8xf32>
    %49 = vector.extract_strided_slice %31 {offsets = [0, 0, 0], sizes = [1, 1, 8], strides = [1, 1, 1]} : vector<4x1x8xf32> to vector<1x1x8xf32>
    %50 = vector.shape_cast %49 : vector<1x1x8xf32> to vector<1x8xf32>
    %51 = vector.broadcast %50 : vector<1x8xf32> to vector<8x8xf32>
    %52 = arith.addf %48, %51 : vector<8x8xf32>
    %53 = vector.extract_strided_slice %33 {offsets = [0, 0, 0], sizes = [1, 32, 8], strides = [1, 1, 1]} : vector<4x32x8xbf16> to vector<1x32x8xbf16>
    %54 = vector.shape_cast %53 : vector<1x32x8xbf16> to vector<32x8xbf16>
    %cst_54 = arith.constant dense<0.000000e+00> : vector<8x8xf32>
    %55 = tpu.matmul %45, %54, %cst_54 {dimension_numbers = #tpu.dot_dimension_numbers<[1], [0], [0], [1], [0, 0, 1, 1], [], []>} : vector<8x32xbf16>, vector<32x8xbf16>, vector<8x8xf32> -> vector<8x8xf32>
    %56 = vector.extract_strided_slice %35 {offsets = [0, 0, 0], sizes = [1, 1, 8], strides = [1, 1, 1]} : vector<4x1x8xf32> to vector<1x1x8xf32>
    %57 = vector.shape_cast %56 : vector<1x1x8xf32> to vector<1x8xf32>
    %58 = vector.broadcast %57 : vector<1x8xf32> to vector<8x8xf32>
    %59 = arith.addf %55, %58 : vector<8x8xf32>
    %60 = vector.extract_strided_slice %37 {offsets = [0, 0, 0], sizes = [1, 32, 8], strides = [1, 1, 1]} : vector<4x32x8xbf16> to vector<1x32x8xbf16>
    %61 = vector.shape_cast %60 : vector<1x32x8xbf16> to vector<32x8xbf16>
    %cst_55 = arith.constant dense<0.000000e+00> : vector<8x8xf32>
    %62 = tpu.matmul %45, %61, %cst_55 {dimension_numbers = #tpu.dot_dimension_numbers<[1], [0], [0], [1], [0, 0, 1, 1], [], []>} : vector<8x32xbf16>, vector<32x8xbf16>, vector<8x8xf32> -> vector<8x8xf32>
    %63 = vector.extract_strided_slice %39 {offsets = [0, 0, 0], sizes = [1, 1, 8], strides = [1, 1, 1]} : vector<4x1x8xf32> to vector<1x1x8xf32>
    %64 = vector.shape_cast %63 : vector<1x1x8xf32> to vector<1x8xf32>
    %65 = vector.broadcast %64 : vector<1x8xf32> to vector<8x8xf32>
    %66 = arith.addf %62, %65 : vector<8x8xf32>
    %67 = arith.truncf %52 : vector<8x8xf32> to vector<8x8xbf16>
    %68 = arith.truncf %59 : vector<8x8xf32> to vector<8x8xbf16>
    "tpu.trace_start"() <{level = 10 : i32, message = "qe,ke->qk"}> : () -> ()
    %cst_56 = arith.constant dense<0.000000e+00> : vector<8x8xf32>
    %69 = tpu.matmul %67, %68, %cst_56 {dimension_numbers = #tpu.dot_dimension_numbers<[1], [1], [0], [0], [0, 0, 1, 0], [], []>} : vector<8x8xbf16>, vector<8x8xbf16>, vector<8x8xf32> -> vector<8x8xf32>
    "tpu.trace_stop"() : () -> ()
    %cst_57 = arith.constant 0.353553385 : f32
    %70 = vector.broadcast %cst_57 : f32 to vector<8x8xf32>
    %71 = arith.mulf %69, %70 : vector<8x8xf32>
    %cst_58 = arith.constant -1.000000e+30 : f32
    %72 = vector.broadcast %cst_58 : f32 to vector<8x8xf32>
    %73 = arith.select %27, %71, %72 : vector<8x8xi1>, vector<8x8xf32>
    %cst_59 = arith.constant dense<0xFF800000> : vector<8xf32>
    %74 = vector.multi_reduction <maximumf>, %73, %cst_59 [1] : vector<8x8xf32> to vector<8xf32>
    %75 = vector.shape_cast %74 : vector<8xf32> to vector<8x1xf32>
    %76 = vector.broadcast %75 : vector<8x1xf32> to vector<8x8xf32>
    %77 = arith.subf %73, %76 : vector<8x8xf32>
    %78 = math.exp %77 : vector<8x8xf32>
    %cst_60 = arith.constant dense<0.000000e+00> : vector<8xf32>
    %79 = vector.multi_reduction <add>, %78, %cst_60 [1] : vector<8x8xf32> to vector<8xf32>
    %80 = vector.shape_cast %79 : vector<8xf32> to vector<8x1xf32>
    %cst_61 = arith.constant 1.000000e+00 : f32
    %81 = vector.broadcast %cst_61 : f32 to vector<8x1xf32>
    %82 = arith.divf %81, %80 : vector<8x1xf32>
    %83 = vector.broadcast %82 : vector<8x1xf32> to vector<8x8xf32>
    %84 = arith.mulf %78, %83 : vector<8x8xf32>
    %85 = arith.truncf %84 : vector<8x8xf32> to vector<8x8xbf16>
    %86 = arith.truncf %66 : vector<8x8xf32> to vector<8x8xbf16>
    %cst_62 = arith.constant dense<0.000000e+00> : vector<8x8xf32>
    %87 = tpu.matmul %85, %86, %cst_62 {dimension_numbers = #tpu.dot_dimension_numbers<[1], [0], [0], [1], [0, 0, 1, 1], [], []>} : vector<8x8xbf16>, vector<8x8xbf16>, vector<8x8xf32> -> vector<8x8xf32>
    %88 = arith.truncf %87 : vector<8x8xf32> to vector<8x8xbf16>
    %89 = vector.extract_strided_slice %41 {offsets = [0, 0, 0], sizes = [1, 8, 32], strides = [1, 1, 1]} : vector<4x8x32xbf16> to vector<1x8x32xbf16>
    %90 = vector.shape_cast %89 : vector<1x8x32xbf16> to vector<8x32xbf16>
    %cst_63 = arith.constant dense<0.000000e+00> : vector<8x32xf32>
    %91 = tpu.matmul %88, %90, %cst_63 {dimension_numbers = #tpu.dot_dimension_numbers<[1], [0], [0], [1], [0, 0, 1, 1], [], []>} : vector<8x8xbf16>, vector<8x32xbf16>, vector<8x32xf32> -> vector<8x32xf32>
    %92 = vector.extract_strided_slice %29 {offsets = [1, 0, 0], sizes = [1, 32, 8], strides = [1, 1, 1]} : vector<4x32x8xbf16> to vector<1x32x8xbf16>
    %93 = vector.shape_cast %92 : vector<1x32x8xbf16> to vector<32x8xbf16>
    %cst_64 = arith.constant dense<0.000000e+00> : vector<8x8xf32>
    %94 = tpu.matmul %44, %93, %cst_64 {dimension_numbers = #tpu.dot_dimension_numbers<[1], [0], [0], [1], [0, 0, 1, 1], [], []>} : vector<8x32xbf16>, vector<32x8xbf16>, vector<8x8xf32> -> vector<8x8xf32>
    %95 = vector.extract_strided_slice %31 {offsets = [1, 0, 0], sizes = [1, 1, 8], strides = [1, 1, 1]} : vector<4x1x8xf32> to vector<1x1x8xf32>
    %96 = vector.shape_cast %95 : vector<1x1x8xf32> to vector<1x8xf32>
    %97 = vector.broadcast %96 : vector<1x8xf32> to vector<8x8xf32>
    %98 = arith.addf %94, %97 : vector<8x8xf32>
    %99 = vector.extract_strided_slice %33 {offsets = [1, 0, 0], sizes = [1, 32, 8], strides = [1, 1, 1]} : vector<4x32x8xbf16> to vector<1x32x8xbf16>
    %100 = vector.shape_cast %99 : vector<1x32x8xbf16> to vector<32x8xbf16>
    %cst_65 = arith.constant dense<0.000000e+00> : vector<8x8xf32>
    %101 = tpu.matmul %45, %100, %cst_65 {dimension_numbers = #tpu.dot_dimension_numbers<[1], [0], [0], [1], [0, 0, 1, 1], [], []>} : vector<8x32xbf16>, vector<32x8xbf16>, vector<8x8xf32> -> vector<8x8xf32>
    %102 = vector.extract_strided_slice %35 {offsets = [1, 0, 0], sizes = [1, 1, 8], strides = [1, 1, 1]} : vector<4x1x8xf32> to vector<1x1x8xf32>
    %103 = vector.shape_cast %102 : vector<1x1x8xf32> to vector<1x8xf32>
    %104 = vector.broadcast %103 : vector<1x8xf32> to vector<8x8xf32>
    %105 = arith.addf %101, %104 : vector<8x8xf32>
    %106 = vector.extract_strided_slice %37 {offsets = [1, 0, 0], sizes = [1, 32, 8], strides = [1, 1, 1]} : vector<4x32x8xbf16> to vector<1x32x8xbf16>
    %107 = vector.shape_cast %106 : vector<1x32x8xbf16> to vector<32x8xbf16>
    %cst_66 = arith.constant dense<0.000000e+00> : vector<8x8xf32>
    %108 = tpu.matmul %45, %107, %cst_66 {dimension_numbers = #tpu.dot_dimension_numbers<[1], [0], [0], [1], [0, 0, 1, 1], [], []>} : vector<8x32xbf16>, vector<32x8xbf16>, vector<8x8xf32> -> vector<8x8xf32>
    %109 = vector.extract_strided_slice %39 {offsets = [1, 0, 0], sizes = [1, 1, 8], strides = [1, 1, 1]} : vector<4x1x8xf32> to vector<1x1x8xf32>
    %110 = vector.shape_cast %109 : vector<1x1x8xf32> to vector<1x8xf32>
    %111 = vector.broadcast %110 : vector<1x8xf32> to vector<8x8xf32>
    %112 = arith.addf %108, %111 : vector<8x8xf32>
    %113 = arith.truncf %98 : vector<8x8xf32> to vector<8x8xbf16>
    %114 = arith.truncf %105 : vector<8x8xf32> to vector<8x8xbf16>
    "tpu.trace_start"() <{level = 10 : i32, message = "qe,ke->qk"}> : () -> ()
    %cst_67 = arith.constant dense<0.000000e+00> : vector<8x8xf32>
    %115 = tpu.matmul %113, %114, %cst_67 {dimension_numbers = #tpu.dot_dimension_numbers<[1], [1], [0], [0], [0, 0, 1, 0], [], []>} : vector<8x8xbf16>, vector<8x8xbf16>, vector<8x8xf32> -> vector<8x8xf32>
    "tpu.trace_stop"() : () -> ()
    %cst_68 = arith.constant 0.353553385 : f32
    %116 = vector.broadcast %cst_68 : f32 to vector<8x8xf32>
    %117 = arith.mulf %115, %116 : vector<8x8xf32>
    %cst_69 = arith.constant -1.000000e+30 : f32
    %118 = vector.broadcast %cst_69 : f32 to vector<8x8xf32>
    %119 = arith.select %27, %117, %118 : vector<8x8xi1>, vector<8x8xf32>
    %cst_70 = arith.constant dense<0xFF800000> : vector<8xf32>
    %120 = vector.multi_reduction <maximumf>, %119, %cst_70 [1] : vector<8x8xf32> to vector<8xf32>
    %121 = vector.shape_cast %120 : vector<8xf32> to vector<8x1xf32>
    %122 = vector.broadcast %121 : vector<8x1xf32> to vector<8x8xf32>
    %123 = arith.subf %119, %122 : vector<8x8xf32>
    %124 = math.exp %123 : vector<8x8xf32>
    %cst_71 = arith.constant dense<0.000000e+00> : vector<8xf32>
    %125 = vector.multi_reduction <add>, %124, %cst_71 [1] : vector<8x8xf32> to vector<8xf32>
    %126 = vector.shape_cast %125 : vector<8xf32> to vector<8x1xf32>
    %cst_72 = arith.constant 1.000000e+00 : f32
    %127 = vector.broadcast %cst_72 : f32 to vector<8x1xf32>
    %128 = arith.divf %127, %126 : vector<8x1xf32>
    %129 = vector.broadcast %128 : vector<8x1xf32> to vector<8x8xf32>
    %130 = arith.mulf %124, %129 : vector<8x8xf32>
    %131 = arith.truncf %130 : vector<8x8xf32> to vector<8x8xbf16>
    %132 = arith.truncf %112 : vector<8x8xf32> to vector<8x8xbf16>
    %cst_73 = arith.constant dense<0.000000e+00> : vector<8x8xf32>
    %133 = tpu.matmul %131, %132, %cst_73 {dimension_numbers = #tpu.dot_dimension_numbers<[1], [0], [0], [1], [0, 0, 1, 1], [], []>} : vector<8x8xbf16>, vector<8x8xbf16>, vector<8x8xf32> -> vector<8x8xf32>
    %134 = arith.truncf %133 : vector<8x8xf32> to vector<8x8xbf16>
    %135 = vector.extract_strided_slice %41 {offsets = [1, 0, 0], sizes = [1, 8, 32], strides = [1, 1, 1]} : vector<4x8x32xbf16> to vector<1x8x32xbf16>
    %136 = vector.shape_cast %135 : vector<1x8x32xbf16> to vector<8x32xbf16>
    %cst_74 = arith.constant dense<0.000000e+00> : vector<8x32xf32>
    %137 = tpu.matmul %134, %136, %cst_74 {dimension_numbers = #tpu.dot_dimension_numbers<[1], [0], [0], [1], [0, 0, 1, 1], [], []>} : vector<8x8xbf16>, vector<8x32xbf16>, vector<8x32xf32> -> vector<8x32xf32>
    %138 = arith.addf %91, %137 : vector<8x32xf32>
    %139 = vector.extract_strided_slice %29 {offsets = [2, 0, 0], sizes = [1, 32, 8], strides = [1, 1, 1]} : vector<4x32x8xbf16> to vector<1x32x8xbf16>
    %140 = vector.shape_cast %139 : vector<1x32x8xbf16> to vector<32x8xbf16>
    %cst_75 = arith.constant dense<0.000000e+00> : vector<8x8xf32>
    %141 = tpu.matmul %44, %140, %cst_75 {dimension_numbers = #tpu.dot_dimension_numbers<[1], [0], [0], [1], [0, 0, 1, 1], [], []>} : vector<8x32xbf16>, vector<32x8xbf16>, vector<8x8xf32> -> vector<8x8xf32>
    %142 = vector.extract_strided_slice %31 {offsets = [2, 0, 0], sizes = [1, 1, 8], strides = [1, 1, 1]} : vector<4x1x8xf32> to vector<1x1x8xf32>
    %143 = vector.shape_cast %142 : vector<1x1x8xf32> to vector<1x8xf32>
    %144 = vector.broadcast %143 : vector<1x8xf32> to vector<8x8xf32>
    %145 = arith.addf %141, %144 : vector<8x8xf32>
    %146 = vector.extract_strided_slice %33 {offsets = [2, 0, 0], sizes = [1, 32, 8], strides = [1, 1, 1]} : vector<4x32x8xbf16> to vector<1x32x8xbf16>
    %147 = vector.shape_cast %146 : vector<1x32x8xbf16> to vector<32x8xbf16>
    %cst_76 = arith.constant dense<0.000000e+00> : vector<8x8xf32>
    %148 = tpu.matmul %45, %147, %cst_76 {dimension_numbers = #tpu.dot_dimension_numbers<[1], [0], [0], [1], [0, 0, 1, 1], [], []>} : vector<8x32xbf16>, vector<32x8xbf16>, vector<8x8xf32> -> vector<8x8xf32>
    %149 = vector.extract_strided_slice %35 {offsets = [2, 0, 0], sizes = [1, 1, 8], strides = [1, 1, 1]} : vector<4x1x8xf32> to vector<1x1x8xf32>
    %150 = vector.shape_cast %149 : vector<1x1x8xf32> to vector<1x8xf32>
    %151 = vector.broadcast %150 : vector<1x8xf32> to vector<8x8xf32>
    %152 = arith.addf %148, %151 : vector<8x8xf32>
    %153 = vector.extract_strided_slice %37 {offsets = [2, 0, 0], sizes = [1, 32, 8], strides = [1, 1, 1]} : vector<4x32x8xbf16> to vector<1x32x8xbf16>
    %154 = vector.shape_cast %153 : vector<1x32x8xbf16> to vector<32x8xbf16>
    %cst_77 = arith.constant dense<0.000000e+00> : vector<8x8xf32>
    %155 = tpu.matmul %45, %154, %cst_77 {dimension_numbers = #tpu.dot_dimension_numbers<[1], [0], [0], [1], [0, 0, 1, 1], [], []>} : vector<8x32xbf16>, vector<32x8xbf16>, vector<8x8xf32> -> vector<8x8xf32>
    %156 = vector.extract_strided_slice %39 {offsets = [2, 0, 0], sizes = [1, 1, 8], strides = [1, 1, 1]} : vector<4x1x8xf32> to vector<1x1x8xf32>
    %157 = vector.shape_cast %156 : vector<1x1x8xf32> to vector<1x8xf32>
    %158 = vector.broadcast %157 : vector<1x8xf32> to vector<8x8xf32>
    %159 = arith.addf %155, %158 : vector<8x8xf32>
    %160 = arith.truncf %145 : vector<8x8xf32> to vector<8x8xbf16>
    %161 = arith.truncf %152 : vector<8x8xf32> to vector<8x8xbf16>
    "tpu.trace_start"() <{level = 10 : i32, message = "qe,ke->qk"}> : () -> ()
    %cst_78 = arith.constant dense<0.000000e+00> : vector<8x8xf32>
    %162 = tpu.matmul %160, %161, %cst_78 {dimension_numbers = #tpu.dot_dimension_numbers<[1], [1], [0], [0], [0, 0, 1, 0], [], []>} : vector<8x8xbf16>, vector<8x8xbf16>, vector<8x8xf32> -> vector<8x8xf32>
    "tpu.trace_stop"() : () -> ()
    %cst_79 = arith.constant 0.353553385 : f32
    %163 = vector.broadcast %cst_79 : f32 to vector<8x8xf32>
    %164 = arith.mulf %162, %163 : vector<8x8xf32>
    %cst_80 = arith.constant -1.000000e+30 : f32
    %165 = vector.broadcast %cst_80 : f32 to vector<8x8xf32>
    %166 = arith.select %27, %164, %165 : vector<8x8xi1>, vector<8x8xf32>
    %cst_81 = arith.constant dense<0xFF800000> : vector<8xf32>
    %167 = vector.multi_reduction <maximumf>, %166, %cst_81 [1] : vector<8x8xf32> to vector<8xf32>
    %168 = vector.shape_cast %167 : vector<8xf32> to vector<8x1xf32>
    %169 = vector.broadcast %168 : vector<8x1xf32> to vector<8x8xf32>
    %170 = arith.subf %166, %169 : vector<8x8xf32>
    %171 = math.exp %170 : vector<8x8xf32>
    %cst_82 = arith.constant dense<0.000000e+00> : vector<8xf32>
    %172 = vector.multi_reduction <add>, %171, %cst_82 [1] : vector<8x8xf32> to vector<8xf32>
    %173 = vector.shape_cast %172 : vector<8xf32> to vector<8x1xf32>
    %cst_83 = arith.constant 1.000000e+00 : f32
    %174 = vector.broadcast %cst_83 : f32 to vector<8x1xf32>
    %175 = arith.divf %174, %173 : vector<8x1xf32>
    %176 = vector.broadcast %175 : vector<8x1xf32> to vector<8x8xf32>
    %177 = arith.mulf %171, %176 : vector<8x8xf32>
    %178 = arith.truncf %177 : vector<8x8xf32> to vector<8x8xbf16>
    %179 = arith.truncf %159 : vector<8x8xf32> to vector<8x8xbf16>
    %cst_84 = arith.constant dense<0.000000e+00> : vector<8x8xf32>
    %180 = tpu.matmul %178, %179, %cst_84 {dimension_numbers = #tpu.dot_dimension_numbers<[1], [0], [0], [1], [0, 0, 1, 1], [], []>} : vector<8x8xbf16>, vector<8x8xbf16>, vector<8x8xf32> -> vector<8x8xf32>
    %181 = arith.truncf %180 : vector<8x8xf32> to vector<8x8xbf16>
    %182 = vector.extract_strided_slice %41 {offsets = [2, 0, 0], sizes = [1, 8, 32], strides = [1, 1, 1]} : vector<4x8x32xbf16> to vector<1x8x32xbf16>
    %183 = vector.shape_cast %182 : vector<1x8x32xbf16> to vector<8x32xbf16>
    %cst_85 = arith.constant dense<0.000000e+00> : vector<8x32xf32>
    %184 = tpu.matmul %181, %183, %cst_85 {dimension_numbers = #tpu.dot_dimension_numbers<[1], [0], [0], [1], [0, 0, 1, 1], [], []>} : vector<8x8xbf16>, vector<8x32xbf16>, vector<8x32xf32> -> vector<8x32xf32>
    %185 = arith.addf %138, %184 : vector<8x32xf32>
    %186 = vector.extract_strided_slice %29 {offsets = [3, 0, 0], sizes = [1, 32, 8], strides = [1, 1, 1]} : vector<4x32x8xbf16> to vector<1x32x8xbf16>
    %187 = vector.shape_cast %186 : vector<1x32x8xbf16> to vector<32x8xbf16>
    %cst_86 = arith.constant dense<0.000000e+00> : vector<8x8xf32>
    %188 = tpu.matmul %44, %187, %cst_86 {dimension_numbers = #tpu.dot_dimension_numbers<[1], [0], [0], [1], [0, 0, 1, 1], [], []>} : vector<8x32xbf16>, vector<32x8xbf16>, vector<8x8xf32> -> vector<8x8xf32>
    %189 = vector.extract_strided_slice %31 {offsets = [3, 0, 0], sizes = [1, 1, 8], strides = [1, 1, 1]} : vector<4x1x8xf32> to vector<1x1x8xf32>
    %190 = vector.shape_cast %189 : vector<1x1x8xf32> to vector<1x8xf32>
    %191 = vector.broadcast %190 : vector<1x8xf32> to vector<8x8xf32>
    %192 = arith.addf %188, %191 : vector<8x8xf32>
    %193 = vector.extract_strided_slice %33 {offsets = [3, 0, 0], sizes = [1, 32, 8], strides = [1, 1, 1]} : vector<4x32x8xbf16> to vector<1x32x8xbf16>
    %194 = vector.shape_cast %193 : vector<1x32x8xbf16> to vector<32x8xbf16>
    %cst_87 = arith.constant dense<0.000000e+00> : vector<8x8xf32>
    %195 = tpu.matmul %45, %194, %cst_87 {dimension_numbers = #tpu.dot_dimension_numbers<[1], [0], [0], [1], [0, 0, 1, 1], [], []>} : vector<8x32xbf16>, vector<32x8xbf16>, vector<8x8xf32> -> vector<8x8xf32>
    %196 = vector.extract_strided_slice %35 {offsets = [3, 0, 0], sizes = [1, 1, 8], strides = [1, 1, 1]} : vector<4x1x8xf32> to vector<1x1x8xf32>
    %197 = vector.shape_cast %196 : vector<1x1x8xf32> to vector<1x8xf32>
    %198 = vector.broadcast %197 : vector<1x8xf32> to vector<8x8xf32>
    %199 = arith.addf %195, %198 : vector<8x8xf32>
    %200 = vector.extract_strided_slice %37 {offsets = [3, 0, 0], sizes = [1, 32, 8], strides = [1, 1, 1]} : vector<4x32x8xbf16> to vector<1x32x8xbf16>
    %201 = vector.shape_cast %200 : vector<1x32x8xbf16> to vector<32x8xbf16>
    %cst_88 = arith.constant dense<0.000000e+00> : vector<8x8xf32>
    %202 = tpu.matmul %45, %201, %cst_88 {dimension_numbers = #tpu.dot_dimension_numbers<[1], [0], [0], [1], [0, 0, 1, 1], [], []>} : vector<8x32xbf16>, vector<32x8xbf16>, vector<8x8xf32> -> vector<8x8xf32>
    %203 = vector.extract_strided_slice %39 {offsets = [3, 0, 0], sizes = [1, 1, 8], strides = [1, 1, 1]} : vector<4x1x8xf32> to vector<1x1x8xf32>
    %204 = vector.shape_cast %203 : vector<1x1x8xf32> to vector<1x8xf32>
    %205 = vector.broadcast %204 : vector<1x8xf32> to vector<8x8xf32>
    %206 = arith.addf %202, %205 : vector<8x8xf32>
    %207 = arith.truncf %192 : vector<8x8xf32> to vector<8x8xbf16>
    %208 = arith.truncf %199 : vector<8x8xf32> to vector<8x8xbf16>
    "tpu.trace_start"() <{level = 10 : i32, message = "qe,ke->qk"}> : () -> ()
    %cst_89 = arith.constant dense<0.000000e+00> : vector<8x8xf32>
    %209 = tpu.matmul %207, %208, %cst_89 {dimension_numbers = #tpu.dot_dimension_numbers<[1], [1], [0], [0], [0, 0, 1, 0], [], []>} : vector<8x8xbf16>, vector<8x8xbf16>, vector<8x8xf32> -> vector<8x8xf32>
    "tpu.trace_stop"() : () -> ()
    %cst_90 = arith.constant 0.353553385 : f32
    %210 = vector.broadcast %cst_90 : f32 to vector<8x8xf32>
    %211 = arith.mulf %209, %210 : vector<8x8xf32>
    %cst_91 = arith.constant -1.000000e+30 : f32
    %212 = vector.broadcast %cst_91 : f32 to vector<8x8xf32>
    %213 = arith.select %27, %211, %212 : vector<8x8xi1>, vector<8x8xf32>
    %cst_92 = arith.constant dense<0xFF800000> : vector<8xf32>
    %214 = vector.multi_reduction <maximumf>, %213, %cst_92 [1] : vector<8x8xf32> to vector<8xf32>
    %215 = vector.shape_cast %214 : vector<8xf32> to vector<8x1xf32>
    %216 = vector.broadcast %215 : vector<8x1xf32> to vector<8x8xf32>
    %217 = arith.subf %213, %216 : vector<8x8xf32>
    %218 = math.exp %217 : vector<8x8xf32>
    %cst_93 = arith.constant dense<0.000000e+00> : vector<8xf32>
    %219 = vector.multi_reduction <add>, %218, %cst_93 [1] : vector<8x8xf32> to vector<8xf32>
    %220 = vector.shape_cast %219 : vector<8xf32> to vector<8x1xf32>
    %cst_94 = arith.constant 1.000000e+00 : f32
    %221 = vector.broadcast %cst_94 : f32 to vector<8x1xf32>
    %222 = arith.divf %221, %220 : vector<8x1xf32>
    %223 = vector.broadcast %222 : vector<8x1xf32> to vector<8x8xf32>
    %224 = arith.mulf %218, %223 : vector<8x8xf32>
    %225 = arith.truncf %224 : vector<8x8xf32> to vector<8x8xbf16>
    %226 = arith.truncf %206 : vector<8x8xf32> to vector<8x8xbf16>
    %cst_95 = arith.constant dense<0.000000e+00> : vector<8x8xf32>
    %227 = tpu.matmul %225, %226, %cst_95 {dimension_numbers = #tpu.dot_dimension_numbers<[1], [0], [0], [1], [0, 0, 1, 1], [], []>} : vector<8x8xbf16>, vector<8x8xbf16>, vector<8x8xf32> -> vector<8x8xf32>
    %228 = arith.truncf %227 : vector<8x8xf32> to vector<8x8xbf16>
    %229 = vector.extract_strided_slice %41 {offsets = [3, 0, 0], sizes = [1, 8, 32], strides = [1, 1, 1]} : vector<4x8x32xbf16> to vector<1x8x32xbf16>
    %230 = vector.shape_cast %229 : vector<1x8x32xbf16> to vector<8x32xbf16>
    %cst_96 = arith.constant dense<0.000000e+00> : vector<8x32xf32>
    %231 = tpu.matmul %228, %230, %cst_96 {dimension_numbers = #tpu.dot_dimension_numbers<[1], [0], [0], [1], [0, 0, 1, 1], [], []>} : vector<8x8xbf16>, vector<8x32xbf16>, vector<8x32xf32> -> vector<8x32xf32>
    %232 = arith.addf %185, %231 : vector<8x32xf32>
    %233 = vector.broadcast %43 : vector<1x32xf32> to vector<8x32xf32>
    %234 = arith.addf %232, %233 : vector<8x32xf32>
    %235 = arith.addf %234, %24 : vector<8x32xf32>
    %c0_97 = arith.constant 0 : index
    %c0_98 = arith.constant 0 : index
    %c0_99 = arith.constant 0 : index
    %236 = vector.load %arg17[%c0_97, %c0_98, %c0_99] : memref<2x1x32xf32, #tpu.memory_space<vmem>>, vector<1x1x32xf32>
    %237 = vector.shape_cast %236 : vector<1x1x32xf32> to vector<1x32xf32>
    %c0_100 = arith.constant 0 : index
    %c0_101 = arith.constant 0 : index
    %c0_102 = arith.constant 0 : index
    %238 = vector.load %arg18[%c0_100, %c0_101, %c0_102] : memref<2x1x32xf32, #tpu.memory_space<vmem>>, vector<1x1x32xf32>
    %239 = vector.shape_cast %238 : vector<1x1x32xf32> to vector<1x32xf32>
    %cst_103 = arith.constant dense<0.000000e+00> : vector<8xf32>
    %240 = vector.multi_reduction <add>, %235, %cst_103 [1] : vector<8x32xf32> to vector<8xf32>
    %241 = vector.shape_cast %240 : vector<8xf32> to vector<8x1xf32>
    %cst_104 = arith.constant 3.200000e+01 : f32
    %242 = vector.broadcast %cst_104 : f32 to vector<8x1xf32>
    %243 = arith.divf %241, %242 : vector<8x1xf32>
    %244 = vector.broadcast %243 : vector<8x1xf32> to vector<8x32xf32>
    %245 = arith.subf %235, %244 : vector<8x32xf32>
    %246 = arith.mulf %245, %245 : vector<8x32xf32>
    %cst_105 = arith.constant dense<0.000000e+00> : vector<8xf32>
    %247 = vector.multi_reduction <add>, %246, %cst_105 [1] : vector<8x32xf32> to vector<8xf32>
    %248 = vector.shape_cast %247 : vector<8xf32> to vector<8x1xf32>
    %cst_106 = arith.constant 3.200000e+01 : f32
    %249 = vector.broadcast %cst_106 : f32 to vector<8x1xf32>
    %250 = arith.divf %248, %249 : vector<8x1xf32>
    %251 = vector.broadcast %243 : vector<8x1xf32> to vector<8x32xf32>
    %252 = arith.subf %235, %251 : vector<8x32xf32>
    %cst_107 = arith.constant 9.99999974E-6 : f32
    %253 = vector.broadcast %cst_107 : f32 to vector<8x1xf32>
    %254 = arith.addf %250, %253 : vector<8x1xf32>
    %255 = math.rsqrt %254 : vector<8x1xf32>
    %256 = vector.broadcast %255 : vector<8x1xf32> to vector<8x32xf32>
    %257 = arith.mulf %252, %256 : vector<8x32xf32>
    %258 = vector.broadcast %237 : vector<1x32xf32> to vector<8x32xf32>
    %259 = arith.mulf %257, %258 : vector<8x32xf32>
    %260 = vector.broadcast %239 : vector<1x32xf32> to vector<8x32xf32>
    %261 = arith.addf %259, %260 : vector<8x32xf32>
    %c0_108 = arith.constant 0 : index
    %c0_109 = arith.constant 0 : index
    %c0_110 = arith.constant 0 : index
    %262 = vector.load %arg19[%c0_108, %c0_109, %c0_110] : memref<2x32x32xbf16, #tpu.memory_space<vmem>>, vector<1x32x32xbf16>
    %263 = vector.shape_cast %262 : vector<1x32x32xbf16> to vector<32x32xbf16>
    %c0_111 = arith.constant 0 : index
    %c0_112 = arith.constant 0 : index
    %c0_113 = arith.constant 0 : index
    %264 = vector.load %arg20[%c0_111, %c0_112, %c0_113] : memref<2x1x32xf32, #tpu.memory_space<vmem>>, vector<1x1x32xf32>
    %265 = vector.shape_cast %264 : vector<1x1x32xf32> to vector<1x32xf32>
    %c0_114 = arith.constant 0 : index
    %c0_115 = arith.constant 0 : index
    %c0_116 = arith.constant 0 : index
    %266 = vector.load %arg21[%c0_114, %c0_115, %c0_116] : memref<2x32x32xbf16, #tpu.memory_space<vmem>>, vector<1x32x32xbf16>
    %267 = vector.shape_cast %266 : vector<1x32x32xbf16> to vector<32x32xbf16>
    %c0_117 = arith.constant 0 : index
    %c0_118 = arith.constant 0 : index
    %c0_119 = arith.constant 0 : index
    %268 = vector.load %arg22[%c0_117, %c0_118, %c0_119] : memref<2x1x32xf32, #tpu.memory_space<vmem>>, vector<1x1x32xf32>
    %269 = vector.shape_cast %268 : vector<1x1x32xf32> to vector<1x32xf32>
    %270 = arith.truncf %261 : vector<8x32xf32> to vector<8x32xbf16>
    %cst_120 = arith.constant dense<0.000000e+00> : vector<8x32xf32>
    %271 = tpu.matmul %270, %263, %cst_120 {dimension_numbers = #tpu.dot_dimension_numbers<[1], [0], [0], [1], [0, 0, 1, 1], [], []>} : vector<8x32xbf16>, vector<32x32xbf16>, vector<8x32xf32> -> vector<8x32xf32>
    %272 = vector.broadcast %265 : vector<1x32xf32> to vector<8x32xf32>
    %273 = arith.addf %271, %272 : vector<8x32xf32>
    %cst_121 = arith.constant 0.000000e+00 : f32
    %274 = vector.broadcast %cst_121 : f32 to vector<8x32xf32>
    %275 = arith.maximumf %273, %274 : vector<8x32xf32>
    %276 = arith.truncf %275 : vector<8x32xf32> to vector<8x32xbf16>
    %cst_122 = arith.constant dense<0.000000e+00> : vector<8x32xf32>
    %277 = tpu.matmul %276, %267, %cst_122 {dimension_numbers = #tpu.dot_dimension_numbers<[1], [0], [0], [1], [0, 0, 1, 1], [], []>} : vector<8x32xbf16>, vector<32x32xbf16>, vector<8x32xf32> -> vector<8x32xf32>
    %278 = vector.broadcast %269 : vector<1x32xf32> to vector<8x32xf32>
    %279 = arith.addf %277, %278 : vector<8x32xf32>
    %280 = arith.addf %279, %261 : vector<8x32xf32>
    %c0_123 = arith.constant 0 : index
    %c0_124 = arith.constant 0 : index
    %c0_125 = arith.constant 0 : index
    %281 = vector.load %arg23[%c0_123, %c0_124, %c0_125] : memref<2x1x32xf32, #tpu.memory_space<vmem>>, vector<1x1x32xf32>
    %282 = vector.shape_cast %281 : vector<1x1x32xf32> to vector<1x32xf32>
    %c0_126 = arith.constant 0 : index
    %c0_127 = arith.constant 0 : index
    %c0_128 = arith.constant 0 : index
    %283 = vector.load %arg24[%c0_126, %c0_127, %c0_128] : memref<2x1x32xf32, #tpu.memory_space<vmem>>, vector<1x1x32xf32>
    %284 = vector.shape_cast %283 : vector<1x1x32xf32> to vector<1x32xf32>
    %cst_129 = arith.constant dense<0.000000e+00> : vector<8xf32>
    %285 = vector.multi_reduction <add>, %280, %cst_129 [1] : vector<8x32xf32> to vector<8xf32>
    %286 = vector.shape_cast %285 : vector<8xf32> to vector<8x1xf32>
    %cst_130 = arith.constant 3.200000e+01 : f32
    %287 = vector.broadcast %cst_130 : f32 to vector<8x1xf32>
    %288 = arith.divf %286, %287 : vector<8x1xf32>
    %289 = vector.broadcast %288 : vector<8x1xf32> to vector<8x32xf32>
    %290 = arith.subf %280, %289 : vector<8x32xf32>
    %291 = arith.mulf %290, %290 : vector<8x32xf32>
    %cst_131 = arith.constant dense<0.000000e+00> : vector<8xf32>
    %292 = vector.multi_reduction <add>, %291, %cst_131 [1] : vector<8x32xf32> to vector<8xf32>
    %293 = vector.shape_cast %292 : vector<8xf32> to vector<8x1xf32>
    %cst_132 = arith.constant 3.200000e+01 : f32
    %294 = vector.broadcast %cst_132 : f32 to vector<8x1xf32>
    %295 = arith.divf %293, %294 : vector<8x1xf32>
    %296 = vector.broadcast %288 : vector<8x1xf32> to vector<8x32xf32>
    %297 = arith.subf %280, %296 : vector<8x32xf32>
    %cst_133 = arith.constant 9.99999974E-6 : f32
    %298 = vector.broadcast %cst_133 : f32 to vector<8x1xf32>
    %299 = arith.addf %295, %298 : vector<8x1xf32>
    %300 = math.rsqrt %299 : vector<8x1xf32>
    %301 = vector.broadcast %300 : vector<8x1xf32> to vector<8x32xf32>
    %302 = arith.mulf %297, %301 : vector<8x32xf32>
    %303 = vector.broadcast %282 : vector<1x32xf32> to vector<8x32xf32>
    %304 = arith.mulf %302, %303 : vector<8x32xf32>
    %305 = vector.broadcast %284 : vector<1x32xf32> to vector<8x32xf32>
    %306 = arith.addf %304, %305 : vector<8x32xf32>
    %c1 = arith.constant 1 : index
    %c0_134 = arith.constant 0 : index
    %c0_135 = arith.constant 0 : index
    %c0_136 = arith.constant 0 : index
    %307 = vector.load %arg9[%c1, %c0_134, %c0_135, %c0_136] : memref<2x4x32x8xbf16, #tpu.memory_space<vmem>>, vector<1x4x32x8xbf16>
    %308 = vector.shape_cast %307 : vector<1x4x32x8xbf16> to vector<4x32x8xbf16>
    %c1_137 = arith.constant 1 : index
    %c0_138 = arith.constant 0 : index
    %c0_139 = arith.constant 0 : index
    %c0_140 = arith.constant 0 : index
    %309 = vector.load %arg10[%c1_137, %c0_138, %c0_139, %c0_140] : memref<2x4x1x8xf32, #tpu.memory_space<vmem>>, vector<1x4x1x8xf32>
    %310 = vector.shape_cast %309 : vector<1x4x1x8xf32> to vector<4x1x8xf32>
    %c1_141 = arith.constant 1 : index
    %c0_142 = arith.constant 0 : index
    %c0_143 = arith.constant 0 : index
    %c0_144 = arith.constant 0 : index
    %311 = vector.load %arg11[%c1_141, %c0_142, %c0_143, %c0_144] : memref<2x4x32x8xbf16, #tpu.memory_space<vmem>>, vector<1x4x32x8xbf16>
    %312 = vector.shape_cast %311 : vector<1x4x32x8xbf16> to vector<4x32x8xbf16>
    %c1_145 = arith.constant 1 : index
    %c0_146 = arith.constant 0 : index
    %c0_147 = arith.constant 0 : index
    %c0_148 = arith.constant 0 : index
    %313 = vector.load %arg12[%c1_145, %c0_146, %c0_147, %c0_148] : memref<2x4x1x8xf32, #tpu.memory_space<vmem>>, vector<1x4x1x8xf32>
    %314 = vector.shape_cast %313 : vector<1x4x1x8xf32> to vector<4x1x8xf32>
    %c1_149 = arith.constant 1 : index
    %c0_150 = arith.constant 0 : index
    %c0_151 = arith.constant 0 : index
    %c0_152 = arith.constant 0 : index
    %315 = vector.load %arg13[%c1_149, %c0_150, %c0_151, %c0_152] : memref<2x4x32x8xbf16, #tpu.memory_space<vmem>>, vector<1x4x32x8xbf16>
    %316 = vector.shape_cast %315 : vector<1x4x32x8xbf16> to vector<4x32x8xbf16>
    %c1_153 = arith.constant 1 : index
    %c0_154 = arith.constant 0 : index
    %c0_155 = arith.constant 0 : index
    %c0_156 = arith.constant 0 : index
    %317 = vector.load %arg14[%c1_153, %c0_154, %c0_155, %c0_156] : memref<2x4x1x8xf32, #tpu.memory_space<vmem>>, vector<1x4x1x8xf32>
    %318 = vector.shape_cast %317 : vector<1x4x1x8xf32> to vector<4x1x8xf32>
    %c1_157 = arith.constant 1 : index
    %c0_158 = arith.constant 0 : index
    %c0_159 = arith.constant 0 : index
    %c0_160 = arith.constant 0 : index
    %319 = vector.load %arg15[%c1_157, %c0_158, %c0_159, %c0_160] : memref<2x4x8x32xbf16, #tpu.memory_space<vmem>>, vector<1x4x8x32xbf16>
    %320 = vector.shape_cast %319 : vector<1x4x8x32xbf16> to vector<4x8x32xbf16>
    %c1_161 = arith.constant 1 : index
    %c0_162 = arith.constant 0 : index
    %c0_163 = arith.constant 0 : index
    %321 = vector.load %arg16[%c1_161, %c0_162, %c0_163] : memref<2x1x32xf32, #tpu.memory_space<vmem>>, vector<1x1x32xf32>
    %322 = vector.shape_cast %321 : vector<1x1x32xf32> to vector<1x32xf32>
    %323 = arith.truncf %306 : vector<8x32xf32> to vector<8x32xbf16>
    %324 = arith.truncf %306 : vector<8x32xf32> to vector<8x32xbf16>
    %325 = vector.extract_strided_slice %308 {offsets = [0, 0, 0], sizes = [1, 32, 8], strides = [1, 1, 1]} : vector<4x32x8xbf16> to vector<1x32x8xbf16>
    %326 = vector.shape_cast %325 : vector<1x32x8xbf16> to vector<32x8xbf16>
    %cst_164 = arith.constant dense<0.000000e+00> : vector<8x8xf32>
    %327 = tpu.matmul %323, %326, %cst_164 {dimension_numbers = #tpu.dot_dimension_numbers<[1], [0], [0], [1], [0, 0, 1, 1], [], []>} : vector<8x32xbf16>, vector<32x8xbf16>, vector<8x8xf32> -> vector<8x8xf32>
    %328 = vector.extract_strided_slice %310 {offsets = [0, 0, 0], sizes = [1, 1, 8], strides = [1, 1, 1]} : vector<4x1x8xf32> to vector<1x1x8xf32>
    %329 = vector.shape_cast %328 : vector<1x1x8xf32> to vector<1x8xf32>
    %330 = vector.broadcast %329 : vector<1x8xf32> to vector<8x8xf32>
    %331 = arith.addf %327, %330 : vector<8x8xf32>
    %332 = vector.extract_strided_slice %312 {offsets = [0, 0, 0], sizes = [1, 32, 8], strides = [1, 1, 1]} : vector<4x32x8xbf16> to vector<1x32x8xbf16>
    %333 = vector.shape_cast %332 : vector<1x32x8xbf16> to vector<32x8xbf16>
    %cst_165 = arith.constant dense<0.000000e+00> : vector<8x8xf32>
    %334 = tpu.matmul %324, %333, %cst_165 {dimension_numbers = #tpu.dot_dimension_numbers<[1], [0], [0], [1], [0, 0, 1, 1], [], []>} : vector<8x32xbf16>, vector<32x8xbf16>, vector<8x8xf32> -> vector<8x8xf32>
    %335 = vector.extract_strided_slice %314 {offsets = [0, 0, 0], sizes = [1, 1, 8], strides = [1, 1, 1]} : vector<4x1x8xf32> to vector<1x1x8xf32>
    %336 = vector.shape_cast %335 : vector<1x1x8xf32> to vector<1x8xf32>
    %337 = vector.broadcast %336 : vector<1x8xf32> to vector<8x8xf32>
    %338 = arith.addf %334, %337 : vector<8x8xf32>
    %339 = vector.extract_strided_slice %316 {offsets = [0, 0, 0], sizes = [1, 32, 8], strides = [1, 1, 1]} : vector<4x32x8xbf16> to vector<1x32x8xbf16>
    %340 = vector.shape_cast %339 : vector<1x32x8xbf16> to vector<32x8xbf16>
    %cst_166 = arith.constant dense<0.000000e+00> : vector<8x8xf32>
    %341 = tpu.matmul %324, %340, %cst_166 {dimension_numbers = #tpu.dot_dimension_numbers<[1], [0], [0], [1], [0, 0, 1, 1], [], []>} : vector<8x32xbf16>, vector<32x8xbf16>, vector<8x8xf32> -> vector<8x8xf32>
    %342 = vector.extract_strided_slice %318 {offsets = [0, 0, 0], sizes = [1, 1, 8], strides = [1, 1, 1]} : vector<4x1x8xf32> to vector<1x1x8xf32>
    %343 = vector.shape_cast %342 : vector<1x1x8xf32> to vector<1x8xf32>
    %344 = vector.broadcast %343 : vector<1x8xf32> to vector<8x8xf32>
    %345 = arith.addf %341, %344 : vector<8x8xf32>
    %346 = arith.truncf %331 : vector<8x8xf32> to vector<8x8xbf16>
    %347 = arith.truncf %338 : vector<8x8xf32> to vector<8x8xbf16>
    "tpu.trace_start"() <{level = 10 : i32, message = "qe,ke->qk"}> : () -> ()
    %cst_167 = arith.constant dense<0.000000e+00> : vector<8x8xf32>
    %348 = tpu.matmul %346, %347, %cst_167 {dimension_numbers = #tpu.dot_dimension_numbers<[1], [1], [0], [0], [0, 0, 1, 0], [], []>} : vector<8x8xbf16>, vector<8x8xbf16>, vector<8x8xf32> -> vector<8x8xf32>
    "tpu.trace_stop"() : () -> ()
    %cst_168 = arith.constant 0.353553385 : f32
    %349 = vector.broadcast %cst_168 : f32 to vector<8x8xf32>
    %350 = arith.mulf %348, %349 : vector<8x8xf32>
    %cst_169 = arith.constant -1.000000e+30 : f32
    %351 = vector.broadcast %cst_169 : f32 to vector<8x8xf32>
    %352 = arith.select %27, %350, %351 : vector<8x8xi1>, vector<8x8xf32>
    %cst_170 = arith.constant dense<0xFF800000> : vector<8xf32>
    %353 = vector.multi_reduction <maximumf>, %352, %cst_170 [1] : vector<8x8xf32> to vector<8xf32>
    %354 = vector.shape_cast %353 : vector<8xf32> to vector<8x1xf32>
    %355 = vector.broadcast %354 : vector<8x1xf32> to vector<8x8xf32>
    %356 = arith.subf %352, %355 : vector<8x8xf32>
    %357 = math.exp %356 : vector<8x8xf32>
    %cst_171 = arith.constant dense<0.000000e+00> : vector<8xf32>
    %358 = vector.multi_reduction <add>, %357, %cst_171 [1] : vector<8x8xf32> to vector<8xf32>
    %359 = vector.shape_cast %358 : vector<8xf32> to vector<8x1xf32>
    %cst_172 = arith.constant 1.000000e+00 : f32
    %360 = vector.broadcast %cst_172 : f32 to vector<8x1xf32>
    %361 = arith.divf %360, %359 : vector<8x1xf32>
    %362 = vector.broadcast %361 : vector<8x1xf32> to vector<8x8xf32>
    %363 = arith.mulf %357, %362 : vector<8x8xf32>
    %364 = arith.truncf %363 : vector<8x8xf32> to vector<8x8xbf16>
    %365 = arith.truncf %345 : vector<8x8xf32> to vector<8x8xbf16>
    %cst_173 = arith.constant dense<0.000000e+00> : vector<8x8xf32>
    %366 = tpu.matmul %364, %365, %cst_173 {dimension_numbers = #tpu.dot_dimension_numbers<[1], [0], [0], [1], [0, 0, 1, 1], [], []>} : vector<8x8xbf16>, vector<8x8xbf16>, vector<8x8xf32> -> vector<8x8xf32>
    %367 = arith.truncf %366 : vector<8x8xf32> to vector<8x8xbf16>
    %368 = vector.extract_strided_slice %320 {offsets = [0, 0, 0], sizes = [1, 8, 32], strides = [1, 1, 1]} : vector<4x8x32xbf16> to vector<1x8x32xbf16>
    %369 = vector.shape_cast %368 : vector<1x8x32xbf16> to vector<8x32xbf16>
    %cst_174 = arith.constant dense<0.000000e+00> : vector<8x32xf32>
    %370 = tpu.matmul %367, %369, %cst_174 {dimension_numbers = #tpu.dot_dimension_numbers<[1], [0], [0], [1], [0, 0, 1, 1], [], []>} : vector<8x8xbf16>, vector<8x32xbf16>, vector<8x32xf32> -> vector<8x32xf32>
    %371 = vector.extract_strided_slice %308 {offsets = [1, 0, 0], sizes = [1, 32, 8], strides = [1, 1, 1]} : vector<4x32x8xbf16> to vector<1x32x8xbf16>
    %372 = vector.shape_cast %371 : vector<1x32x8xbf16> to vector<32x8xbf16>
    %cst_175 = arith.constant dense<0.000000e+00> : vector<8x8xf32>
    %373 = tpu.matmul %323, %372, %cst_175 {dimension_numbers = #tpu.dot_dimension_numbers<[1], [0], [0], [1], [0, 0, 1, 1], [], []>} : vector<8x32xbf16>, vector<32x8xbf16>, vector<8x8xf32> -> vector<8x8xf32>
    %374 = vector.extract_strided_slice %310 {offsets = [1, 0, 0], sizes = [1, 1, 8], strides = [1, 1, 1]} : vector<4x1x8xf32> to vector<1x1x8xf32>
    %375 = vector.shape_cast %374 : vector<1x1x8xf32> to vector<1x8xf32>
    %376 = vector.broadcast %375 : vector<1x8xf32> to vector<8x8xf32>
    %377 = arith.addf %373, %376 : vector<8x8xf32>
    %378 = vector.extract_strided_slice %312 {offsets = [1, 0, 0], sizes = [1, 32, 8], strides = [1, 1, 1]} : vector<4x32x8xbf16> to vector<1x32x8xbf16>
    %379 = vector.shape_cast %378 : vector<1x32x8xbf16> to vector<32x8xbf16>
    %cst_176 = arith.constant dense<0.000000e+00> : vector<8x8xf32>
    %380 = tpu.matmul %324, %379, %cst_176 {dimension_numbers = #tpu.dot_dimension_numbers<[1], [0], [0], [1], [0, 0, 1, 1], [], []>} : vector<8x32xbf16>, vector<32x8xbf16>, vector<8x8xf32> -> vector<8x8xf32>
    %381 = vector.extract_strided_slice %314 {offsets = [1, 0, 0], sizes = [1, 1, 8], strides = [1, 1, 1]} : vector<4x1x8xf32> to vector<1x1x8xf32>
    %382 = vector.shape_cast %381 : vector<1x1x8xf32> to vector<1x8xf32>
    %383 = vector.broadcast %382 : vector<1x8xf32> to vector<8x8xf32>
    %384 = arith.addf %380, %383 : vector<8x8xf32>
    %385 = vector.extract_strided_slice %316 {offsets = [1, 0, 0], sizes = [1, 32, 8], strides = [1, 1, 1]} : vector<4x32x8xbf16> to vector<1x32x8xbf16>
    %386 = vector.shape_cast %385 : vector<1x32x8xbf16> to vector<32x8xbf16>
    %cst_177 = arith.constant dense<0.000000e+00> : vector<8x8xf32>
    %387 = tpu.matmul %324, %386, %cst_177 {dimension_numbers = #tpu.dot_dimension_numbers<[1], [0], [0], [1], [0, 0, 1, 1], [], []>} : vector<8x32xbf16>, vector<32x8xbf16>, vector<8x8xf32> -> vector<8x8xf32>
    %388 = vector.extract_strided_slice %318 {offsets = [1, 0, 0], sizes = [1, 1, 8], strides = [1, 1, 1]} : vector<4x1x8xf32> to vector<1x1x8xf32>
    %389 = vector.shape_cast %388 : vector<1x1x8xf32> to vector<1x8xf32>
    %390 = vector.broadcast %389 : vector<1x8xf32> to vector<8x8xf32>
    %391 = arith.addf %387, %390 : vector<8x8xf32>
    %392 = arith.truncf %377 : vector<8x8xf32> to vector<8x8xbf16>
    %393 = arith.truncf %384 : vector<8x8xf32> to vector<8x8xbf16>
    "tpu.trace_start"() <{level = 10 : i32, message = "qe,ke->qk"}> : () -> ()
    %cst_178 = arith.constant dense<0.000000e+00> : vector<8x8xf32>
    %394 = tpu.matmul %392, %393, %cst_178 {dimension_numbers = #tpu.dot_dimension_numbers<[1], [1], [0], [0], [0, 0, 1, 0], [], []>} : vector<8x8xbf16>, vector<8x8xbf16>, vector<8x8xf32> -> vector<8x8xf32>
    "tpu.trace_stop"() : () -> ()
    %cst_179 = arith.constant 0.353553385 : f32
    %395 = vector.broadcast %cst_179 : f32 to vector<8x8xf32>
    %396 = arith.mulf %394, %395 : vector<8x8xf32>
    %cst_180 = arith.constant -1.000000e+30 : f32
    %397 = vector.broadcast %cst_180 : f32 to vector<8x8xf32>
    %398 = arith.select %27, %396, %397 : vector<8x8xi1>, vector<8x8xf32>
    %cst_181 = arith.constant dense<0xFF800000> : vector<8xf32>
    %399 = vector.multi_reduction <maximumf>, %398, %cst_181 [1] : vector<8x8xf32> to vector<8xf32>
    %400 = vector.shape_cast %399 : vector<8xf32> to vector<8x1xf32>
    %401 = vector.broadcast %400 : vector<8x1xf32> to vector<8x8xf32>
    %402 = arith.subf %398, %401 : vector<8x8xf32>
    %403 = math.exp %402 : vector<8x8xf32>
    %cst_182 = arith.constant dense<0.000000e+00> : vector<8xf32>
    %404 = vector.multi_reduction <add>, %403, %cst_182 [1] : vector<8x8xf32> to vector<8xf32>
    %405 = vector.shape_cast %404 : vector<8xf32> to vector<8x1xf32>
    %cst_183 = arith.constant 1.000000e+00 : f32
    %406 = vector.broadcast %cst_183 : f32 to vector<8x1xf32>
    %407 = arith.divf %406, %405 : vector<8x1xf32>
    %408 = vector.broadcast %407 : vector<8x1xf32> to vector<8x8xf32>
    %409 = arith.mulf %403, %408 : vector<8x8xf32>
    %410 = arith.truncf %409 : vector<8x8xf32> to vector<8x8xbf16>
    %411 = arith.truncf %391 : vector<8x8xf32> to vector<8x8xbf16>
    %cst_184 = arith.constant dense<0.000000e+00> : vector<8x8xf32>
    %412 = tpu.matmul %410, %411, %cst_184 {dimension_numbers = #tpu.dot_dimension_numbers<[1], [0], [0], [1], [0, 0, 1, 1], [], []>} : vector<8x8xbf16>, vector<8x8xbf16>, vector<8x8xf32> -> vector<8x8xf32>
    %413 = arith.truncf %412 : vector<8x8xf32> to vector<8x8xbf16>
    %414 = vector.extract_strided_slice %320 {offsets = [1, 0, 0], sizes = [1, 8, 32], strides = [1, 1, 1]} : vector<4x8x32xbf16> to vector<1x8x32xbf16>
    %415 = vector.shape_cast %414 : vector<1x8x32xbf16> to vector<8x32xbf16>
    %cst_185 = arith.constant dense<0.000000e+00> : vector<8x32xf32>
    %416 = tpu.matmul %413, %415, %cst_185 {dimension_numbers = #tpu.dot_dimension_numbers<[1], [0], [0], [1], [0, 0, 1, 1], [], []>} : vector<8x8xbf16>, vector<8x32xbf16>, vector<8x32xf32> -> vector<8x32xf32>
    %417 = arith.addf %370, %416 : vector<8x32xf32>
    %418 = vector.extract_strided_slice %308 {offsets = [2, 0, 0], sizes = [1, 32, 8], strides = [1, 1, 1]} : vector<4x32x8xbf16> to vector<1x32x8xbf16>
    %419 = vector.shape_cast %418 : vector<1x32x8xbf16> to vector<32x8xbf16>
    %cst_186 = arith.constant dense<0.000000e+00> : vector<8x8xf32>
    %420 = tpu.matmul %323, %419, %cst_186 {dimension_numbers = #tpu.dot_dimension_numbers<[1], [0], [0], [1], [0, 0, 1, 1], [], []>} : vector<8x32xbf16>, vector<32x8xbf16>, vector<8x8xf32> -> vector<8x8xf32>
    %421 = vector.extract_strided_slice %310 {offsets = [2, 0, 0], sizes = [1, 1, 8], strides = [1, 1, 1]} : vector<4x1x8xf32> to vector<1x1x8xf32>
    %422 = vector.shape_cast %421 : vector<1x1x8xf32> to vector<1x8xf32>
    %423 = vector.broadcast %422 : vector<1x8xf32> to vector<8x8xf32>
    %424 = arith.addf %420, %423 : vector<8x8xf32>
    %425 = vector.extract_strided_slice %312 {offsets = [2, 0, 0], sizes = [1, 32, 8], strides = [1, 1, 1]} : vector<4x32x8xbf16> to vector<1x32x8xbf16>
    %426 = vector.shape_cast %425 : vector<1x32x8xbf16> to vector<32x8xbf16>
    %cst_187 = arith.constant dense<0.000000e+00> : vector<8x8xf32>
    %427 = tpu.matmul %324, %426, %cst_187 {dimension_numbers = #tpu.dot_dimension_numbers<[1], [0], [0], [1], [0, 0, 1, 1], [], []>} : vector<8x32xbf16>, vector<32x8xbf16>, vector<8x8xf32> -> vector<8x8xf32>
    %428 = vector.extract_strided_slice %314 {offsets = [2, 0, 0], sizes = [1, 1, 8], strides = [1, 1, 1]} : vector<4x1x8xf32> to vector<1x1x8xf32>
    %429 = vector.shape_cast %428 : vector<1x1x8xf32> to vector<1x8xf32>
    %430 = vector.broadcast %429 : vector<1x8xf32> to vector<8x8xf32>
    %431 = arith.addf %427, %430 : vector<8x8xf32>
    %432 = vector.extract_strided_slice %316 {offsets = [2, 0, 0], sizes = [1, 32, 8], strides = [1, 1, 1]} : vector<4x32x8xbf16> to vector<1x32x8xbf16>
    %433 = vector.shape_cast %432 : vector<1x32x8xbf16> to vector<32x8xbf16>
    %cst_188 = arith.constant dense<0.000000e+00> : vector<8x8xf32>
    %434 = tpu.matmul %324, %433, %cst_188 {dimension_numbers = #tpu.dot_dimension_numbers<[1], [0], [0], [1], [0, 0, 1, 1], [], []>} : vector<8x32xbf16>, vector<32x8xbf16>, vector<8x8xf32> -> vector<8x8xf32>
    %435 = vector.extract_strided_slice %318 {offsets = [2, 0, 0], sizes = [1, 1, 8], strides = [1, 1, 1]} : vector<4x1x8xf32> to vector<1x1x8xf32>
    %436 = vector.shape_cast %435 : vector<1x1x8xf32> to vector<1x8xf32>
    %437 = vector.broadcast %436 : vector<1x8xf32> to vector<8x8xf32>
    %438 = arith.addf %434, %437 : vector<8x8xf32>
    %439 = arith.truncf %424 : vector<8x8xf32> to vector<8x8xbf16>
    %440 = arith.truncf %431 : vector<8x8xf32> to vector<8x8xbf16>
    "tpu.trace_start"() <{level = 10 : i32, message = "qe,ke->qk"}> : () -> ()
    %cst_189 = arith.constant dense<0.000000e+00> : vector<8x8xf32>
    %441 = tpu.matmul %439, %440, %cst_189 {dimension_numbers = #tpu.dot_dimension_numbers<[1], [1], [0], [0], [0, 0, 1, 0], [], []>} : vector<8x8xbf16>, vector<8x8xbf16>, vector<8x8xf32> -> vector<8x8xf32>
    "tpu.trace_stop"() : () -> ()
    %cst_190 = arith.constant 0.353553385 : f32
    %442 = vector.broadcast %cst_190 : f32 to vector<8x8xf32>
    %443 = arith.mulf %441, %442 : vector<8x8xf32>
    %cst_191 = arith.constant -1.000000e+30 : f32
    %444 = vector.broadcast %cst_191 : f32 to vector<8x8xf32>
    %445 = arith.select %27, %443, %444 : vector<8x8xi1>, vector<8x8xf32>
    %cst_192 = arith.constant dense<0xFF800000> : vector<8xf32>
    %446 = vector.multi_reduction <maximumf>, %445, %cst_192 [1] : vector<8x8xf32> to vector<8xf32>
    %447 = vector.shape_cast %446 : vector<8xf32> to vector<8x1xf32>
    %448 = vector.broadcast %447 : vector<8x1xf32> to vector<8x8xf32>
    %449 = arith.subf %445, %448 : vector<8x8xf32>
    %450 = math.exp %449 : vector<8x8xf32>
    %cst_193 = arith.constant dense<0.000000e+00> : vector<8xf32>
    %451 = vector.multi_reduction <add>, %450, %cst_193 [1] : vector<8x8xf32> to vector<8xf32>
    %452 = vector.shape_cast %451 : vector<8xf32> to vector<8x1xf32>
    %cst_194 = arith.constant 1.000000e+00 : f32
    %453 = vector.broadcast %cst_194 : f32 to vector<8x1xf32>
    %454 = arith.divf %453, %452 : vector<8x1xf32>
    %455 = vector.broadcast %454 : vector<8x1xf32> to vector<8x8xf32>
    %456 = arith.mulf %450, %455 : vector<8x8xf32>
    %457 = arith.truncf %456 : vector<8x8xf32> to vector<8x8xbf16>
    %458 = arith.truncf %438 : vector<8x8xf32> to vector<8x8xbf16>
    %cst_195 = arith.constant dense<0.000000e+00> : vector<8x8xf32>
    %459 = tpu.matmul %457, %458, %cst_195 {dimension_numbers = #tpu.dot_dimension_numbers<[1], [0], [0], [1], [0, 0, 1, 1], [], []>} : vector<8x8xbf16>, vector<8x8xbf16>, vector<8x8xf32> -> vector<8x8xf32>
    %460 = arith.truncf %459 : vector<8x8xf32> to vector<8x8xbf16>
    %461 = vector.extract_strided_slice %320 {offsets = [2, 0, 0], sizes = [1, 8, 32], strides = [1, 1, 1]} : vector<4x8x32xbf16> to vector<1x8x32xbf16>
    %462 = vector.shape_cast %461 : vector<1x8x32xbf16> to vector<8x32xbf16>
    %cst_196 = arith.constant dense<0.000000e+00> : vector<8x32xf32>
    %463 = tpu.matmul %460, %462, %cst_196 {dimension_numbers = #tpu.dot_dimension_numbers<[1], [0], [0], [1], [0, 0, 1, 1], [], []>} : vector<8x8xbf16>, vector<8x32xbf16>, vector<8x32xf32> -> vector<8x32xf32>
    %464 = arith.addf %417, %463 : vector<8x32xf32>
    %465 = vector.extract_strided_slice %308 {offsets = [3, 0, 0], sizes = [1, 32, 8], strides = [1, 1, 1]} : vector<4x32x8xbf16> to vector<1x32x8xbf16>
    %466 = vector.shape_cast %465 : vector<1x32x8xbf16> to vector<32x8xbf16>
    %cst_197 = arith.constant dense<0.000000e+00> : vector<8x8xf32>
    %467 = tpu.matmul %323, %466, %cst_197 {dimension_numbers = #tpu.dot_dimension_numbers<[1], [0], [0], [1], [0, 0, 1, 1], [], []>} : vector<8x32xbf16>, vector<32x8xbf16>, vector<8x8xf32> -> vector<8x8xf32>
    %468 = vector.extract_strided_slice %310 {offsets = [3, 0, 0], sizes = [1, 1, 8], strides = [1, 1, 1]} : vector<4x1x8xf32> to vector<1x1x8xf32>
    %469 = vector.shape_cast %468 : vector<1x1x8xf32> to vector<1x8xf32>
    %470 = vector.broadcast %469 : vector<1x8xf32> to vector<8x8xf32>
    %471 = arith.addf %467, %470 : vector<8x8xf32>
    %472 = vector.extract_strided_slice %312 {offsets = [3, 0, 0], sizes = [1, 32, 8], strides = [1, 1, 1]} : vector<4x32x8xbf16> to vector<1x32x8xbf16>
    %473 = vector.shape_cast %472 : vector<1x32x8xbf16> to vector<32x8xbf16>
    %cst_198 = arith.constant dense<0.000000e+00> : vector<8x8xf32>
    %474 = tpu.matmul %324, %473, %cst_198 {dimension_numbers = #tpu.dot_dimension_numbers<[1], [0], [0], [1], [0, 0, 1, 1], [], []>} : vector<8x32xbf16>, vector<32x8xbf16>, vector<8x8xf32> -> vector<8x8xf32>
    %475 = vector.extract_strided_slice %314 {offsets = [3, 0, 0], sizes = [1, 1, 8], strides = [1, 1, 1]} : vector<4x1x8xf32> to vector<1x1x8xf32>
    %476 = vector.shape_cast %475 : vector<1x1x8xf32> to vector<1x8xf32>
    %477 = vector.broadcast %476 : vector<1x8xf32> to vector<8x8xf32>
    %478 = arith.addf %474, %477 : vector<8x8xf32>
    %479 = vector.extract_strided_slice %316 {offsets = [3, 0, 0], sizes = [1, 32, 8], strides = [1, 1, 1]} : vector<4x32x8xbf16> to vector<1x32x8xbf16>
    %480 = vector.shape_cast %479 : vector<1x32x8xbf16> to vector<32x8xbf16>
    %cst_199 = arith.constant dense<0.000000e+00> : vector<8x8xf32>
    %481 = tpu.matmul %324, %480, %cst_199 {dimension_numbers = #tpu.dot_dimension_numbers<[1], [0], [0], [1], [0, 0, 1, 1], [], []>} : vector<8x32xbf16>, vector<32x8xbf16>, vector<8x8xf32> -> vector<8x8xf32>
    %482 = vector.extract_strided_slice %318 {offsets = [3, 0, 0], sizes = [1, 1, 8], strides = [1, 1, 1]} : vector<4x1x8xf32> to vector<1x1x8xf32>
    %483 = vector.shape_cast %482 : vector<1x1x8xf32> to vector<1x8xf32>
    %484 = vector.broadcast %483 : vector<1x8xf32> to vector<8x8xf32>
    %485 = arith.addf %481, %484 : vector<8x8xf32>
    %486 = arith.truncf %471 : vector<8x8xf32> to vector<8x8xbf16>
    %487 = arith.truncf %478 : vector<8x8xf32> to vector<8x8xbf16>
    "tpu.trace_start"() <{level = 10 : i32, message = "qe,ke->qk"}> : () -> ()
    %cst_200 = arith.constant dense<0.000000e+00> : vector<8x8xf32>
    %488 = tpu.matmul %486, %487, %cst_200 {dimension_numbers = #tpu.dot_dimension_numbers<[1], [1], [0], [0], [0, 0, 1, 0], [], []>} : vector<8x8xbf16>, vector<8x8xbf16>, vector<8x8xf32> -> vector<8x8xf32>
    "tpu.trace_stop"() : () -> ()
    %cst_201 = arith.constant 0.353553385 : f32
    %489 = vector.broadcast %cst_201 : f32 to vector<8x8xf32>
    %490 = arith.mulf %488, %489 : vector<8x8xf32>
    %cst_202 = arith.constant -1.000000e+30 : f32
    %491 = vector.broadcast %cst_202 : f32 to vector<8x8xf32>
    %492 = arith.select %27, %490, %491 : vector<8x8xi1>, vector<8x8xf32>
    %cst_203 = arith.constant dense<0xFF800000> : vector<8xf32>
    %493 = vector.multi_reduction <maximumf>, %492, %cst_203 [1] : vector<8x8xf32> to vector<8xf32>
    %494 = vector.shape_cast %493 : vector<8xf32> to vector<8x1xf32>
    %495 = vector.broadcast %494 : vector<8x1xf32> to vector<8x8xf32>
    %496 = arith.subf %492, %495 : vector<8x8xf32>
    %497 = math.exp %496 : vector<8x8xf32>
    %cst_204 = arith.constant dense<0.000000e+00> : vector<8xf32>
    %498 = vector.multi_reduction <add>, %497, %cst_204 [1] : vector<8x8xf32> to vector<8xf32>
    %499 = vector.shape_cast %498 : vector<8xf32> to vector<8x1xf32>
    %cst_205 = arith.constant 1.000000e+00 : f32
    %500 = vector.broadcast %cst_205 : f32 to vector<8x1xf32>
    %501 = arith.divf %500, %499 : vector<8x1xf32>
    %502 = vector.broadcast %501 : vector<8x1xf32> to vector<8x8xf32>
    %503 = arith.mulf %497, %502 : vector<8x8xf32>
    %504 = arith.truncf %503 : vector<8x8xf32> to vector<8x8xbf16>
    %505 = arith.truncf %485 : vector<8x8xf32> to vector<8x8xbf16>
    %cst_206 = arith.constant dense<0.000000e+00> : vector<8x8xf32>
    %506 = tpu.matmul %504, %505, %cst_206 {dimension_numbers = #tpu.dot_dimension_numbers<[1], [0], [0], [1], [0, 0, 1, 1], [], []>} : vector<8x8xbf16>, vector<8x8xbf16>, vector<8x8xf32> -> vector<8x8xf32>
    %507 = arith.truncf %506 : vector<8x8xf32> to vector<8x8xbf16>
    %508 = vector.extract_strided_slice %320 {offsets = [3, 0, 0], sizes = [1, 8, 32], strides = [1, 1, 1]} : vector<4x8x32xbf16> to vector<1x8x32xbf16>
    %509 = vector.shape_cast %508 : vector<1x8x32xbf16> to vector<8x32xbf16>
    %cst_207 = arith.constant dense<0.000000e+00> : vector<8x32xf32>
    %510 = tpu.matmul %507, %509, %cst_207 {dimension_numbers = #tpu.dot_dimension_numbers<[1], [0], [0], [1], [0, 0, 1, 1], [], []>} : vector<8x8xbf16>, vector<8x32xbf16>, vector<8x32xf32> -> vector<8x32xf32>
    %511 = arith.addf %464, %510 : vector<8x32xf32>
    %512 = vector.broadcast %322 : vector<1x32xf32> to vector<8x32xf32>
    %513 = arith.addf %511, %512 : vector<8x32xf32>
    %514 = arith.addf %513, %306 : vector<8x32xf32>
    %c1_208 = arith.constant 1 : index
    %c0_209 = arith.constant 0 : index
    %c0_210 = arith.constant 0 : index
    %515 = vector.load %arg17[%c1_208, %c0_209, %c0_210] : memref<2x1x32xf32, #tpu.memory_space<vmem>>, vector<1x1x32xf32>
    %516 = vector.shape_cast %515 : vector<1x1x32xf32> to vector<1x32xf32>
    %c1_211 = arith.constant 1 : index
    %c0_212 = arith.constant 0 : index
    %c0_213 = arith.constant 0 : index
    %517 = vector.load %arg18[%c1_211, %c0_212, %c0_213] : memref<2x1x32xf32, #tpu.memory_space<vmem>>, vector<1x1x32xf32>
    %518 = vector.shape_cast %517 : vector<1x1x32xf32> to vector<1x32xf32>
    %cst_214 = arith.constant dense<0.000000e+00> : vector<8xf32>
    %519 = vector.multi_reduction <add>, %514, %cst_214 [1] : vector<8x32xf32> to vector<8xf32>
    %520 = vector.shape_cast %519 : vector<8xf32> to vector<8x1xf32>
    %cst_215 = arith.constant 3.200000e+01 : f32
    %521 = vector.broadcast %cst_215 : f32 to vector<8x1xf32>
    %522 = arith.divf %520, %521 : vector<8x1xf32>
    %523 = vector.broadcast %522 : vector<8x1xf32> to vector<8x32xf32>
    %524 = arith.subf %514, %523 : vector<8x32xf32>
    %525 = arith.mulf %524, %524 : vector<8x32xf32>
    %cst_216 = arith.constant dense<0.000000e+00> : vector<8xf32>
    %526 = vector.multi_reduction <add>, %525, %cst_216 [1] : vector<8x32xf32> to vector<8xf32>
    %527 = vector.shape_cast %526 : vector<8xf32> to vector<8x1xf32>
    %cst_217 = arith.constant 3.200000e+01 : f32
    %528 = vector.broadcast %cst_217 : f32 to vector<8x1xf32>
    %529 = arith.divf %527, %528 : vector<8x1xf32>
    %530 = vector.broadcast %522 : vector<8x1xf32> to vector<8x32xf32>
    %531 = arith.subf %514, %530 : vector<8x32xf32>
    %cst_218 = arith.constant 9.99999974E-6 : f32
    %532 = vector.broadcast %cst_218 : f32 to vector<8x1xf32>
    %533 = arith.addf %529, %532 : vector<8x1xf32>
    %534 = math.rsqrt %533 : vector<8x1xf32>
    %535 = vector.broadcast %534 : vector<8x1xf32> to vector<8x32xf32>
    %536 = arith.mulf %531, %535 : vector<8x32xf32>
    %537 = vector.broadcast %516 : vector<1x32xf32> to vector<8x32xf32>
    %538 = arith.mulf %536, %537 : vector<8x32xf32>
    %539 = vector.broadcast %518 : vector<1x32xf32> to vector<8x32xf32>
    %540 = arith.addf %538, %539 : vector<8x32xf32>
    %c1_219 = arith.constant 1 : index
    %c0_220 = arith.constant 0 : index
    %c0_221 = arith.constant 0 : index
    %541 = vector.load %arg19[%c1_219, %c0_220, %c0_221] : memref<2x32x32xbf16, #tpu.memory_space<vmem>>, vector<1x32x32xbf16>
    %542 = vector.shape_cast %541 : vector<1x32x32xbf16> to vector<32x32xbf16>
    %c1_222 = arith.constant 1 : index
    %c0_223 = arith.constant 0 : index
    %c0_224 = arith.constant 0 : index
    %543 = vector.load %arg20[%c1_222, %c0_223, %c0_224] : memref<2x1x32xf32, #tpu.memory_space<vmem>>, vector<1x1x32xf32>
    %544 = vector.shape_cast %543 : vector<1x1x32xf32> to vector<1x32xf32>
    %c1_225 = arith.constant 1 : index
    %c0_226 = arith.constant 0 : index
    %c0_227 = arith.constant 0 : index
    %545 = vector.load %arg21[%c1_225, %c0_226, %c0_227] : memref<2x32x32xbf16, #tpu.memory_space<vmem>>, vector<1x32x32xbf16>
    %546 = vector.shape_cast %545 : vector<1x32x32xbf16> to vector<32x32xbf16>
    %c1_228 = arith.constant 1 : index
    %c0_229 = arith.constant 0 : index
    %c0_230 = arith.constant 0 : index
    %547 = vector.load %arg22[%c1_228, %c0_229, %c0_230] : memref<2x1x32xf32, #tpu.memory_space<vmem>>, vector<1x1x32xf32>
    %548 = vector.shape_cast %547 : vector<1x1x32xf32> to vector<1x32xf32>
    %549 = arith.truncf %540 : vector<8x32xf32> to vector<8x32xbf16>
    %cst_231 = arith.constant dense<0.000000e+00> : vector<8x32xf32>
    %550 = tpu.matmul %549, %542, %cst_231 {dimension_numbers = #tpu.dot_dimension_numbers<[1], [0], [0], [1], [0, 0, 1, 1], [], []>} : vector<8x32xbf16>, vector<32x32xbf16>, vector<8x32xf32> -> vector<8x32xf32>
    %551 = vector.broadcast %544 : vector<1x32xf32> to vector<8x32xf32>
    %552 = arith.addf %550, %551 : vector<8x32xf32>
    %cst_232 = arith.constant 0.000000e+00 : f32
    %553 = vector.broadcast %cst_232 : f32 to vector<8x32xf32>
    %554 = arith.maximumf %552, %553 : vector<8x32xf32>
    %555 = arith.truncf %554 : vector<8x32xf32> to vector<8x32xbf16>
    %cst_233 = arith.constant dense<0.000000e+00> : vector<8x32xf32>
    %556 = tpu.matmul %555, %546, %cst_233 {dimension_numbers = #tpu.dot_dimension_numbers<[1], [0], [0], [1], [0, 0, 1, 1], [], []>} : vector<8x32xbf16>, vector<32x32xbf16>, vector<8x32xf32> -> vector<8x32xf32>
    %557 = vector.broadcast %548 : vector<1x32xf32> to vector<8x32xf32>
    %558 = arith.addf %556, %557 : vector<8x32xf32>
    %559 = arith.addf %558, %540 : vector<8x32xf32>
    %c1_234 = arith.constant 1 : index
    %c0_235 = arith.constant 0 : index
    %c0_236 = arith.constant 0 : index
    %560 = vector.load %arg23[%c1_234, %c0_235, %c0_236] : memref<2x1x32xf32, #tpu.memory_space<vmem>>, vector<1x1x32xf32>
    %561 = vector.shape_cast %560 : vector<1x1x32xf32> to vector<1x32xf32>
    %c1_237 = arith.constant 1 : index
    %c0_238 = arith.constant 0 : index
    %c0_239 = arith.constant 0 : index
    %562 = vector.load %arg24[%c1_237, %c0_238, %c0_239] : memref<2x1x32xf32, #tpu.memory_space<vmem>>, vector<1x1x32xf32>
    %563 = vector.shape_cast %562 : vector<1x1x32xf32> to vector<1x32xf32>
    %cst_240 = arith.constant dense<0.000000e+00> : vector<8xf32>
    %564 = vector.multi_reduction <add>, %559, %cst_240 [1] : vector<8x32xf32> to vector<8xf32>
    %565 = vector.shape_cast %564 : vector<8xf32> to vector<8x1xf32>
    %cst_241 = arith.constant 3.200000e+01 : f32
    %566 = vector.broadcast %cst_241 : f32 to vector<8x1xf32>
    %567 = arith.divf %565, %566 : vector<8x1xf32>
    %568 = vector.broadcast %567 : vector<8x1xf32> to vector<8x32xf32>
    %569 = arith.subf %559, %568 : vector<8x32xf32>
    %570 = arith.mulf %569, %569 : vector<8x32xf32>
    %cst_242 = arith.constant dense<0.000000e+00> : vector<8xf32>
    %571 = vector.multi_reduction <add>, %570, %cst_242 [1] : vector<8x32xf32> to vector<8xf32>
    %572 = vector.shape_cast %571 : vector<8xf32> to vector<8x1xf32>
    %cst_243 = arith.constant 3.200000e+01 : f32
    %573 = vector.broadcast %cst_243 : f32 to vector<8x1xf32>
    %574 = arith.divf %572, %573 : vector<8x1xf32>
    %575 = vector.broadcast %567 : vector<8x1xf32> to vector<8x32xf32>
    %576 = arith.subf %559, %575 : vector<8x32xf32>
    %cst_244 = arith.constant 9.99999974E-6 : f32
    %577 = vector.broadcast %cst_244 : f32 to vector<8x1xf32>
    %578 = arith.addf %574, %577 : vector<8x1xf32>
    %579 = math.rsqrt %578 : vector<8x1xf32>
    %580 = vector.broadcast %579 : vector<8x1xf32> to vector<8x32xf32>
    %581 = arith.mulf %576, %580 : vector<8x32xf32>
    %582 = vector.broadcast %561 : vector<1x32xf32> to vector<8x32xf32>
    %583 = arith.mulf %581, %582 : vector<8x32xf32>
    %584 = vector.broadcast %563 : vector<1x32xf32> to vector<8x32xf32>
    %585 = arith.addf %583, %584 : vector<8x32xf32>
    %c0_245 = arith.constant 0 : index
    %c0_246 = arith.constant 0 : index
    %c0_247 = arith.constant 0 : index
    %586 = vector.load %arg26[%c0_245, %c0_246, %c0_247] : memref<1x8x32xf32, #tpu.memory_space<vmem>>, vector<1x8x32xf32>
    %587 = vector.shape_cast %586 : vector<1x8x32xf32> to vector<8x32xf32>
    %588 = vector.shape_cast %585 : vector<8x32xf32> to vector<1x8x32xf32>
    tpu.vector_store %arg26[%c0_245, %c0_246, %c0_247], %588 {strides = array<i32>} : memref<1x8x32xf32, #tpu.memory_space<vmem>>, vector<1x8x32xf32>,
    return
  }
  func.func @transform_0(%arg0: i32) -> (i32, i32, i32) {
    %c0_i32 = arith.constant 0 : i32
    %c0_i32_0 = arith.constant 0 : i32
    %c0_i32_1 = arith.constant 0 : i32
    return %arg0, %c0_i32, %c0_i32_0 : i32, i32, i32
  }
  func.func @transform_1(%arg0: i32) -> (i32, i32, i32) {
    %c0_i32 = arith.constant 0 : i32
    %c0_i32_0 = arith.constant 0 : i32
    %c0_i32_1 = arith.constant 0 : i32
    return %arg0, %c0_i32, %c0_i32_0 : i32, i32, i32
  }
  func.func @transform_2(%arg0: i32) -> (i32, i32) {
    %c0_i32 = arith.constant 0 : i32
    %c0_i32_0 = arith.constant 0 : i32
    %c0_i32_1 = arith.constant 0 : i32
    return %c0_i32, %c0_i32_0 : i32, i32
  }
  func.func @transform_3(%arg0: i32) -> (i32, i32) {
    %c0_i32 = arith.constant 0 : i32
    %c0_i32_0 = arith.constant 0 : i32
    %c0_i32_1 = arith.constant 0 : i32
    return %c0_i32, %c0_i32_0 : i32, i32
  }
  func.func @transform_4(%arg0: i32) -> (i32, i32) {
    %c0_i32 = arith.constant 0 : i32
    %c0_i32_0 = arith.constant 0 : i32
    %c0_i32_1 = arith.constant 0 : i32
    return %c0_i32, %c0_i32_0 : i32, i32
  }
  func.func @transform_5(%arg0: i32) -> (i32, i32) {
    %c0_i32 = arith.constant 0 : i32
    %c0_i32_0 = arith.constant 0 : i32
    %c0_i32_1 = arith.constant 0 : i32
    return %c0_i32, %c0_i32_0 : i32, i32
  }
  func.func @transform_6(%arg0: i32) -> (i32, i32) {
    %c0_i32 = arith.constant 0 : i32
    %c0_i32_0 = arith.constant 0 : i32
    %c0_i32_1 = arith.constant 0 : i32
    return %c0_i32, %c0_i32_0 : i32, i32
  }
  func.func @transform_7(%arg0: i32) -> (i32, i32) {
    %c0_i32 = arith.constant 0 : i32
    %c0_i32_0 = arith.constant 0 : i32
    %c0_i32_1 = arith.constant 0 : i32
    return %c0_i32, %c0_i32_0 : i32, i32
  }
  func.func @transform_8(%arg0: i32) -> (i32, i32, i32, i32) {
    %c0_i32 = arith.constant 0 : i32
    %c0_i32_0 = arith.constant 0 : i32
    %c0_i32_1 = arith.constant 0 : i32
    %c0_i32_2 = arith.constant 0 : i32
    %c0_i32_3 = arith.constant 0 : i32
    return %c0_i32, %c0_i32_0, %c0_i32_1, %c0_i32_2 : i32, i32, i32, i32
  }
  func.func @transform_9(%arg0: i32) -> (i32, i32, i32, i32) {
    %c0_i32 = arith.constant 0 : i32
    %c0_i32_0 = arith.constant 0 : i32
    %c0_i32_1 = arith.constant 0 : i32
    %c0_i32_2 = arith.constant 0 : i32
    %c0_i32_3 = arith.constant 0 : i32
    return %c0_i32, %c0_i32_0, %c0_i32_1, %c0_i32_2 : i32, i32, i32, i32
  }
  func.func @transform_10(%arg0: i32) -> (i32, i32, i32, i32) {
    %c0_i32 = arith.constant 0 : i32
    %c0_i32_0 = arith.constant 0 : i32
    %c0_i32_1 = arith.constant 0 : i32
    %c0_i32_2 = arith.constant 0 : i32
    %c0_i32_3 = arith.constant 0 : i32
    return %c0_i32, %c0_i32_0, %c0_i32_1, %c0_i32_2 : i32, i32, i32, i32
  }
  func.func @transform_11(%arg0: i32) -> (i32, i32, i32, i32) {
    %c0_i32 = arith.constant 0 : i32
    %c0_i32_0 = arith.constant 0 : i32
    %c0_i32_1 = arith.constant 0 : i32
    %c0_i32_2 = arith.constant 0 : i32
    %c0_i32_3 = arith.constant 0 : i32
    return %c0_i32, %c0_i32_0, %c0_i32_1, %c0_i32_2 : i32, i32, i32, i32
  }
  func.func @transform_12(%arg0: i32) -> (i32, i32, i32, i32) {
    %c0_i32 = arith.constant 0 : i32
    %c0_i32_0 = arith.constant 0 : i32
    %c0_i32_1 = arith.constant 0 : i32
    %c0_i32_2 = arith.constant 0 : i32
    %c0_i32_3 = arith.constant 0 : i32
    return %c0_i32, %c0_i32_0, %c0_i32_1, %c0_i32_2 : i32, i32, i32, i32
  }
  func.func @transform_13(%arg0: i32) -> (i32, i32, i32, i32) {
    %c0_i32 = arith.constant 0 : i32
    %c0_i32_0 = arith.constant 0 : i32
    %c0_i32_1 = arith.constant 0 : i32
    %c0_i32_2 = arith.constant 0 : i32
    %c0_i32_3 = arith.constant 0 : i32
    return %c0_i32, %c0_i32_0, %c0_i32_1, %c0_i32_2 : i32, i32, i32, i32
  }
  func.func @transform_14(%arg0: i32) -> (i32, i32, i32, i32) {
    %c0_i32 = arith.constant 0 : i32
    %c0_i32_0 = arith.constant 0 : i32
    %c0_i32_1 = arith.constant 0 : i32
    %c0_i32_2 = arith.constant 0 : i32
    %c0_i32_3 = arith.constant 0 : i32
    return %c0_i32, %c0_i32_0, %c0_i32_1, %c0_i32_2 : i32, i32, i32, i32
  }
  func.func @transform_15(%arg0: i32) -> (i32, i32, i32) {
    %c0_i32 = arith.constant 0 : i32
    %c0_i32_0 = arith.constant 0 : i32
    %c0_i32_1 = arith.constant 0 : i32
    %c0_i32_2 = arith.constant 0 : i32
    return %c0_i32, %c0_i32_0, %c0_i32_1 : i32, i32, i32
  }
  func.func @transform_16(%arg0: i32) -> (i32, i32, i32) {
    %c0_i32 = arith.constant 0 : i32
    %c0_i32_0 = arith.constant 0 : i32
    %c0_i32_1 = arith.constant 0 : i32
    %c0_i32_2 = arith.constant 0 : i32
    return %c0_i32, %c0_i32_0, %c0_i32_1 : i32, i32, i32
  }
  func.func @transform_17(%arg0: i32) -> (i32, i32, i32) {
    %c0_i32 = arith.constant 0 : i32
    %c0_i32_0 = arith.constant 0 : i32
    %c0_i32_1 = arith.constant 0 : i32
    %c0_i32_2 = arith.constant 0 : i32
    return %c0_i32, %c0_i32_0, %c0_i32_1 : i32, i32, i32
  }
  func.func @transform_18(%arg0: i32) -> (i32, i32, i32) {
    %c0_i32 = arith.constant 0 : i32
    %c0_i32_0 = arith.constant 0 : i32
    %c0_i32_1 = arith.constant 0 : i32
    %c0_i32_2 = arith.constant 0 : i32
    return %c0_i32, %c0_i32_0, %c0_i32_1 : i32, i32, i32
  }
  func.func @transform_19(%arg0: i32) -> (i32, i32, i32) {
    %c0_i32 = arith.constant 0 : i32
    %c0_i32_0 = arith.constant 0 : i32
    %c0_i32_1 = arith.constant 0 : i32
    %c0_i32_2 = arith.constant 0 : i32
    return %c0_i32, %c0_i32_0, %c0_i32_1 : i32, i32, i32
  }
  func.func @transform_20(%arg0: i32) -> (i32, i32, i32) {
    %c0_i32 = arith.constant 0 : i32
    %c0_i32_0 = arith.constant 0 : i32
    %c0_i32_1 = arith.constant 0 : i32
    %c0_i32_2 = arith.constant 0 : i32
    return %c0_i32, %c0_i32_0, %c0_i32_1 : i32, i32, i32
  }
  func.func @transform_21(%arg0: i32) -> (i32, i32, i32) {
    %c0_i32 = arith.constant 0 : i32
    %c0_i32_0 = arith.constant 0 : i32
    %c0_i32_1 = arith.constant 0 : i32
    %c0_i32_2 = arith.constant 0 : i32
    return %c0_i32, %c0_i32_0, %c0_i32_1 : i32, i32, i32
  }
  func.func @transform_22(%arg0: i32) -> (i32, i32, i32) {
    %c0_i32 = arith.constant 0 : i32
    %c0_i32_0 = arith.constant 0 : i32
    %c0_i32_1 = arith.constant 0 : i32
    %c0_i32_2 = arith.constant 0 : i32
    return %c0_i32, %c0_i32_0, %c0_i32_1 : i32, i32, i32
  }
  func.func @transform_23(%arg0: i32) -> (i32, i32, i32) {
    %c0_i32 = arith.constant 0 : i32
    %c0_i32_0 = arith.constant 0 : i32
    %c0_i32_1 = arith.constant 0 : i32
    %c0_i32_2 = arith.constant 0 : i32
    return %c0_i32, %c0_i32_0, %c0_i32_1 : i32, i32, i32
  }
  func.func @transform_24(%arg0: i32) -> (i32, i32, i32) {
    %c0_i32 = arith.constant 0 : i32
    %c0_i32_0 = arith.constant 0 : i32
    %c0_i32_1 = arith.constant 0 : i32
    return %arg0, %c0_i32, %c0_i32_0 : i32, i32, i32
  }
  func.func @transform_25(%arg0: i32) -> (i32, i32, i32) {
    %c0_i32 = arith.constant 0 : i32
    %c0_i32_0 = arith.constant 0 : i32
    %c0_i32_1 = arith.constant 0 : i32
    return %arg0, %c0_i32, %c0_i32_0 : i32, i32, i32
  }
}

module attributes {stable_mosaic.version = 11 : i64} {
  func.func @_decoder_stack_kernel(%arg0: i32, %arg1: memref<1x8x4xf32, #tpu.memory_space<vmem>>, %arg2: memref<1x8x32xf32, #tpu.memory_space<vmem>>, %arg3: memref<4x32xbf16, #tpu.memory_space<vmem>>, %arg4: memref<1x32xf32, #tpu.memory_space<vmem>>, %arg5: memref<8x32xf32, #tpu.memory_space<vmem>>, %arg6: memref<2x4x32x8xbf16, #tpu.memory_space<vmem>>, %arg7: memref<2x4x1x8xf32, #tpu.memory_space<vmem>>, %arg8: memref<2x4x32x8xbf16, #tpu.memory_space<vmem>>, %arg9: memref<2x4x1x8xf32, #tpu.memory_space<vmem>>, %arg10: memref<2x4x32x8xbf16, #tpu.memory_space<vmem>>, %arg11: memref<2x4x1x8xf32, #tpu.memory_space<vmem>>, %arg12: memref<2x4x8x32xbf16, #tpu.memory_space<vmem>>, %arg13: memref<2x1x32xf32, #tpu.memory_space<vmem>>, %arg14: memref<2x1x32xf32, #tpu.memory_space<vmem>>, %arg15: memref<2x1x32xf32, #tpu.memory_space<vmem>>, %arg16: memref<2x4x32x8xbf16, #tpu.memory_space<vmem>>, %arg17: memref<2x4x1x8xf32, #tpu.memory_space<vmem>>, %arg18: memref<2x4x32x8xbf16, #tpu.memory_space<vmem>>, %arg19: memref<2x4x1x8xf32, #tpu.memory_space<vmem>>, %arg20: memref<2x4x32x8xbf16, #tpu.memory_space<vmem>>, %arg21: memref<2x4x1x8xf32, #tpu.memory_space<vmem>>, %arg22: memref<2x4x8x32xbf16, #tpu.memory_space<vmem>>, %arg23: memref<2x1x32xf32, #tpu.memory_space<vmem>>, %arg24: memref<2x1x32xf32, #tpu.memory_space<vmem>>, %arg25: memref<2x1x32xf32, #tpu.memory_space<vmem>>, %arg26: memref<2x32x32xbf16, #tpu.memory_space<vmem>>, %arg27: memref<2x1x32xf32, #tpu.memory_space<vmem>>, %arg28: memref<2x32x32xbf16, #tpu.memory_space<vmem>>, %arg29: memref<2x1x32xf32, #tpu.memory_space<vmem>>, %arg30: memref<2x1x32xf32, #tpu.memory_space<vmem>>, %arg31: memref<2x1x32xf32, #tpu.memory_space<vmem>>, %arg32: memref<32x4xbf16, #tpu.memory_space<vmem>>, %arg33: memref<1x4xf32, #tpu.memory_space<vmem>>, %arg34: memref<1x8x4xf32, #tpu.memory_space<vmem>>) attributes {dimension_semantics = [#tpu.dimension_semantics<parallel>], iteration_bounds = array<i64: 2>, scalar_prefetch = 0 : i64, scratch_operands = 0 : i64, tpu.core_type = #tpu.core_type<tc>, window_params = [{transform_indices = @transform_0, window_bounds = array<i64: 1, 8, 4>}, {transform_indices = @transform_1, window_bounds = array<i64: 1, 8, 32>}, {pipeline_mode = #tpu.pipeline_mode<synchronous>, transform_indices = @transform_2, window_bounds = array<i64: 4, 32>}, {pipeline_mode = #tpu.pipeline_mode<synchronous>, transform_indices = @transform_3, window_bounds = array<i64: 1, 32>}, {pipeline_mode = #tpu.pipeline_mode<synchronous>, transform_indices = @transform_4, window_bounds = array<i64: 8, 32>}, {pipeline_mode = #tpu.pipeline_mode<synchronous>, transform_indices = @transform_5, window_bounds = array<i64: 2, 4, 32, 8>}, {pipeline_mode = #tpu.pipeline_mode<synchronous>, transform_indices = @transform_6, window_bounds = array<i64: 2, 4, 1, 8>}, {pipeline_mode = #tpu.pipeline_mode<synchronous>, transform_indices = @transform_7, window_bounds = array<i64: 2, 4, 32, 8>}, {pipeline_mode = #tpu.pipeline_mode<synchronous>, transform_indices = @transform_8, window_bounds = array<i64: 2, 4, 1, 8>}, {pipeline_mode = #tpu.pipeline_mode<synchronous>, transform_indices = @transform_9, window_bounds = array<i64: 2, 4, 32, 8>}, {pipeline_mode = #tpu.pipeline_mode<synchronous>, transform_indices = @transform_10, window_bounds = array<i64: 2, 4, 1, 8>}, {pipeline_mode = #tpu.pipeline_mode<synchronous>, transform_indices = @transform_11, window_bounds = array<i64: 2, 4, 8, 32>}, {pipeline_mode = #tpu.pipeline_mode<synchronous>, transform_indices = @transform_12, window_bounds = array<i64: 2, 1, 32>}, {pipeline_mode = #tpu.pipeline_mode<synchronous>, transform_indices = @transform_13, window_bounds = array<i64: 2, 1, 32>}, {pipeline_mode = #tpu.pipeline_mode<synchronous>, transform_indices = @transform_14, window_bounds = array<i64: 2, 1, 32>}, {pipeline_mode = #tpu.pipeline_mode<synchronous>, transform_indices = @transform_15, window_bounds = array<i64: 2, 4, 32, 8>}, {pipeline_mode = #tpu.pipeline_mode<synchronous>, transform_indices = @transform_16, window_bounds = array<i64: 2, 4, 1, 8>}, {pipeline_mode = #tpu.pipeline_mode<synchronous>, transform_indices = @transform_17, window_bounds = array<i64: 2, 4, 32, 8>}, {pipeline_mode = #tpu.pipeline_mode<synchronous>, transform_indices = @transform_18, window_bounds = array<i64: 2, 4, 1, 8>}, {pipeline_mode = #tpu.pipeline_mode<synchronous>, transform_indices = @transform_19, window_bounds = array<i64: 2, 4, 32, 8>}, {pipeline_mode = #tpu.pipeline_mode<synchronous>, transform_indices = @transform_20, window_bounds = array<i64: 2, 4, 1, 8>}, {pipeline_mode = #tpu.pipeline_mode<synchronous>, transform_indices = @transform_21, window_bounds = array<i64: 2, 4, 8, 32>}, {pipeline_mode = #tpu.pipeline_mode<synchronous>, transform_indices = @transform_22, window_bounds = array<i64: 2, 1, 32>}, {pipeline_mode = #tpu.pipeline_mode<synchronous>, transform_indices = @transform_23, window_bounds = array<i64: 2, 1, 32>}, {pipeline_mode = #tpu.pipeline_mode<synchronous>, transform_indices = @transform_24, window_bounds = array<i64: 2, 1, 32>}, {pipeline_mode = #tpu.pipeline_mode<synchronous>, transform_indices = @transform_25, window_bounds = array<i64: 2, 32, 32>}, {pipeline_mode = #tpu.pipeline_mode<synchronous>, transform_indices = @transform_26, window_bounds = array<i64: 2, 1, 32>}, {pipeline_mode = #tpu.pipeline_mode<synchronous>, transform_indices = @transform_27, window_bounds = array<i64: 2, 32, 32>}, {pipeline_mode = #tpu.pipeline_mode<synchronous>, transform_indices = @transform_28, window_bounds = array<i64: 2, 1, 32>}, {pipeline_mode = #tpu.pipeline_mode<synchronous>, transform_indices = @transform_29, window_bounds = array<i64: 2, 1, 32>}, {pipeline_mode = #tpu.pipeline_mode<synchronous>, transform_indices = @transform_30, window_bounds = array<i64: 2, 1, 32>}, {pipeline_mode = #tpu.pipeline_mode<synchronous>, transform_indices = @transform_31, window_bounds = array<i64: 32, 4>}, {pipeline_mode = #tpu.pipeline_mode<synchronous>, transform_indices = @transform_32, window_bounds = array<i64: 1, 4>}, {transform_indices = @transform_33, window_bounds = array<i64: 1, 8, 4>}]} {
    %c0 = arith.constant 0 : index
    %c0_0 = arith.constant 0 : index
    %c0_1 = arith.constant 0 : index
    %0 = vector.load %arg1[%c0, %c0_0, %c0_1] : memref<1x8x4xf32, #tpu.memory_space<vmem>>, vector<1x8x4xf32>
    %1 = vector.shape_cast %0 : vector<1x8x4xf32> to vector<8x4xf32>
    %c0_2 = arith.constant 0 : index
    %c0_3 = arith.constant 0 : index
    %c0_4 = arith.constant 0 : index
    %2 = vector.load %arg2[%c0_2, %c0_3, %c0_4] : memref<1x8x32xf32, #tpu.memory_space<vmem>>, vector<1x8x32xf32>
    %3 = vector.shape_cast %2 : vector<1x8x32xf32> to vector<8x32xf32>
    %4 = arith.truncf %1 : vector<8x4xf32> to vector<8x4xbf16>
    %c0_5 = arith.constant 0 : index
    %c0_6 = arith.constant 0 : index
    %5 = vector.load %arg3[%c0_5, %c0_6] : memref<4x32xbf16, #tpu.memory_space<vmem>>, vector<4x32xbf16>
    %cst = arith.constant dense<0.000000e+00> : vector<8x32xf32>
    %6 = tpu.matmul %4, %5, %cst {dimension_numbers = #tpu.dot_dimension_numbers<[1], [0], [0], [1], [0, 0, 1, 1], [], []>} : vector<8x4xbf16>, vector<4x32xbf16>, vector<8x32xf32> -> vector<8x32xf32>
    %c0_7 = arith.constant 0 : index
    %c0_8 = arith.constant 0 : index
    %7 = vector.load %arg4[%c0_7, %c0_8] : memref<1x32xf32, #tpu.memory_space<vmem>>, vector<1x32xf32>
    %8 = vector.broadcast %7 : vector<1x32xf32> to vector<8x32xf32>
    %9 = arith.addf %6, %8 : vector<8x32xf32>
    %c0_9 = arith.constant 0 : index
    %c0_10 = arith.constant 0 : index
    %10 = vector.load %arg5[%c0_9, %c0_10] : memref<8x32xf32, #tpu.memory_space<vmem>>, vector<8x32xf32>
    %11 = arith.addf %9, %10 : vector<8x32xf32>
    %12 = tpu.iota {dimensions = array<i32: 0>} : vector<8x8xi32>
    %13 = tpu.iota {dimensions = array<i32: 1>} : vector<8x8xi32>
    %14 = arith.cmpi sle, %13, %12 : vector<8x8xi32>
    %c0_11 = arith.constant 0 : index
    %c0_12 = arith.constant 0 : index
    %c0_13 = arith.constant 0 : index
    %c0_14 = arith.constant 0 : index
    %15 = vector.load %arg6[%c0_11, %c0_12, %c0_13, %c0_14] : memref<2x4x32x8xbf16, #tpu.memory_space<vmem>>, vector<1x4x32x8xbf16>
    %16 = vector.shape_cast %15 : vector<1x4x32x8xbf16> to vector<4x32x8xbf16>
    %c0_15 = arith.constant 0 : index
    %c0_16 = arith.constant 0 : index
    %c0_17 = arith.constant 0 : index
    %c0_18 = arith.constant 0 : index
    %17 = vector.load %arg7[%c0_15, %c0_16, %c0_17, %c0_18] : memref<2x4x1x8xf32, #tpu.memory_space<vmem>>, vector<1x4x1x8xf32>
    %18 = vector.shape_cast %17 : vector<1x4x1x8xf32> to vector<4x1x8xf32>
    %c0_19 = arith.constant 0 : index
    %c0_20 = arith.constant 0 : index
    %c0_21 = arith.constant 0 : index
    %c0_22 = arith.constant 0 : index
    %19 = vector.load %arg8[%c0_19, %c0_20, %c0_21, %c0_22] : memref<2x4x32x8xbf16, #tpu.memory_space<vmem>>, vector<1x4x32x8xbf16>
    %20 = vector.shape_cast %19 : vector<1x4x32x8xbf16> to vector<4x32x8xbf16>
    %c0_23 = arith.constant 0 : index
    %c0_24 = arith.constant 0 : index
    %c0_25 = arith.constant 0 : index
    %c0_26 = arith.constant 0 : index
    %21 = vector.load %arg9[%c0_23, %c0_24, %c0_25, %c0_26] : memref<2x4x1x8xf32, #tpu.memory_space<vmem>>, vector<1x4x1x8xf32>
    %22 = vector.shape_cast %21 : vector<1x4x1x8xf32> to vector<4x1x8xf32>
    %c0_27 = arith.constant 0 : index
    %c0_28 = arith.constant 0 : index
    %c0_29 = arith.constant 0 : index
    %c0_30 = arith.constant 0 : index
    %23 = vector.load %arg10[%c0_27, %c0_28, %c0_29, %c0_30] : memref<2x4x32x8xbf16, #tpu.memory_space<vmem>>, vector<1x4x32x8xbf16>
    %24 = vector.shape_cast %23 : vector<1x4x32x8xbf16> to vector<4x32x8xbf16>
    %c0_31 = arith.constant 0 : index
    %c0_32 = arith.constant 0 : index
    %c0_33 = arith.constant 0 : index
    %c0_34 = arith.constant 0 : index
    %25 = vector.load %arg11[%c0_31, %c0_32, %c0_33, %c0_34] : memref<2x4x1x8xf32, #tpu.memory_space<vmem>>, vector<1x4x1x8xf32>
    %26 = vector.shape_cast %25 : vector<1x4x1x8xf32> to vector<4x1x8xf32>
    %c0_35 = arith.constant 0 : index
    %c0_36 = arith.constant 0 : index
    %c0_37 = arith.constant 0 : index
    %c0_38 = arith.constant 0 : index
    %27 = vector.load %arg12[%c0_35, %c0_36, %c0_37, %c0_38] : memref<2x4x8x32xbf16, #tpu.memory_space<vmem>>, vector<1x4x8x32xbf16>
    %28 = vector.shape_cast %27 : vector<1x4x8x32xbf16> to vector<4x8x32xbf16>
    %c0_39 = arith.constant 0 : index
    %c0_40 = arith.constant 0 : index
    %c0_41 = arith.constant 0 : index
    %29 = vector.load %arg13[%c0_39, %c0_40, %c0_41] : memref<2x1x32xf32, #tpu.memory_space<vmem>>, vector<1x1x32xf32>
    %30 = vector.shape_cast %29 : vector<1x1x32xf32> to vector<1x32xf32>
    %31 = arith.truncf %11 : vector<8x32xf32> to vector<8x32xbf16>
    %32 = arith.truncf %11 : vector<8x32xf32> to vector<8x32xbf16>
    %33 = vector.extract_strided_slice %16 {offsets = [0, 0, 0], sizes = [1, 32, 8], strides = [1, 1, 1]} : vector<4x32x8xbf16> to vector<1x32x8xbf16>
    %34 = vector.shape_cast %33 : vector<1x32x8xbf16> to vector<32x8xbf16>
    %cst_42 = arith.constant dense<0.000000e+00> : vector<8x8xf32>
    %35 = tpu.matmul %31, %34, %cst_42 {dimension_numbers = #tpu.dot_dimension_numbers<[1], [0], [0], [1], [0, 0, 1, 1], [], []>} : vector<8x32xbf16>, vector<32x8xbf16>, vector<8x8xf32> -> vector<8x8xf32>
    %36 = vector.extract_strided_slice %18 {offsets = [0, 0, 0], sizes = [1, 1, 8], strides = [1, 1, 1]} : vector<4x1x8xf32> to vector<1x1x8xf32>
    %37 = vector.shape_cast %36 : vector<1x1x8xf32> to vector<1x8xf32>
    %38 = vector.broadcast %37 : vector<1x8xf32> to vector<8x8xf32>
    %39 = arith.addf %35, %38 : vector<8x8xf32>
    %40 = vector.extract_strided_slice %20 {offsets = [0, 0, 0], sizes = [1, 32, 8], strides = [1, 1, 1]} : vector<4x32x8xbf16> to vector<1x32x8xbf16>
    %41 = vector.shape_cast %40 : vector<1x32x8xbf16> to vector<32x8xbf16>
    %cst_43 = arith.constant dense<0.000000e+00> : vector<8x8xf32>
    %42 = tpu.matmul %32, %41, %cst_43 {dimension_numbers = #tpu.dot_dimension_numbers<[1], [0], [0], [1], [0, 0, 1, 1], [], []>} : vector<8x32xbf16>, vector<32x8xbf16>, vector<8x8xf32> -> vector<8x8xf32>
    %43 = vector.extract_strided_slice %22 {offsets = [0, 0, 0], sizes = [1, 1, 8], strides = [1, 1, 1]} : vector<4x1x8xf32> to vector<1x1x8xf32>
    %44 = vector.shape_cast %43 : vector<1x1x8xf32> to vector<1x8xf32>
    %45 = vector.broadcast %44 : vector<1x8xf32> to vector<8x8xf32>
    %46 = arith.addf %42, %45 : vector<8x8xf32>
    %47 = vector.extract_strided_slice %24 {offsets = [0, 0, 0], sizes = [1, 32, 8], strides = [1, 1, 1]} : vector<4x32x8xbf16> to vector<1x32x8xbf16>
    %48 = vector.shape_cast %47 : vector<1x32x8xbf16> to vector<32x8xbf16>
    %cst_44 = arith.constant dense<0.000000e+00> : vector<8x8xf32>
    %49 = tpu.matmul %32, %48, %cst_44 {dimension_numbers = #tpu.dot_dimension_numbers<[1], [0], [0], [1], [0, 0, 1, 1], [], []>} : vector<8x32xbf16>, vector<32x8xbf16>, vector<8x8xf32> -> vector<8x8xf32>
    %50 = vector.extract_strided_slice %26 {offsets = [0, 0, 0], sizes = [1, 1, 8], strides = [1, 1, 1]} : vector<4x1x8xf32> to vector<1x1x8xf32>
    %51 = vector.shape_cast %50 : vector<1x1x8xf32> to vector<1x8xf32>
    %52 = vector.broadcast %51 : vector<1x8xf32> to vector<8x8xf32>
    %53 = arith.addf %49, %52 : vector<8x8xf32>
    %54 = arith.truncf %39 : vector<8x8xf32> to vector<8x8xbf16>
    %55 = arith.truncf %46 : vector<8x8xf32> to vector<8x8xbf16>
    "tpu.trace_start"() <{level = 10 : i32, message = "qe,ke->qk"}> : () -> ()
    %cst_45 = arith.constant dense<0.000000e+00> : vector<8x8xf32>
    %56 = tpu.matmul %54, %55, %cst_45 {dimension_numbers = #tpu.dot_dimension_numbers<[1], [1], [0], [0], [0, 0, 1, 0], [], []>} : vector<8x8xbf16>, vector<8x8xbf16>, vector<8x8xf32> -> vector<8x8xf32>
    "tpu.trace_stop"() : () -> ()
    %cst_46 = arith.constant 0.353553385 : f32
    %57 = vector.broadcast %cst_46 : f32 to vector<8x8xf32>
    %58 = arith.mulf %56, %57 : vector<8x8xf32>
    %cst_47 = arith.constant -1.000000e+30 : f32
    %59 = vector.broadcast %cst_47 : f32 to vector<8x8xf32>
    %60 = arith.select %14, %58, %59 : vector<8x8xi1>, vector<8x8xf32>
    %cst_48 = arith.constant dense<0xFF800000> : vector<8xf32>
    %61 = vector.multi_reduction <maximumf>, %60, %cst_48 [1] : vector<8x8xf32> to vector<8xf32>
    %62 = vector.shape_cast %61 : vector<8xf32> to vector<8x1xf32>
    %63 = vector.broadcast %62 : vector<8x1xf32> to vector<8x8xf32>
    %64 = arith.subf %60, %63 : vector<8x8xf32>
    %65 = math.exp %64 : vector<8x8xf32>
    %cst_49 = arith.constant dense<0.000000e+00> : vector<8xf32>
    %66 = vector.multi_reduction <add>, %65, %cst_49 [1] : vector<8x8xf32> to vector<8xf32>
    %67 = vector.shape_cast %66 : vector<8xf32> to vector<8x1xf32>
    %cst_50 = arith.constant 1.000000e+00 : f32
    %68 = vector.broadcast %cst_50 : f32 to vector<8x1xf32>
    %69 = arith.divf %68, %67 : vector<8x1xf32>
    %70 = vector.broadcast %69 : vector<8x1xf32> to vector<8x8xf32>
    %71 = arith.mulf %65, %70 : vector<8x8xf32>
    %72 = arith.truncf %71 : vector<8x8xf32> to vector<8x8xbf16>
    %73 = arith.truncf %53 : vector<8x8xf32> to vector<8x8xbf16>
    %cst_51 = arith.constant dense<0.000000e+00> : vector<8x8xf32>
    %74 = tpu.matmul %72, %73, %cst_51 {dimension_numbers = #tpu.dot_dimension_numbers<[1], [0], [0], [1], [0, 0, 1, 1], [], []>} : vector<8x8xbf16>, vector<8x8xbf16>, vector<8x8xf32> -> vector<8x8xf32>
    %75 = arith.truncf %74 : vector<8x8xf32> to vector<8x8xbf16>
    %76 = vector.extract_strided_slice %28 {offsets = [0, 0, 0], sizes = [1, 8, 32], strides = [1, 1, 1]} : vector<4x8x32xbf16> to vector<1x8x32xbf16>
    %77 = vector.shape_cast %76 : vector<1x8x32xbf16> to vector<8x32xbf16>
    %cst_52 = arith.constant dense<0.000000e+00> : vector<8x32xf32>
    %78 = tpu.matmul %75, %77, %cst_52 {dimension_numbers = #tpu.dot_dimension_numbers<[1], [0], [0], [1], [0, 0, 1, 1], [], []>} : vector<8x8xbf16>, vector<8x32xbf16>, vector<8x32xf32> -> vector<8x32xf32>
    %79 = vector.extract_strided_slice %16 {offsets = [1, 0, 0], sizes = [1, 32, 8], strides = [1, 1, 1]} : vector<4x32x8xbf16> to vector<1x32x8xbf16>
    %80 = vector.shape_cast %79 : vector<1x32x8xbf16> to vector<32x8xbf16>
    %cst_53 = arith.constant dense<0.000000e+00> : vector<8x8xf32>
    %81 = tpu.matmul %31, %80, %cst_53 {dimension_numbers = #tpu.dot_dimension_numbers<[1], [0], [0], [1], [0, 0, 1, 1], [], []>} : vector<8x32xbf16>, vector<32x8xbf16>, vector<8x8xf32> -> vector<8x8xf32>
    %82 = vector.extract_strided_slice %18 {offsets = [1, 0, 0], sizes = [1, 1, 8], strides = [1, 1, 1]} : vector<4x1x8xf32> to vector<1x1x8xf32>
    %83 = vector.shape_cast %82 : vector<1x1x8xf32> to vector<1x8xf32>
    %84 = vector.broadcast %83 : vector<1x8xf32> to vector<8x8xf32>
    %85 = arith.addf %81, %84 : vector<8x8xf32>
    %86 = vector.extract_strided_slice %20 {offsets = [1, 0, 0], sizes = [1, 32, 8], strides = [1, 1, 1]} : vector<4x32x8xbf16> to vector<1x32x8xbf16>
    %87 = vector.shape_cast %86 : vector<1x32x8xbf16> to vector<32x8xbf16>
    %cst_54 = arith.constant dense<0.000000e+00> : vector<8x8xf32>
    %88 = tpu.matmul %32, %87, %cst_54 {dimension_numbers = #tpu.dot_dimension_numbers<[1], [0], [0], [1], [0, 0, 1, 1], [], []>} : vector<8x32xbf16>, vector<32x8xbf16>, vector<8x8xf32> -> vector<8x8xf32>
    %89 = vector.extract_strided_slice %22 {offsets = [1, 0, 0], sizes = [1, 1, 8], strides = [1, 1, 1]} : vector<4x1x8xf32> to vector<1x1x8xf32>
    %90 = vector.shape_cast %89 : vector<1x1x8xf32> to vector<1x8xf32>
    %91 = vector.broadcast %90 : vector<1x8xf32> to vector<8x8xf32>
    %92 = arith.addf %88, %91 : vector<8x8xf32>
    %93 = vector.extract_strided_slice %24 {offsets = [1, 0, 0], sizes = [1, 32, 8], strides = [1, 1, 1]} : vector<4x32x8xbf16> to vector<1x32x8xbf16>
    %94 = vector.shape_cast %93 : vector<1x32x8xbf16> to vector<32x8xbf16>
    %cst_55 = arith.constant dense<0.000000e+00> : vector<8x8xf32>
    %95 = tpu.matmul %32, %94, %cst_55 {dimension_numbers = #tpu.dot_dimension_numbers<[1], [0], [0], [1], [0, 0, 1, 1], [], []>} : vector<8x32xbf16>, vector<32x8xbf16>, vector<8x8xf32> -> vector<8x8xf32>
    %96 = vector.extract_strided_slice %26 {offsets = [1, 0, 0], sizes = [1, 1, 8], strides = [1, 1, 1]} : vector<4x1x8xf32> to vector<1x1x8xf32>
    %97 = vector.shape_cast %96 : vector<1x1x8xf32> to vector<1x8xf32>
    %98 = vector.broadcast %97 : vector<1x8xf32> to vector<8x8xf32>
    %99 = arith.addf %95, %98 : vector<8x8xf32>
    %100 = arith.truncf %85 : vector<8x8xf32> to vector<8x8xbf16>
    %101 = arith.truncf %92 : vector<8x8xf32> to vector<8x8xbf16>
    "tpu.trace_start"() <{level = 10 : i32, message = "qe,ke->qk"}> : () -> ()
    %cst_56 = arith.constant dense<0.000000e+00> : vector<8x8xf32>
    %102 = tpu.matmul %100, %101, %cst_56 {dimension_numbers = #tpu.dot_dimension_numbers<[1], [1], [0], [0], [0, 0, 1, 0], [], []>} : vector<8x8xbf16>, vector<8x8xbf16>, vector<8x8xf32> -> vector<8x8xf32>
    "tpu.trace_stop"() : () -> ()
    %cst_57 = arith.constant 0.353553385 : f32
    %103 = vector.broadcast %cst_57 : f32 to vector<8x8xf32>
    %104 = arith.mulf %102, %103 : vector<8x8xf32>
    %cst_58 = arith.constant -1.000000e+30 : f32
    %105 = vector.broadcast %cst_58 : f32 to vector<8x8xf32>
    %106 = arith.select %14, %104, %105 : vector<8x8xi1>, vector<8x8xf32>
    %cst_59 = arith.constant dense<0xFF800000> : vector<8xf32>
    %107 = vector.multi_reduction <maximumf>, %106, %cst_59 [1] : vector<8x8xf32> to vector<8xf32>
    %108 = vector.shape_cast %107 : vector<8xf32> to vector<8x1xf32>
    %109 = vector.broadcast %108 : vector<8x1xf32> to vector<8x8xf32>
    %110 = arith.subf %106, %109 : vector<8x8xf32>
    %111 = math.exp %110 : vector<8x8xf32>
    %cst_60 = arith.constant dense<0.000000e+00> : vector<8xf32>
    %112 = vector.multi_reduction <add>, %111, %cst_60 [1] : vector<8x8xf32> to vector<8xf32>
    %113 = vector.shape_cast %112 : vector<8xf32> to vector<8x1xf32>
    %cst_61 = arith.constant 1.000000e+00 : f32
    %114 = vector.broadcast %cst_61 : f32 to vector<8x1xf32>
    %115 = arith.divf %114, %113 : vector<8x1xf32>
    %116 = vector.broadcast %115 : vector<8x1xf32> to vector<8x8xf32>
    %117 = arith.mulf %111, %116 : vector<8x8xf32>
    %118 = arith.truncf %117 : vector<8x8xf32> to vector<8x8xbf16>
    %119 = arith.truncf %99 : vector<8x8xf32> to vector<8x8xbf16>
    %cst_62 = arith.constant dense<0.000000e+00> : vector<8x8xf32>
    %120 = tpu.matmul %118, %119, %cst_62 {dimension_numbers = #tpu.dot_dimension_numbers<[1], [0], [0], [1], [0, 0, 1, 1], [], []>} : vector<8x8xbf16>, vector<8x8xbf16>, vector<8x8xf32> -> vector<8x8xf32>
    %121 = arith.truncf %120 : vector<8x8xf32> to vector<8x8xbf16>
    %122 = vector.extract_strided_slice %28 {offsets = [1, 0, 0], sizes = [1, 8, 32], strides = [1, 1, 1]} : vector<4x8x32xbf16> to vector<1x8x32xbf16>
    %123 = vector.shape_cast %122 : vector<1x8x32xbf16> to vector<8x32xbf16>
    %cst_63 = arith.constant dense<0.000000e+00> : vector<8x32xf32>
    %124 = tpu.matmul %121, %123, %cst_63 {dimension_numbers = #tpu.dot_dimension_numbers<[1], [0], [0], [1], [0, 0, 1, 1], [], []>} : vector<8x8xbf16>, vector<8x32xbf16>, vector<8x32xf32> -> vector<8x32xf32>
    %125 = arith.addf %78, %124 : vector<8x32xf32>
    %126 = vector.extract_strided_slice %16 {offsets = [2, 0, 0], sizes = [1, 32, 8], strides = [1, 1, 1]} : vector<4x32x8xbf16> to vector<1x32x8xbf16>
    %127 = vector.shape_cast %126 : vector<1x32x8xbf16> to vector<32x8xbf16>
    %cst_64 = arith.constant dense<0.000000e+00> : vector<8x8xf32>
    %128 = tpu.matmul %31, %127, %cst_64 {dimension_numbers = #tpu.dot_dimension_numbers<[1], [0], [0], [1], [0, 0, 1, 1], [], []>} : vector<8x32xbf16>, vector<32x8xbf16>, vector<8x8xf32> -> vector<8x8xf32>
    %129 = vector.extract_strided_slice %18 {offsets = [2, 0, 0], sizes = [1, 1, 8], strides = [1, 1, 1]} : vector<4x1x8xf32> to vector<1x1x8xf32>
    %130 = vector.shape_cast %129 : vector<1x1x8xf32> to vector<1x8xf32>
    %131 = vector.broadcast %130 : vector<1x8xf32> to vector<8x8xf32>
    %132 = arith.addf %128, %131 : vector<8x8xf32>
    %133 = vector.extract_strided_slice %20 {offsets = [2, 0, 0], sizes = [1, 32, 8], strides = [1, 1, 1]} : vector<4x32x8xbf16> to vector<1x32x8xbf16>
    %134 = vector.shape_cast %133 : vector<1x32x8xbf16> to vector<32x8xbf16>
    %cst_65 = arith.constant dense<0.000000e+00> : vector<8x8xf32>
    %135 = tpu.matmul %32, %134, %cst_65 {dimension_numbers = #tpu.dot_dimension_numbers<[1], [0], [0], [1], [0, 0, 1, 1], [], []>} : vector<8x32xbf16>, vector<32x8xbf16>, vector<8x8xf32> -> vector<8x8xf32>
    %136 = vector.extract_strided_slice %22 {offsets = [2, 0, 0], sizes = [1, 1, 8], strides = [1, 1, 1]} : vector<4x1x8xf32> to vector<1x1x8xf32>
    %137 = vector.shape_cast %136 : vector<1x1x8xf32> to vector<1x8xf32>
    %138 = vector.broadcast %137 : vector<1x8xf32> to vector<8x8xf32>
    %139 = arith.addf %135, %138 : vector<8x8xf32>
    %140 = vector.extract_strided_slice %24 {offsets = [2, 0, 0], sizes = [1, 32, 8], strides = [1, 1, 1]} : vector<4x32x8xbf16> to vector<1x32x8xbf16>
    %141 = vector.shape_cast %140 : vector<1x32x8xbf16> to vector<32x8xbf16>
    %cst_66 = arith.constant dense<0.000000e+00> : vector<8x8xf32>
    %142 = tpu.matmul %32, %141, %cst_66 {dimension_numbers = #tpu.dot_dimension_numbers<[1], [0], [0], [1], [0, 0, 1, 1], [], []>} : vector<8x32xbf16>, vector<32x8xbf16>, vector<8x8xf32> -> vector<8x8xf32>
    %143 = vector.extract_strided_slice %26 {offsets = [2, 0, 0], sizes = [1, 1, 8], strides = [1, 1, 1]} : vector<4x1x8xf32> to vector<1x1x8xf32>
    %144 = vector.shape_cast %143 : vector<1x1x8xf32> to vector<1x8xf32>
    %145 = vector.broadcast %144 : vector<1x8xf32> to vector<8x8xf32>
    %146 = arith.addf %142, %145 : vector<8x8xf32>
    %147 = arith.truncf %132 : vector<8x8xf32> to vector<8x8xbf16>
    %148 = arith.truncf %139 : vector<8x8xf32> to vector<8x8xbf16>
    "tpu.trace_start"() <{level = 10 : i32, message = "qe,ke->qk"}> : () -> ()
    %cst_67 = arith.constant dense<0.000000e+00> : vector<8x8xf32>
    %149 = tpu.matmul %147, %148, %cst_67 {dimension_numbers = #tpu.dot_dimension_numbers<[1], [1], [0], [0], [0, 0, 1, 0], [], []>} : vector<8x8xbf16>, vector<8x8xbf16>, vector<8x8xf32> -> vector<8x8xf32>
    "tpu.trace_stop"() : () -> ()
    %cst_68 = arith.constant 0.353553385 : f32
    %150 = vector.broadcast %cst_68 : f32 to vector<8x8xf32>
    %151 = arith.mulf %149, %150 : vector<8x8xf32>
    %cst_69 = arith.constant -1.000000e+30 : f32
    %152 = vector.broadcast %cst_69 : f32 to vector<8x8xf32>
    %153 = arith.select %14, %151, %152 : vector<8x8xi1>, vector<8x8xf32>
    %cst_70 = arith.constant dense<0xFF800000> : vector<8xf32>
    %154 = vector.multi_reduction <maximumf>, %153, %cst_70 [1] : vector<8x8xf32> to vector<8xf32>
    %155 = vector.shape_cast %154 : vector<8xf32> to vector<8x1xf32>
    %156 = vector.broadcast %155 : vector<8x1xf32> to vector<8x8xf32>
    %157 = arith.subf %153, %156 : vector<8x8xf32>
    %158 = math.exp %157 : vector<8x8xf32>
    %cst_71 = arith.constant dense<0.000000e+00> : vector<8xf32>
    %159 = vector.multi_reduction <add>, %158, %cst_71 [1] : vector<8x8xf32> to vector<8xf32>
    %160 = vector.shape_cast %159 : vector<8xf32> to vector<8x1xf32>
    %cst_72 = arith.constant 1.000000e+00 : f32
    %161 = vector.broadcast %cst_72 : f32 to vector<8x1xf32>
    %162 = arith.divf %161, %160 : vector<8x1xf32>
    %163 = vector.broadcast %162 : vector<8x1xf32> to vector<8x8xf32>
    %164 = arith.mulf %158, %163 : vector<8x8xf32>
    %165 = arith.truncf %164 : vector<8x8xf32> to vector<8x8xbf16>
    %166 = arith.truncf %146 : vector<8x8xf32> to vector<8x8xbf16>
    %cst_73 = arith.constant dense<0.000000e+00> : vector<8x8xf32>
    %167 = tpu.matmul %165, %166, %cst_73 {dimension_numbers = #tpu.dot_dimension_numbers<[1], [0], [0], [1], [0, 0, 1, 1], [], []>} : vector<8x8xbf16>, vector<8x8xbf16>, vector<8x8xf32> -> vector<8x8xf32>
    %168 = arith.truncf %167 : vector<8x8xf32> to vector<8x8xbf16>
    %169 = vector.extract_strided_slice %28 {offsets = [2, 0, 0], sizes = [1, 8, 32], strides = [1, 1, 1]} : vector<4x8x32xbf16> to vector<1x8x32xbf16>
    %170 = vector.shape_cast %169 : vector<1x8x32xbf16> to vector<8x32xbf16>
    %cst_74 = arith.constant dense<0.000000e+00> : vector<8x32xf32>
    %171 = tpu.matmul %168, %170, %cst_74 {dimension_numbers = #tpu.dot_dimension_numbers<[1], [0], [0], [1], [0, 0, 1, 1], [], []>} : vector<8x8xbf16>, vector<8x32xbf16>, vector<8x32xf32> -> vector<8x32xf32>
    %172 = arith.addf %125, %171 : vector<8x32xf32>
    %173 = vector.extract_strided_slice %16 {offsets = [3, 0, 0], sizes = [1, 32, 8], strides = [1, 1, 1]} : vector<4x32x8xbf16> to vector<1x32x8xbf16>
    %174 = vector.shape_cast %173 : vector<1x32x8xbf16> to vector<32x8xbf16>
    %cst_75 = arith.constant dense<0.000000e+00> : vector<8x8xf32>
    %175 = tpu.matmul %31, %174, %cst_75 {dimension_numbers = #tpu.dot_dimension_numbers<[1], [0], [0], [1], [0, 0, 1, 1], [], []>} : vector<8x32xbf16>, vector<32x8xbf16>, vector<8x8xf32> -> vector<8x8xf32>
    %176 = vector.extract_strided_slice %18 {offsets = [3, 0, 0], sizes = [1, 1, 8], strides = [1, 1, 1]} : vector<4x1x8xf32> to vector<1x1x8xf32>
    %177 = vector.shape_cast %176 : vector<1x1x8xf32> to vector<1x8xf32>
    %178 = vector.broadcast %177 : vector<1x8xf32> to vector<8x8xf32>
    %179 = arith.addf %175, %178 : vector<8x8xf32>
    %180 = vector.extract_strided_slice %20 {offsets = [3, 0, 0], sizes = [1, 32, 8], strides = [1, 1, 1]} : vector<4x32x8xbf16> to vector<1x32x8xbf16>
    %181 = vector.shape_cast %180 : vector<1x32x8xbf16> to vector<32x8xbf16>
    %cst_76 = arith.constant dense<0.000000e+00> : vector<8x8xf32>
    %182 = tpu.matmul %32, %181, %cst_76 {dimension_numbers = #tpu.dot_dimension_numbers<[1], [0], [0], [1], [0, 0, 1, 1], [], []>} : vector<8x32xbf16>, vector<32x8xbf16>, vector<8x8xf32> -> vector<8x8xf32>
    %183 = vector.extract_strided_slice %22 {offsets = [3, 0, 0], sizes = [1, 1, 8], strides = [1, 1, 1]} : vector<4x1x8xf32> to vector<1x1x8xf32>
    %184 = vector.shape_cast %183 : vector<1x1x8xf32> to vector<1x8xf32>
    %185 = vector.broadcast %184 : vector<1x8xf32> to vector<8x8xf32>
    %186 = arith.addf %182, %185 : vector<8x8xf32>
    %187 = vector.extract_strided_slice %24 {offsets = [3, 0, 0], sizes = [1, 32, 8], strides = [1, 1, 1]} : vector<4x32x8xbf16> to vector<1x32x8xbf16>
    %188 = vector.shape_cast %187 : vector<1x32x8xbf16> to vector<32x8xbf16>
    %cst_77 = arith.constant dense<0.000000e+00> : vector<8x8xf32>
    %189 = tpu.matmul %32, %188, %cst_77 {dimension_numbers = #tpu.dot_dimension_numbers<[1], [0], [0], [1], [0, 0, 1, 1], [], []>} : vector<8x32xbf16>, vector<32x8xbf16>, vector<8x8xf32> -> vector<8x8xf32>
    %190 = vector.extract_strided_slice %26 {offsets = [3, 0, 0], sizes = [1, 1, 8], strides = [1, 1, 1]} : vector<4x1x8xf32> to vector<1x1x8xf32>
    %191 = vector.shape_cast %190 : vector<1x1x8xf32> to vector<1x8xf32>
    %192 = vector.broadcast %191 : vector<1x8xf32> to vector<8x8xf32>
    %193 = arith.addf %189, %192 : vector<8x8xf32>
    %194 = arith.truncf %179 : vector<8x8xf32> to vector<8x8xbf16>
    %195 = arith.truncf %186 : vector<8x8xf32> to vector<8x8xbf16>
    "tpu.trace_start"() <{level = 10 : i32, message = "qe,ke->qk"}> : () -> ()
    %cst_78 = arith.constant dense<0.000000e+00> : vector<8x8xf32>
    %196 = tpu.matmul %194, %195, %cst_78 {dimension_numbers = #tpu.dot_dimension_numbers<[1], [1], [0], [0], [0, 0, 1, 0], [], []>} : vector<8x8xbf16>, vector<8x8xbf16>, vector<8x8xf32> -> vector<8x8xf32>
    "tpu.trace_stop"() : () -> ()
    %cst_79 = arith.constant 0.353553385 : f32
    %197 = vector.broadcast %cst_79 : f32 to vector<8x8xf32>
    %198 = arith.mulf %196, %197 : vector<8x8xf32>
    %cst_80 = arith.constant -1.000000e+30 : f32
    %199 = vector.broadcast %cst_80 : f32 to vector<8x8xf32>
    %200 = arith.select %14, %198, %199 : vector<8x8xi1>, vector<8x8xf32>
    %cst_81 = arith.constant dense<0xFF800000> : vector<8xf32>
    %201 = vector.multi_reduction <maximumf>, %200, %cst_81 [1] : vector<8x8xf32> to vector<8xf32>
    %202 = vector.shape_cast %201 : vector<8xf32> to vector<8x1xf32>
    %203 = vector.broadcast %202 : vector<8x1xf32> to vector<8x8xf32>
    %204 = arith.subf %200, %203 : vector<8x8xf32>
    %205 = math.exp %204 : vector<8x8xf32>
    %cst_82 = arith.constant dense<0.000000e+00> : vector<8xf32>
    %206 = vector.multi_reduction <add>, %205, %cst_82 [1] : vector<8x8xf32> to vector<8xf32>
    %207 = vector.shape_cast %206 : vector<8xf32> to vector<8x1xf32>
    %cst_83 = arith.constant 1.000000e+00 : f32
    %208 = vector.broadcast %cst_83 : f32 to vector<8x1xf32>
    %209 = arith.divf %208, %207 : vector<8x1xf32>
    %210 = vector.broadcast %209 : vector<8x1xf32> to vector<8x8xf32>
    %211 = arith.mulf %205, %210 : vector<8x8xf32>
    %212 = arith.truncf %211 : vector<8x8xf32> to vector<8x8xbf16>
    %213 = arith.truncf %193 : vector<8x8xf32> to vector<8x8xbf16>
    %cst_84 = arith.constant dense<0.000000e+00> : vector<8x8xf32>
    %214 = tpu.matmul %212, %213, %cst_84 {dimension_numbers = #tpu.dot_dimension_numbers<[1], [0], [0], [1], [0, 0, 1, 1], [], []>} : vector<8x8xbf16>, vector<8x8xbf16>, vector<8x8xf32> -> vector<8x8xf32>
    %215 = arith.truncf %214 : vector<8x8xf32> to vector<8x8xbf16>
    %216 = vector.extract_strided_slice %28 {offsets = [3, 0, 0], sizes = [1, 8, 32], strides = [1, 1, 1]} : vector<4x8x32xbf16> to vector<1x8x32xbf16>
    %217 = vector.shape_cast %216 : vector<1x8x32xbf16> to vector<8x32xbf16>
    %cst_85 = arith.constant dense<0.000000e+00> : vector<8x32xf32>
    %218 = tpu.matmul %215, %217, %cst_85 {dimension_numbers = #tpu.dot_dimension_numbers<[1], [0], [0], [1], [0, 0, 1, 1], [], []>} : vector<8x8xbf16>, vector<8x32xbf16>, vector<8x32xf32> -> vector<8x32xf32>
    %219 = arith.addf %172, %218 : vector<8x32xf32>
    %220 = vector.broadcast %30 : vector<1x32xf32> to vector<8x32xf32>
    %221 = arith.addf %219, %220 : vector<8x32xf32>
    %222 = arith.addf %221, %11 : vector<8x32xf32>
    %c0_86 = arith.constant 0 : index
    %c0_87 = arith.constant 0 : index
    %c0_88 = arith.constant 0 : index
    %223 = vector.load %arg14[%c0_86, %c0_87, %c0_88] : memref<2x1x32xf32, #tpu.memory_space<vmem>>, vector<1x1x32xf32>
    %224 = vector.shape_cast %223 : vector<1x1x32xf32> to vector<1x32xf32>
    %c0_89 = arith.constant 0 : index
    %c0_90 = arith.constant 0 : index
    %c0_91 = arith.constant 0 : index
    %225 = vector.load %arg15[%c0_89, %c0_90, %c0_91] : memref<2x1x32xf32, #tpu.memory_space<vmem>>, vector<1x1x32xf32>
    %226 = vector.shape_cast %225 : vector<1x1x32xf32> to vector<1x32xf32>
    %cst_92 = arith.constant dense<0.000000e+00> : vector<8xf32>
    %227 = vector.multi_reduction <add>, %222, %cst_92 [1] : vector<8x32xf32> to vector<8xf32>
    %228 = vector.shape_cast %227 : vector<8xf32> to vector<8x1xf32>
    %cst_93 = arith.constant 3.200000e+01 : f32
    %229 = vector.broadcast %cst_93 : f32 to vector<8x1xf32>
    %230 = arith.divf %228, %229 : vector<8x1xf32>
    %231 = vector.broadcast %230 : vector<8x1xf32> to vector<8x32xf32>
    %232 = arith.subf %222, %231 : vector<8x32xf32>
    %233 = arith.mulf %232, %232 : vector<8x32xf32>
    %cst_94 = arith.constant dense<0.000000e+00> : vector<8xf32>
    %234 = vector.multi_reduction <add>, %233, %cst_94 [1] : vector<8x32xf32> to vector<8xf32>
    %235 = vector.shape_cast %234 : vector<8xf32> to vector<8x1xf32>
    %cst_95 = arith.constant 3.200000e+01 : f32
    %236 = vector.broadcast %cst_95 : f32 to vector<8x1xf32>
    %237 = arith.divf %235, %236 : vector<8x1xf32>
    %238 = vector.broadcast %230 : vector<8x1xf32> to vector<8x32xf32>
    %239 = arith.subf %222, %238 : vector<8x32xf32>
    %cst_96 = arith.constant 9.99999974E-6 : f32
    %240 = vector.broadcast %cst_96 : f32 to vector<8x1xf32>
    %241 = arith.addf %237, %240 : vector<8x1xf32>
    %242 = math.rsqrt %241 : vector<8x1xf32>
    %243 = vector.broadcast %242 : vector<8x1xf32> to vector<8x32xf32>
    %244 = arith.mulf %239, %243 : vector<8x32xf32>
    %245 = vector.broadcast %224 : vector<1x32xf32> to vector<8x32xf32>
    %246 = arith.mulf %244, %245 : vector<8x32xf32>
    %247 = vector.broadcast %226 : vector<1x32xf32> to vector<8x32xf32>
    %248 = arith.addf %246, %247 : vector<8x32xf32>
    %c0_97 = arith.constant 0 : index
    %c0_98 = arith.constant 0 : index
    %c0_99 = arith.constant 0 : index
    %c0_100 = arith.constant 0 : index
    %249 = vector.load %arg16[%c0_97, %c0_98, %c0_99, %c0_100] : memref<2x4x32x8xbf16, #tpu.memory_space<vmem>>, vector<1x4x32x8xbf16>
    %250 = vector.shape_cast %249 : vector<1x4x32x8xbf16> to vector<4x32x8xbf16>
    %c0_101 = arith.constant 0 : index
    %c0_102 = arith.constant 0 : index
    %c0_103 = arith.constant 0 : index
    %c0_104 = arith.constant 0 : index
    %251 = vector.load %arg17[%c0_101, %c0_102, %c0_103, %c0_104] : memref<2x4x1x8xf32, #tpu.memory_space<vmem>>, vector<1x4x1x8xf32>
    %252 = vector.shape_cast %251 : vector<1x4x1x8xf32> to vector<4x1x8xf32>
    %c0_105 = arith.constant 0 : index
    %c0_106 = arith.constant 0 : index
    %c0_107 = arith.constant 0 : index
    %c0_108 = arith.constant 0 : index
    %253 = vector.load %arg18[%c0_105, %c0_106, %c0_107, %c0_108] : memref<2x4x32x8xbf16, #tpu.memory_space<vmem>>, vector<1x4x32x8xbf16>
    %254 = vector.shape_cast %253 : vector<1x4x32x8xbf16> to vector<4x32x8xbf16>
    %c0_109 = arith.constant 0 : index
    %c0_110 = arith.constant 0 : index
    %c0_111 = arith.constant 0 : index
    %c0_112 = arith.constant 0 : index
    %255 = vector.load %arg19[%c0_109, %c0_110, %c0_111, %c0_112] : memref<2x4x1x8xf32, #tpu.memory_space<vmem>>, vector<1x4x1x8xf32>
    %256 = vector.shape_cast %255 : vector<1x4x1x8xf32> to vector<4x1x8xf32>
    %c0_113 = arith.constant 0 : index
    %c0_114 = arith.constant 0 : index
    %c0_115 = arith.constant 0 : index
    %c0_116 = arith.constant 0 : index
    %257 = vector.load %arg20[%c0_113, %c0_114, %c0_115, %c0_116] : memref<2x4x32x8xbf16, #tpu.memory_space<vmem>>, vector<1x4x32x8xbf16>
    %258 = vector.shape_cast %257 : vector<1x4x32x8xbf16> to vector<4x32x8xbf16>
    %c0_117 = arith.constant 0 : index
    %c0_118 = arith.constant 0 : index
    %c0_119 = arith.constant 0 : index
    %c0_120 = arith.constant 0 : index
    %259 = vector.load %arg21[%c0_117, %c0_118, %c0_119, %c0_120] : memref<2x4x1x8xf32, #tpu.memory_space<vmem>>, vector<1x4x1x8xf32>
    %260 = vector.shape_cast %259 : vector<1x4x1x8xf32> to vector<4x1x8xf32>
    %c0_121 = arith.constant 0 : index
    %c0_122 = arith.constant 0 : index
    %c0_123 = arith.constant 0 : index
    %c0_124 = arith.constant 0 : index
    %261 = vector.load %arg22[%c0_121, %c0_122, %c0_123, %c0_124] : memref<2x4x8x32xbf16, #tpu.memory_space<vmem>>, vector<1x4x8x32xbf16>
    %262 = vector.shape_cast %261 : vector<1x4x8x32xbf16> to vector<4x8x32xbf16>
    %c0_125 = arith.constant 0 : index
    %c0_126 = arith.constant 0 : index
    %c0_127 = arith.constant 0 : index
    %263 = vector.load %arg23[%c0_125, %c0_126, %c0_127] : memref<2x1x32xf32, #tpu.memory_space<vmem>>, vector<1x1x32xf32>
    %264 = vector.shape_cast %263 : vector<1x1x32xf32> to vector<1x32xf32>
    %265 = arith.truncf %248 : vector<8x32xf32> to vector<8x32xbf16>
    %266 = arith.truncf %3 : vector<8x32xf32> to vector<8x32xbf16>
    %267 = vector.extract_strided_slice %250 {offsets = [0, 0, 0], sizes = [1, 32, 8], strides = [1, 1, 1]} : vector<4x32x8xbf16> to vector<1x32x8xbf16>
    %268 = vector.shape_cast %267 : vector<1x32x8xbf16> to vector<32x8xbf16>
    %cst_128 = arith.constant dense<0.000000e+00> : vector<8x8xf32>
    %269 = tpu.matmul %265, %268, %cst_128 {dimension_numbers = #tpu.dot_dimension_numbers<[1], [0], [0], [1], [0, 0, 1, 1], [], []>} : vector<8x32xbf16>, vector<32x8xbf16>, vector<8x8xf32> -> vector<8x8xf32>
    %270 = vector.extract_strided_slice %252 {offsets = [0, 0, 0], sizes = [1, 1, 8], strides = [1, 1, 1]} : vector<4x1x8xf32> to vector<1x1x8xf32>
    %271 = vector.shape_cast %270 : vector<1x1x8xf32> to vector<1x8xf32>
    %272 = vector.broadcast %271 : vector<1x8xf32> to vector<8x8xf32>
    %273 = arith.addf %269, %272 : vector<8x8xf32>
    %274 = vector.extract_strided_slice %254 {offsets = [0, 0, 0], sizes = [1, 32, 8], strides = [1, 1, 1]} : vector<4x32x8xbf16> to vector<1x32x8xbf16>
    %275 = vector.shape_cast %274 : vector<1x32x8xbf16> to vector<32x8xbf16>
    %cst_129 = arith.constant dense<0.000000e+00> : vector<8x8xf32>
    %276 = tpu.matmul %266, %275, %cst_129 {dimension_numbers = #tpu.dot_dimension_numbers<[1], [0], [0], [1], [0, 0, 1, 1], [], []>} : vector<8x32xbf16>, vector<32x8xbf16>, vector<8x8xf32> -> vector<8x8xf32>
    %277 = vector.extract_strided_slice %256 {offsets = [0, 0, 0], sizes = [1, 1, 8], strides = [1, 1, 1]} : vector<4x1x8xf32> to vector<1x1x8xf32>
    %278 = vector.shape_cast %277 : vector<1x1x8xf32> to vector<1x8xf32>
    %279 = vector.broadcast %278 : vector<1x8xf32> to vector<8x8xf32>
    %280 = arith.addf %276, %279 : vector<8x8xf32>
    %281 = vector.extract_strided_slice %258 {offsets = [0, 0, 0], sizes = [1, 32, 8], strides = [1, 1, 1]} : vector<4x32x8xbf16> to vector<1x32x8xbf16>
    %282 = vector.shape_cast %281 : vector<1x32x8xbf16> to vector<32x8xbf16>
    %cst_130 = arith.constant dense<0.000000e+00> : vector<8x8xf32>
    %283 = tpu.matmul %266, %282, %cst_130 {dimension_numbers = #tpu.dot_dimension_numbers<[1], [0], [0], [1], [0, 0, 1, 1], [], []>} : vector<8x32xbf16>, vector<32x8xbf16>, vector<8x8xf32> -> vector<8x8xf32>
    %284 = vector.extract_strided_slice %260 {offsets = [0, 0, 0], sizes = [1, 1, 8], strides = [1, 1, 1]} : vector<4x1x8xf32> to vector<1x1x8xf32>
    %285 = vector.shape_cast %284 : vector<1x1x8xf32> to vector<1x8xf32>
    %286 = vector.broadcast %285 : vector<1x8xf32> to vector<8x8xf32>
    %287 = arith.addf %283, %286 : vector<8x8xf32>
    %288 = arith.truncf %273 : vector<8x8xf32> to vector<8x8xbf16>
    %289 = arith.truncf %280 : vector<8x8xf32> to vector<8x8xbf16>
    "tpu.trace_start"() <{level = 10 : i32, message = "qe,ke->qk"}> : () -> ()
    %cst_131 = arith.constant dense<0.000000e+00> : vector<8x8xf32>
    %290 = tpu.matmul %288, %289, %cst_131 {dimension_numbers = #tpu.dot_dimension_numbers<[1], [1], [0], [0], [0, 0, 1, 0], [], []>} : vector<8x8xbf16>, vector<8x8xbf16>, vector<8x8xf32> -> vector<8x8xf32>
    "tpu.trace_stop"() : () -> ()
    %cst_132 = arith.constant 0.353553385 : f32
    %291 = vector.broadcast %cst_132 : f32 to vector<8x8xf32>
    %292 = arith.mulf %290, %291 : vector<8x8xf32>
    %cst_133 = arith.constant -1.000000e+30 : f32
    %293 = vector.broadcast %cst_133 : f32 to vector<8x8xf32>
    %294 = arith.select %14, %292, %293 : vector<8x8xi1>, vector<8x8xf32>
    %cst_134 = arith.constant dense<0xFF800000> : vector<8xf32>
    %295 = vector.multi_reduction <maximumf>, %294, %cst_134 [1] : vector<8x8xf32> to vector<8xf32>
    %296 = vector.shape_cast %295 : vector<8xf32> to vector<8x1xf32>
    %297 = vector.broadcast %296 : vector<8x1xf32> to vector<8x8xf32>
    %298 = arith.subf %294, %297 : vector<8x8xf32>
    %299 = math.exp %298 : vector<8x8xf32>
    %cst_135 = arith.constant dense<0.000000e+00> : vector<8xf32>
    %300 = vector.multi_reduction <add>, %299, %cst_135 [1] : vector<8x8xf32> to vector<8xf32>
    %301 = vector.shape_cast %300 : vector<8xf32> to vector<8x1xf32>
    %cst_136 = arith.constant 1.000000e+00 : f32
    %302 = vector.broadcast %cst_136 : f32 to vector<8x1xf32>
    %303 = arith.divf %302, %301 : vector<8x1xf32>
    %304 = vector.broadcast %303 : vector<8x1xf32> to vector<8x8xf32>
    %305 = arith.mulf %299, %304 : vector<8x8xf32>
    %306 = arith.truncf %305 : vector<8x8xf32> to vector<8x8xbf16>
    %307 = arith.truncf %287 : vector<8x8xf32> to vector<8x8xbf16>
    %cst_137 = arith.constant dense<0.000000e+00> : vector<8x8xf32>
    %308 = tpu.matmul %306, %307, %cst_137 {dimension_numbers = #tpu.dot_dimension_numbers<[1], [0], [0], [1], [0, 0, 1, 1], [], []>} : vector<8x8xbf16>, vector<8x8xbf16>, vector<8x8xf32> -> vector<8x8xf32>
    %309 = arith.truncf %308 : vector<8x8xf32> to vector<8x8xbf16>
    %310 = vector.extract_strided_slice %262 {offsets = [0, 0, 0], sizes = [1, 8, 32], strides = [1, 1, 1]} : vector<4x8x32xbf16> to vector<1x8x32xbf16>
    %311 = vector.shape_cast %310 : vector<1x8x32xbf16> to vector<8x32xbf16>
    %cst_138 = arith.constant dense<0.000000e+00> : vector<8x32xf32>
    %312 = tpu.matmul %309, %311, %cst_138 {dimension_numbers = #tpu.dot_dimension_numbers<[1], [0], [0], [1], [0, 0, 1, 1], [], []>} : vector<8x8xbf16>, vector<8x32xbf16>, vector<8x32xf32> -> vector<8x32xf32>
    %313 = vector.extract_strided_slice %250 {offsets = [1, 0, 0], sizes = [1, 32, 8], strides = [1, 1, 1]} : vector<4x32x8xbf16> to vector<1x32x8xbf16>
    %314 = vector.shape_cast %313 : vector<1x32x8xbf16> to vector<32x8xbf16>
    %cst_139 = arith.constant dense<0.000000e+00> : vector<8x8xf32>
    %315 = tpu.matmul %265, %314, %cst_139 {dimension_numbers = #tpu.dot_dimension_numbers<[1], [0], [0], [1], [0, 0, 1, 1], [], []>} : vector<8x32xbf16>, vector<32x8xbf16>, vector<8x8xf32> -> vector<8x8xf32>
    %316 = vector.extract_strided_slice %252 {offsets = [1, 0, 0], sizes = [1, 1, 8], strides = [1, 1, 1]} : vector<4x1x8xf32> to vector<1x1x8xf32>
    %317 = vector.shape_cast %316 : vector<1x1x8xf32> to vector<1x8xf32>
    %318 = vector.broadcast %317 : vector<1x8xf32> to vector<8x8xf32>
    %319 = arith.addf %315, %318 : vector<8x8xf32>
    %320 = vector.extract_strided_slice %254 {offsets = [1, 0, 0], sizes = [1, 32, 8], strides = [1, 1, 1]} : vector<4x32x8xbf16> to vector<1x32x8xbf16>
    %321 = vector.shape_cast %320 : vector<1x32x8xbf16> to vector<32x8xbf16>
    %cst_140 = arith.constant dense<0.000000e+00> : vector<8x8xf32>
    %322 = tpu.matmul %266, %321, %cst_140 {dimension_numbers = #tpu.dot_dimension_numbers<[1], [0], [0], [1], [0, 0, 1, 1], [], []>} : vector<8x32xbf16>, vector<32x8xbf16>, vector<8x8xf32> -> vector<8x8xf32>
    %323 = vector.extract_strided_slice %256 {offsets = [1, 0, 0], sizes = [1, 1, 8], strides = [1, 1, 1]} : vector<4x1x8xf32> to vector<1x1x8xf32>
    %324 = vector.shape_cast %323 : vector<1x1x8xf32> to vector<1x8xf32>
    %325 = vector.broadcast %324 : vector<1x8xf32> to vector<8x8xf32>
    %326 = arith.addf %322, %325 : vector<8x8xf32>
    %327 = vector.extract_strided_slice %258 {offsets = [1, 0, 0], sizes = [1, 32, 8], strides = [1, 1, 1]} : vector<4x32x8xbf16> to vector<1x32x8xbf16>
    %328 = vector.shape_cast %327 : vector<1x32x8xbf16> to vector<32x8xbf16>
    %cst_141 = arith.constant dense<0.000000e+00> : vector<8x8xf32>
    %329 = tpu.matmul %266, %328, %cst_141 {dimension_numbers = #tpu.dot_dimension_numbers<[1], [0], [0], [1], [0, 0, 1, 1], [], []>} : vector<8x32xbf16>, vector<32x8xbf16>, vector<8x8xf32> -> vector<8x8xf32>
    %330 = vector.extract_strided_slice %260 {offsets = [1, 0, 0], sizes = [1, 1, 8], strides = [1, 1, 1]} : vector<4x1x8xf32> to vector<1x1x8xf32>
    %331 = vector.shape_cast %330 : vector<1x1x8xf32> to vector<1x8xf32>
    %332 = vector.broadcast %331 : vector<1x8xf32> to vector<8x8xf32>
    %333 = arith.addf %329, %332 : vector<8x8xf32>
    %334 = arith.truncf %319 : vector<8x8xf32> to vector<8x8xbf16>
    %335 = arith.truncf %326 : vector<8x8xf32> to vector<8x8xbf16>
    "tpu.trace_start"() <{level = 10 : i32, message = "qe,ke->qk"}> : () -> ()
    %cst_142 = arith.constant dense<0.000000e+00> : vector<8x8xf32>
    %336 = tpu.matmul %334, %335, %cst_142 {dimension_numbers = #tpu.dot_dimension_numbers<[1], [1], [0], [0], [0, 0, 1, 0], [], []>} : vector<8x8xbf16>, vector<8x8xbf16>, vector<8x8xf32> -> vector<8x8xf32>
    "tpu.trace_stop"() : () -> ()
    %cst_143 = arith.constant 0.353553385 : f32
    %337 = vector.broadcast %cst_143 : f32 to vector<8x8xf32>
    %338 = arith.mulf %336, %337 : vector<8x8xf32>
    %cst_144 = arith.constant -1.000000e+30 : f32
    %339 = vector.broadcast %cst_144 : f32 to vector<8x8xf32>
    %340 = arith.select %14, %338, %339 : vector<8x8xi1>, vector<8x8xf32>
    %cst_145 = arith.constant dense<0xFF800000> : vector<8xf32>
    %341 = vector.multi_reduction <maximumf>, %340, %cst_145 [1] : vector<8x8xf32> to vector<8xf32>
    %342 = vector.shape_cast %341 : vector<8xf32> to vector<8x1xf32>
    %343 = vector.broadcast %342 : vector<8x1xf32> to vector<8x8xf32>
    %344 = arith.subf %340, %343 : vector<8x8xf32>
    %345 = math.exp %344 : vector<8x8xf32>
    %cst_146 = arith.constant dense<0.000000e+00> : vector<8xf32>
    %346 = vector.multi_reduction <add>, %345, %cst_146 [1] : vector<8x8xf32> to vector<8xf32>
    %347 = vector.shape_cast %346 : vector<8xf32> to vector<8x1xf32>
    %cst_147 = arith.constant 1.000000e+00 : f32
    %348 = vector.broadcast %cst_147 : f32 to vector<8x1xf32>
    %349 = arith.divf %348, %347 : vector<8x1xf32>
    %350 = vector.broadcast %349 : vector<8x1xf32> to vector<8x8xf32>
    %351 = arith.mulf %345, %350 : vector<8x8xf32>
    %352 = arith.truncf %351 : vector<8x8xf32> to vector<8x8xbf16>
    %353 = arith.truncf %333 : vector<8x8xf32> to vector<8x8xbf16>
    %cst_148 = arith.constant dense<0.000000e+00> : vector<8x8xf32>
    %354 = tpu.matmul %352, %353, %cst_148 {dimension_numbers = #tpu.dot_dimension_numbers<[1], [0], [0], [1], [0, 0, 1, 1], [], []>} : vector<8x8xbf16>, vector<8x8xbf16>, vector<8x8xf32> -> vector<8x8xf32>
    %355 = arith.truncf %354 : vector<8x8xf32> to vector<8x8xbf16>
    %356 = vector.extract_strided_slice %262 {offsets = [1, 0, 0], sizes = [1, 8, 32], strides = [1, 1, 1]} : vector<4x8x32xbf16> to vector<1x8x32xbf16>
    %357 = vector.shape_cast %356 : vector<1x8x32xbf16> to vector<8x32xbf16>
    %cst_149 = arith.constant dense<0.000000e+00> : vector<8x32xf32>
    %358 = tpu.matmul %355, %357, %cst_149 {dimension_numbers = #tpu.dot_dimension_numbers<[1], [0], [0], [1], [0, 0, 1, 1], [], []>} : vector<8x8xbf16>, vector<8x32xbf16>, vector<8x32xf32> -> vector<8x32xf32>
    %359 = arith.addf %312, %358 : vector<8x32xf32>
    %360 = vector.extract_strided_slice %250 {offsets = [2, 0, 0], sizes = [1, 32, 8], strides = [1, 1, 1]} : vector<4x32x8xbf16> to vector<1x32x8xbf16>
    %361 = vector.shape_cast %360 : vector<1x32x8xbf16> to vector<32x8xbf16>
    %cst_150 = arith.constant dense<0.000000e+00> : vector<8x8xf32>
    %362 = tpu.matmul %265, %361, %cst_150 {dimension_numbers = #tpu.dot_dimension_numbers<[1], [0], [0], [1], [0, 0, 1, 1], [], []>} : vector<8x32xbf16>, vector<32x8xbf16>, vector<8x8xf32> -> vector<8x8xf32>
    %363 = vector.extract_strided_slice %252 {offsets = [2, 0, 0], sizes = [1, 1, 8], strides = [1, 1, 1]} : vector<4x1x8xf32> to vector<1x1x8xf32>
    %364 = vector.shape_cast %363 : vector<1x1x8xf32> to vector<1x8xf32>
    %365 = vector.broadcast %364 : vector<1x8xf32> to vector<8x8xf32>
    %366 = arith.addf %362, %365 : vector<8x8xf32>
    %367 = vector.extract_strided_slice %254 {offsets = [2, 0, 0], sizes = [1, 32, 8], strides = [1, 1, 1]} : vector<4x32x8xbf16> to vector<1x32x8xbf16>
    %368 = vector.shape_cast %367 : vector<1x32x8xbf16> to vector<32x8xbf16>
    %cst_151 = arith.constant dense<0.000000e+00> : vector<8x8xf32>
    %369 = tpu.matmul %266, %368, %cst_151 {dimension_numbers = #tpu.dot_dimension_numbers<[1], [0], [0], [1], [0, 0, 1, 1], [], []>} : vector<8x32xbf16>, vector<32x8xbf16>, vector<8x8xf32> -> vector<8x8xf32>
    %370 = vector.extract_strided_slice %256 {offsets = [2, 0, 0], sizes = [1, 1, 8], strides = [1, 1, 1]} : vector<4x1x8xf32> to vector<1x1x8xf32>
    %371 = vector.shape_cast %370 : vector<1x1x8xf32> to vector<1x8xf32>
    %372 = vector.broadcast %371 : vector<1x8xf32> to vector<8x8xf32>
    %373 = arith.addf %369, %372 : vector<8x8xf32>
    %374 = vector.extract_strided_slice %258 {offsets = [2, 0, 0], sizes = [1, 32, 8], strides = [1, 1, 1]} : vector<4x32x8xbf16> to vector<1x32x8xbf16>
    %375 = vector.shape_cast %374 : vector<1x32x8xbf16> to vector<32x8xbf16>
    %cst_152 = arith.constant dense<0.000000e+00> : vector<8x8xf32>
    %376 = tpu.matmul %266, %375, %cst_152 {dimension_numbers = #tpu.dot_dimension_numbers<[1], [0], [0], [1], [0, 0, 1, 1], [], []>} : vector<8x32xbf16>, vector<32x8xbf16>, vector<8x8xf32> -> vector<8x8xf32>
    %377 = vector.extract_strided_slice %260 {offsets = [2, 0, 0], sizes = [1, 1, 8], strides = [1, 1, 1]} : vector<4x1x8xf32> to vector<1x1x8xf32>
    %378 = vector.shape_cast %377 : vector<1x1x8xf32> to vector<1x8xf32>
    %379 = vector.broadcast %378 : vector<1x8xf32> to vector<8x8xf32>
    %380 = arith.addf %376, %379 : vector<8x8xf32>
    %381 = arith.truncf %366 : vector<8x8xf32> to vector<8x8xbf16>
    %382 = arith.truncf %373 : vector<8x8xf32> to vector<8x8xbf16>
    "tpu.trace_start"() <{level = 10 : i32, message = "qe,ke->qk"}> : () -> ()
    %cst_153 = arith.constant dense<0.000000e+00> : vector<8x8xf32>
    %383 = tpu.matmul %381, %382, %cst_153 {dimension_numbers = #tpu.dot_dimension_numbers<[1], [1], [0], [0], [0, 0, 1, 0], [], []>} : vector<8x8xbf16>, vector<8x8xbf16>, vector<8x8xf32> -> vector<8x8xf32>
    "tpu.trace_stop"() : () -> ()
    %cst_154 = arith.constant 0.353553385 : f32
    %384 = vector.broadcast %cst_154 : f32 to vector<8x8xf32>
    %385 = arith.mulf %383, %384 : vector<8x8xf32>
    %cst_155 = arith.constant -1.000000e+30 : f32
    %386 = vector.broadcast %cst_155 : f32 to vector<8x8xf32>
    %387 = arith.select %14, %385, %386 : vector<8x8xi1>, vector<8x8xf32>
    %cst_156 = arith.constant dense<0xFF800000> : vector<8xf32>
    %388 = vector.multi_reduction <maximumf>, %387, %cst_156 [1] : vector<8x8xf32> to vector<8xf32>
    %389 = vector.shape_cast %388 : vector<8xf32> to vector<8x1xf32>
    %390 = vector.broadcast %389 : vector<8x1xf32> to vector<8x8xf32>
    %391 = arith.subf %387, %390 : vector<8x8xf32>
    %392 = math.exp %391 : vector<8x8xf32>
    %cst_157 = arith.constant dense<0.000000e+00> : vector<8xf32>
    %393 = vector.multi_reduction <add>, %392, %cst_157 [1] : vector<8x8xf32> to vector<8xf32>
    %394 = vector.shape_cast %393 : vector<8xf32> to vector<8x1xf32>
    %cst_158 = arith.constant 1.000000e+00 : f32
    %395 = vector.broadcast %cst_158 : f32 to vector<8x1xf32>
    %396 = arith.divf %395, %394 : vector<8x1xf32>
    %397 = vector.broadcast %396 : vector<8x1xf32> to vector<8x8xf32>
    %398 = arith.mulf %392, %397 : vector<8x8xf32>
    %399 = arith.truncf %398 : vector<8x8xf32> to vector<8x8xbf16>
    %400 = arith.truncf %380 : vector<8x8xf32> to vector<8x8xbf16>
    %cst_159 = arith.constant dense<0.000000e+00> : vector<8x8xf32>
    %401 = tpu.matmul %399, %400, %cst_159 {dimension_numbers = #tpu.dot_dimension_numbers<[1], [0], [0], [1], [0, 0, 1, 1], [], []>} : vector<8x8xbf16>, vector<8x8xbf16>, vector<8x8xf32> -> vector<8x8xf32>
    %402 = arith.truncf %401 : vector<8x8xf32> to vector<8x8xbf16>
    %403 = vector.extract_strided_slice %262 {offsets = [2, 0, 0], sizes = [1, 8, 32], strides = [1, 1, 1]} : vector<4x8x32xbf16> to vector<1x8x32xbf16>
    %404 = vector.shape_cast %403 : vector<1x8x32xbf16> to vector<8x32xbf16>
    %cst_160 = arith.constant dense<0.000000e+00> : vector<8x32xf32>
    %405 = tpu.matmul %402, %404, %cst_160 {dimension_numbers = #tpu.dot_dimension_numbers<[1], [0], [0], [1], [0, 0, 1, 1], [], []>} : vector<8x8xbf16>, vector<8x32xbf16>, vector<8x32xf32> -> vector<8x32xf32>
    %406 = arith.addf %359, %405 : vector<8x32xf32>
    %407 = vector.extract_strided_slice %250 {offsets = [3, 0, 0], sizes = [1, 32, 8], strides = [1, 1, 1]} : vector<4x32x8xbf16> to vector<1x32x8xbf16>
    %408 = vector.shape_cast %407 : vector<1x32x8xbf16> to vector<32x8xbf16>
    %cst_161 = arith.constant dense<0.000000e+00> : vector<8x8xf32>
    %409 = tpu.matmul %265, %408, %cst_161 {dimension_numbers = #tpu.dot_dimension_numbers<[1], [0], [0], [1], [0, 0, 1, 1], [], []>} : vector<8x32xbf16>, vector<32x8xbf16>, vector<8x8xf32> -> vector<8x8xf32>
    %410 = vector.extract_strided_slice %252 {offsets = [3, 0, 0], sizes = [1, 1, 8], strides = [1, 1, 1]} : vector<4x1x8xf32> to vector<1x1x8xf32>
    %411 = vector.shape_cast %410 : vector<1x1x8xf32> to vector<1x8xf32>
    %412 = vector.broadcast %411 : vector<1x8xf32> to vector<8x8xf32>
    %413 = arith.addf %409, %412 : vector<8x8xf32>
    %414 = vector.extract_strided_slice %254 {offsets = [3, 0, 0], sizes = [1, 32, 8], strides = [1, 1, 1]} : vector<4x32x8xbf16> to vector<1x32x8xbf16>
    %415 = vector.shape_cast %414 : vector<1x32x8xbf16> to vector<32x8xbf16>
    %cst_162 = arith.constant dense<0.000000e+00> : vector<8x8xf32>
    %416 = tpu.matmul %266, %415, %cst_162 {dimension_numbers = #tpu.dot_dimension_numbers<[1], [0], [0], [1], [0, 0, 1, 1], [], []>} : vector<8x32xbf16>, vector<32x8xbf16>, vector<8x8xf32> -> vector<8x8xf32>
    %417 = vector.extract_strided_slice %256 {offsets = [3, 0, 0], sizes = [1, 1, 8], strides = [1, 1, 1]} : vector<4x1x8xf32> to vector<1x1x8xf32>
    %418 = vector.shape_cast %417 : vector<1x1x8xf32> to vector<1x8xf32>
    %419 = vector.broadcast %418 : vector<1x8xf32> to vector<8x8xf32>
    %420 = arith.addf %416, %419 : vector<8x8xf32>
    %421 = vector.extract_strided_slice %258 {offsets = [3, 0, 0], sizes = [1, 32, 8], strides = [1, 1, 1]} : vector<4x32x8xbf16> to vector<1x32x8xbf16>
    %422 = vector.shape_cast %421 : vector<1x32x8xbf16> to vector<32x8xbf16>
    %cst_163 = arith.constant dense<0.000000e+00> : vector<8x8xf32>
    %423 = tpu.matmul %266, %422, %cst_163 {dimension_numbers = #tpu.dot_dimension_numbers<[1], [0], [0], [1], [0, 0, 1, 1], [], []>} : vector<8x32xbf16>, vector<32x8xbf16>, vector<8x8xf32> -> vector<8x8xf32>
    %424 = vector.extract_strided_slice %260 {offsets = [3, 0, 0], sizes = [1, 1, 8], strides = [1, 1, 1]} : vector<4x1x8xf32> to vector<1x1x8xf32>
    %425 = vector.shape_cast %424 : vector<1x1x8xf32> to vector<1x8xf32>
    %426 = vector.broadcast %425 : vector<1x8xf32> to vector<8x8xf32>
    %427 = arith.addf %423, %426 : vector<8x8xf32>
    %428 = arith.truncf %413 : vector<8x8xf32> to vector<8x8xbf16>
    %429 = arith.truncf %420 : vector<8x8xf32> to vector<8x8xbf16>
    "tpu.trace_start"() <{level = 10 : i32, message = "qe,ke->qk"}> : () -> ()
    %cst_164 = arith.constant dense<0.000000e+00> : vector<8x8xf32>
    %430 = tpu.matmul %428, %429, %cst_164 {dimension_numbers = #tpu.dot_dimension_numbers<[1], [1], [0], [0], [0, 0, 1, 0], [], []>} : vector<8x8xbf16>, vector<8x8xbf16>, vector<8x8xf32> -> vector<8x8xf32>
    "tpu.trace_stop"() : () -> ()
    %cst_165 = arith.constant 0.353553385 : f32
    %431 = vector.broadcast %cst_165 : f32 to vector<8x8xf32>
    %432 = arith.mulf %430, %431 : vector<8x8xf32>
    %cst_166 = arith.constant -1.000000e+30 : f32
    %433 = vector.broadcast %cst_166 : f32 to vector<8x8xf32>
    %434 = arith.select %14, %432, %433 : vector<8x8xi1>, vector<8x8xf32>
    %cst_167 = arith.constant dense<0xFF800000> : vector<8xf32>
    %435 = vector.multi_reduction <maximumf>, %434, %cst_167 [1] : vector<8x8xf32> to vector<8xf32>
    %436 = vector.shape_cast %435 : vector<8xf32> to vector<8x1xf32>
    %437 = vector.broadcast %436 : vector<8x1xf32> to vector<8x8xf32>
    %438 = arith.subf %434, %437 : vector<8x8xf32>
    %439 = math.exp %438 : vector<8x8xf32>
    %cst_168 = arith.constant dense<0.000000e+00> : vector<8xf32>
    %440 = vector.multi_reduction <add>, %439, %cst_168 [1] : vector<8x8xf32> to vector<8xf32>
    %441 = vector.shape_cast %440 : vector<8xf32> to vector<8x1xf32>
    %cst_169 = arith.constant 1.000000e+00 : f32
    %442 = vector.broadcast %cst_169 : f32 to vector<8x1xf32>
    %443 = arith.divf %442, %441 : vector<8x1xf32>
    %444 = vector.broadcast %443 : vector<8x1xf32> to vector<8x8xf32>
    %445 = arith.mulf %439, %444 : vector<8x8xf32>
    %446 = arith.truncf %445 : vector<8x8xf32> to vector<8x8xbf16>
    %447 = arith.truncf %427 : vector<8x8xf32> to vector<8x8xbf16>
    %cst_170 = arith.constant dense<0.000000e+00> : vector<8x8xf32>
    %448 = tpu.matmul %446, %447, %cst_170 {dimension_numbers = #tpu.dot_dimension_numbers<[1], [0], [0], [1], [0, 0, 1, 1], [], []>} : vector<8x8xbf16>, vector<8x8xbf16>, vector<8x8xf32> -> vector<8x8xf32>
    %449 = arith.truncf %448 : vector<8x8xf32> to vector<8x8xbf16>
    %450 = vector.extract_strided_slice %262 {offsets = [3, 0, 0], sizes = [1, 8, 32], strides = [1, 1, 1]} : vector<4x8x32xbf16> to vector<1x8x32xbf16>
    %451 = vector.shape_cast %450 : vector<1x8x32xbf16> to vector<8x32xbf16>
    %cst_171 = arith.constant dense<0.000000e+00> : vector<8x32xf32>
    %452 = tpu.matmul %449, %451, %cst_171 {dimension_numbers = #tpu.dot_dimension_numbers<[1], [0], [0], [1], [0, 0, 1, 1], [], []>} : vector<8x8xbf16>, vector<8x32xbf16>, vector<8x32xf32> -> vector<8x32xf32>
    %453 = arith.addf %406, %452 : vector<8x32xf32>
    %454 = vector.broadcast %264 : vector<1x32xf32> to vector<8x32xf32>
    %455 = arith.addf %453, %454 : vector<8x32xf32>
    %456 = arith.addf %455, %248 : vector<8x32xf32>
    %c0_172 = arith.constant 0 : index
    %c0_173 = arith.constant 0 : index
    %c0_174 = arith.constant 0 : index
    %457 = vector.load %arg24[%c0_172, %c0_173, %c0_174] : memref<2x1x32xf32, #tpu.memory_space<vmem>>, vector<1x1x32xf32>
    %458 = vector.shape_cast %457 : vector<1x1x32xf32> to vector<1x32xf32>
    %c0_175 = arith.constant 0 : index
    %c0_176 = arith.constant 0 : index
    %c0_177 = arith.constant 0 : index
    %459 = vector.load %arg25[%c0_175, %c0_176, %c0_177] : memref<2x1x32xf32, #tpu.memory_space<vmem>>, vector<1x1x32xf32>
    %460 = vector.shape_cast %459 : vector<1x1x32xf32> to vector<1x32xf32>
    %cst_178 = arith.constant dense<0.000000e+00> : vector<8xf32>
    %461 = vector.multi_reduction <add>, %456, %cst_178 [1] : vector<8x32xf32> to vector<8xf32>
    %462 = vector.shape_cast %461 : vector<8xf32> to vector<8x1xf32>
    %cst_179 = arith.constant 3.200000e+01 : f32
    %463 = vector.broadcast %cst_179 : f32 to vector<8x1xf32>
    %464 = arith.divf %462, %463 : vector<8x1xf32>
    %465 = vector.broadcast %464 : vector<8x1xf32> to vector<8x32xf32>
    %466 = arith.subf %456, %465 : vector<8x32xf32>
    %467 = arith.mulf %466, %466 : vector<8x32xf32>
    %cst_180 = arith.constant dense<0.000000e+00> : vector<8xf32>
    %468 = vector.multi_reduction <add>, %467, %cst_180 [1] : vector<8x32xf32> to vector<8xf32>
    %469 = vector.shape_cast %468 : vector<8xf32> to vector<8x1xf32>
    %cst_181 = arith.constant 3.200000e+01 : f32
    %470 = vector.broadcast %cst_181 : f32 to vector<8x1xf32>
    %471 = arith.divf %469, %470 : vector<8x1xf32>
    %472 = vector.broadcast %464 : vector<8x1xf32> to vector<8x32xf32>
    %473 = arith.subf %456, %472 : vector<8x32xf32>
    %cst_182 = arith.constant 9.99999974E-6 : f32
    %474 = vector.broadcast %cst_182 : f32 to vector<8x1xf32>
    %475 = arith.addf %471, %474 : vector<8x1xf32>
    %476 = math.rsqrt %475 : vector<8x1xf32>
    %477 = vector.broadcast %476 : vector<8x1xf32> to vector<8x32xf32>
    %478 = arith.mulf %473, %477 : vector<8x32xf32>
    %479 = vector.broadcast %458 : vector<1x32xf32> to vector<8x32xf32>
    %480 = arith.mulf %478, %479 : vector<8x32xf32>
    %481 = vector.broadcast %460 : vector<1x32xf32> to vector<8x32xf32>
    %482 = arith.addf %480, %481 : vector<8x32xf32>
    %c0_183 = arith.constant 0 : index
    %c0_184 = arith.constant 0 : index
    %c0_185 = arith.constant 0 : index
    %483 = vector.load %arg26[%c0_183, %c0_184, %c0_185] : memref<2x32x32xbf16, #tpu.memory_space<vmem>>, vector<1x32x32xbf16>
    %484 = vector.shape_cast %483 : vector<1x32x32xbf16> to vector<32x32xbf16>
    %c0_186 = arith.constant 0 : index
    %c0_187 = arith.constant 0 : index
    %c0_188 = arith.constant 0 : index
    %485 = vector.load %arg27[%c0_186, %c0_187, %c0_188] : memref<2x1x32xf32, #tpu.memory_space<vmem>>, vector<1x1x32xf32>
    %486 = vector.shape_cast %485 : vector<1x1x32xf32> to vector<1x32xf32>
    %c0_189 = arith.constant 0 : index
    %c0_190 = arith.constant 0 : index
    %c0_191 = arith.constant 0 : index
    %487 = vector.load %arg28[%c0_189, %c0_190, %c0_191] : memref<2x32x32xbf16, #tpu.memory_space<vmem>>, vector<1x32x32xbf16>
    %488 = vector.shape_cast %487 : vector<1x32x32xbf16> to vector<32x32xbf16>
    %c0_192 = arith.constant 0 : index
    %c0_193 = arith.constant 0 : index
    %c0_194 = arith.constant 0 : index
    %489 = vector.load %arg29[%c0_192, %c0_193, %c0_194] : memref<2x1x32xf32, #tpu.memory_space<vmem>>, vector<1x1x32xf32>
    %490 = vector.shape_cast %489 : vector<1x1x32xf32> to vector<1x32xf32>
    %491 = arith.truncf %482 : vector<8x32xf32> to vector<8x32xbf16>
    %cst_195 = arith.constant dense<0.000000e+00> : vector<8x32xf32>
    %492 = tpu.matmul %491, %484, %cst_195 {dimension_numbers = #tpu.dot_dimension_numbers<[1], [0], [0], [1], [0, 0, 1, 1], [], []>} : vector<8x32xbf16>, vector<32x32xbf16>, vector<8x32xf32> -> vector<8x32xf32>
    %493 = vector.broadcast %486 : vector<1x32xf32> to vector<8x32xf32>
    %494 = arith.addf %492, %493 : vector<8x32xf32>
    %cst_196 = arith.constant 0.000000e+00 : f32
    %495 = vector.broadcast %cst_196 : f32 to vector<8x32xf32>
    %496 = arith.maximumf %494, %495 : vector<8x32xf32>
    %497 = arith.truncf %496 : vector<8x32xf32> to vector<8x32xbf16>
    %cst_197 = arith.constant dense<0.000000e+00> : vector<8x32xf32>
    %498 = tpu.matmul %497, %488, %cst_197 {dimension_numbers = #tpu.dot_dimension_numbers<[1], [0], [0], [1], [0, 0, 1, 1], [], []>} : vector<8x32xbf16>, vector<32x32xbf16>, vector<8x32xf32> -> vector<8x32xf32>
    %499 = vector.broadcast %490 : vector<1x32xf32> to vector<8x32xf32>
    %500 = arith.addf %498, %499 : vector<8x32xf32>
    %501 = arith.addf %500, %482 : vector<8x32xf32>
    %c0_198 = arith.constant 0 : index
    %c0_199 = arith.constant 0 : index
    %c0_200 = arith.constant 0 : index
    %502 = vector.load %arg30[%c0_198, %c0_199, %c0_200] : memref<2x1x32xf32, #tpu.memory_space<vmem>>, vector<1x1x32xf32>
    %503 = vector.shape_cast %502 : vector<1x1x32xf32> to vector<1x32xf32>
    %c0_201 = arith.constant 0 : index
    %c0_202 = arith.constant 0 : index
    %c0_203 = arith.constant 0 : index
    %504 = vector.load %arg31[%c0_201, %c0_202, %c0_203] : memref<2x1x32xf32, #tpu.memory_space<vmem>>, vector<1x1x32xf32>
    %505 = vector.shape_cast %504 : vector<1x1x32xf32> to vector<1x32xf32>
    %cst_204 = arith.constant dense<0.000000e+00> : vector<8xf32>
    %506 = vector.multi_reduction <add>, %501, %cst_204 [1] : vector<8x32xf32> to vector<8xf32>
    %507 = vector.shape_cast %506 : vector<8xf32> to vector<8x1xf32>
    %cst_205 = arith.constant 3.200000e+01 : f32
    %508 = vector.broadcast %cst_205 : f32 to vector<8x1xf32>
    %509 = arith.divf %507, %508 : vector<8x1xf32>
    %510 = vector.broadcast %509 : vector<8x1xf32> to vector<8x32xf32>
    %511 = arith.subf %501, %510 : vector<8x32xf32>
    %512 = arith.mulf %511, %511 : vector<8x32xf32>
    %cst_206 = arith.constant dense<0.000000e+00> : vector<8xf32>
    %513 = vector.multi_reduction <add>, %512, %cst_206 [1] : vector<8x32xf32> to vector<8xf32>
    %514 = vector.shape_cast %513 : vector<8xf32> to vector<8x1xf32>
    %cst_207 = arith.constant 3.200000e+01 : f32
    %515 = vector.broadcast %cst_207 : f32 to vector<8x1xf32>
    %516 = arith.divf %514, %515 : vector<8x1xf32>
    %517 = vector.broadcast %509 : vector<8x1xf32> to vector<8x32xf32>
    %518 = arith.subf %501, %517 : vector<8x32xf32>
    %cst_208 = arith.constant 9.99999974E-6 : f32
    %519 = vector.broadcast %cst_208 : f32 to vector<8x1xf32>
    %520 = arith.addf %516, %519 : vector<8x1xf32>
    %521 = math.rsqrt %520 : vector<8x1xf32>
    %522 = vector.broadcast %521 : vector<8x1xf32> to vector<8x32xf32>
    %523 = arith.mulf %518, %522 : vector<8x32xf32>
    %524 = vector.broadcast %503 : vector<1x32xf32> to vector<8x32xf32>
    %525 = arith.mulf %523, %524 : vector<8x32xf32>
    %526 = vector.broadcast %505 : vector<1x32xf32> to vector<8x32xf32>
    %527 = arith.addf %525, %526 : vector<8x32xf32>
    %c1 = arith.constant 1 : index
    %c0_209 = arith.constant 0 : index
    %c0_210 = arith.constant 0 : index
    %c0_211 = arith.constant 0 : index
    %528 = vector.load %arg6[%c1, %c0_209, %c0_210, %c0_211] : memref<2x4x32x8xbf16, #tpu.memory_space<vmem>>, vector<1x4x32x8xbf16>
    %529 = vector.shape_cast %528 : vector<1x4x32x8xbf16> to vector<4x32x8xbf16>
    %c1_212 = arith.constant 1 : index
    %c0_213 = arith.constant 0 : index
    %c0_214 = arith.constant 0 : index
    %c0_215 = arith.constant 0 : index
    %530 = vector.load %arg7[%c1_212, %c0_213, %c0_214, %c0_215] : memref<2x4x1x8xf32, #tpu.memory_space<vmem>>, vector<1x4x1x8xf32>
    %531 = vector.shape_cast %530 : vector<1x4x1x8xf32> to vector<4x1x8xf32>
    %c1_216 = arith.constant 1 : index
    %c0_217 = arith.constant 0 : index
    %c0_218 = arith.constant 0 : index
    %c0_219 = arith.constant 0 : index
    %532 = vector.load %arg8[%c1_216, %c0_217, %c0_218, %c0_219] : memref<2x4x32x8xbf16, #tpu.memory_space<vmem>>, vector<1x4x32x8xbf16>
    %533 = vector.shape_cast %532 : vector<1x4x32x8xbf16> to vector<4x32x8xbf16>
    %c1_220 = arith.constant 1 : index
    %c0_221 = arith.constant 0 : index
    %c0_222 = arith.constant 0 : index
    %c0_223 = arith.constant 0 : index
    %534 = vector.load %arg9[%c1_220, %c0_221, %c0_222, %c0_223] : memref<2x4x1x8xf32, #tpu.memory_space<vmem>>, vector<1x4x1x8xf32>
    %535 = vector.shape_cast %534 : vector<1x4x1x8xf32> to vector<4x1x8xf32>
    %c1_224 = arith.constant 1 : index
    %c0_225 = arith.constant 0 : index
    %c0_226 = arith.constant 0 : index
    %c0_227 = arith.constant 0 : index
    %536 = vector.load %arg10[%c1_224, %c0_225, %c0_226, %c0_227] : memref<2x4x32x8xbf16, #tpu.memory_space<vmem>>, vector<1x4x32x8xbf16>
    %537 = vector.shape_cast %536 : vector<1x4x32x8xbf16> to vector<4x32x8xbf16>
    %c1_228 = arith.constant 1 : index
    %c0_229 = arith.constant 0 : index
    %c0_230 = arith.constant 0 : index
    %c0_231 = arith.constant 0 : index
    %538 = vector.load %arg11[%c1_228, %c0_229, %c0_230, %c0_231] : memref<2x4x1x8xf32, #tpu.memory_space<vmem>>, vector<1x4x1x8xf32>
    %539 = vector.shape_cast %538 : vector<1x4x1x8xf32> to vector<4x1x8xf32>
    %c1_232 = arith.constant 1 : index
    %c0_233 = arith.constant 0 : index
    %c0_234 = arith.constant 0 : index
    %c0_235 = arith.constant 0 : index
    %540 = vector.load %arg12[%c1_232, %c0_233, %c0_234, %c0_235] : memref<2x4x8x32xbf16, #tpu.memory_space<vmem>>, vector<1x4x8x32xbf16>
    %541 = vector.shape_cast %540 : vector<1x4x8x32xbf16> to vector<4x8x32xbf16>
    %c1_236 = arith.constant 1 : index
    %c0_237 = arith.constant 0 : index
    %c0_238 = arith.constant 0 : index
    %542 = vector.load %arg13[%c1_236, %c0_237, %c0_238] : memref<2x1x32xf32, #tpu.memory_space<vmem>>, vector<1x1x32xf32>
    %543 = vector.shape_cast %542 : vector<1x1x32xf32> to vector<1x32xf32>
    %544 = arith.truncf %527 : vector<8x32xf32> to vector<8x32xbf16>
    %545 = arith.truncf %527 : vector<8x32xf32> to vector<8x32xbf16>
    %546 = vector.extract_strided_slice %529 {offsets = [0, 0, 0], sizes = [1, 32, 8], strides = [1, 1, 1]} : vector<4x32x8xbf16> to vector<1x32x8xbf16>
    %547 = vector.shape_cast %546 : vector<1x32x8xbf16> to vector<32x8xbf16>
    %cst_239 = arith.constant dense<0.000000e+00> : vector<8x8xf32>
    %548 = tpu.matmul %544, %547, %cst_239 {dimension_numbers = #tpu.dot_dimension_numbers<[1], [0], [0], [1], [0, 0, 1, 1], [], []>} : vector<8x32xbf16>, vector<32x8xbf16>, vector<8x8xf32> -> vector<8x8xf32>
    %549 = vector.extract_strided_slice %531 {offsets = [0, 0, 0], sizes = [1, 1, 8], strides = [1, 1, 1]} : vector<4x1x8xf32> to vector<1x1x8xf32>
    %550 = vector.shape_cast %549 : vector<1x1x8xf32> to vector<1x8xf32>
    %551 = vector.broadcast %550 : vector<1x8xf32> to vector<8x8xf32>
    %552 = arith.addf %548, %551 : vector<8x8xf32>
    %553 = vector.extract_strided_slice %533 {offsets = [0, 0, 0], sizes = [1, 32, 8], strides = [1, 1, 1]} : vector<4x32x8xbf16> to vector<1x32x8xbf16>
    %554 = vector.shape_cast %553 : vector<1x32x8xbf16> to vector<32x8xbf16>
    %cst_240 = arith.constant dense<0.000000e+00> : vector<8x8xf32>
    %555 = tpu.matmul %545, %554, %cst_240 {dimension_numbers = #tpu.dot_dimension_numbers<[1], [0], [0], [1], [0, 0, 1, 1], [], []>} : vector<8x32xbf16>, vector<32x8xbf16>, vector<8x8xf32> -> vector<8x8xf32>
    %556 = vector.extract_strided_slice %535 {offsets = [0, 0, 0], sizes = [1, 1, 8], strides = [1, 1, 1]} : vector<4x1x8xf32> to vector<1x1x8xf32>
    %557 = vector.shape_cast %556 : vector<1x1x8xf32> to vector<1x8xf32>
    %558 = vector.broadcast %557 : vector<1x8xf32> to vector<8x8xf32>
    %559 = arith.addf %555, %558 : vector<8x8xf32>
    %560 = vector.extract_strided_slice %537 {offsets = [0, 0, 0], sizes = [1, 32, 8], strides = [1, 1, 1]} : vector<4x32x8xbf16> to vector<1x32x8xbf16>
    %561 = vector.shape_cast %560 : vector<1x32x8xbf16> to vector<32x8xbf16>
    %cst_241 = arith.constant dense<0.000000e+00> : vector<8x8xf32>
    %562 = tpu.matmul %545, %561, %cst_241 {dimension_numbers = #tpu.dot_dimension_numbers<[1], [0], [0], [1], [0, 0, 1, 1], [], []>} : vector<8x32xbf16>, vector<32x8xbf16>, vector<8x8xf32> -> vector<8x8xf32>
    %563 = vector.extract_strided_slice %539 {offsets = [0, 0, 0], sizes = [1, 1, 8], strides = [1, 1, 1]} : vector<4x1x8xf32> to vector<1x1x8xf32>
    %564 = vector.shape_cast %563 : vector<1x1x8xf32> to vector<1x8xf32>
    %565 = vector.broadcast %564 : vector<1x8xf32> to vector<8x8xf32>
    %566 = arith.addf %562, %565 : vector<8x8xf32>
    %567 = arith.truncf %552 : vector<8x8xf32> to vector<8x8xbf16>
    %568 = arith.truncf %559 : vector<8x8xf32> to vector<8x8xbf16>
    "tpu.trace_start"() <{level = 10 : i32, message = "qe,ke->qk"}> : () -> ()
    %cst_242 = arith.constant dense<0.000000e+00> : vector<8x8xf32>
    %569 = tpu.matmul %567, %568, %cst_242 {dimension_numbers = #tpu.dot_dimension_numbers<[1], [1], [0], [0], [0, 0, 1, 0], [], []>} : vector<8x8xbf16>, vector<8x8xbf16>, vector<8x8xf32> -> vector<8x8xf32>
    "tpu.trace_stop"() : () -> ()
    %cst_243 = arith.constant 0.353553385 : f32
    %570 = vector.broadcast %cst_243 : f32 to vector<8x8xf32>
    %571 = arith.mulf %569, %570 : vector<8x8xf32>
    %cst_244 = arith.constant -1.000000e+30 : f32
    %572 = vector.broadcast %cst_244 : f32 to vector<8x8xf32>
    %573 = arith.select %14, %571, %572 : vector<8x8xi1>, vector<8x8xf32>
    %cst_245 = arith.constant dense<0xFF800000> : vector<8xf32>
    %574 = vector.multi_reduction <maximumf>, %573, %cst_245 [1] : vector<8x8xf32> to vector<8xf32>
    %575 = vector.shape_cast %574 : vector<8xf32> to vector<8x1xf32>
    %576 = vector.broadcast %575 : vector<8x1xf32> to vector<8x8xf32>
    %577 = arith.subf %573, %576 : vector<8x8xf32>
    %578 = math.exp %577 : vector<8x8xf32>
    %cst_246 = arith.constant dense<0.000000e+00> : vector<8xf32>
    %579 = vector.multi_reduction <add>, %578, %cst_246 [1] : vector<8x8xf32> to vector<8xf32>
    %580 = vector.shape_cast %579 : vector<8xf32> to vector<8x1xf32>
    %cst_247 = arith.constant 1.000000e+00 : f32
    %581 = vector.broadcast %cst_247 : f32 to vector<8x1xf32>
    %582 = arith.divf %581, %580 : vector<8x1xf32>
    %583 = vector.broadcast %582 : vector<8x1xf32> to vector<8x8xf32>
    %584 = arith.mulf %578, %583 : vector<8x8xf32>
    %585 = arith.truncf %584 : vector<8x8xf32> to vector<8x8xbf16>
    %586 = arith.truncf %566 : vector<8x8xf32> to vector<8x8xbf16>
    %cst_248 = arith.constant dense<0.000000e+00> : vector<8x8xf32>
    %587 = tpu.matmul %585, %586, %cst_248 {dimension_numbers = #tpu.dot_dimension_numbers<[1], [0], [0], [1], [0, 0, 1, 1], [], []>} : vector<8x8xbf16>, vector<8x8xbf16>, vector<8x8xf32> -> vector<8x8xf32>
    %588 = arith.truncf %587 : vector<8x8xf32> to vector<8x8xbf16>
    %589 = vector.extract_strided_slice %541 {offsets = [0, 0, 0], sizes = [1, 8, 32], strides = [1, 1, 1]} : vector<4x8x32xbf16> to vector<1x8x32xbf16>
    %590 = vector.shape_cast %589 : vector<1x8x32xbf16> to vector<8x32xbf16>
    %cst_249 = arith.constant dense<0.000000e+00> : vector<8x32xf32>
    %591 = tpu.matmul %588, %590, %cst_249 {dimension_numbers = #tpu.dot_dimension_numbers<[1], [0], [0], [1], [0, 0, 1, 1], [], []>} : vector<8x8xbf16>, vector<8x32xbf16>, vector<8x32xf32> -> vector<8x32xf32>
    %592 = vector.extract_strided_slice %529 {offsets = [1, 0, 0], sizes = [1, 32, 8], strides = [1, 1, 1]} : vector<4x32x8xbf16> to vector<1x32x8xbf16>
    %593 = vector.shape_cast %592 : vector<1x32x8xbf16> to vector<32x8xbf16>
    %cst_250 = arith.constant dense<0.000000e+00> : vector<8x8xf32>
    %594 = tpu.matmul %544, %593, %cst_250 {dimension_numbers = #tpu.dot_dimension_numbers<[1], [0], [0], [1], [0, 0, 1, 1], [], []>} : vector<8x32xbf16>, vector<32x8xbf16>, vector<8x8xf32> -> vector<8x8xf32>
    %595 = vector.extract_strided_slice %531 {offsets = [1, 0, 0], sizes = [1, 1, 8], strides = [1, 1, 1]} : vector<4x1x8xf32> to vector<1x1x8xf32>
    %596 = vector.shape_cast %595 : vector<1x1x8xf32> to vector<1x8xf32>
    %597 = vector.broadcast %596 : vector<1x8xf32> to vector<8x8xf32>
    %598 = arith.addf %594, %597 : vector<8x8xf32>
    %599 = vector.extract_strided_slice %533 {offsets = [1, 0, 0], sizes = [1, 32, 8], strides = [1, 1, 1]} : vector<4x32x8xbf16> to vector<1x32x8xbf16>
    %600 = vector.shape_cast %599 : vector<1x32x8xbf16> to vector<32x8xbf16>
    %cst_251 = arith.constant dense<0.000000e+00> : vector<8x8xf32>
    %601 = tpu.matmul %545, %600, %cst_251 {dimension_numbers = #tpu.dot_dimension_numbers<[1], [0], [0], [1], [0, 0, 1, 1], [], []>} : vector<8x32xbf16>, vector<32x8xbf16>, vector<8x8xf32> -> vector<8x8xf32>
    %602 = vector.extract_strided_slice %535 {offsets = [1, 0, 0], sizes = [1, 1, 8], strides = [1, 1, 1]} : vector<4x1x8xf32> to vector<1x1x8xf32>
    %603 = vector.shape_cast %602 : vector<1x1x8xf32> to vector<1x8xf32>
    %604 = vector.broadcast %603 : vector<1x8xf32> to vector<8x8xf32>
    %605 = arith.addf %601, %604 : vector<8x8xf32>
    %606 = vector.extract_strided_slice %537 {offsets = [1, 0, 0], sizes = [1, 32, 8], strides = [1, 1, 1]} : vector<4x32x8xbf16> to vector<1x32x8xbf16>
    %607 = vector.shape_cast %606 : vector<1x32x8xbf16> to vector<32x8xbf16>
    %cst_252 = arith.constant dense<0.000000e+00> : vector<8x8xf32>
    %608 = tpu.matmul %545, %607, %cst_252 {dimension_numbers = #tpu.dot_dimension_numbers<[1], [0], [0], [1], [0, 0, 1, 1], [], []>} : vector<8x32xbf16>, vector<32x8xbf16>, vector<8x8xf32> -> vector<8x8xf32>
    %609 = vector.extract_strided_slice %539 {offsets = [1, 0, 0], sizes = [1, 1, 8], strides = [1, 1, 1]} : vector<4x1x8xf32> to vector<1x1x8xf32>
    %610 = vector.shape_cast %609 : vector<1x1x8xf32> to vector<1x8xf32>
    %611 = vector.broadcast %610 : vector<1x8xf32> to vector<8x8xf32>
    %612 = arith.addf %608, %611 : vector<8x8xf32>
    %613 = arith.truncf %598 : vector<8x8xf32> to vector<8x8xbf16>
    %614 = arith.truncf %605 : vector<8x8xf32> to vector<8x8xbf16>
    "tpu.trace_start"() <{level = 10 : i32, message = "qe,ke->qk"}> : () -> ()
    %cst_253 = arith.constant dense<0.000000e+00> : vector<8x8xf32>
    %615 = tpu.matmul %613, %614, %cst_253 {dimension_numbers = #tpu.dot_dimension_numbers<[1], [1], [0], [0], [0, 0, 1, 0], [], []>} : vector<8x8xbf16>, vector<8x8xbf16>, vector<8x8xf32> -> vector<8x8xf32>
    "tpu.trace_stop"() : () -> ()
    %cst_254 = arith.constant 0.353553385 : f32
    %616 = vector.broadcast %cst_254 : f32 to vector<8x8xf32>
    %617 = arith.mulf %615, %616 : vector<8x8xf32>
    %cst_255 = arith.constant -1.000000e+30 : f32
    %618 = vector.broadcast %cst_255 : f32 to vector<8x8xf32>
    %619 = arith.select %14, %617, %618 : vector<8x8xi1>, vector<8x8xf32>
    %cst_256 = arith.constant dense<0xFF800000> : vector<8xf32>
    %620 = vector.multi_reduction <maximumf>, %619, %cst_256 [1] : vector<8x8xf32> to vector<8xf32>
    %621 = vector.shape_cast %620 : vector<8xf32> to vector<8x1xf32>
    %622 = vector.broadcast %621 : vector<8x1xf32> to vector<8x8xf32>
    %623 = arith.subf %619, %622 : vector<8x8xf32>
    %624 = math.exp %623 : vector<8x8xf32>
    %cst_257 = arith.constant dense<0.000000e+00> : vector<8xf32>
    %625 = vector.multi_reduction <add>, %624, %cst_257 [1] : vector<8x8xf32> to vector<8xf32>
    %626 = vector.shape_cast %625 : vector<8xf32> to vector<8x1xf32>
    %cst_258 = arith.constant 1.000000e+00 : f32
    %627 = vector.broadcast %cst_258 : f32 to vector<8x1xf32>
    %628 = arith.divf %627, %626 : vector<8x1xf32>
    %629 = vector.broadcast %628 : vector<8x1xf32> to vector<8x8xf32>
    %630 = arith.mulf %624, %629 : vector<8x8xf32>
    %631 = arith.truncf %630 : vector<8x8xf32> to vector<8x8xbf16>
    %632 = arith.truncf %612 : vector<8x8xf32> to vector<8x8xbf16>
    %cst_259 = arith.constant dense<0.000000e+00> : vector<8x8xf32>
    %633 = tpu.matmul %631, %632, %cst_259 {dimension_numbers = #tpu.dot_dimension_numbers<[1], [0], [0], [1], [0, 0, 1, 1], [], []>} : vector<8x8xbf16>, vector<8x8xbf16>, vector<8x8xf32> -> vector<8x8xf32>
    %634 = arith.truncf %633 : vector<8x8xf32> to vector<8x8xbf16>
    %635 = vector.extract_strided_slice %541 {offsets = [1, 0, 0], sizes = [1, 8, 32], strides = [1, 1, 1]} : vector<4x8x32xbf16> to vector<1x8x32xbf16>
    %636 = vector.shape_cast %635 : vector<1x8x32xbf16> to vector<8x32xbf16>
    %cst_260 = arith.constant dense<0.000000e+00> : vector<8x32xf32>
    %637 = tpu.matmul %634, %636, %cst_260 {dimension_numbers = #tpu.dot_dimension_numbers<[1], [0], [0], [1], [0, 0, 1, 1], [], []>} : vector<8x8xbf16>, vector<8x32xbf16>, vector<8x32xf32> -> vector<8x32xf32>
    %638 = arith.addf %591, %637 : vector<8x32xf32>
    %639 = vector.extract_strided_slice %529 {offsets = [2, 0, 0], sizes = [1, 32, 8], strides = [1, 1, 1]} : vector<4x32x8xbf16> to vector<1x32x8xbf16>
    %640 = vector.shape_cast %639 : vector<1x32x8xbf16> to vector<32x8xbf16>
    %cst_261 = arith.constant dense<0.000000e+00> : vector<8x8xf32>
    %641 = tpu.matmul %544, %640, %cst_261 {dimension_numbers = #tpu.dot_dimension_numbers<[1], [0], [0], [1], [0, 0, 1, 1], [], []>} : vector<8x32xbf16>, vector<32x8xbf16>, vector<8x8xf32> -> vector<8x8xf32>
    %642 = vector.extract_strided_slice %531 {offsets = [2, 0, 0], sizes = [1, 1, 8], strides = [1, 1, 1]} : vector<4x1x8xf32> to vector<1x1x8xf32>
    %643 = vector.shape_cast %642 : vector<1x1x8xf32> to vector<1x8xf32>
    %644 = vector.broadcast %643 : vector<1x8xf32> to vector<8x8xf32>
    %645 = arith.addf %641, %644 : vector<8x8xf32>
    %646 = vector.extract_strided_slice %533 {offsets = [2, 0, 0], sizes = [1, 32, 8], strides = [1, 1, 1]} : vector<4x32x8xbf16> to vector<1x32x8xbf16>
    %647 = vector.shape_cast %646 : vector<1x32x8xbf16> to vector<32x8xbf16>
    %cst_262 = arith.constant dense<0.000000e+00> : vector<8x8xf32>
    %648 = tpu.matmul %545, %647, %cst_262 {dimension_numbers = #tpu.dot_dimension_numbers<[1], [0], [0], [1], [0, 0, 1, 1], [], []>} : vector<8x32xbf16>, vector<32x8xbf16>, vector<8x8xf32> -> vector<8x8xf32>
    %649 = vector.extract_strided_slice %535 {offsets = [2, 0, 0], sizes = [1, 1, 8], strides = [1, 1, 1]} : vector<4x1x8xf32> to vector<1x1x8xf32>
    %650 = vector.shape_cast %649 : vector<1x1x8xf32> to vector<1x8xf32>
    %651 = vector.broadcast %650 : vector<1x8xf32> to vector<8x8xf32>
    %652 = arith.addf %648, %651 : vector<8x8xf32>
    %653 = vector.extract_strided_slice %537 {offsets = [2, 0, 0], sizes = [1, 32, 8], strides = [1, 1, 1]} : vector<4x32x8xbf16> to vector<1x32x8xbf16>
    %654 = vector.shape_cast %653 : vector<1x32x8xbf16> to vector<32x8xbf16>
    %cst_263 = arith.constant dense<0.000000e+00> : vector<8x8xf32>
    %655 = tpu.matmul %545, %654, %cst_263 {dimension_numbers = #tpu.dot_dimension_numbers<[1], [0], [0], [1], [0, 0, 1, 1], [], []>} : vector<8x32xbf16>, vector<32x8xbf16>, vector<8x8xf32> -> vector<8x8xf32>
    %656 = vector.extract_strided_slice %539 {offsets = [2, 0, 0], sizes = [1, 1, 8], strides = [1, 1, 1]} : vector<4x1x8xf32> to vector<1x1x8xf32>
    %657 = vector.shape_cast %656 : vector<1x1x8xf32> to vector<1x8xf32>
    %658 = vector.broadcast %657 : vector<1x8xf32> to vector<8x8xf32>
    %659 = arith.addf %655, %658 : vector<8x8xf32>
    %660 = arith.truncf %645 : vector<8x8xf32> to vector<8x8xbf16>
    %661 = arith.truncf %652 : vector<8x8xf32> to vector<8x8xbf16>
    "tpu.trace_start"() <{level = 10 : i32, message = "qe,ke->qk"}> : () -> ()
    %cst_264 = arith.constant dense<0.000000e+00> : vector<8x8xf32>
    %662 = tpu.matmul %660, %661, %cst_264 {dimension_numbers = #tpu.dot_dimension_numbers<[1], [1], [0], [0], [0, 0, 1, 0], [], []>} : vector<8x8xbf16>, vector<8x8xbf16>, vector<8x8xf32> -> vector<8x8xf32>
    "tpu.trace_stop"() : () -> ()
    %cst_265 = arith.constant 0.353553385 : f32
    %663 = vector.broadcast %cst_265 : f32 to vector<8x8xf32>
    %664 = arith.mulf %662, %663 : vector<8x8xf32>
    %cst_266 = arith.constant -1.000000e+30 : f32
    %665 = vector.broadcast %cst_266 : f32 to vector<8x8xf32>
    %666 = arith.select %14, %664, %665 : vector<8x8xi1>, vector<8x8xf32>
    %cst_267 = arith.constant dense<0xFF800000> : vector<8xf32>
    %667 = vector.multi_reduction <maximumf>, %666, %cst_267 [1] : vector<8x8xf32> to vector<8xf32>
    %668 = vector.shape_cast %667 : vector<8xf32> to vector<8x1xf32>
    %669 = vector.broadcast %668 : vector<8x1xf32> to vector<8x8xf32>
    %670 = arith.subf %666, %669 : vector<8x8xf32>
    %671 = math.exp %670 : vector<8x8xf32>
    %cst_268 = arith.constant dense<0.000000e+00> : vector<8xf32>
    %672 = vector.multi_reduction <add>, %671, %cst_268 [1] : vector<8x8xf32> to vector<8xf32>
    %673 = vector.shape_cast %672 : vector<8xf32> to vector<8x1xf32>
    %cst_269 = arith.constant 1.000000e+00 : f32
    %674 = vector.broadcast %cst_269 : f32 to vector<8x1xf32>
    %675 = arith.divf %674, %673 : vector<8x1xf32>
    %676 = vector.broadcast %675 : vector<8x1xf32> to vector<8x8xf32>
    %677 = arith.mulf %671, %676 : vector<8x8xf32>
    %678 = arith.truncf %677 : vector<8x8xf32> to vector<8x8xbf16>
    %679 = arith.truncf %659 : vector<8x8xf32> to vector<8x8xbf16>
    %cst_270 = arith.constant dense<0.000000e+00> : vector<8x8xf32>
    %680 = tpu.matmul %678, %679, %cst_270 {dimension_numbers = #tpu.dot_dimension_numbers<[1], [0], [0], [1], [0, 0, 1, 1], [], []>} : vector<8x8xbf16>, vector<8x8xbf16>, vector<8x8xf32> -> vector<8x8xf32>
    %681 = arith.truncf %680 : vector<8x8xf32> to vector<8x8xbf16>
    %682 = vector.extract_strided_slice %541 {offsets = [2, 0, 0], sizes = [1, 8, 32], strides = [1, 1, 1]} : vector<4x8x32xbf16> to vector<1x8x32xbf16>
    %683 = vector.shape_cast %682 : vector<1x8x32xbf16> to vector<8x32xbf16>
    %cst_271 = arith.constant dense<0.000000e+00> : vector<8x32xf32>
    %684 = tpu.matmul %681, %683, %cst_271 {dimension_numbers = #tpu.dot_dimension_numbers<[1], [0], [0], [1], [0, 0, 1, 1], [], []>} : vector<8x8xbf16>, vector<8x32xbf16>, vector<8x32xf32> -> vector<8x32xf32>
    %685 = arith.addf %638, %684 : vector<8x32xf32>
    %686 = vector.extract_strided_slice %529 {offsets = [3, 0, 0], sizes = [1, 32, 8], strides = [1, 1, 1]} : vector<4x32x8xbf16> to vector<1x32x8xbf16>
    %687 = vector.shape_cast %686 : vector<1x32x8xbf16> to vector<32x8xbf16>
    %cst_272 = arith.constant dense<0.000000e+00> : vector<8x8xf32>
    %688 = tpu.matmul %544, %687, %cst_272 {dimension_numbers = #tpu.dot_dimension_numbers<[1], [0], [0], [1], [0, 0, 1, 1], [], []>} : vector<8x32xbf16>, vector<32x8xbf16>, vector<8x8xf32> -> vector<8x8xf32>
    %689 = vector.extract_strided_slice %531 {offsets = [3, 0, 0], sizes = [1, 1, 8], strides = [1, 1, 1]} : vector<4x1x8xf32> to vector<1x1x8xf32>
    %690 = vector.shape_cast %689 : vector<1x1x8xf32> to vector<1x8xf32>
    %691 = vector.broadcast %690 : vector<1x8xf32> to vector<8x8xf32>
    %692 = arith.addf %688, %691 : vector<8x8xf32>
    %693 = vector.extract_strided_slice %533 {offsets = [3, 0, 0], sizes = [1, 32, 8], strides = [1, 1, 1]} : vector<4x32x8xbf16> to vector<1x32x8xbf16>
    %694 = vector.shape_cast %693 : vector<1x32x8xbf16> to vector<32x8xbf16>
    %cst_273 = arith.constant dense<0.000000e+00> : vector<8x8xf32>
    %695 = tpu.matmul %545, %694, %cst_273 {dimension_numbers = #tpu.dot_dimension_numbers<[1], [0], [0], [1], [0, 0, 1, 1], [], []>} : vector<8x32xbf16>, vector<32x8xbf16>, vector<8x8xf32> -> vector<8x8xf32>
    %696 = vector.extract_strided_slice %535 {offsets = [3, 0, 0], sizes = [1, 1, 8], strides = [1, 1, 1]} : vector<4x1x8xf32> to vector<1x1x8xf32>
    %697 = vector.shape_cast %696 : vector<1x1x8xf32> to vector<1x8xf32>
    %698 = vector.broadcast %697 : vector<1x8xf32> to vector<8x8xf32>
    %699 = arith.addf %695, %698 : vector<8x8xf32>
    %700 = vector.extract_strided_slice %537 {offsets = [3, 0, 0], sizes = [1, 32, 8], strides = [1, 1, 1]} : vector<4x32x8xbf16> to vector<1x32x8xbf16>
    %701 = vector.shape_cast %700 : vector<1x32x8xbf16> to vector<32x8xbf16>
    %cst_274 = arith.constant dense<0.000000e+00> : vector<8x8xf32>
    %702 = tpu.matmul %545, %701, %cst_274 {dimension_numbers = #tpu.dot_dimension_numbers<[1], [0], [0], [1], [0, 0, 1, 1], [], []>} : vector<8x32xbf16>, vector<32x8xbf16>, vector<8x8xf32> -> vector<8x8xf32>
    %703 = vector.extract_strided_slice %539 {offsets = [3, 0, 0], sizes = [1, 1, 8], strides = [1, 1, 1]} : vector<4x1x8xf32> to vector<1x1x8xf32>
    %704 = vector.shape_cast %703 : vector<1x1x8xf32> to vector<1x8xf32>
    %705 = vector.broadcast %704 : vector<1x8xf32> to vector<8x8xf32>
    %706 = arith.addf %702, %705 : vector<8x8xf32>
    %707 = arith.truncf %692 : vector<8x8xf32> to vector<8x8xbf16>
    %708 = arith.truncf %699 : vector<8x8xf32> to vector<8x8xbf16>
    "tpu.trace_start"() <{level = 10 : i32, message = "qe,ke->qk"}> : () -> ()
    %cst_275 = arith.constant dense<0.000000e+00> : vector<8x8xf32>
    %709 = tpu.matmul %707, %708, %cst_275 {dimension_numbers = #tpu.dot_dimension_numbers<[1], [1], [0], [0], [0, 0, 1, 0], [], []>} : vector<8x8xbf16>, vector<8x8xbf16>, vector<8x8xf32> -> vector<8x8xf32>
    "tpu.trace_stop"() : () -> ()
    %cst_276 = arith.constant 0.353553385 : f32
    %710 = vector.broadcast %cst_276 : f32 to vector<8x8xf32>
    %711 = arith.mulf %709, %710 : vector<8x8xf32>
    %cst_277 = arith.constant -1.000000e+30 : f32
    %712 = vector.broadcast %cst_277 : f32 to vector<8x8xf32>
    %713 = arith.select %14, %711, %712 : vector<8x8xi1>, vector<8x8xf32>
    %cst_278 = arith.constant dense<0xFF800000> : vector<8xf32>
    %714 = vector.multi_reduction <maximumf>, %713, %cst_278 [1] : vector<8x8xf32> to vector<8xf32>
    %715 = vector.shape_cast %714 : vector<8xf32> to vector<8x1xf32>
    %716 = vector.broadcast %715 : vector<8x1xf32> to vector<8x8xf32>
    %717 = arith.subf %713, %716 : vector<8x8xf32>
    %718 = math.exp %717 : vector<8x8xf32>
    %cst_279 = arith.constant dense<0.000000e+00> : vector<8xf32>
    %719 = vector.multi_reduction <add>, %718, %cst_279 [1] : vector<8x8xf32> to vector<8xf32>
    %720 = vector.shape_cast %719 : vector<8xf32> to vector<8x1xf32>
    %cst_280 = arith.constant 1.000000e+00 : f32
    %721 = vector.broadcast %cst_280 : f32 to vector<8x1xf32>
    %722 = arith.divf %721, %720 : vector<8x1xf32>
    %723 = vector.broadcast %722 : vector<8x1xf32> to vector<8x8xf32>
    %724 = arith.mulf %718, %723 : vector<8x8xf32>
    %725 = arith.truncf %724 : vector<8x8xf32> to vector<8x8xbf16>
    %726 = arith.truncf %706 : vector<8x8xf32> to vector<8x8xbf16>
    %cst_281 = arith.constant dense<0.000000e+00> : vector<8x8xf32>
    %727 = tpu.matmul %725, %726, %cst_281 {dimension_numbers = #tpu.dot_dimension_numbers<[1], [0], [0], [1], [0, 0, 1, 1], [], []>} : vector<8x8xbf16>, vector<8x8xbf16>, vector<8x8xf32> -> vector<8x8xf32>
    %728 = arith.truncf %727 : vector<8x8xf32> to vector<8x8xbf16>
    %729 = vector.extract_strided_slice %541 {offsets = [3, 0, 0], sizes = [1, 8, 32], strides = [1, 1, 1]} : vector<4x8x32xbf16> to vector<1x8x32xbf16>
    %730 = vector.shape_cast %729 : vector<1x8x32xbf16> to vector<8x32xbf16>
    %cst_282 = arith.constant dense<0.000000e+00> : vector<8x32xf32>
    %731 = tpu.matmul %728, %730, %cst_282 {dimension_numbers = #tpu.dot_dimension_numbers<[1], [0], [0], [1], [0, 0, 1, 1], [], []>} : vector<8x8xbf16>, vector<8x32xbf16>, vector<8x32xf32> -> vector<8x32xf32>
    %732 = arith.addf %685, %731 : vector<8x32xf32>
    %733 = vector.broadcast %543 : vector<1x32xf32> to vector<8x32xf32>
    %734 = arith.addf %732, %733 : vector<8x32xf32>
    %735 = arith.addf %734, %527 : vector<8x32xf32>
    %c1_283 = arith.constant 1 : index
    %c0_284 = arith.constant 0 : index
    %c0_285 = arith.constant 0 : index
    %736 = vector.load %arg14[%c1_283, %c0_284, %c0_285] : memref<2x1x32xf32, #tpu.memory_space<vmem>>, vector<1x1x32xf32>
    %737 = vector.shape_cast %736 : vector<1x1x32xf32> to vector<1x32xf32>
    %c1_286 = arith.constant 1 : index
    %c0_287 = arith.constant 0 : index
    %c0_288 = arith.constant 0 : index
    %738 = vector.load %arg15[%c1_286, %c0_287, %c0_288] : memref<2x1x32xf32, #tpu.memory_space<vmem>>, vector<1x1x32xf32>
    %739 = vector.shape_cast %738 : vector<1x1x32xf32> to vector<1x32xf32>
    %cst_289 = arith.constant dense<0.000000e+00> : vector<8xf32>
    %740 = vector.multi_reduction <add>, %735, %cst_289 [1] : vector<8x32xf32> to vector<8xf32>
    %741 = vector.shape_cast %740 : vector<8xf32> to vector<8x1xf32>
    %cst_290 = arith.constant 3.200000e+01 : f32
    %742 = vector.broadcast %cst_290 : f32 to vector<8x1xf32>
    %743 = arith.divf %741, %742 : vector<8x1xf32>
    %744 = vector.broadcast %743 : vector<8x1xf32> to vector<8x32xf32>
    %745 = arith.subf %735, %744 : vector<8x32xf32>
    %746 = arith.mulf %745, %745 : vector<8x32xf32>
    %cst_291 = arith.constant dense<0.000000e+00> : vector<8xf32>
    %747 = vector.multi_reduction <add>, %746, %cst_291 [1] : vector<8x32xf32> to vector<8xf32>
    %748 = vector.shape_cast %747 : vector<8xf32> to vector<8x1xf32>
    %cst_292 = arith.constant 3.200000e+01 : f32
    %749 = vector.broadcast %cst_292 : f32 to vector<8x1xf32>
    %750 = arith.divf %748, %749 : vector<8x1xf32>
    %751 = vector.broadcast %743 : vector<8x1xf32> to vector<8x32xf32>
    %752 = arith.subf %735, %751 : vector<8x32xf32>
    %cst_293 = arith.constant 9.99999974E-6 : f32
    %753 = vector.broadcast %cst_293 : f32 to vector<8x1xf32>
    %754 = arith.addf %750, %753 : vector<8x1xf32>
    %755 = math.rsqrt %754 : vector<8x1xf32>
    %756 = vector.broadcast %755 : vector<8x1xf32> to vector<8x32xf32>
    %757 = arith.mulf %752, %756 : vector<8x32xf32>
    %758 = vector.broadcast %737 : vector<1x32xf32> to vector<8x32xf32>
    %759 = arith.mulf %757, %758 : vector<8x32xf32>
    %760 = vector.broadcast %739 : vector<1x32xf32> to vector<8x32xf32>
    %761 = arith.addf %759, %760 : vector<8x32xf32>
    %c1_294 = arith.constant 1 : index
    %c0_295 = arith.constant 0 : index
    %c0_296 = arith.constant 0 : index
    %c0_297 = arith.constant 0 : index
    %762 = vector.load %arg16[%c1_294, %c0_295, %c0_296, %c0_297] : memref<2x4x32x8xbf16, #tpu.memory_space<vmem>>, vector<1x4x32x8xbf16>
    %763 = vector.shape_cast %762 : vector<1x4x32x8xbf16> to vector<4x32x8xbf16>
    %c1_298 = arith.constant 1 : index
    %c0_299 = arith.constant 0 : index
    %c0_300 = arith.constant 0 : index
    %c0_301 = arith.constant 0 : index
    %764 = vector.load %arg17[%c1_298, %c0_299, %c0_300, %c0_301] : memref<2x4x1x8xf32, #tpu.memory_space<vmem>>, vector<1x4x1x8xf32>
    %765 = vector.shape_cast %764 : vector<1x4x1x8xf32> to vector<4x1x8xf32>
    %c1_302 = arith.constant 1 : index
    %c0_303 = arith.constant 0 : index
    %c0_304 = arith.constant 0 : index
    %c0_305 = arith.constant 0 : index
    %766 = vector.load %arg18[%c1_302, %c0_303, %c0_304, %c0_305] : memref<2x4x32x8xbf16, #tpu.memory_space<vmem>>, vector<1x4x32x8xbf16>
    %767 = vector.shape_cast %766 : vector<1x4x32x8xbf16> to vector<4x32x8xbf16>
    %c1_306 = arith.constant 1 : index
    %c0_307 = arith.constant 0 : index
    %c0_308 = arith.constant 0 : index
    %c0_309 = arith.constant 0 : index
    %768 = vector.load %arg19[%c1_306, %c0_307, %c0_308, %c0_309] : memref<2x4x1x8xf32, #tpu.memory_space<vmem>>, vector<1x4x1x8xf32>
    %769 = vector.shape_cast %768 : vector<1x4x1x8xf32> to vector<4x1x8xf32>
    %c1_310 = arith.constant 1 : index
    %c0_311 = arith.constant 0 : index
    %c0_312 = arith.constant 0 : index
    %c0_313 = arith.constant 0 : index
    %770 = vector.load %arg20[%c1_310, %c0_311, %c0_312, %c0_313] : memref<2x4x32x8xbf16, #tpu.memory_space<vmem>>, vector<1x4x32x8xbf16>
    %771 = vector.shape_cast %770 : vector<1x4x32x8xbf16> to vector<4x32x8xbf16>
    %c1_314 = arith.constant 1 : index
    %c0_315 = arith.constant 0 : index
    %c0_316 = arith.constant 0 : index
    %c0_317 = arith.constant 0 : index
    %772 = vector.load %arg21[%c1_314, %c0_315, %c0_316, %c0_317] : memref<2x4x1x8xf32, #tpu.memory_space<vmem>>, vector<1x4x1x8xf32>
    %773 = vector.shape_cast %772 : vector<1x4x1x8xf32> to vector<4x1x8xf32>
    %c1_318 = arith.constant 1 : index
    %c0_319 = arith.constant 0 : index
    %c0_320 = arith.constant 0 : index
    %c0_321 = arith.constant 0 : index
    %774 = vector.load %arg22[%c1_318, %c0_319, %c0_320, %c0_321] : memref<2x4x8x32xbf16, #tpu.memory_space<vmem>>, vector<1x4x8x32xbf16>
    %775 = vector.shape_cast %774 : vector<1x4x8x32xbf16> to vector<4x8x32xbf16>
    %c1_322 = arith.constant 1 : index
    %c0_323 = arith.constant 0 : index
    %c0_324 = arith.constant 0 : index
    %776 = vector.load %arg23[%c1_322, %c0_323, %c0_324] : memref<2x1x32xf32, #tpu.memory_space<vmem>>, vector<1x1x32xf32>
    %777 = vector.shape_cast %776 : vector<1x1x32xf32> to vector<1x32xf32>
    %778 = arith.truncf %761 : vector<8x32xf32> to vector<8x32xbf16>
    %779 = arith.truncf %3 : vector<8x32xf32> to vector<8x32xbf16>
    %780 = vector.extract_strided_slice %763 {offsets = [0, 0, 0], sizes = [1, 32, 8], strides = [1, 1, 1]} : vector<4x32x8xbf16> to vector<1x32x8xbf16>
    %781 = vector.shape_cast %780 : vector<1x32x8xbf16> to vector<32x8xbf16>
    %cst_325 = arith.constant dense<0.000000e+00> : vector<8x8xf32>
    %782 = tpu.matmul %778, %781, %cst_325 {dimension_numbers = #tpu.dot_dimension_numbers<[1], [0], [0], [1], [0, 0, 1, 1], [], []>} : vector<8x32xbf16>, vector<32x8xbf16>, vector<8x8xf32> -> vector<8x8xf32>
    %783 = vector.extract_strided_slice %765 {offsets = [0, 0, 0], sizes = [1, 1, 8], strides = [1, 1, 1]} : vector<4x1x8xf32> to vector<1x1x8xf32>
    %784 = vector.shape_cast %783 : vector<1x1x8xf32> to vector<1x8xf32>
    %785 = vector.broadcast %784 : vector<1x8xf32> to vector<8x8xf32>
    %786 = arith.addf %782, %785 : vector<8x8xf32>
    %787 = vector.extract_strided_slice %767 {offsets = [0, 0, 0], sizes = [1, 32, 8], strides = [1, 1, 1]} : vector<4x32x8xbf16> to vector<1x32x8xbf16>
    %788 = vector.shape_cast %787 : vector<1x32x8xbf16> to vector<32x8xbf16>
    %cst_326 = arith.constant dense<0.000000e+00> : vector<8x8xf32>
    %789 = tpu.matmul %779, %788, %cst_326 {dimension_numbers = #tpu.dot_dimension_numbers<[1], [0], [0], [1], [0, 0, 1, 1], [], []>} : vector<8x32xbf16>, vector<32x8xbf16>, vector<8x8xf32> -> vector<8x8xf32>
    %790 = vector.extract_strided_slice %769 {offsets = [0, 0, 0], sizes = [1, 1, 8], strides = [1, 1, 1]} : vector<4x1x8xf32> to vector<1x1x8xf32>
    %791 = vector.shape_cast %790 : vector<1x1x8xf32> to vector<1x8xf32>
    %792 = vector.broadcast %791 : vector<1x8xf32> to vector<8x8xf32>
    %793 = arith.addf %789, %792 : vector<8x8xf32>
    %794 = vector.extract_strided_slice %771 {offsets = [0, 0, 0], sizes = [1, 32, 8], strides = [1, 1, 1]} : vector<4x32x8xbf16> to vector<1x32x8xbf16>
    %795 = vector.shape_cast %794 : vector<1x32x8xbf16> to vector<32x8xbf16>
    %cst_327 = arith.constant dense<0.000000e+00> : vector<8x8xf32>
    %796 = tpu.matmul %779, %795, %cst_327 {dimension_numbers = #tpu.dot_dimension_numbers<[1], [0], [0], [1], [0, 0, 1, 1], [], []>} : vector<8x32xbf16>, vector<32x8xbf16>, vector<8x8xf32> -> vector<8x8xf32>
    %797 = vector.extract_strided_slice %773 {offsets = [0, 0, 0], sizes = [1, 1, 8], strides = [1, 1, 1]} : vector<4x1x8xf32> to vector<1x1x8xf32>
    %798 = vector.shape_cast %797 : vector<1x1x8xf32> to vector<1x8xf32>
    %799 = vector.broadcast %798 : vector<1x8xf32> to vector<8x8xf32>
    %800 = arith.addf %796, %799 : vector<8x8xf32>
    %801 = arith.truncf %786 : vector<8x8xf32> to vector<8x8xbf16>
    %802 = arith.truncf %793 : vector<8x8xf32> to vector<8x8xbf16>
    "tpu.trace_start"() <{level = 10 : i32, message = "qe,ke->qk"}> : () -> ()
    %cst_328 = arith.constant dense<0.000000e+00> : vector<8x8xf32>
    %803 = tpu.matmul %801, %802, %cst_328 {dimension_numbers = #tpu.dot_dimension_numbers<[1], [1], [0], [0], [0, 0, 1, 0], [], []>} : vector<8x8xbf16>, vector<8x8xbf16>, vector<8x8xf32> -> vector<8x8xf32>
    "tpu.trace_stop"() : () -> ()
    %cst_329 = arith.constant 0.353553385 : f32
    %804 = vector.broadcast %cst_329 : f32 to vector<8x8xf32>
    %805 = arith.mulf %803, %804 : vector<8x8xf32>
    %cst_330 = arith.constant -1.000000e+30 : f32
    %806 = vector.broadcast %cst_330 : f32 to vector<8x8xf32>
    %807 = arith.select %14, %805, %806 : vector<8x8xi1>, vector<8x8xf32>
    %cst_331 = arith.constant dense<0xFF800000> : vector<8xf32>
    %808 = vector.multi_reduction <maximumf>, %807, %cst_331 [1] : vector<8x8xf32> to vector<8xf32>
    %809 = vector.shape_cast %808 : vector<8xf32> to vector<8x1xf32>
    %810 = vector.broadcast %809 : vector<8x1xf32> to vector<8x8xf32>
    %811 = arith.subf %807, %810 : vector<8x8xf32>
    %812 = math.exp %811 : vector<8x8xf32>
    %cst_332 = arith.constant dense<0.000000e+00> : vector<8xf32>
    %813 = vector.multi_reduction <add>, %812, %cst_332 [1] : vector<8x8xf32> to vector<8xf32>
    %814 = vector.shape_cast %813 : vector<8xf32> to vector<8x1xf32>
    %cst_333 = arith.constant 1.000000e+00 : f32
    %815 = vector.broadcast %cst_333 : f32 to vector<8x1xf32>
    %816 = arith.divf %815, %814 : vector<8x1xf32>
    %817 = vector.broadcast %816 : vector<8x1xf32> to vector<8x8xf32>
    %818 = arith.mulf %812, %817 : vector<8x8xf32>
    %819 = arith.truncf %818 : vector<8x8xf32> to vector<8x8xbf16>
    %820 = arith.truncf %800 : vector<8x8xf32> to vector<8x8xbf16>
    %cst_334 = arith.constant dense<0.000000e+00> : vector<8x8xf32>
    %821 = tpu.matmul %819, %820, %cst_334 {dimension_numbers = #tpu.dot_dimension_numbers<[1], [0], [0], [1], [0, 0, 1, 1], [], []>} : vector<8x8xbf16>, vector<8x8xbf16>, vector<8x8xf32> -> vector<8x8xf32>
    %822 = arith.truncf %821 : vector<8x8xf32> to vector<8x8xbf16>
    %823 = vector.extract_strided_slice %775 {offsets = [0, 0, 0], sizes = [1, 8, 32], strides = [1, 1, 1]} : vector<4x8x32xbf16> to vector<1x8x32xbf16>
    %824 = vector.shape_cast %823 : vector<1x8x32xbf16> to vector<8x32xbf16>
    %cst_335 = arith.constant dense<0.000000e+00> : vector<8x32xf32>
    %825 = tpu.matmul %822, %824, %cst_335 {dimension_numbers = #tpu.dot_dimension_numbers<[1], [0], [0], [1], [0, 0, 1, 1], [], []>} : vector<8x8xbf16>, vector<8x32xbf16>, vector<8x32xf32> -> vector<8x32xf32>
    %826 = vector.extract_strided_slice %763 {offsets = [1, 0, 0], sizes = [1, 32, 8], strides = [1, 1, 1]} : vector<4x32x8xbf16> to vector<1x32x8xbf16>
    %827 = vector.shape_cast %826 : vector<1x32x8xbf16> to vector<32x8xbf16>
    %cst_336 = arith.constant dense<0.000000e+00> : vector<8x8xf32>
    %828 = tpu.matmul %778, %827, %cst_336 {dimension_numbers = #tpu.dot_dimension_numbers<[1], [0], [0], [1], [0, 0, 1, 1], [], []>} : vector<8x32xbf16>, vector<32x8xbf16>, vector<8x8xf32> -> vector<8x8xf32>
    %829 = vector.extract_strided_slice %765 {offsets = [1, 0, 0], sizes = [1, 1, 8], strides = [1, 1, 1]} : vector<4x1x8xf32> to vector<1x1x8xf32>
    %830 = vector.shape_cast %829 : vector<1x1x8xf32> to vector<1x8xf32>
    %831 = vector.broadcast %830 : vector<1x8xf32> to vector<8x8xf32>
    %832 = arith.addf %828, %831 : vector<8x8xf32>
    %833 = vector.extract_strided_slice %767 {offsets = [1, 0, 0], sizes = [1, 32, 8], strides = [1, 1, 1]} : vector<4x32x8xbf16> to vector<1x32x8xbf16>
    %834 = vector.shape_cast %833 : vector<1x32x8xbf16> to vector<32x8xbf16>
    %cst_337 = arith.constant dense<0.000000e+00> : vector<8x8xf32>
    %835 = tpu.matmul %779, %834, %cst_337 {dimension_numbers = #tpu.dot_dimension_numbers<[1], [0], [0], [1], [0, 0, 1, 1], [], []>} : vector<8x32xbf16>, vector<32x8xbf16>, vector<8x8xf32> -> vector<8x8xf32>
    %836 = vector.extract_strided_slice %769 {offsets = [1, 0, 0], sizes = [1, 1, 8], strides = [1, 1, 1]} : vector<4x1x8xf32> to vector<1x1x8xf32>
    %837 = vector.shape_cast %836 : vector<1x1x8xf32> to vector<1x8xf32>
    %838 = vector.broadcast %837 : vector<1x8xf32> to vector<8x8xf32>
    %839 = arith.addf %835, %838 : vector<8x8xf32>
    %840 = vector.extract_strided_slice %771 {offsets = [1, 0, 0], sizes = [1, 32, 8], strides = [1, 1, 1]} : vector<4x32x8xbf16> to vector<1x32x8xbf16>
    %841 = vector.shape_cast %840 : vector<1x32x8xbf16> to vector<32x8xbf16>
    %cst_338 = arith.constant dense<0.000000e+00> : vector<8x8xf32>
    %842 = tpu.matmul %779, %841, %cst_338 {dimension_numbers = #tpu.dot_dimension_numbers<[1], [0], [0], [1], [0, 0, 1, 1], [], []>} : vector<8x32xbf16>, vector<32x8xbf16>, vector<8x8xf32> -> vector<8x8xf32>
    %843 = vector.extract_strided_slice %773 {offsets = [1, 0, 0], sizes = [1, 1, 8], strides = [1, 1, 1]} : vector<4x1x8xf32> to vector<1x1x8xf32>
    %844 = vector.shape_cast %843 : vector<1x1x8xf32> to vector<1x8xf32>
    %845 = vector.broadcast %844 : vector<1x8xf32> to vector<8x8xf32>
    %846 = arith.addf %842, %845 : vector<8x8xf32>
    %847 = arith.truncf %832 : vector<8x8xf32> to vector<8x8xbf16>
    %848 = arith.truncf %839 : vector<8x8xf32> to vector<8x8xbf16>
    "tpu.trace_start"() <{level = 10 : i32, message = "qe,ke->qk"}> : () -> ()
    %cst_339 = arith.constant dense<0.000000e+00> : vector<8x8xf32>
    %849 = tpu.matmul %847, %848, %cst_339 {dimension_numbers = #tpu.dot_dimension_numbers<[1], [1], [0], [0], [0, 0, 1, 0], [], []>} : vector<8x8xbf16>, vector<8x8xbf16>, vector<8x8xf32> -> vector<8x8xf32>
    "tpu.trace_stop"() : () -> ()
    %cst_340 = arith.constant 0.353553385 : f32
    %850 = vector.broadcast %cst_340 : f32 to vector<8x8xf32>
    %851 = arith.mulf %849, %850 : vector<8x8xf32>
    %cst_341 = arith.constant -1.000000e+30 : f32
    %852 = vector.broadcast %cst_341 : f32 to vector<8x8xf32>
    %853 = arith.select %14, %851, %852 : vector<8x8xi1>, vector<8x8xf32>
    %cst_342 = arith.constant dense<0xFF800000> : vector<8xf32>
    %854 = vector.multi_reduction <maximumf>, %853, %cst_342 [1] : vector<8x8xf32> to vector<8xf32>
    %855 = vector.shape_cast %854 : vector<8xf32> to vector<8x1xf32>
    %856 = vector.broadcast %855 : vector<8x1xf32> to vector<8x8xf32>
    %857 = arith.subf %853, %856 : vector<8x8xf32>
    %858 = math.exp %857 : vector<8x8xf32>
    %cst_343 = arith.constant dense<0.000000e+00> : vector<8xf32>
    %859 = vector.multi_reduction <add>, %858, %cst_343 [1] : vector<8x8xf32> to vector<8xf32>
    %860 = vector.shape_cast %859 : vector<8xf32> to vector<8x1xf32>
    %cst_344 = arith.constant 1.000000e+00 : f32
    %861 = vector.broadcast %cst_344 : f32 to vector<8x1xf32>
    %862 = arith.divf %861, %860 : vector<8x1xf32>
    %863 = vector.broadcast %862 : vector<8x1xf32> to vector<8x8xf32>
    %864 = arith.mulf %858, %863 : vector<8x8xf32>
    %865 = arith.truncf %864 : vector<8x8xf32> to vector<8x8xbf16>
    %866 = arith.truncf %846 : vector<8x8xf32> to vector<8x8xbf16>
    %cst_345 = arith.constant dense<0.000000e+00> : vector<8x8xf32>
    %867 = tpu.matmul %865, %866, %cst_345 {dimension_numbers = #tpu.dot_dimension_numbers<[1], [0], [0], [1], [0, 0, 1, 1], [], []>} : vector<8x8xbf16>, vector<8x8xbf16>, vector<8x8xf32> -> vector<8x8xf32>
    %868 = arith.truncf %867 : vector<8x8xf32> to vector<8x8xbf16>
    %869 = vector.extract_strided_slice %775 {offsets = [1, 0, 0], sizes = [1, 8, 32], strides = [1, 1, 1]} : vector<4x8x32xbf16> to vector<1x8x32xbf16>
    %870 = vector.shape_cast %869 : vector<1x8x32xbf16> to vector<8x32xbf16>
    %cst_346 = arith.constant dense<0.000000e+00> : vector<8x32xf32>
    %871 = tpu.matmul %868, %870, %cst_346 {dimension_numbers = #tpu.dot_dimension_numbers<[1], [0], [0], [1], [0, 0, 1, 1], [], []>} : vector<8x8xbf16>, vector<8x32xbf16>, vector<8x32xf32> -> vector<8x32xf32>
    %872 = arith.addf %825, %871 : vector<8x32xf32>
    %873 = vector.extract_strided_slice %763 {offsets = [2, 0, 0], sizes = [1, 32, 8], strides = [1, 1, 1]} : vector<4x32x8xbf16> to vector<1x32x8xbf16>
    %874 = vector.shape_cast %873 : vector<1x32x8xbf16> to vector<32x8xbf16>
    %cst_347 = arith.constant dense<0.000000e+00> : vector<8x8xf32>
    %875 = tpu.matmul %778, %874, %cst_347 {dimension_numbers = #tpu.dot_dimension_numbers<[1], [0], [0], [1], [0, 0, 1, 1], [], []>} : vector<8x32xbf16>, vector<32x8xbf16>, vector<8x8xf32> -> vector<8x8xf32>
    %876 = vector.extract_strided_slice %765 {offsets = [2, 0, 0], sizes = [1, 1, 8], strides = [1, 1, 1]} : vector<4x1x8xf32> to vector<1x1x8xf32>
    %877 = vector.shape_cast %876 : vector<1x1x8xf32> to vector<1x8xf32>
    %878 = vector.broadcast %877 : vector<1x8xf32> to vector<8x8xf32>
    %879 = arith.addf %875, %878 : vector<8x8xf32>
    %880 = vector.extract_strided_slice %767 {offsets = [2, 0, 0], sizes = [1, 32, 8], strides = [1, 1, 1]} : vector<4x32x8xbf16> to vector<1x32x8xbf16>
    %881 = vector.shape_cast %880 : vector<1x32x8xbf16> to vector<32x8xbf16>
    %cst_348 = arith.constant dense<0.000000e+00> : vector<8x8xf32>
    %882 = tpu.matmul %779, %881, %cst_348 {dimension_numbers = #tpu.dot_dimension_numbers<[1], [0], [0], [1], [0, 0, 1, 1], [], []>} : vector<8x32xbf16>, vector<32x8xbf16>, vector<8x8xf32> -> vector<8x8xf32>
    %883 = vector.extract_strided_slice %769 {offsets = [2, 0, 0], sizes = [1, 1, 8], strides = [1, 1, 1]} : vector<4x1x8xf32> to vector<1x1x8xf32>
    %884 = vector.shape_cast %883 : vector<1x1x8xf32> to vector<1x8xf32>
    %885 = vector.broadcast %884 : vector<1x8xf32> to vector<8x8xf32>
    %886 = arith.addf %882, %885 : vector<8x8xf32>
    %887 = vector.extract_strided_slice %771 {offsets = [2, 0, 0], sizes = [1, 32, 8], strides = [1, 1, 1]} : vector<4x32x8xbf16> to vector<1x32x8xbf16>
    %888 = vector.shape_cast %887 : vector<1x32x8xbf16> to vector<32x8xbf16>
    %cst_349 = arith.constant dense<0.000000e+00> : vector<8x8xf32>
    %889 = tpu.matmul %779, %888, %cst_349 {dimension_numbers = #tpu.dot_dimension_numbers<[1], [0], [0], [1], [0, 0, 1, 1], [], []>} : vector<8x32xbf16>, vector<32x8xbf16>, vector<8x8xf32> -> vector<8x8xf32>
    %890 = vector.extract_strided_slice %773 {offsets = [2, 0, 0], sizes = [1, 1, 8], strides = [1, 1, 1]} : vector<4x1x8xf32> to vector<1x1x8xf32>
    %891 = vector.shape_cast %890 : vector<1x1x8xf32> to vector<1x8xf32>
    %892 = vector.broadcast %891 : vector<1x8xf32> to vector<8x8xf32>
    %893 = arith.addf %889, %892 : vector<8x8xf32>
    %894 = arith.truncf %879 : vector<8x8xf32> to vector<8x8xbf16>
    %895 = arith.truncf %886 : vector<8x8xf32> to vector<8x8xbf16>
    "tpu.trace_start"() <{level = 10 : i32, message = "qe,ke->qk"}> : () -> ()
    %cst_350 = arith.constant dense<0.000000e+00> : vector<8x8xf32>
    %896 = tpu.matmul %894, %895, %cst_350 {dimension_numbers = #tpu.dot_dimension_numbers<[1], [1], [0], [0], [0, 0, 1, 0], [], []>} : vector<8x8xbf16>, vector<8x8xbf16>, vector<8x8xf32> -> vector<8x8xf32>
    "tpu.trace_stop"() : () -> ()
    %cst_351 = arith.constant 0.353553385 : f32
    %897 = vector.broadcast %cst_351 : f32 to vector<8x8xf32>
    %898 = arith.mulf %896, %897 : vector<8x8xf32>
    %cst_352 = arith.constant -1.000000e+30 : f32
    %899 = vector.broadcast %cst_352 : f32 to vector<8x8xf32>
    %900 = arith.select %14, %898, %899 : vector<8x8xi1>, vector<8x8xf32>
    %cst_353 = arith.constant dense<0xFF800000> : vector<8xf32>
    %901 = vector.multi_reduction <maximumf>, %900, %cst_353 [1] : vector<8x8xf32> to vector<8xf32>
    %902 = vector.shape_cast %901 : vector<8xf32> to vector<8x1xf32>
    %903 = vector.broadcast %902 : vector<8x1xf32> to vector<8x8xf32>
    %904 = arith.subf %900, %903 : vector<8x8xf32>
    %905 = math.exp %904 : vector<8x8xf32>
    %cst_354 = arith.constant dense<0.000000e+00> : vector<8xf32>
    %906 = vector.multi_reduction <add>, %905, %cst_354 [1] : vector<8x8xf32> to vector<8xf32>
    %907 = vector.shape_cast %906 : vector<8xf32> to vector<8x1xf32>
    %cst_355 = arith.constant 1.000000e+00 : f32
    %908 = vector.broadcast %cst_355 : f32 to vector<8x1xf32>
    %909 = arith.divf %908, %907 : vector<8x1xf32>
    %910 = vector.broadcast %909 : vector<8x1xf32> to vector<8x8xf32>
    %911 = arith.mulf %905, %910 : vector<8x8xf32>
    %912 = arith.truncf %911 : vector<8x8xf32> to vector<8x8xbf16>
    %913 = arith.truncf %893 : vector<8x8xf32> to vector<8x8xbf16>
    %cst_356 = arith.constant dense<0.000000e+00> : vector<8x8xf32>
    %914 = tpu.matmul %912, %913, %cst_356 {dimension_numbers = #tpu.dot_dimension_numbers<[1], [0], [0], [1], [0, 0, 1, 1], [], []>} : vector<8x8xbf16>, vector<8x8xbf16>, vector<8x8xf32> -> vector<8x8xf32>
    %915 = arith.truncf %914 : vector<8x8xf32> to vector<8x8xbf16>
    %916 = vector.extract_strided_slice %775 {offsets = [2, 0, 0], sizes = [1, 8, 32], strides = [1, 1, 1]} : vector<4x8x32xbf16> to vector<1x8x32xbf16>
    %917 = vector.shape_cast %916 : vector<1x8x32xbf16> to vector<8x32xbf16>
    %cst_357 = arith.constant dense<0.000000e+00> : vector<8x32xf32>
    %918 = tpu.matmul %915, %917, %cst_357 {dimension_numbers = #tpu.dot_dimension_numbers<[1], [0], [0], [1], [0, 0, 1, 1], [], []>} : vector<8x8xbf16>, vector<8x32xbf16>, vector<8x32xf32> -> vector<8x32xf32>
    %919 = arith.addf %872, %918 : vector<8x32xf32>
    %920 = vector.extract_strided_slice %763 {offsets = [3, 0, 0], sizes = [1, 32, 8], strides = [1, 1, 1]} : vector<4x32x8xbf16> to vector<1x32x8xbf16>
    %921 = vector.shape_cast %920 : vector<1x32x8xbf16> to vector<32x8xbf16>
    %cst_358 = arith.constant dense<0.000000e+00> : vector<8x8xf32>
    %922 = tpu.matmul %778, %921, %cst_358 {dimension_numbers = #tpu.dot_dimension_numbers<[1], [0], [0], [1], [0, 0, 1, 1], [], []>} : vector<8x32xbf16>, vector<32x8xbf16>, vector<8x8xf32> -> vector<8x8xf32>
    %923 = vector.extract_strided_slice %765 {offsets = [3, 0, 0], sizes = [1, 1, 8], strides = [1, 1, 1]} : vector<4x1x8xf32> to vector<1x1x8xf32>
    %924 = vector.shape_cast %923 : vector<1x1x8xf32> to vector<1x8xf32>
    %925 = vector.broadcast %924 : vector<1x8xf32> to vector<8x8xf32>
    %926 = arith.addf %922, %925 : vector<8x8xf32>
    %927 = vector.extract_strided_slice %767 {offsets = [3, 0, 0], sizes = [1, 32, 8], strides = [1, 1, 1]} : vector<4x32x8xbf16> to vector<1x32x8xbf16>
    %928 = vector.shape_cast %927 : vector<1x32x8xbf16> to vector<32x8xbf16>
    %cst_359 = arith.constant dense<0.000000e+00> : vector<8x8xf32>
    %929 = tpu.matmul %779, %928, %cst_359 {dimension_numbers = #tpu.dot_dimension_numbers<[1], [0], [0], [1], [0, 0, 1, 1], [], []>} : vector<8x32xbf16>, vector<32x8xbf16>, vector<8x8xf32> -> vector<8x8xf32>
    %930 = vector.extract_strided_slice %769 {offsets = [3, 0, 0], sizes = [1, 1, 8], strides = [1, 1, 1]} : vector<4x1x8xf32> to vector<1x1x8xf32>
    %931 = vector.shape_cast %930 : vector<1x1x8xf32> to vector<1x8xf32>
    %932 = vector.broadcast %931 : vector<1x8xf32> to vector<8x8xf32>
    %933 = arith.addf %929, %932 : vector<8x8xf32>
    %934 = vector.extract_strided_slice %771 {offsets = [3, 0, 0], sizes = [1, 32, 8], strides = [1, 1, 1]} : vector<4x32x8xbf16> to vector<1x32x8xbf16>
    %935 = vector.shape_cast %934 : vector<1x32x8xbf16> to vector<32x8xbf16>
    %cst_360 = arith.constant dense<0.000000e+00> : vector<8x8xf32>
    %936 = tpu.matmul %779, %935, %cst_360 {dimension_numbers = #tpu.dot_dimension_numbers<[1], [0], [0], [1], [0, 0, 1, 1], [], []>} : vector<8x32xbf16>, vector<32x8xbf16>, vector<8x8xf32> -> vector<8x8xf32>
    %937 = vector.extract_strided_slice %773 {offsets = [3, 0, 0], sizes = [1, 1, 8], strides = [1, 1, 1]} : vector<4x1x8xf32> to vector<1x1x8xf32>
    %938 = vector.shape_cast %937 : vector<1x1x8xf32> to vector<1x8xf32>
    %939 = vector.broadcast %938 : vector<1x8xf32> to vector<8x8xf32>
    %940 = arith.addf %936, %939 : vector<8x8xf32>
    %941 = arith.truncf %926 : vector<8x8xf32> to vector<8x8xbf16>
    %942 = arith.truncf %933 : vector<8x8xf32> to vector<8x8xbf16>
    "tpu.trace_start"() <{level = 10 : i32, message = "qe,ke->qk"}> : () -> ()
    %cst_361 = arith.constant dense<0.000000e+00> : vector<8x8xf32>
    %943 = tpu.matmul %941, %942, %cst_361 {dimension_numbers = #tpu.dot_dimension_numbers<[1], [1], [0], [0], [0, 0, 1, 0], [], []>} : vector<8x8xbf16>, vector<8x8xbf16>, vector<8x8xf32> -> vector<8x8xf32>
    "tpu.trace_stop"() : () -> ()
    %cst_362 = arith.constant 0.353553385 : f32
    %944 = vector.broadcast %cst_362 : f32 to vector<8x8xf32>
    %945 = arith.mulf %943, %944 : vector<8x8xf32>
    %cst_363 = arith.constant -1.000000e+30 : f32
    %946 = vector.broadcast %cst_363 : f32 to vector<8x8xf32>
    %947 = arith.select %14, %945, %946 : vector<8x8xi1>, vector<8x8xf32>
    %cst_364 = arith.constant dense<0xFF800000> : vector<8xf32>
    %948 = vector.multi_reduction <maximumf>, %947, %cst_364 [1] : vector<8x8xf32> to vector<8xf32>
    %949 = vector.shape_cast %948 : vector<8xf32> to vector<8x1xf32>
    %950 = vector.broadcast %949 : vector<8x1xf32> to vector<8x8xf32>
    %951 = arith.subf %947, %950 : vector<8x8xf32>
    %952 = math.exp %951 : vector<8x8xf32>
    %cst_365 = arith.constant dense<0.000000e+00> : vector<8xf32>
    %953 = vector.multi_reduction <add>, %952, %cst_365 [1] : vector<8x8xf32> to vector<8xf32>
    %954 = vector.shape_cast %953 : vector<8xf32> to vector<8x1xf32>
    %cst_366 = arith.constant 1.000000e+00 : f32
    %955 = vector.broadcast %cst_366 : f32 to vector<8x1xf32>
    %956 = arith.divf %955, %954 : vector<8x1xf32>
    %957 = vector.broadcast %956 : vector<8x1xf32> to vector<8x8xf32>
    %958 = arith.mulf %952, %957 : vector<8x8xf32>
    %959 = arith.truncf %958 : vector<8x8xf32> to vector<8x8xbf16>
    %960 = arith.truncf %940 : vector<8x8xf32> to vector<8x8xbf16>
    %cst_367 = arith.constant dense<0.000000e+00> : vector<8x8xf32>
    %961 = tpu.matmul %959, %960, %cst_367 {dimension_numbers = #tpu.dot_dimension_numbers<[1], [0], [0], [1], [0, 0, 1, 1], [], []>} : vector<8x8xbf16>, vector<8x8xbf16>, vector<8x8xf32> -> vector<8x8xf32>
    %962 = arith.truncf %961 : vector<8x8xf32> to vector<8x8xbf16>
    %963 = vector.extract_strided_slice %775 {offsets = [3, 0, 0], sizes = [1, 8, 32], strides = [1, 1, 1]} : vector<4x8x32xbf16> to vector<1x8x32xbf16>
    %964 = vector.shape_cast %963 : vector<1x8x32xbf16> to vector<8x32xbf16>
    %cst_368 = arith.constant dense<0.000000e+00> : vector<8x32xf32>
    %965 = tpu.matmul %962, %964, %cst_368 {dimension_numbers = #tpu.dot_dimension_numbers<[1], [0], [0], [1], [0, 0, 1, 1], [], []>} : vector<8x8xbf16>, vector<8x32xbf16>, vector<8x32xf32> -> vector<8x32xf32>
    %966 = arith.addf %919, %965 : vector<8x32xf32>
    %967 = vector.broadcast %777 : vector<1x32xf32> to vector<8x32xf32>
    %968 = arith.addf %966, %967 : vector<8x32xf32>
    %969 = arith.addf %968, %761 : vector<8x32xf32>
    %c1_369 = arith.constant 1 : index
    %c0_370 = arith.constant 0 : index
    %c0_371 = arith.constant 0 : index
    %970 = vector.load %arg24[%c1_369, %c0_370, %c0_371] : memref<2x1x32xf32, #tpu.memory_space<vmem>>, vector<1x1x32xf32>
    %971 = vector.shape_cast %970 : vector<1x1x32xf32> to vector<1x32xf32>
    %c1_372 = arith.constant 1 : index
    %c0_373 = arith.constant 0 : index
    %c0_374 = arith.constant 0 : index
    %972 = vector.load %arg25[%c1_372, %c0_373, %c0_374] : memref<2x1x32xf32, #tpu.memory_space<vmem>>, vector<1x1x32xf32>
    %973 = vector.shape_cast %972 : vector<1x1x32xf32> to vector<1x32xf32>
    %cst_375 = arith.constant dense<0.000000e+00> : vector<8xf32>
    %974 = vector.multi_reduction <add>, %969, %cst_375 [1] : vector<8x32xf32> to vector<8xf32>
    %975 = vector.shape_cast %974 : vector<8xf32> to vector<8x1xf32>
    %cst_376 = arith.constant 3.200000e+01 : f32
    %976 = vector.broadcast %cst_376 : f32 to vector<8x1xf32>
    %977 = arith.divf %975, %976 : vector<8x1xf32>
    %978 = vector.broadcast %977 : vector<8x1xf32> to vector<8x32xf32>
    %979 = arith.subf %969, %978 : vector<8x32xf32>
    %980 = arith.mulf %979, %979 : vector<8x32xf32>
    %cst_377 = arith.constant dense<0.000000e+00> : vector<8xf32>
    %981 = vector.multi_reduction <add>, %980, %cst_377 [1] : vector<8x32xf32> to vector<8xf32>
    %982 = vector.shape_cast %981 : vector<8xf32> to vector<8x1xf32>
    %cst_378 = arith.constant 3.200000e+01 : f32
    %983 = vector.broadcast %cst_378 : f32 to vector<8x1xf32>
    %984 = arith.divf %982, %983 : vector<8x1xf32>
    %985 = vector.broadcast %977 : vector<8x1xf32> to vector<8x32xf32>
    %986 = arith.subf %969, %985 : vector<8x32xf32>
    %cst_379 = arith.constant 9.99999974E-6 : f32
    %987 = vector.broadcast %cst_379 : f32 to vector<8x1xf32>
    %988 = arith.addf %984, %987 : vector<8x1xf32>
    %989 = math.rsqrt %988 : vector<8x1xf32>
    %990 = vector.broadcast %989 : vector<8x1xf32> to vector<8x32xf32>
    %991 = arith.mulf %986, %990 : vector<8x32xf32>
    %992 = vector.broadcast %971 : vector<1x32xf32> to vector<8x32xf32>
    %993 = arith.mulf %991, %992 : vector<8x32xf32>
    %994 = vector.broadcast %973 : vector<1x32xf32> to vector<8x32xf32>
    %995 = arith.addf %993, %994 : vector<8x32xf32>
    %c1_380 = arith.constant 1 : index
    %c0_381 = arith.constant 0 : index
    %c0_382 = arith.constant 0 : index
    %996 = vector.load %arg26[%c1_380, %c0_381, %c0_382] : memref<2x32x32xbf16, #tpu.memory_space<vmem>>, vector<1x32x32xbf16>
    %997 = vector.shape_cast %996 : vector<1x32x32xbf16> to vector<32x32xbf16>
    %c1_383 = arith.constant 1 : index
    %c0_384 = arith.constant 0 : index
    %c0_385 = arith.constant 0 : index
    %998 = vector.load %arg27[%c1_383, %c0_384, %c0_385] : memref<2x1x32xf32, #tpu.memory_space<vmem>>, vector<1x1x32xf32>
    %999 = vector.shape_cast %998 : vector<1x1x32xf32> to vector<1x32xf32>
    %c1_386 = arith.constant 1 : index
    %c0_387 = arith.constant 0 : index
    %c0_388 = arith.constant 0 : index
    %1000 = vector.load %arg28[%c1_386, %c0_387, %c0_388] : memref<2x32x32xbf16, #tpu.memory_space<vmem>>, vector<1x32x32xbf16>
    %1001 = vector.shape_cast %1000 : vector<1x32x32xbf16> to vector<32x32xbf16>
    %c1_389 = arith.constant 1 : index
    %c0_390 = arith.constant 0 : index
    %c0_391 = arith.constant 0 : index
    %1002 = vector.load %arg29[%c1_389, %c0_390, %c0_391] : memref<2x1x32xf32, #tpu.memory_space<vmem>>, vector<1x1x32xf32>
    %1003 = vector.shape_cast %1002 : vector<1x1x32xf32> to vector<1x32xf32>
    %1004 = arith.truncf %995 : vector<8x32xf32> to vector<8x32xbf16>
    %cst_392 = arith.constant dense<0.000000e+00> : vector<8x32xf32>
    %1005 = tpu.matmul %1004, %997, %cst_392 {dimension_numbers = #tpu.dot_dimension_numbers<[1], [0], [0], [1], [0, 0, 1, 1], [], []>} : vector<8x32xbf16>, vector<32x32xbf16>, vector<8x32xf32> -> vector<8x32xf32>
    %1006 = vector.broadcast %999 : vector<1x32xf32> to vector<8x32xf32>
    %1007 = arith.addf %1005, %1006 : vector<8x32xf32>
    %cst_393 = arith.constant 0.000000e+00 : f32
    %1008 = vector.broadcast %cst_393 : f32 to vector<8x32xf32>
    %1009 = arith.maximumf %1007, %1008 : vector<8x32xf32>
    %1010 = arith.truncf %1009 : vector<8x32xf32> to vector<8x32xbf16>
    %cst_394 = arith.constant dense<0.000000e+00> : vector<8x32xf32>
    %1011 = tpu.matmul %1010, %1001, %cst_394 {dimension_numbers = #tpu.dot_dimension_numbers<[1], [0], [0], [1], [0, 0, 1, 1], [], []>} : vector<8x32xbf16>, vector<32x32xbf16>, vector<8x32xf32> -> vector<8x32xf32>
    %1012 = vector.broadcast %1003 : vector<1x32xf32> to vector<8x32xf32>
    %1013 = arith.addf %1011, %1012 : vector<8x32xf32>
    %1014 = arith.addf %1013, %995 : vector<8x32xf32>
    %c1_395 = arith.constant 1 : index
    %c0_396 = arith.constant 0 : index
    %c0_397 = arith.constant 0 : index
    %1015 = vector.load %arg30[%c1_395, %c0_396, %c0_397] : memref<2x1x32xf32, #tpu.memory_space<vmem>>, vector<1x1x32xf32>
    %1016 = vector.shape_cast %1015 : vector<1x1x32xf32> to vector<1x32xf32>
    %c1_398 = arith.constant 1 : index
    %c0_399 = arith.constant 0 : index
    %c0_400 = arith.constant 0 : index
    %1017 = vector.load %arg31[%c1_398, %c0_399, %c0_400] : memref<2x1x32xf32, #tpu.memory_space<vmem>>, vector<1x1x32xf32>
    %1018 = vector.shape_cast %1017 : vector<1x1x32xf32> to vector<1x32xf32>
    %cst_401 = arith.constant dense<0.000000e+00> : vector<8xf32>
    %1019 = vector.multi_reduction <add>, %1014, %cst_401 [1] : vector<8x32xf32> to vector<8xf32>
    %1020 = vector.shape_cast %1019 : vector<8xf32> to vector<8x1xf32>
    %cst_402 = arith.constant 3.200000e+01 : f32
    %1021 = vector.broadcast %cst_402 : f32 to vector<8x1xf32>
    %1022 = arith.divf %1020, %1021 : vector<8x1xf32>
    %1023 = vector.broadcast %1022 : vector<8x1xf32> to vector<8x32xf32>
    %1024 = arith.subf %1014, %1023 : vector<8x32xf32>
    %1025 = arith.mulf %1024, %1024 : vector<8x32xf32>
    %cst_403 = arith.constant dense<0.000000e+00> : vector<8xf32>
    %1026 = vector.multi_reduction <add>, %1025, %cst_403 [1] : vector<8x32xf32> to vector<8xf32>
    %1027 = vector.shape_cast %1026 : vector<8xf32> to vector<8x1xf32>
    %cst_404 = arith.constant 3.200000e+01 : f32
    %1028 = vector.broadcast %cst_404 : f32 to vector<8x1xf32>
    %1029 = arith.divf %1027, %1028 : vector<8x1xf32>
    %1030 = vector.broadcast %1022 : vector<8x1xf32> to vector<8x32xf32>
    %1031 = arith.subf %1014, %1030 : vector<8x32xf32>
    %cst_405 = arith.constant 9.99999974E-6 : f32
    %1032 = vector.broadcast %cst_405 : f32 to vector<8x1xf32>
    %1033 = arith.addf %1029, %1032 : vector<8x1xf32>
    %1034 = math.rsqrt %1033 : vector<8x1xf32>
    %1035 = vector.broadcast %1034 : vector<8x1xf32> to vector<8x32xf32>
    %1036 = arith.mulf %1031, %1035 : vector<8x32xf32>
    %1037 = vector.broadcast %1016 : vector<1x32xf32> to vector<8x32xf32>
    %1038 = arith.mulf %1036, %1037 : vector<8x32xf32>
    %1039 = vector.broadcast %1018 : vector<1x32xf32> to vector<8x32xf32>
    %1040 = arith.addf %1038, %1039 : vector<8x32xf32>
    %1041 = arith.truncf %1040 : vector<8x32xf32> to vector<8x32xbf16>
    %c0_406 = arith.constant 0 : index
    %c0_407 = arith.constant 0 : index
    %1042 = vector.load %arg32[%c0_406, %c0_407] : memref<32x4xbf16, #tpu.memory_space<vmem>>, vector<32x4xbf16>
    %cst_408 = arith.constant dense<0.000000e+00> : vector<8x4xf32>
    %1043 = tpu.matmul %1041, %1042, %cst_408 {dimension_numbers = #tpu.dot_dimension_numbers<[1], [0], [0], [1], [0, 0, 1, 1], [], []>} : vector<8x32xbf16>, vector<32x4xbf16>, vector<8x4xf32> -> vector<8x4xf32>
    %c0_409 = arith.constant 0 : index
    %c0_410 = arith.constant 0 : index
    %1044 = vector.load %arg33[%c0_409, %c0_410] : memref<1x4xf32, #tpu.memory_space<vmem>>, vector<1x4xf32>
    %1045 = vector.broadcast %1044 : vector<1x4xf32> to vector<8x4xf32>
    %1046 = arith.addf %1043, %1045 : vector<8x4xf32>
    %c0_411 = arith.constant 0 : index
    %c0_412 = arith.constant 0 : index
    %c0_413 = arith.constant 0 : index
    %1047 = vector.load %arg34[%c0_411, %c0_412, %c0_413] : memref<1x8x4xf32, #tpu.memory_space<vmem>>, vector<1x8x4xf32>
    %1048 = vector.shape_cast %1047 : vector<1x8x4xf32> to vector<8x4xf32>
    %1049 = vector.shape_cast %1046 : vector<8x4xf32> to vector<1x8x4xf32>
    tpu.vector_store %arg34[%c0_411, %c0_412, %c0_413], %1049 {strides = array<i32>} : memref<1x8x4xf32, #tpu.memory_space<vmem>>, vector<1x8x4xf32>,
    return
  }
  func.func @transform_0(%arg0: i32) -> (i32, i32, i32) {
    %c0_i32 = arith.constant 0 : i32
    %c0_i32_0 = arith.constant 0 : i32
    %c0_i32_1 = arith.constant 0 : i32
    return %arg0, %c0_i32, %c0_i32_0 : i32, i32, i32
  }
  func.func @transform_1(%arg0: i32) -> (i32, i32, i32) {
    %c0_i32 = arith.constant 0 : i32
    %c0_i32_0 = arith.constant 0 : i32
    %c0_i32_1 = arith.constant 0 : i32
    return %arg0, %c0_i32, %c0_i32_0 : i32, i32, i32
  }
  func.func @transform_2(%arg0: i32) -> (i32, i32) {
    %c0_i32 = arith.constant 0 : i32
    %c0_i32_0 = arith.constant 0 : i32
    %c0_i32_1 = arith.constant 0 : i32
    return %c0_i32, %c0_i32_0 : i32, i32
  }
  func.func @transform_3(%arg0: i32) -> (i32, i32) {
    %c0_i32 = arith.constant 0 : i32
    %c0_i32_0 = arith.constant 0 : i32
    %c0_i32_1 = arith.constant 0 : i32
    return %c0_i32, %c0_i32_0 : i32, i32
  }
  func.func @transform_4(%arg0: i32) -> (i32, i32) {
    %c0_i32 = arith.constant 0 : i32
    %c0_i32_0 = arith.constant 0 : i32
    %c0_i32_1 = arith.constant 0 : i32
    return %c0_i32, %c0_i32_0 : i32, i32
  }
  func.func @transform_5(%arg0: i32) -> (i32, i32, i32, i32) {
    %c0_i32 = arith.constant 0 : i32
    %c0_i32_0 = arith.constant 0 : i32
    %c0_i32_1 = arith.constant 0 : i32
    %c0_i32_2 = arith.constant 0 : i32
    %c0_i32_3 = arith.constant 0 : i32
    return %c0_i32, %c0_i32_0, %c0_i32_1, %c0_i32_2 : i32, i32, i32, i32
  }
  func.func @transform_6(%arg0: i32) -> (i32, i32, i32, i32) {
    %c0_i32 = arith.constant 0 : i32
    %c0_i32_0 = arith.constant 0 : i32
    %c0_i32_1 = arith.constant 0 : i32
    %c0_i32_2 = arith.constant 0 : i32
    %c0_i32_3 = arith.constant 0 : i32
    return %c0_i32, %c0_i32_0, %c0_i32_1, %c0_i32_2 : i32, i32, i32, i32
  }
  func.func @transform_7(%arg0: i32) -> (i32, i32, i32, i32) {
    %c0_i32 = arith.constant 0 : i32
    %c0_i32_0 = arith.constant 0 : i32
    %c0_i32_1 = arith.constant 0 : i32
    %c0_i32_2 = arith.constant 0 : i32
    %c0_i32_3 = arith.constant 0 : i32
    return %c0_i32, %c0_i32_0, %c0_i32_1, %c0_i32_2 : i32, i32, i32, i32
  }
  func.func @transform_8(%arg0: i32) -> (i32, i32, i32, i32) {
    %c0_i32 = arith.constant 0 : i32
    %c0_i32_0 = arith.constant 0 : i32
    %c0_i32_1 = arith.constant 0 : i32
    %c0_i32_2 = arith.constant 0 : i32
    %c0_i32_3 = arith.constant 0 : i32
    return %c0_i32, %c0_i32_0, %c0_i32_1, %c0_i32_2 : i32, i32, i32, i32
  }
  func.func @transform_9(%arg0: i32) -> (i32, i32, i32, i32) {
    %c0_i32 = arith.constant 0 : i32
    %c0_i32_0 = arith.constant 0 : i32
    %c0_i32_1 = arith.constant 0 : i32
    %c0_i32_2 = arith.constant 0 : i32
    %c0_i32_3 = arith.constant 0 : i32
    return %c0_i32, %c0_i32_0, %c0_i32_1, %c0_i32_2 : i32, i32, i32, i32
  }
  func.func @transform_10(%arg0: i32) -> (i32, i32, i32, i32) {
    %c0_i32 = arith.constant 0 : i32
    %c0_i32_0 = arith.constant 0 : i32
    %c0_i32_1 = arith.constant 0 : i32
    %c0_i32_2 = arith.constant 0 : i32
    %c0_i32_3 = arith.constant 0 : i32
    return %c0_i32, %c0_i32_0, %c0_i32_1, %c0_i32_2 : i32, i32, i32, i32
  }
  func.func @transform_11(%arg0: i32) -> (i32, i32, i32, i32) {
    %c0_i32 = arith.constant 0 : i32
    %c0_i32_0 = arith.constant 0 : i32
    %c0_i32_1 = arith.constant 0 : i32
    %c0_i32_2 = arith.constant 0 : i32
    %c0_i32_3 = arith.constant 0 : i32
    return %c0_i32, %c0_i32_0, %c0_i32_1, %c0_i32_2 : i32, i32, i32, i32
  }
  func.func @transform_12(%arg0: i32) -> (i32, i32, i32) {
    %c0_i32 = arith.constant 0 : i32
    %c0_i32_0 = arith.constant 0 : i32
    %c0_i32_1 = arith.constant 0 : i32
    %c0_i32_2 = arith.constant 0 : i32
    return %c0_i32, %c0_i32_0, %c0_i32_1 : i32, i32, i32
  }
  func.func @transform_13(%arg0: i32) -> (i32, i32, i32) {
    %c0_i32 = arith.constant 0 : i32
    %c0_i32_0 = arith.constant 0 : i32
    %c0_i32_1 = arith.constant 0 : i32
    %c0_i32_2 = arith.constant 0 : i32
    return %c0_i32, %c0_i32_0, %c0_i32_1 : i32, i32, i32
  }
  func.func @transform_14(%arg0: i32) -> (i32, i32, i32) {
    %c0_i32 = arith.constant 0 : i32
    %c0_i32_0 = arith.constant 0 : i32
    %c0_i32_1 = arith.constant 0 : i32
    %c0_i32_2 = arith.constant 0 : i32
    return %c0_i32, %c0_i32_0, %c0_i32_1 : i32, i32, i32
  }
  func.func @transform_15(%arg0: i32) -> (i32, i32, i32, i32) {
    %c0_i32 = arith.constant 0 : i32
    %c0_i32_0 = arith.constant 0 : i32
    %c0_i32_1 = arith.constant 0 : i32
    %c0_i32_2 = arith.constant 0 : i32
    %c0_i32_3 = arith.constant 0 : i32
    return %c0_i32, %c0_i32_0, %c0_i32_1, %c0_i32_2 : i32, i32, i32, i32
  }
  func.func @transform_16(%arg0: i32) -> (i32, i32, i32, i32) {
    %c0_i32 = arith.constant 0 : i32
    %c0_i32_0 = arith.constant 0 : i32
    %c0_i32_1 = arith.constant 0 : i32
    %c0_i32_2 = arith.constant 0 : i32
    %c0_i32_3 = arith.constant 0 : i32
    return %c0_i32, %c0_i32_0, %c0_i32_1, %c0_i32_2 : i32, i32, i32, i32
  }
  func.func @transform_17(%arg0: i32) -> (i32, i32, i32, i32) {
    %c0_i32 = arith.constant 0 : i32
    %c0_i32_0 = arith.constant 0 : i32
    %c0_i32_1 = arith.constant 0 : i32
    %c0_i32_2 = arith.constant 0 : i32
    %c0_i32_3 = arith.constant 0 : i32
    return %c0_i32, %c0_i32_0, %c0_i32_1, %c0_i32_2 : i32, i32, i32, i32
  }
  func.func @transform_18(%arg0: i32) -> (i32, i32, i32, i32) {
    %c0_i32 = arith.constant 0 : i32
    %c0_i32_0 = arith.constant 0 : i32
    %c0_i32_1 = arith.constant 0 : i32
    %c0_i32_2 = arith.constant 0 : i32
    %c0_i32_3 = arith.constant 0 : i32
    return %c0_i32, %c0_i32_0, %c0_i32_1, %c0_i32_2 : i32, i32, i32, i32
  }
  func.func @transform_19(%arg0: i32) -> (i32, i32, i32, i32) {
    %c0_i32 = arith.constant 0 : i32
    %c0_i32_0 = arith.constant 0 : i32
    %c0_i32_1 = arith.constant 0 : i32
    %c0_i32_2 = arith.constant 0 : i32
    %c0_i32_3 = arith.constant 0 : i32
    return %c0_i32, %c0_i32_0, %c0_i32_1, %c0_i32_2 : i32, i32, i32, i32
  }
  func.func @transform_20(%arg0: i32) -> (i32, i32, i32, i32) {
    %c0_i32 = arith.constant 0 : i32
    %c0_i32_0 = arith.constant 0 : i32
    %c0_i32_1 = arith.constant 0 : i32
    %c0_i32_2 = arith.constant 0 : i32
    %c0_i32_3 = arith.constant 0 : i32
    return %c0_i32, %c0_i32_0, %c0_i32_1, %c0_i32_2 : i32, i32, i32, i32
  }
  func.func @transform_21(%arg0: i32) -> (i32, i32, i32, i32) {
    %c0_i32 = arith.constant 0 : i32
    %c0_i32_0 = arith.constant 0 : i32
    %c0_i32_1 = arith.constant 0 : i32
    %c0_i32_2 = arith.constant 0 : i32
    %c0_i32_3 = arith.constant 0 : i32
    return %c0_i32, %c0_i32_0, %c0_i32_1, %c0_i32_2 : i32, i32, i32, i32
  }
  func.func @transform_22(%arg0: i32) -> (i32, i32, i32) {
    %c0_i32 = arith.constant 0 : i32
    %c0_i32_0 = arith.constant 0 : i32
    %c0_i32_1 = arith.constant 0 : i32
    %c0_i32_2 = arith.constant 0 : i32
    return %c0_i32, %c0_i32_0, %c0_i32_1 : i32, i32, i32
  }
  func.func @transform_23(%arg0: i32) -> (i32, i32, i32) {
    %c0_i32 = arith.constant 0 : i32
    %c0_i32_0 = arith.constant 0 : i32
    %c0_i32_1 = arith.constant 0 : i32
    %c0_i32_2 = arith.constant 0 : i32
    return %c0_i32, %c0_i32_0, %c0_i32_1 : i32, i32, i32
  }
  func.func @transform_24(%arg0: i32) -> (i32, i32, i32) {
    %c0_i32 = arith.constant 0 : i32
    %c0_i32_0 = arith.constant 0 : i32
    %c0_i32_1 = arith.constant 0 : i32
    %c0_i32_2 = arith.constant 0 : i32
    return %c0_i32, %c0_i32_0, %c0_i32_1 : i32, i32, i32
  }
  func.func @transform_25(%arg0: i32) -> (i32, i32, i32) {
    %c0_i32 = arith.constant 0 : i32
    %c0_i32_0 = arith.constant 0 : i32
    %c0_i32_1 = arith.constant 0 : i32
    %c0_i32_2 = arith.constant 0 : i32
    return %c0_i32, %c0_i32_0, %c0_i32_1 : i32, i32, i32
  }
  func.func @transform_26(%arg0: i32) -> (i32, i32, i32) {
    %c0_i32 = arith.constant 0 : i32
    %c0_i32_0 = arith.constant 0 : i32
    %c0_i32_1 = arith.constant 0 : i32
    %c0_i32_2 = arith.constant 0 : i32
    return %c0_i32, %c0_i32_0, %c0_i32_1 : i32, i32, i32
  }
  func.func @transform_27(%arg0: i32) -> (i32, i32, i32) {
    %c0_i32 = arith.constant 0 : i32
    %c0_i32_0 = arith.constant 0 : i32
    %c0_i32_1 = arith.constant 0 : i32
    %c0_i32_2 = arith.constant 0 : i32
    return %c0_i32, %c0_i32_0, %c0_i32_1 : i32, i32, i32
  }
  func.func @transform_28(%arg0: i32) -> (i32, i32, i32) {
    %c0_i32 = arith.constant 0 : i32
    %c0_i32_0 = arith.constant 0 : i32
    %c0_i32_1 = arith.constant 0 : i32
    %c0_i32_2 = arith.constant 0 : i32
    return %c0_i32, %c0_i32_0, %c0_i32_1 : i32, i32, i32
  }
  func.func @transform_29(%arg0: i32) -> (i32, i32, i32) {
    %c0_i32 = arith.constant 0 : i32
    %c0_i32_0 = arith.constant 0 : i32
    %c0_i32_1 = arith.constant 0 : i32
    %c0_i32_2 = arith.constant 0 : i32
    return %c0_i32, %c0_i32_0, %c0_i32_1 : i32, i32, i32
  }
  func.func @transform_30(%arg0: i32) -> (i32, i32, i32) {
    %c0_i32 = arith.constant 0 : i32
    %c0_i32_0 = arith.constant 0 : i32
    %c0_i32_1 = arith.constant 0 : i32
    %c0_i32_2 = arith.constant 0 : i32
    return %c0_i32, %c0_i32_0, %c0_i32_1 : i32, i32, i32
  }
  func.func @transform_31(%arg0: i32) -> (i32, i32) {
    %c0_i32 = arith.constant 0 : i32
    %c0_i32_0 = arith.constant 0 : i32
    %c0_i32_1 = arith.constant 0 : i32
    return %c0_i32, %c0_i32_0 : i32, i32
  }
  func.func @transform_32(%arg0: i32) -> (i32, i32) {
    %c0_i32 = arith.constant 0 : i32
    %c0_i32_0 = arith.constant 0 : i32
    %c0_i32_1 = arith.constant 0 : i32
    return %c0_i32, %c0_i32_0 : i32, i32
  }
  func.func @transform_33(%arg0: i32) -> (i32, i32, i32) {
    %c0_i32 = arith.constant 0 : i32
    %c0_i32_0 = arith.constant 0 : i32
    %c0_i32_1 = arith.constant 0 : i32
    return %arg0, %c0_i32, %c0_i32_0 : i32, i32, i32
  }
}

</mosaic_0001>

<bundles_post_ra>
// kernel: forward.2
= control target key start
LH: loop header
LB: loop body
LE: loop exit
PB: predicated region body
PF: predicated region fallthrough
CT: control target
= control target key end

     0   :  { %s5335_s29 = smov 0   ;;  %s6058_s0 = inlined_call_operand.vmem [shape: f32[2,8,64], index: 0, kind: input, shape index: {}]   ;;  %s6059_s1 = inlined_call_operand.vmem [shape: f32[2,8,4], index: 1, kind: input, shape index: {}]   ;;  %s6060_s2 = inlined_call_operand.vmem [shape: bf16[64,16], index: 2, kind: input, shape index: {}]   ;;  %s6061_s3 = inlined_call_operand.vmem [shape: f32[1,16], index: 3, kind: input, shape index: {}]   ;;  %s6062_s4 = inlined_call_operand.vmem [shape: bf16[16,32], index: 4, kind: input, shape index: {}]   ;;  %s6063_s5 = inlined_call_operand.vmem [shape: bf16[4,32], index: 5, kind: input, shape index: {}]   ;;  %s6064_s6 = inlined_call_operand.vmem [shape: f32[1,32], index: 6, kind: input, shape index: {}]   ;;  %s6065_s7 = inlined_call_operand.vmem [shape: f32[8,32], index: 7, kind: input, shape index: {}]   ;;  %s6066_s8 = inlined_call_operand.vmem [shape: bf16[2,4,32,8], index: 8, kind: input, shape index: {}]   ;;  %s6067_s9 = inlined_call_operand.vmem [shape: f32[2,4,1,8], index: 9, kind: input, shape index: {}]   ;;  %s6068_s10 = inlined_call_operand.vmem [shape: bf16[2,4,32,8], index: 10, kind: input, shape index: {}]   ;;  %s6069_s11 = inlined_call_operand.vmem [shape: f32[2,4,1,8], index: 11, kind: input, shape index: {}]   ;;  %s6070_s12 = inlined_call_operand.vmem [shape: bf16[2,4,32,8], index: 12, kind: input, shape index: {}]   ;;  %s6071_s13 = inlined_call_operand.vmem [shape: f32[2,4,1,8], index: 13, kind: input, shape index: {}]   ;;  %s6072_s14 = inlined_call_operand.vmem [shape: bf16[2,4,8,32], index: 14, kind: input, shape index: {}]   ;;  %s6073_s15 = inlined_call_operand.vmem [shape: f32[2,1,32], index: 15, kind: input, shape index: {}]   ;;  %s6074_s16 = inlined_call_operand.vmem [shape: f32[2,1,32], index: 16, kind: input, shape index: {}]   ;;  %s6075_s17 = inlined_call_operand.vmem [shape: f32[2,1,32], index: 17, kind: input, shape index: {}]   ;;  %s6076_s18 = inlined_call_operand.vmem [shape: bf16[2,32,32], index: 18, kind: input, shape index: {}]   ;;  %s6077_s19 = inlined_call_operand.vmem [shape: f32[2,1,32], index: 19, kind: input, shape index: {}]   ;;  %s6078_s20 = inlined_call_operand.vmem [shape: bf16[2,32,32], index: 20, kind: input, shape index: {}]   ;;  %s6079_s21 = inlined_call_operand.vmem [shape: f32[2,1,32], index: 21, kind: input, shape index: {}]   ;;  %s6080_s22 = inlined_call_operand.vmem [shape: f32[2,1,32], index: 22, kind: input, shape index: {}]   ;;  %s6081_s23 = inlined_call_operand.vmem [shape: f32[2,1,32], index: 23, kind: input, shape index: {}]   ;;  %s6082_s24 = inlined_call_operand.vmem [shape: f32[2,8,16], index: 24, kind: output, shape index: {0}]   ;;  %s6083_s25 = inlined_call_operand.vmem [shape: f32[2,8,32], index: 25, kind: output, shape index: {1}]  }
   0x1   :  { %6088 = sst [smem:[#allocation3_spill]] %s6058_s0 }
   0x2   :  { %6089 = sst [smem:[#allocation4_spill]] %s6059_s1 }
   0x3   :  { %6090 = sst [smem:[#allocation5_spill]] %s6060_s2 }
   0x4   :  { %6091 = sst [smem:[#allocation6_spill]] %s6061_s3 }
   0x5   :  { %6092 = sst [smem:[#allocation7_spill]] %s6062_s4 }
   0x6   :  { %6093 = sst [smem:[#allocation8_spill]] %s6063_s5 }
   0x7   :  { %6094 = sst [smem:[#allocation9_spill]] %s6064_s6 }
   0x8   :  { %6095 = sst [smem:[#allocation10_spill]] %s6065_s7 }
   0x9   :  { %6096 = sst [smem:[#allocation11_spill]] %s6066_s8 }
   0xa   :  { %6097 = sst [smem:[#allocation12_spill]] %s6067_s9 }
   0xb LB: > { %6098 = sst [smem:[#allocation2_spill]] %s5201_s29  ;;  %s4305_s2 = sadd.s32 4294967295, %s5201_s29   ;;  %s5201_s29 = sphi %s5335_s29, %s36_s29  }
   0xc   : > { %p4309_p0 = scmp.ge.s32.totalorder %s5201_s29, 1  ;;  %p698_p1 = scmp.lt.s32.totalorder %s5201_s29, 3 }
   0xe   : > { %p699_p2 = pnand %p4309_p0, %p698_p1 }
   0xf   : > { %s6099_s7 = sld [smem:[#allocation5_spill]] (!%p699_p2)  ;;  %v5203_v1 = vmov (!%p699_p2), 0.0   ;;  %vm5204_vm0 = vmmov (!%p699_p2), 0   ;;  %p772_p3 = scmp.lt.s32.totalorder (!%p699_p2), %s4305_s2, 1  ;;  %vm886_vm1 = vcmask (!%p699_p2), 1041408   ;;  %vm831_vm2 = vcmask (!%p699_p2), 523264  }
  0x10   : > { %702 = sbr.rel (%p699_p2) target bundleno = 10392 (0x2898), region = 116  ;;  %4692 = vmatprep.subr.bf16.mxu0 (!%p699_p2), %v5203_v1  ;;  %4704 = vmatprep.subr.bf16.mxu1 (!%p699_p2), %v5203_v1  ;;  %s6100_s27 = sld [smem:[#allocation8_spill]] (!%p699_p2)  ;;  %vm882_vm3 = vcmask (!%p699_p2), 31744   ;;  %vm875_vm4 = vcmask (!%p699_p2), 130048   ;;  %v5100_v24 = vld [vmem:[%s6068_s10] sm:$0xff] (!%p699_p2)   ;;  %v5102_v26 = vld [vmem:[%s6068_s10 + $0x8] sm:$0xff] (!%p699_p2)  }
  0x11   : > { %4700 = vmatprep.mubr.msk.bf16.mxu0 (!%p699_p2), %vm5204_vm0, %v5203_v1  ;;  %4706 = vmatprep.mubr.msk.bf16.mxu1 (!%p699_p2), %vm5204_vm0, %v5203_v1  ;;  %s6101_s6 = sld [smem:[#allocation3_spill]] (!%p699_p2)  ;;  %s6102_s1 = sld [smem:[#allocation7_spill]] (!%p699_p2)  ;;  %vm1078_vm5 = vcmask (!%p699_p2), 261120   ;;  %v5103_v36 = vld [vmem:[%s6070_s12] sm:$0xff] (!%p699_p2)   ;;  %v5104_v38 = vld [vmem:[%s6070_s12 + $0x8] sm:$0xff] (!%p699_p2)   ;;  %vm1240_vm6 = vcmask (!%p699_p2), 64512  }
  0x12   : > { %s6103_s28 = sld [smem:[#allocation4_spill]] (!%p699_p2)  ;;  %s6104_s0 = sld [smem:[#allocation6_spill]] (!%p699_p2)  ;;  %v4328_v39 = vld [vmem:[%s6069_s11] ss:$0 sm:$0xff] (!%p699_p2)  ;;  %vm1306_vm7 = vcmask (!%p699_p2), 1043456  }
  0x13   : > { %s6105_s8 = sld [smem:[#allocation11_spill]] (!%p699_p2)  ;;  %v4332_v52 = vld [vmem:[%s6071_s13] ss:$0 sm:$0xff] (!%p699_p2) }
  0x15   : > { %v5094_v0 = vld [vmem:[%s6099_s7] sm:$0xff] (!%p699_p2)   ;;  %v5095_v2 = vld [vmem:[%s6099_s7 + $0x8] sm:$0xff] (!%p699_p2)   ;;  %v5096_v5 = vld [vmem:[%s6099_s7 + $0x10] sm:$0xff] (!%p699_p2)  }
  0x16   : > { %4693 = vmatpush3.bf16.msra.mxu0 (!%p699_p2), %v5094_v0  ;;  %v881_v3 = vld [vmem:[%s6100_s27] sm:$0x3] (!%p699_p2)  ;;  %v5097_v7 = vld [vmem:[%s6099_s7 + $0x18] sm:$0xff] (!%p699_p2)   ;;  %v5107_v0 = vld [vmem:[%s6070_s12 + $0x10] sm:$0xff] (!%p699_p2)  }
  0x17   : > { %4694 = vmatprep.subr.bf16.mxu0 %v5203_v1  ;;  %s6113_s2 = smov (!%p772_p3, %s4305_s2), 1  ;;  %v888_v4 = vsel %vm886_vm1, %v881_v3, 0  ;;  %v5098_v6 = vld [vmem:[%s6102_s1] sm:$0xff]   ;;  %s6107_s1 = sld [smem:[#allocation10_spill]]  ;;  %v989_v3 = vlaneseq }
  0x18   : > { %s5362_s9 = sshll.u32 %s6113_s2, 3  ;;  %4705 = vmatpush3.bf16.msra.mxu1 %v888_v4  ;;  %v4314_v15 = vld [vmem:[%s6104_s0] ss:$0 sm:$0xff] }
  0x19   : > { %s775_s30 = scalar_lea.vmem %s6101_s6, %s5362_s9  ;;  %4710 = vmatprep.subr.bf16.mxu1 %v5203_v1  ;;  %s779_s29 = scalar_lea.vmem %s6103_s28, %s5362_s9  ;;  %v5099_v23 = vld [vmem:[%s6105_s8] sm:$0xff]   ;;  %v5101_v25 = vld [vmem:[%s6105_s8 + $0x8] sm:$0xff]   ;;  %v5105_v58 = vld [vmem:[%s6105_s8 + $0x10] sm:$0xff]   ;;  %v990_v4 = vshrl.u32 %v989_v3, 7 }
  0x1a   : > { %4695 = vmatpush3.bf16.msra.mxu0 %v5095_v2  ;;  %v789_v8 = vld [vmem:[%s775_s30] sm:$0xff]  ;;  %s783_s3 = scalar_lea.vmem %s6082_s24, %s5362_s9  ;;  %s6106_s30 = sld [smem:[#allocation9_spill]]  ;;  %v5106_v63 = vld [vmem:[%s6105_s8 + $0x18] sm:$0xff]  }
  0x1b   : > { %4696 = vmatprep.subr.bf16.mxu0 %v5203_v1  ;;  %v790_v9 = vld [vmem:[%s779_s29] sm:$0xff]  ;;  %v791_v11 = vpack.c.bf16 %v789_v8, %v789_v8  ;;  %v5108_v2 = vld [vmem:[%s6070_s12 + $0x18] sm:$0xff]   ;;  %s787_s27 = scalar_lea.vmem %s6083_s25, %s5362_s9 }
  0x1c   : > { %v880_v10 = vpack.c.bf16 %v790_v9, %v790_v9 }
  0x1d   : > { %v987_v31 = vld [vmem:[%s6107_s1] sm:$0xff] }
  0x1e   : > { %4697 = vmatpush3.bf16.msra.mxu0 %v5096_v5  ;;  %4707 = vmatmul.mubr.msk.bf16.vlgmr.msra.gmra.mrb[0].mxu1 %vm882_vm3, %v880_v10  ;;  %v992_v5 = vand.u32 127, %v989_v3  ;;  %v1055_v3 = vld [vmem:[%s6072_s14 + $0x4] sm:$0xf] }
  0x1f   : > { %4698 = vmatprep.subr.bf16.mxu0 %v5203_v1  ;;  %4711 = vmatpush3.bf16.msra.mxu1 %v5098_v6 }
  0x20   : > { %4712 = vmatprep.mubr.msk.bf16.mxu1 %vm5204_vm0, %v5203_v1  ;;  %4716 = vmatprep.subr.bf16.mxu1 %v5203_v1  ;;  %v4323_v28 = vld [vmem:[%s6106_s30] ss:$0 sm:$0xff]  ;;  %s6108_s30 = sld [smem:[#allocation12_spill]]  ;;  %vm5484_vm8 = vcmp.le.s32.totalorder %v992_v5, %v990_v4  ;;  %v1640_v4 = vsel %vm1306_vm7, %v1055_v3, 0 }
  0x22   : > { %4699 = vmatpush3.bf16.msra.mxu0 %v5097_v7 }
  0x23   : > { %4724 = vmatprep.subr.bf16.mxu0 %v5203_v1 }
  0x25   : > { %4701 = vmatmul.mubr.msk.bf16.vlgmr.msra.gmra.mrb[0].mxu0 %vm831_vm2, %v791_v11 }
  0x26   : > { %4728 = vmatprep.mubr.msk.bf16.mxu0 %vm5204_vm0, %v5203_v1  ;;  %4725 = vmatpush3.bf16.msra.mxu0 %v5100_v24  ;;  %v4324_v50 = vld [vmem:[%s6108_s30] ss:$0 sm:$0xff] }
  0x27   : > { %4726 = vmatprep.subr.bf16.mxu0 %v5203_v1 }
  0x2a   : > { %4727 = vmatpush3.bf16.msra.mxu0 %v5102_v26 }
  0x2b   : > { %4740 = vmatprep.subr.bf16.mxu0 %v5203_v1 }
  0xf1   : > { %v924_v12 = vpop.f32.mrb[0].mxu1 }
  0xf2   : > { %v4708_v13 = vpop.f32.mrb[1].mxu1 }
  0xf3   : > { %v927_v14 = vpop.f32.mrb[2].mxu1 }
  0xf4   : > { %v4709_v16 = vpop.f32.mrb[3].mxu1 }
  0xf8   : > { %v869_v17 = vpop.f32.mrb[0].mxu0 }
  0xf9   : > { %v870_v18 = vadd.f32 %v4314_v15, %v869_v17  ;;  %v4702_v19 = vpop.f32.mrb[1].mxu0 }
  0xfa   : > { %v872_v20 = vpop.f32.mrb[2].mxu0 }
  0xfb   : > { %876 = vst.msk [vmem:[%s783_s3] sm:$0xff] %vm875_vm4, %v870_v18  ;;  %v877_v21 = vpack.c.bf16 %v870_v18, %v870_v18  ;;  %v4703_v22 = vpop.f32.mrb[3].mxu0  ;;  %v4346_v18 = vld [vmem:[%s6071_s13 + $0x1] ss:$0 sm:$0xff] }
  0xfd   : > { %4713 = vmatmul.mubr.msk.bf16.vlgmr.msra.gmra.mrb[4].mxu1 %vm875_vm4, %v877_v21 }
  0xfe   : > { %4720 = vmatprep.mubr.msk.bf16.mxu1 %vm5204_vm0, %v5203_v1  ;;  %4717 = vmatpush3.bf16.msra.mxu1 %v5099_v23 }
  0xff   : > { %4718 = vmatprep.subr.bf16.mxu1 %v5203_v1 }
 0x102   : > { %4719 = vmatpush3.bf16.msra.mxu1 %v5101_v25 }
 0x103   : > { %4732 = vmatprep.subr.bf16.mxu1 %v5203_v1 }
 0x1d0   : > { %v973_v27 = vpop.f32.mrb[4].mxu1 }
 0x1d1   : > { %v974_v29 = vadd.f32 %v973_v27, %v924_v12  ;;  %v4714_v30 = vpop.f32.mrb[5].mxu1 }
 0x1d2   : > { %v976_v32 = vpop.f32.mrb[6].mxu1 }
 0x1d3   : > { %v986_v33 = vadd.f32 %v4323_v28, %v974_v29  ;;  %v4715_v34 = vpop.f32.mrb[7].mxu1 }
 0x1d4   : > { %v5109_v34 = vld [vmem:[%s6068_s10 + $0x10] sm:$0xff]  }
 0x1d5   : > { %v5418_v35 = vadd.f32 %v987_v31, %v986_v33 }
 0x1d7   : > { %v5425_v37 = vpack.c.bf16 %v5418_v35, %v5418_v35 }
 0x1d9   : > { %4721 = vmatmul.mubr.msk.bf16.vlgmr.msra.gmra.mrb[8].mxu1 %vm1078_vm5, %v5425_v37  ;;  %4729 = vmatmul.mubr.msk.bf16.vlgmr.msra.gmra.mrb[4].mxu0 %vm1078_vm5, %v5425_v37 }
 0x1da   : > { %4733 = vmatpush3.bf16.msra.mxu1 %v5103_v36  ;;  %4736 = vmatprep.mubr.msk.bf16.mxu1 %vm5204_vm0, %v5203_v1 }
 0x1db   : > { %4734 = vmatprep.subr.bf16.mxu1 %v5203_v1  ;;  %4742 = vmatprep.mubr.msk.bf16.mxu0 %vm5204_vm0, %v5203_v1 }
 0x1de   : > { %4735 = vmatpush3.bf16.msra.mxu1 %v5104_v38  ;;  %v5110_v38 = vld [vmem:[%s6068_s10 + $0x18] sm:$0xff]  }
 0x1df   : > { %4746 = vmatprep.subr.bf16.mxu1 %v5203_v1 }
 0x1e1   : > { %4737 = vmatmul.mubr.msk.bf16.vlgmr.msra.gmra.mrb[12].mxu1 %vm1078_vm5, %v5425_v37 }
 0x1e2   : > { %4748 = vmatprep.mubr.msk.bf16.mxu1 %vm5204_vm0, %v5203_v1 }
 0x2ac   : > { %v1116_v40 = vpop.f32.mrb[8].mxu1  ;;  %v1174_v41 = vpop.f32.mrb[4].mxu0 }
 0x2ad   : > { %v1175_v42 = vadd.f32 %v4328_v39, %v1174_v41  ;;  %v4722_v43 = vpop.f32.mrb[9].mxu1  ;;  %v4730_v44 = vpop.f32.mrb[5].mxu0  ;;  %v1117_v53 = vadd.f32 %v4324_v50, %v1116_v40  ;;  %v4338_v50 = vld [vmem:[%s6108_s30 + $0x1] ss:$0 sm:$0xff] }
 0x2ae   : > { %v1119_v45 = vpop.f32.mrb[10].mxu1  ;;  %v1177_v46 = vpop.f32.mrb[6].mxu0  ;;  %v4342_v43 = vld [vmem:[%s6069_s11 + $0x1] ss:$0 sm:$0xff] }
 0x2af   : > { %v1239_v47 = vpack.c.bf16 %v1175_v42, %v1175_v42  ;;  %v4723_v48 = vpop.f32.mrb[11].mxu1  ;;  %v4731_v49 = vpop.f32.mrb[7].mxu0  ;;  %v1238_v59 = vpack.c.bf16 %v1117_v53, %v1117_v53 }
 0x2b1   : > { %v1245_v51 = vsel %vm1240_vm6, %v1239_v47, 0 }
 0x2b2   : > { %4741 = vmatpush3.bf16.xpose.msra.mxu0 %v1245_v51 }
 0x2b3   : > { %4752 = vmatprep.subr.bf16.mxu0 %v5203_v1 }
 0x2b4   : > { %v1232_v54 = vpop.f32.mrb[12].mxu1 }
 0x2b5   : > { %v1233_v55 = vadd.f32 %v4332_v52, %v1232_v54  ;;  %v4738_v56 = vpop.f32.mrb[13].mxu1 }
 0x2b6   : > { %v1235_v57 = vpop.f32.mrb[14].mxu1 }
 0x2b7   : > { %v1302_v60 = vpack.c.bf16 %v1233_v55, %v1233_v55  ;;  %v4739_v61 = vpop.f32.mrb[15].mxu1 }
 0x2b9   : > { %v1308_v62 = vsel %vm1306_vm7, %v1302_v60, 0  ;;  %4743 = vmatmul.mubr.msk.bf16.vlgmr.msra.gmra.mrb[8].mxu0 %vm1240_vm6, %v1238_v59 }
 0x2ba   : > { %4747 = vmatpush3.bf16.msra.mxu1 %v1308_v62  ;;  %4753 = vmatpush3.bf16.msra.mxu0 %v5105_v58 }
 0x2bb   : > { %4754 = vmatprep.subr.bf16.mxu0 %v5203_v1  ;;  %4756 = vmatprep.mubr.msk.bf16.mxu0 %vm5204_vm0, %v5203_v1 }
 0x2bc   : > { %4760 = vmatprep.subr.bf16.mxu1 %v5203_v1 }
 0x2be   : > { %4755 = vmatpush3.bf16.msra.mxu0 %v5106_v63 }
 0x2bf   : > { %4768 = vmatprep.subr.bf16.mxu0 %v5203_v1 }
 0x2c1   : > { %4757 = vmatmul.mubr.msk.bf16.vlgmr.msra.gmra.mrb[12].mxu0 %vm1078_vm5, %v5425_v37 }
 0x2c2   : > { %4769 = vmatpush3.bf16.msra.mxu0 %v5107_v0  ;;  %4772 = vmatprep.mubr.msk.bf16.mxu0 %vm5204_vm0, %v5203_v1 }
 0x2c3   : > { %4770 = vmatprep.subr.bf16.mxu0 %v5203_v1 }
 0x2c6   : > { %4771 = vmatpush3.bf16.msra.mxu0 %v5108_v2 }
 0x2c7   : > { %4782 = vmatprep.subr.bf16.mxu0 %v5203_v1 }
 0x2c9   : > { %4773 = vmatmul.mubr.msk.bf16.vlgmr.msra.gmra.mrb[16].mxu0 %vm1078_vm5, %v5425_v37 }
 0x2ca   : > { %4784 = vmatprep.mubr.msk.bf16.mxu0 %vm5204_vm0, %v5203_v1 }
 0x38c   : > { %v1281_v6 = vpop.f32.mrb[8].mxu0 }
 0x38d   : > { %v1287_v8 = vmul.f32 0.35355338, %v1281_v6  ;;  %v4744_v9 = vpop.f32.mrb[9].mxu0 }
 0x38e   : > { %v1284_v10 = vpop.f32.mrb[10].mxu0 }
 0x38f   : > { %v4745_v11 = vpop.f32.mrb[11].mxu0  ;;  %v1288_v12 = vsel %vm5484_vm8, %v1287_v8, -1e+30  ;;  %v1054_v8 = vld [vmem:[%s6072_s14] sm:$0xf] }
 0x390   : > { %v1289_v13 = vsel %vm1240_vm6, %v1288_v12, -inf  ;;  %v1686_v11 = vsel %vm1306_vm7, %v1054_v8, 0  ;;  %v1056_v8 = vld [vmem:[%s6072_s14 + $0x8] sm:$0xf] }
 0x391   : > { %1290 = vmax.xlane.f32.xlu0 %v1289_v13 }
 0x394   : > { %v1403_v14 = vpop.f32.mrb[12].mxu0 }
 0x395   : > { %v4758_v15 = vpop.f32.mrb[13].mxu0  ;;  %v1404_v52 = vadd.f32 %v4338_v50, %v1403_v14  ;;  %v5112_v14 = vld [vmem:[%s6068_s10 + $0x28] sm:$0xff]   ;;  %v4362_v50 = vld [vmem:[%s6071_s13 + $0x2] ss:$0 sm:$0xff] }
 0x396   : > { %v1406_v16 = vpop.f32.mrb[14].mxu0 }
 0x397   : > { %v4759_v17 = vpop.f32.mrb[15].mxu0  ;;  %v1525_v53 = vpack.c.bf16 %v1404_v52, %v1404_v52  ;;  %v5113_v16 = vld [vmem:[%s6105_s8 + $0x20] sm:$0xff]  }
 0x39c   : > { %v1519_v19 = vpop.f32.mrb[16].mxu0 }
 0x39d   : > { %v1520_v20 = vadd.f32 %v4346_v18, %v1519_v19  ;;  %v4774_v21 = vpop.f32.mrb[17].mxu0 }
 0x39e   : > { %v1522_v22 = vpop.f32.mrb[18].mxu0  ;;  %v5114_v21 = vld [vmem:[%s6105_s8 + $0x28] sm:$0xff]  }
 0x39f   : > { %v1588_v23 = vpack.c.bf16 %v1520_v20, %v1520_v20  ;;  %v4775_v24 = vpop.f32.mrb[19].mxu0 }
 0x3a1   : > { %v1593_v25 = vsel %vm1306_vm7, %v1588_v23, 0  ;;  %v5115_v23 = vld [vmem:[%s6070_s12 + $0x20] sm:$0xff]  }
 0x3a2   : > { %4783 = vmatpush3.bf16.msra.mxu0 %v1593_v25 }
 0x3a3   : > { %4794 = vmatprep.subr.bf16.mxu0 %v5203_v1 }
 0x41e   : > { %v1291_v26 = vpop.xlane.xlu0 %1290 }
 0x41f   : > { %v1292_v27 = vsub.f32 %v1288_v12, %v1291_v26  ;;  %v5111_v12 = vld [vmem:[%s6068_s10 + $0x20] sm:$0xff]  }
 0x421   : > { %v1293_v28 = vmul.f32 1.442695, %v1292_v27  ;;  %v5116_v27 = vld [vmem:[%s6070_s12 + $0x28] sm:$0xff]  }
 0x423   : > { %5155 = vpow2.f32 %v1293_v28  ;;  %v4358_v28 = vld [vmem:[%s6069_s11 + $0x2] ss:$0 sm:$0xff] }
 0x42d   : > { %v5156_v29 = vpop.eup %5155 }
 0x42e   : > { %v1295_v30 = vsel %vm1240_vm6, %v5156_v29, 0.0 }
 0x42f   : > { %1296 = vadd.xlane.f32.xlu0 %v1295_v30 }
 0x4bc   : > { %v1297_v31 = vpop.xlane.xlu0 %1296 }
 0x4bd   : > { %5157 = vrcp.f32 %v1297_v31 }
 0x4c7   : > { %v5158_v32 = vpop.eup %5157 }
 0x4c8   : > { %v1300_v33 = vmul.f32 %v5158_v32, %v5156_v29 }
 0x4ca   : > { %v1301_v36 = vpack.c.bf16 %v1300_v33, %v1300_v33 }
 0x4cc   : > { %4749 = vmatmul.mubr.msk.bf16.vlgmr.msra.gmra.mrb[16].mxu1 %vm1240_vm6, %v1301_v36 }
 0x4cd   : > { %4761 = vmatpush3.bf16.msra.mxu1 %v5109_v34  ;;  %4764 = vmatprep.mubr.msk.bf16.mxu1 %vm5204_vm0, %v5203_v1 }
 0x4ce   : > { %4762 = vmatprep.subr.bf16.mxu1 %v5203_v1 }
 0x4d1   : > { %4763 = vmatpush3.bf16.msra.mxu1 %v5110_v38 }
 0x4d2   : > { %4776 = vmatprep.subr.bf16.mxu1 %v5203_v1 }
 0x4d4   : > { %4765 = vmatmul.mubr.msk.bf16.vlgmr.msra.gmra.mrb[20].mxu1 %vm1078_vm5, %v5425_v37 }
 0x4d5   : > { %4778 = vmatprep.mubr.msk.bf16.mxu1 %vm5204_vm0, %v5203_v1 }
 0x59f   : > { %v1344_v39 = vpop.f32.mrb[16].mxu1 }
 0x5a0   : > { %v4750_v40 = vpop.f32.mrb[17].mxu1  ;;  %v1350_v13 = vpack.c.bf16 %v1344_v39, %v1344_v39 }
 0x5a1   : > { %v1347_v41 = vpop.f32.mrb[18].mxu1 }
 0x5a2   : > { %v4751_v42 = vpop.f32.mrb[19].mxu1 }
 0x5a7   : > { %v1461_v44 = vpop.f32.mrb[20].mxu1 }
 0x5a8   : > { %v1462_v45 = vadd.f32 %v4342_v43, %v1461_v44  ;;  %v4766_v46 = vpop.f32.mrb[21].mxu1  ;;  %v4354_v43 = vld [vmem:[%s6108_s30 + $0x2] ss:$0 sm:$0xff] }
 0x5a9   : > { %v1464_v47 = vpop.f32.mrb[22].mxu1 }
 0x5aa   : > { %v1526_v48 = vpack.c.bf16 %v1462_v45, %v1462_v45  ;;  %v4767_v49 = vpop.f32.mrb[23].mxu1 }
 0x5ac   : > { %v1531_v51 = vsel %vm1240_vm6, %v1526_v48, 0 }
 0x5ad   : > { %4777 = vmatpush3.bf16.xpose.msra.mxu1 %v1531_v51 }
 0x5ae   : > { %4788 = vmatprep.subr.bf16.mxu1 %v5203_v1 }
 0x5b4   : > { %4779 = vmatmul.mubr.msk.bf16.vlgmr.msra.gmra.mrb[24].mxu1 %vm1240_vm6, %v1525_v53 }
 0x5b5   : > { %4790 = vmatprep.mubr.msk.bf16.mxu1 %vm5204_vm0, %v5203_v1  ;;  %4789 = vmatpush3.bf16.msra.mxu1 %v1640_v4 }
 0x5b6   : > { %4800 = vmatprep.subr.bf16.mxu1 %v5203_v1 }
 0x687   : > { %v1567_v54 = vpop.f32.mrb[24].mxu1 }
 0x688   : > { %v1573_v55 = vmul.f32 0.35355338, %v1567_v54  ;;  %v4780_v56 = vpop.f32.mrb[25].mxu1 }
 0x689   : > { %v1570_v57 = vpop.f32.mrb[26].mxu1 }
 0x68a   : > { %v4781_v58 = vpop.f32.mrb[27].mxu1  ;;  %v1574_v59 = vsel %vm5484_vm8, %v1573_v55, -1e+30 }
 0x68b   : > { %v1575_v60 = vsel %vm1240_vm6, %v1574_v59, -inf }
 0x68c   : > { %1576 = vmax.xlane.f32.xlu1 %v1575_v60 }
 0x719   : > { %v1577_v61 = vpop.xlane.xlu1 %1576 }
 0x71a   : > { %v1578_v62 = vsub.f32 %v1574_v59, %v1577_v61 }
 0x71c   : > { %v1579_v63 = vmul.f32 1.442695, %v1578_v62 }
 0x71e   : > { %5159 = vpow2.f32 %v1579_v63 }
 0x728   : > { %v5160_v0 = vpop.eup %5159 }
 0x729   : > { %v1581_v2 = vsel %vm1240_vm6, %v5160_v0, 0.0 }
 0x72a   : > { %1582 = vadd.xlane.f32.xlu1 %v1581_v2 }
 0x7b7   : > { %v1583_v5 = vpop.xlane.xlu1 %1582 }
 0x7b8   : > { %5161 = vrcp.f32 %v1583_v5 }
 0x7c2   : > { %v5162_v6 = vpop.eup %5161 }
 0x7c3   : > { %v1586_v9 = vmul.f32 %v5162_v6, %v5160_v0 }
 0x7c5   : > { %v1587_v10 = vpack.c.bf16 %v1586_v9, %v1586_v9  ;;  %v2017_v9 = vsel %vm1306_vm7, %v1056_v8, 0 }
 0x7c7   : > { %4785 = vmatmul.mubr.msk.bf16.vlgmr.msra.gmra.mrb[20].mxu0 %vm1240_vm6, %v1587_v10 }
 0x7c8   : > { %4795 = vmatpush3.bf16.msra.mxu0 %v1686_v11  ;;  %4796 = vmatprep.mubr.msk.bf16.mxu0 %vm5204_vm0, %v5203_v1 }
 0x7c9   : > { %4808 = vmatprep.subr.bf16.mxu0 %v5203_v1 }
 0x7cf   : > { %4797 = vmatmul.mubr.msk.bf16.vlgmr.msra.gmra.mrb[24].mxu0 %vm1240_vm6, %v1350_v13  ;;  %v5117_v13 = vld [vmem:[%s6105_s8 + $0x30] sm:$0xff]  }
 0x7d0   : > { %4809 = vmatpush3.bf16.msra.mxu0 %v5111_v12  ;;  %4812 = vmatprep.mubr.msk.bf16.mxu0 %vm5204_vm0, %v5203_v1 }
 0x7d1   : > { %4810 = vmatprep.subr.bf16.mxu0 %v5203_v1 }
 0x7d4   : > { %4811 = vmatpush3.bf16.msra.mxu0 %v5112_v14 }
 0x7d5   : > { %4824 = vmatprep.subr.bf16.mxu0 %v5203_v1 }
 0x7d7   : > { %4813 = vmatmul.mubr.msk.bf16.vlgmr.msra.gmra.mrb[28].mxu0 %vm1078_vm5, %v5425_v37 }
 0x7d8   : > { %4826 = vmatprep.mubr.msk.bf16.mxu0 %vm5204_vm0, %v5203_v1 }
 0x89a   : > { %v1629_v15 = vpop.f32.mrb[20].mxu0 }
 0x89b   : > { %v1635_v17 = vpack.c.bf16 %v1629_v15, %v1629_v15  ;;  %v4786_v18 = vpop.f32.mrb[21].mxu0  ;;  %v5118_v15 = vld [vmem:[%s6105_s8 + $0x38] sm:$0xff]  }
 0x89c   : > { %v1632_v19 = vpop.f32.mrb[22].mxu0 }
 0x89d   : > { %v4787_v20 = vpop.f32.mrb[23].mxu0  ;;  %4791 = vmatmul.mubr.msk.bf16.vlgmr.msra.gmra.mrb[28].mxu1 %vm1240_vm6, %v1635_v17  ;;  %v5120_v17 = vld [vmem:[%s6070_s12 + $0x38] sm:$0xff]   ;;  %v5121_v19 = vld [vmem:[%s6068_s10 + $0x30] sm:$0xff]  }
 0x89e   : > { %4801 = vmatpush3.bf16.msra.mxu1 %v5113_v16  ;;  %4804 = vmatprep.mubr.msk.bf16.mxu1 %vm5204_vm0, %v5203_v1  ;;  %v5119_v16 = vld [vmem:[%s6070_s12 + $0x30] sm:$0xff]  }
 0x89f   : > { %4802 = vmatprep.subr.bf16.mxu1 %v5203_v1 }
 0x8a2   : > { %v1722_v22 = vpop.f32.mrb[24].mxu0  ;;  %4803 = vmatpush3.bf16.msra.mxu1 %v5114_v21 }
 0x8a3   : > { %v4798_v24 = vpop.f32.mrb[25].mxu0  ;;  %4816 = vmatprep.subr.bf16.mxu1 %v5203_v1 }
 0x8a4   : > { %v1725_v25 = vpop.f32.mrb[26].mxu0  ;;  %v5122_v24 = vld [vmem:[%s6068_s10 + $0x38] sm:$0xff]  }
 0x8a5   : > { %v4799_v26 = vpop.f32.mrb[27].mxu0  ;;  %4805 = vmatmul.mubr.msk.bf16.vlgmr.msra.gmra.mrb[32].mxu1 %vm1078_vm5, %v5425_v37 }
 0x8a6   : > { %4817 = vmatpush3.bf16.msra.mxu1 %v5115_v23  ;;  %4820 = vmatprep.mubr.msk.bf16.mxu1 %vm5204_vm0, %v5203_v1 }
 0x8a7   : > { %4818 = vmatprep.subr.bf16.mxu1 %v5203_v1 }
 0x8aa   : > { %v1838_v29 = vpop.f32.mrb[28].mxu0  ;;  %4819 = vmatpush3.bf16.msra.mxu1 %v5116_v27 }
 0x8ab   : > { %v1839_v30 = vadd.f32 %v4358_v28, %v1838_v29  ;;  %v4814_v31 = vpop.f32.mrb[29].mxu0  ;;  %4830 = vmatprep.subr.bf16.mxu1 %v5203_v1  ;;  %v4377_v29 = vld [vmem:[%s6071_s13 + $0x3] ss:$0 sm:$0xff] }
 0x8ac   : > { %v1841_v32 = vpop.f32.mrb[30].mxu0 }
 0x8ad   : > { %v1903_v33 = vpack.c.bf16 %v1839_v30, %v1839_v30  ;;  %v4815_v34 = vpop.f32.mrb[31].mxu0  ;;  %4821 = vmatmul.mubr.msk.bf16.vlgmr.msra.gmra.mrb[36].mxu1 %vm1078_vm5, %v5425_v37 }
 0x8ae   : > { %4832 = vmatprep.mubr.msk.bf16.mxu1 %vm5204_vm0, %v5203_v1 }
 0x8af   : > { %v1908_v36 = vsel %vm1240_vm6, %v1903_v33, 0 }
 0x8b0   : > { %4825 = vmatpush3.bf16.xpose.msra.mxu0 %v1908_v36 }
 0x8b1   : > { %4836 = vmatprep.subr.bf16.mxu0 %v5203_v1 }
 0x970   : > { %v1676_v38 = vpop.f32.mrb[28].mxu1 }
 0x971   : > { %v5587_v39 = vadd.f32 %v1722_v22, %v1676_v38  ;;  %v4792_v40 = vpop.f32.mrb[29].mxu1 }
 0x972   : > { %v1679_v41 = vpop.f32.mrb[30].mxu1 }
 0x973   : > { %v4793_v42 = vpop.f32.mrb[31].mxu1 }
 0x978   : > { %v1780_v44 = vpop.f32.mrb[32].mxu1 }
 0x979   : > { %v1781_v45 = vadd.f32 %v4354_v43, %v1780_v44  ;;  %v4806_v46 = vpop.f32.mrb[33].mxu1  ;;  %v4373_v44 = vld [vmem:[%s6069_s11 + $0x3] ss:$0 sm:$0xff] }
 0x97a   : > { %v1783_v47 = vpop.f32.mrb[34].mxu1 }
 0x97b   : > { %v1902_v48 = vpack.c.bf16 %v1781_v45, %v1781_v45  ;;  %v4807_v49 = vpop.f32.mrb[35].mxu1 }
 0x97d   : > { %4827 = vmatmul.mubr.msk.bf16.vlgmr.msra.gmra.mrb[32].mxu0 %vm1240_vm6, %v1902_v48 }
 0x97e   : > { %4838 = vmatprep.mubr.msk.bf16.mxu0 %vm5204_vm0, %v5203_v1  ;;  %4837 = vmatpush3.bf16.msra.mxu0 %v2017_v9 }
 0x97f   : > { %4850 = vmatprep.subr.bf16.mxu0 %v5203_v1 }
 0x980   : > { %v1896_v51 = vpop.f32.mrb[36].mxu1 }
 0x981   : > { %v1897_v52 = vadd.f32 %v4362_v50, %v1896_v51  ;;  %v4822_v53 = vpop.f32.mrb[37].mxu1  ;;  %v4369_v51 = vld [vmem:[%s6108_s30 + $0x3] ss:$0 sm:$0xff] }
 0x982   : > { %v1899_v54 = vpop.f32.mrb[38].mxu1 }
 0x983   : > { %v1965_v55 = vpack.c.bf16 %v1897_v52, %v1897_v52  ;;  %v4823_v56 = vpop.f32.mrb[39].mxu1 }
 0x985   : > { %v1970_v57 = vsel %vm1306_vm7, %v1965_v55, 0 }
 0x986   : > { %4831 = vmatpush3.bf16.msra.mxu1 %v1970_v57 }
 0x987   : > { %4842 = vmatprep.subr.bf16.mxu1 %v5203_v1 }
 0xa50   : > { %v1944_v58 = vpop.f32.mrb[32].mxu0 }
 0xa51   : > { %v1950_v59 = vmul.f32 0.35355338, %v1944_v58  ;;  %v4828_v60 = vpop.f32.mrb[33].mxu0 }
 0xa52   : > { %v1947_v61 = vpop.f32.mrb[34].mxu0 }
 0xa53   : > { %v4829_v62 = vpop.f32.mrb[35].mxu0  ;;  %v1951_v63 = vsel %vm5484_vm8, %v1950_v59, -1e+30 }
 0xa54   : > { %v1952_v0 = vsel %vm1240_vm6, %v1951_v63, -inf }
 0xa55   : > { %1953 = vmax.xlane.f32.xlu0 %v1952_v0 }
 0xae2   : > { %v1954_v2 = vpop.xlane.xlu0 %1953 }
 0xae3   : > { %v1955_v3 = vsub.f32 %v1951_v63, %v1954_v2 }
 0xae5   : > { %v1956_v4 = vmul.f32 1.442695, %v1955_v3  ;;  %v1057_v3 = vld [vmem:[%s6072_s14 + $0xc] sm:$0xf] }
 0xae7   : > { %5163 = vpow2.f32 %v1956_v4  ;;  %v2349_v4 = vsel %vm1306_vm7, %v1057_v3, 0  ;;  %v5129_v3 = vld [vmem:[%s6105_s8 + $0x48] sm:$0xff]  }
 0xaf1   : > { %v5164_v5 = vpop.eup %5163 }
 0xaf2   : > { %v1958_v6 = vsel %vm1240_vm6, %v5164_v5, 0.0 }
 0xaf3   : > { %1959 = vadd.xlane.f32.xlu1 %v1958_v6 }
 0xb80   : > { %v1960_v10 = vpop.xlane.xlu1 %1959 }
 0xb81   : > { %5165 = vrcp.f32 %v1960_v10 }
 0xb8b   : > { %v5166_v11 = vpop.eup %5165 }
 0xb8c   : > { %v1963_v12 = vmul.f32 %v5166_v11, %v5164_v5 }
 0xb8e   : > { %v1964_v14 = vpack.c.bf16 %v1963_v12, %v1963_v12 }
 0xb90   : > { %4833 = vmatmul.mubr.msk.bf16.vlgmr.msra.gmra.mrb[40].mxu1 %vm1240_vm6, %v1964_v14 }
 0xb91   : > { %4843 = vmatpush3.bf16.msra.mxu1 %v5117_v13  ;;  %4846 = vmatprep.mubr.msk.bf16.mxu1 %vm5204_vm0, %v5203_v1 }
 0xb92   : > { %4844 = vmatprep.subr.bf16.mxu1 %v5203_v1 }
 0xb95   : > { %4845 = vmatpush3.bf16.msra.mxu1 %v5118_v15  ;;  %v4384_v15 = vld [vmem:[%s6073_s15] ss:$0 sm:$0xff] }
 0xb96   : > { %4858 = vmatprep.subr.bf16.mxu1 %v5203_v1 }
 0xb98   : > { %4847 = vmatmul.mubr.msk.bf16.vlgmr.msra.gmra.mrb[44].mxu1 %vm1078_vm5, %v5425_v37 }
 0xb99   : > { %4859 = vmatpush3.bf16.msra.mxu1 %v5119_v16  ;;  %4862 = vmatprep.mubr.msk.bf16.mxu1 %vm5204_vm0, %v5203_v1 }
 0xb9a   : > { %4860 = vmatprep.subr.bf16.mxu1 %v5203_v1 }
 0xb9d   : > { %4861 = vmatpush3.bf16.msra.mxu1 %v5120_v17 }
 0xb9e   : > { %4872 = vmatprep.subr.bf16.mxu1 %v5203_v1 }
 0xba0   : > { %4863 = vmatmul.mubr.msk.bf16.vlgmr.msra.gmra.mrb[48].mxu1 %vm1078_vm5, %v5425_v37 }
 0xba1   : > { %4874 = vmatprep.mubr.msk.bf16.mxu1 %vm5204_vm0, %v5203_v1 }
 0xc63   : > { %v2006_v18 = vpop.f32.mrb[40].mxu1 }
 0xc64   : > { %v2012_v20 = vpack.c.bf16 %v2006_v18, %v2006_v18  ;;  %v4834_v21 = vpop.f32.mrb[41].mxu1 }
 0xc65   : > { %v2009_v22 = vpop.f32.mrb[42].mxu1 }
 0xc66   : > { %v4835_v23 = vpop.f32.mrb[43].mxu1  ;;  %4839 = vmatmul.mubr.msk.bf16.vlgmr.msra.gmra.mrb[36].mxu0 %vm1240_vm6, %v2012_v20 }
 0xc67   : > { %4851 = vmatpush3.bf16.msra.mxu0 %v5121_v19  ;;  %4854 = vmatprep.mubr.msk.bf16.mxu0 %vm5204_vm0, %v5203_v1 }
 0xc68   : > { %4852 = vmatprep.subr.bf16.mxu0 %v5203_v1 }
 0xc6b   : > { %v2112_v25 = vpop.f32.mrb[44].mxu1  ;;  %4853 = vmatpush3.bf16.msra.mxu0 %v5122_v24 }
 0xc6c   : > { %v4848_v26 = vpop.f32.mrb[45].mxu1  ;;  %4866 = vmatprep.subr.bf16.mxu0 %v5203_v1 }
 0xc6d   : > { %v2115_v27 = vpop.f32.mrb[46].mxu1 }
 0xc6e   : > { %v4849_v28 = vpop.f32.mrb[47].mxu1  ;;  %4855 = vmatmul.mubr.msk.bf16.vlgmr.msra.gmra.mrb[40].mxu0 %vm1078_vm5, %v5425_v37 }
 0xc6f   : > { %4868 = vmatprep.mubr.msk.bf16.mxu0 %vm5204_vm0, %v5203_v1 }
 0xc73   : > { %v2228_v30 = vpop.f32.mrb[48].mxu1 }
 0xc74   : > { %v2229_v31 = vadd.f32 %v4377_v29, %v2228_v30  ;;  %v4864_v32 = vpop.f32.mrb[49].mxu1  ;;  %v5123_v29 = vld [vmem:[%s6076_s18] sm:$0xff]  }
 0xc75   : > { %v2231_v33 = vpop.f32.mrb[50].mxu1 }
 0xc76   : > { %v2297_v34 = vpack.c.bf16 %v2229_v31, %v2229_v31  ;;  %v4865_v36 = vpop.f32.mrb[51].mxu1 }
 0xc78   : > { %v2302_v38 = vsel %vm1306_vm7, %v2297_v34, 0  ;;  %v4385_v34 = vld [vmem:[%s6074_s16] ss:$0 sm:$0xff] }
 0xc79   : > { %4873 = vmatpush3.bf16.msra.mxu1 %v2302_v38  ;;  %v4386_v38 = vld [vmem:[%s6075_s17] ss:$0 sm:$0xff] }
 0xc7a   : > { %4884 = vmatprep.subr.bf16.mxu1 %v5203_v1 }
 0xd39   : > { %v2053_v40 = vpop.f32.mrb[36].mxu0 }
 0xd3a   : > { %v2059_v37 = vadd.f32 %v2053_v40, %v5587_v39  ;;  %v4840_v41 = vpop.f32.mrb[37].mxu0  ;;  %v2113_v39 = vadd.f32 %v4369_v51, %v2112_v25 }
 0xd3b   : > { %v2056_v42 = vpop.f32.mrb[38].mxu0 }
 0xd3c   : > { %v4841_v43 = vpop.f32.mrb[39].mxu0  ;;  %v2234_v53 = vpack.c.bf16 %v2113_v39, %v2113_v39  ;;  %v5125_v42 = vld [vmem:[%s6078_s20] sm:$0xff]  }
 0xd3d   : > { %v5126_v43 = vld [vmem:[%s6078_s20 + $0x8] sm:$0xff]  }
 0xd41   : > { %v2170_v45 = vpop.f32.mrb[40].mxu0 }
 0xd42   : > { %v2171_v46 = vadd.f32 %v4373_v44, %v2170_v45  ;;  %v4856_v47 = vpop.f32.mrb[41].mxu0  ;;  %v4387_v44 = vld [vmem:[%s6077_s19] ss:$0 sm:$0xff] }
 0xd43   : > { %v2173_v48 = vpop.f32.mrb[42].mxu0 }
 0xd44   : > { %v2235_v49 = vpack.c.bf16 %v2171_v46, %v2171_v46  ;;  %v4857_v50 = vpop.f32.mrb[43].mxu0 }
 0xd46   : > { %v2240_v52 = vsel %vm1240_vm6, %v2235_v49, 0 }
 0xd47   : > { %4867 = vmatpush3.bf16.xpose.msra.mxu0 %v2240_v52  ;;  %v4391_v52 = vld [vmem:[%s6079_s21] ss:$0 sm:$0xff] }
 0xd48   : > { %4878 = vmatprep.subr.bf16.mxu0 %v5203_v1 }
 0xd4e   : > { %4869 = vmatmul.mubr.msk.bf16.vlgmr.msra.gmra.mrb[44].mxu0 %vm1240_vm6, %v2234_v53 }
 0xd4f   : > { %4880 = vmatprep.mubr.msk.bf16.mxu0 %vm5204_vm0, %v5203_v1  ;;  %4879 = vmatpush3.bf16.msra.mxu0 %v2349_v4  ;;  %v5130_v4 = vld [vmem:[%s6068_s10 + $0x48] sm:$0xff]  }
 0xd50   : > { %4892 = vmatprep.subr.bf16.mxu0 %v5203_v1 }
 0xe21   : > { %v2276_v54 = vpop.f32.mrb[44].mxu0 }
 0xe22   : > { %v2282_v55 = vmul.f32 0.35355338, %v2276_v54  ;;  %v4870_v56 = vpop.f32.mrb[45].mxu0 }
 0xe23   : > { %v2279_v57 = vpop.f32.mrb[46].mxu0 }
 0xe24   : > { %v4871_v58 = vpop.f32.mrb[47].mxu0  ;;  %v2283_v59 = vsel %vm5484_vm8, %v2282_v55, -1e+30 }
 0xe25   : > { %v2284_v60 = vsel %vm1240_vm6, %v2283_v59, -inf }
 0xe26   : > { %2285 = vmax.xlane.f32.xlu0 %v2284_v60 }
 0xeb3   : > { %v2286_v61 = vpop.xlane.xlu0 %2285 }
 0xeb4   : > { %v2287_v62 = vsub.f32 %v2283_v59, %v2286_v61 }
 0xeb6   : > { %v2288_v63 = vmul.f32 1.442695, %v2287_v62 }
 0xeb8   : > { %5167 = vpow2.f32 %v2288_v63 }
 0xec2   : > { %v5168_v0 = vpop.eup %5167 }
 0xec3   : > { %v2290_v2 = vsel %vm1240_vm6, %v5168_v0, 0.0 }
 0xec4   : > { %2291 = vadd.xlane.f32.xlu1 %v2290_v2  ;;  %v5128_v2 = vld [vmem:[%s6068_s10 + $0x40] sm:$0xff]  }
 0xf51   : > { %v2292_v5 = vpop.xlane.xlu1 %2291 }
 0xf52   : > { %5169 = vrcp.f32 %v2292_v5 }
 0xf5c   : > { %v5170_v6 = vpop.eup %5169 }
 0xf5d   : > { %v2295_v8 = vmul.f32 %v5170_v6, %v5168_v0  ;;  %v5127_v0 = vld [vmem:[%s6105_s8 + $0x40] sm:$0xff]  }
 0xf5f   : > { %v2296_v9 = vpack.c.bf16 %v2295_v8, %v2295_v8 }
 0xf61   : > { %4875 = vmatmul.mubr.msk.bf16.vlgmr.msra.gmra.mrb[52].mxu1 %vm1240_vm6, %v2296_v9 }
 0xf62   : > { %4888 = vmatprep.mubr.msk.bf16.mxu1 %vm5204_vm0, %v5203_v1  ;;  %4885 = vmatpush3.bf16.msra.mxu1 %v5123_v29  ;;  %v4462_v29 = vld [vmem:[%s6108_s30 + $0x4] ss:$0 sm:$0xff] }
 0xf63   : > { %4886 = vmatprep.subr.bf16.mxu1 %v5203_v1 }
0x1034   : > { %v2338_v10 = vpop.f32.mrb[52].mxu1 }
0x1035   : > { %v2344_v11 = vpack.c.bf16 %v2338_v10, %v2338_v10  ;;  %v4876_v12 = vpop.f32.mrb[53].mxu1  ;;  %v4395_v10 = vld [vmem:[%s6080_s22] ss:$0 sm:$0xff] }
0x1036   : > { %v2341_v13 = vpop.f32.mrb[54].mxu1  ;;  %v4396_v12 = vld [vmem:[%s6081_s23] ss:$0 sm:$0xff] }
0x1037   : > { %v4877_v14 = vpop.f32.mrb[55].mxu1  ;;  %4881 = vmatmul.mubr.msk.bf16.vlgmr.msra.gmra.mrb[48].mxu0 %vm1240_vm6, %v2344_v11 }
0x1038   : > { %4896 = vmatprep.mubr.msk.bf16.mxu0 %vm5204_vm0, %v5203_v1  ;;  %4893 = vmatpush3.bf16.msra.mxu0 %v5125_v42 }
0x1039   : > { %4894 = vmatprep.subr.bf16.mxu0 %v5203_v1 }
0x103c   : > { %4895 = vmatpush3.bf16.msra.mxu0 %v5126_v43  ;;  %v5134_v43 = vld [vmem:[%s6105_s8 + $0x58] sm:$0xff]  }
0x103d   : > { %4908 = vmatprep.subr.bf16.mxu0 %v5203_v1 }
0x110a   : > { %v2385_v16 = vpop.f32.mrb[48].mxu0 }
0x110b   : > { %v2391_v17 = vadd.f32 %v2385_v16, %v2059_v37  ;;  %v4882_v18 = vpop.f32.mrb[49].mxu0 }
0x110c   : > { %v2388_v19 = vpop.f32.mrb[50].mxu0  ;;  %v4466_v18 = vld [vmem:[%s6069_s11 + $0x4] ss:$0 sm:$0xff] }
0x110d   : > { %v2398_v20 = vadd.f32 %v4384_v15, %v2391_v17  ;;  %v4883_v21 = vpop.f32.mrb[51].mxu0  ;;  %v5131_v15 = vld [vmem:[%s6070_s12 + $0x40] sm:$0xff]   ;;  %v5132_v17 = vld [vmem:[%s6070_s12 + $0x48] sm:$0xff]  }
0x110f   : > { %v2399_v22 = vadd.f32 %v2398_v20, %v5418_v35  ;;  %v5124_v35 = vld [vmem:[%s6076_s18 + $0x8] sm:$0xff]  }
0x1110   : > { %4887 = vmatpush3.bf16.msra.mxu1 %v5124_v35 }
0x1111   : > { %v2402_v23 = vsel %vm1078_vm5, %v2399_v22, 0.0  ;;  %4900 = vmatprep.subr.bf16.mxu1 %v5203_v1 }
0x1112   : > { %2403 = vadd.xlane.f32.xlu0 %v2402_v23 }
0x119f   : > { %v2404_v24 = vpop.xlane.xlu0 %2403 }
0x11a0   : > { %v2406_v25 = vmul.f32 0.03125, %v2404_v24 }
0x11a2   : > { %v2407_v26 = vsub.f32 %v2399_v22, %v2406_v25 }
0x11a4   : > { %v2408_v27 = vmul.f32 %v2407_v26, %v2407_v26 }
0x11a6   : > { %v2409_v28 = vsel %vm1078_vm5, %v2408_v27, 0.0 }
0x11a7   : > { %2410 = vadd.xlane.f32.xlu1 %v2409_v28 }
0x1234   : > { %v2411_v30 = vpop.xlane.xlu1 %2410 }
0x1235   : > { %v2412_v31 = vmul.f32 0.03125, %v2411_v30  ;;  %v4470_v30 = vld [vmem:[%s6071_s13 + $0x4] ss:$0 sm:$0xff] }
0x1237   : > { %v2413_v32 = vadd.f32 1e-05, %v2412_v31 }
0x1239   : > { %5171 = vrsqrt.f32 %v2413_v32 }
0x1243   : > { %v5172_v33 = vpop.eup %5171 }
0x1244   : > { %v2415_v36 = vmul.f32 %v5172_v33, %v2407_v26 }
0x1246   : > { %v2422_v40 = vmul.f32 %v4385_v34, %v2415_v36 }
0x1248   : > { %v2429_v37 = vadd.f32 %v4386_v38, %v2422_v40  ;;  %v5133_v38 = vld [vmem:[%s6105_s8 + $0x50] sm:$0xff]  }
0x124a   : > { %v2440_v41 = vpack.c.bf16 %v2429_v37, %v2429_v37 }
0x124c   : > { %4889 = vmatmul.mubr.msk.bf16.vlgmr.msra.gmra.mrb[56].mxu1 %vm1078_vm5, %v2440_v41 }
0x124d   : > { %4904 = vmatprep.mubr.msk.bf16.mxu1 %vm5204_vm0, %v5203_v1  ;;  %4901 = vmatpush3.bf16.msra.mxu1 %v5127_v0 }
0x124e   : > { %4902 = vmatprep.subr.bf16.mxu1 %v5203_v1 }
0x1251   : > { %4903 = vmatpush3.bf16.msra.mxu1 %v5129_v3 }
0x1252   : > { %4916 = vmatprep.subr.bf16.mxu1 %v5203_v1 }
0x131f   : > { %v2496_v45 = vpop.f32.mrb[56].mxu1 }
0x1320   : > { %v2497_v46 = vadd.f32 %v4387_v44, %v2496_v45  ;;  %v4890_v47 = vpop.f32.mrb[57].mxu1  ;;  %v5135_v44 = vld [vmem:[%s6070_s12 + $0x50] sm:$0xff]   ;;  %v5136_v45 = vld [vmem:[%s6070_s12 + $0x58] sm:$0xff]  }
0x1321   : > { %v2499_v48 = vpop.f32.mrb[58].mxu1 }
0x1322   : > { %v2502_v49 = vmax.f32 %v2497_v46, 0.0  ;;  %v4891_v50 = vpop.f32.mrb[59].mxu1 }
0x1324   : > { %v2503_v51 = vpack.c.bf16 %v2502_v49, %v2502_v49 }
0x1326   : > { %4897 = vmatmul.mubr.msk.bf16.vlgmr.msra.gmra.mrb[52].mxu0 %vm1078_vm5, %v2503_v51 }
0x1327   : > { %4912 = vmatprep.mubr.msk.bf16.mxu0 %vm5204_vm0, %v5203_v1  ;;  %4909 = vmatpush3.bf16.msra.mxu0 %v5128_v2 }
0x1328   : > { %4910 = vmatprep.subr.bf16.mxu0 %v5203_v1 }
0x132b   : > { %4911 = vmatpush3.bf16.msra.mxu0 %v5130_v4 }
0x132c   : > { %4924 = vmatprep.subr.bf16.mxu0 %v5203_v1 }
0x13f9   : > { %v2559_v39 = vpop.f32.mrb[52].mxu0 }
0x13fa   : > { %v2560_v53 = vadd.f32 %v4391_v52, %v2559_v39  ;;  %v4898_v54 = vpop.f32.mrb[53].mxu0 }
0x13fb   : > { %v2562_v55 = vpop.f32.mrb[54].mxu0 }
0x13fc   : > { %v4899_v56 = vpop.f32.mrb[55].mxu0  ;;  %v2565_v57 = vadd.f32 %v2560_v53, %v2429_v37 }
0x13fd   : > { %v4484_v56 = vld [vmem:[%s6071_s13 + $0x5] ss:$0 sm:$0xff] }
0x13fe   : > { %v2568_v58 = vsel %vm1078_vm5, %v2565_v57, 0.0 }
0x13ff   : > { %2569 = vadd.xlane.f32.xlu0 %v2568_v58 }
0x148c   : > { %v2570_v59 = vpop.xlane.xlu0 %2569 }
0x148d   : > { %v2571_v60 = vmul.f32 0.03125, %v2570_v59 }
0x148f   : > { %v2572_v61 = vsub.f32 %v2565_v57, %v2571_v60 }
0x1491   : > { %v2573_v62 = vmul.f32 %v2572_v61, %v2572_v61 }
0x1493   : > { %v2574_v63 = vsel %vm1078_vm5, %v2573_v62, 0.0 }
0x1494   : > { %2575 = vadd.xlane.f32.xlu1 %v2574_v63 }
0x1521   : > { %v2576_v5 = vpop.xlane.xlu1 %2575 }
0x1522   : > { %v2577_v6 = vmul.f32 0.03125, %v2576_v5 }
0x1524   : > { %v2578_v8 = vadd.f32 1e-05, %v2577_v6 }
0x1526   : > { %5173 = vrsqrt.f32 %v2578_v8 }
0x1530   : > { %v5174_v9 = vpop.eup %5173 }
0x1531   : > { %v2580_v11 = vmul.f32 %v5174_v9, %v2572_v61 }
0x1533   : > { %v2587_v13 = vmul.f32 %v4395_v10, %v2580_v11  ;;  %v5137_v10 = vld [vmem:[%s6068_s10 + $0x50] sm:$0xff]  }
0x1535   : > { %v5747_v14 = vadd.f32 %v4396_v12, %v2587_v13  ;;  %v5138_v12 = vld [vmem:[%s6068_s10 + $0x58] sm:$0xff]  }
0x1537   : > { %v5754_v16 = vpack.c.bf16 %v5747_v14, %v5747_v14 }
0x1539   : > { %4905 = vmatmul.mubr.msk.bf16.vlgmr.msra.gmra.mrb[60].mxu1 %vm1078_vm5, %v5754_v16  ;;  %4913 = vmatmul.mubr.msk.bf16.vlgmr.msra.gmra.mrb[56].mxu0 %vm1078_vm5, %v5754_v16 }
0x153a   : > { %4917 = vmatpush3.bf16.msra.mxu1 %v5131_v15  ;;  %4920 = vmatprep.mubr.msk.bf16.mxu1 %vm5204_vm0, %v5203_v1 }
0x153b   : > { %4918 = vmatprep.subr.bf16.mxu1 %v5203_v1  ;;  %4926 = vmatprep.mubr.msk.bf16.mxu0 %vm5204_vm0, %v5203_v1 }
0x153e   : > { %4919 = vmatpush3.bf16.msra.mxu1 %v5132_v17 }
0x153f   : > { %4930 = vmatprep.subr.bf16.mxu1 %v5203_v1 }
0x1541   : > { %4921 = vmatmul.mubr.msk.bf16.vlgmr.msra.gmra.mrb[64].mxu1 %vm1078_vm5, %v5754_v16 }
0x1542   : > { %4932 = vmatprep.mubr.msk.bf16.mxu1 %vm5204_vm0, %v5203_v1 }
0x160c   : > { %v2724_v19 = vpop.f32.mrb[60].mxu1  ;;  %v2782_v20 = vpop.f32.mrb[56].mxu0 }
0x160d   : > { %v2783_v21 = vadd.f32 %v4466_v18, %v2782_v20  ;;  %v4906_v22 = vpop.f32.mrb[61].mxu1  ;;  %v4914_v23 = vpop.f32.mrb[57].mxu0  ;;  %v2725_v31 = vadd.f32 %v4462_v29, %v2724_v19  ;;  %v4480_v19 = vld [vmem:[%s6069_s11 + $0x5] ss:$0 sm:$0xff] }
0x160e   : > { %v2727_v24 = vpop.f32.mrb[62].mxu1  ;;  %v2785_v25 = vpop.f32.mrb[58].mxu0 }
0x160f   : > { %v2847_v26 = vpack.c.bf16 %v2783_v21, %v2783_v21  ;;  %v4907_v27 = vpop.f32.mrb[63].mxu1  ;;  %v4915_v28 = vpop.f32.mrb[59].mxu0  ;;  %v2846_v40 = vpack.c.bf16 %v2725_v31, %v2725_v31 }
0x1611   : > { %v2852_v35 = vsel %vm1240_vm6, %v2847_v26, 0  ;;  %v4476_v26 = vld [vmem:[%s6108_s30 + $0x5] ss:$0 sm:$0xff] }
0x1612   : > { %4925 = vmatpush3.bf16.xpose.msra.mxu0 %v2852_v35 }
0x1613   : > { %4936 = vmatprep.subr.bf16.mxu0 %v5203_v1 }
0x1614   : > { %v2840_v32 = vpop.f32.mrb[64].mxu1 }
0x1615   : > { %v2841_v33 = vadd.f32 %v4470_v30, %v2840_v32  ;;  %v4922_v34 = vpop.f32.mrb[65].mxu1 }
0x1616   : > { %v2843_v36 = vpop.f32.mrb[66].mxu1 }
0x1617   : > { %v2909_v37 = vpack.c.bf16 %v2841_v33, %v2841_v33  ;;  %v4923_v41 = vpop.f32.mrb[67].mxu1 }
0x1619   : > { %v2914_v42 = vsel %vm1306_vm7, %v2909_v37, 0  ;;  %4927 = vmatmul.mubr.msk.bf16.vlgmr.msra.gmra.mrb[60].mxu0 %vm1240_vm6, %v2846_v40 }
0x161a   : > { %4931 = vmatpush3.bf16.msra.mxu1 %v2914_v42  ;;  %4937 = vmatpush3.bf16.msra.mxu0 %v5133_v38 }
0x161b   : > { %4938 = vmatprep.subr.bf16.mxu0 %v5203_v1  ;;  %4940 = vmatprep.mubr.msk.bf16.mxu0 %vm5204_vm0, %v5203_v1 }
0x161c   : > { %4944 = vmatprep.subr.bf16.mxu1 %v5203_v1 }
0x161e   : > { %4939 = vmatpush3.bf16.msra.mxu0 %v5134_v43  ;;  %v4458_v43 = vld [vmem:[%s6072_s14 + $0x14] sm:$0xf] }
0x161f   : > { %4952 = vmatprep.subr.bf16.mxu0 %v5203_v1 }
0x1621   : > { %4941 = vmatmul.mubr.msk.bf16.vlgmr.msra.gmra.mrb[64].mxu0 %vm1078_vm5, %v5754_v16 }
0x1622   : > { %4953 = vmatpush3.bf16.msra.mxu0 %v5135_v44  ;;  %4956 = vmatprep.mubr.msk.bf16.mxu0 %vm5204_vm0, %v5203_v1  ;;  %v3246_v44 = vsel %vm1306_vm7, %v4458_v43, 0 }
0x1623   : > { %4954 = vmatprep.subr.bf16.mxu0 %v5203_v1 }
0x1626   : > { %4955 = vmatpush3.bf16.msra.mxu0 %v5136_v45 }
0x1627   : > { %4966 = vmatprep.subr.bf16.mxu0 %v5203_v1 }
0x1629   : > { %4957 = vmatmul.mubr.msk.bf16.vlgmr.msra.gmra.mrb[68].mxu0 %vm1078_vm5, %v5754_v16 }
0x162a   : > { %4968 = vmatprep.mubr.msk.bf16.mxu0 %vm5204_vm0, %v5203_v1 }
0x16ec   : > { %v2888_v46 = vpop.f32.mrb[60].mxu0 }
0x16ed   : > { %v2894_v47 = vmul.f32 0.35355338, %v2888_v46  ;;  %v4928_v48 = vpop.f32.mrb[61].mxu0 }
0x16ee   : > { %v2891_v49 = vpop.f32.mrb[62].mxu0 }
0x16ef   : > { %v4929_v50 = vpop.f32.mrb[63].mxu0  ;;  %v2895_v51 = vsel %vm5484_vm8, %v2894_v47, -1e+30  ;;  %v4457_v47 = vld [vmem:[%s6072_s14 + $0x10] sm:$0xf] }
0x16f0   : > { %v2896_v52 = vsel %vm1240_vm6, %v2895_v51, -inf  ;;  %v3292_v50 = vsel %vm1306_vm7, %v4457_v47, 0  ;;  %v4459_v47 = vld [vmem:[%s6072_s14 + $0x18] sm:$0xf] }
0x16f1   : > { %2897 = vmax.xlane.f32.xlu0 %v2896_v52 }
0x16f4   : > { %v3009_v39 = vpop.f32.mrb[64].mxu0 }
0x16f5   : > { %v4942_v53 = vpop.f32.mrb[65].mxu0  ;;  %v3010_v28 = vadd.f32 %v4476_v26, %v3009_v39  ;;  %v5140_v39 = vld [vmem:[%s6068_s10 + $0x68] sm:$0xff]   ;;  %v4500_v26 = vld [vmem:[%s6071_s13 + $0x6] ss:$0 sm:$0xff] }
0x16f6   : > { %v3012_v54 = vpop.f32.mrb[66].mxu0 }
0x16f7   : > { %v4943_v55 = vpop.f32.mrb[67].mxu0  ;;  %v3131_v29 = vpack.c.bf16 %v3010_v28, %v3010_v28  ;;  %v5141_v54 = vld [vmem:[%s6105_s8 + $0x60] sm:$0xff]  }
0x16fc   : > { %v3125_v57 = vpop.f32.mrb[68].mxu0 }
0x16fd   : > { %v3126_v58 = vadd.f32 %v4484_v56, %v3125_v57  ;;  %v4958_v59 = vpop.f32.mrb[69].mxu0 }
0x16fe   : > { %v3128_v60 = vpop.f32.mrb[70].mxu0  ;;  %v5142_v59 = vld [vmem:[%s6105_s8 + $0x68] sm:$0xff]  }
0x16ff   : > { %v3194_v61 = vpack.c.bf16 %v3126_v58, %v3126_v58  ;;  %v4959_v62 = vpop.f32.mrb[71].mxu0 }
0x1701   : > { %v3199_v63 = vsel %vm1306_vm7, %v3194_v61, 0  ;;  %v5143_v61 = vld [vmem:[%s6070_s12 + $0x60] sm:$0xff]  }
0x1702   : > { %4967 = vmatpush3.bf16.msra.mxu0 %v3199_v63 }
0x1703   : > { %4978 = vmatprep.subr.bf16.mxu0 %v5203_v1 }
0x177e   : > { %v2898_v0 = vpop.xlane.xlu0 %2897 }
0x177f   : > { %v2899_v2 = vsub.f32 %v2895_v51, %v2898_v0  ;;  %v5139_v51 = vld [vmem:[%s6068_s10 + $0x60] sm:$0xff]  }
0x1781   : > { %v2900_v3 = vmul.f32 1.442695, %v2899_v2  ;;  %v5144_v2 = vld [vmem:[%s6070_s12 + $0x68] sm:$0xff]  }
0x1783   : > { %5175 = vpow2.f32 %v2900_v3  ;;  %v4496_v3 = vld [vmem:[%s6069_s11 + $0x6] ss:$0 sm:$0xff] }
0x178d   : > { %v5176_v4 = vpop.eup %5175 }
0x178e   : > { %v2902_v5 = vsel %vm1240_vm6, %v5176_v4, 0.0 }
0x178f   : > { %2903 = vadd.xlane.f32.xlu1 %v2902_v5 }
0x181c   : > { %v2904_v6 = vpop.xlane.xlu1 %2903 }
0x181d   : > { %5177 = vrcp.f32 %v2904_v6 }
0x1827   : > { %v5178_v8 = vpop.eup %5177 }
0x1828   : > { %v2907_v9 = vmul.f32 %v5178_v8, %v5176_v4 }
0x182a   : > { %v2908_v11 = vpack.c.bf16 %v2907_v9, %v2907_v9 }
0x182c   : > { %4933 = vmatmul.mubr.msk.bf16.vlgmr.msra.gmra.mrb[68].mxu1 %vm1240_vm6, %v2908_v11 }
0x182d   : > { %4945 = vmatpush3.bf16.msra.mxu1 %v5137_v10  ;;  %4948 = vmatprep.mubr.msk.bf16.mxu1 %vm5204_vm0, %v5203_v1 }
0x182e   : > { %4946 = vmatprep.subr.bf16.mxu1 %v5203_v1 }
0x1831   : > { %4947 = vmatpush3.bf16.msra.mxu1 %v5138_v12 }
0x1832   : > { %4960 = vmatprep.subr.bf16.mxu1 %v5203_v1 }
0x1834   : > { %4949 = vmatmul.mubr.msk.bf16.vlgmr.msra.gmra.mrb[72].mxu1 %vm1078_vm5, %v5754_v16 }
0x1835   : > { %4962 = vmatprep.mubr.msk.bf16.mxu1 %vm5204_vm0, %v5203_v1 }
0x18ff   : > { %v2950_v13 = vpop.f32.mrb[68].mxu1 }
0x1900   : > { %v4934_v15 = vpop.f32.mrb[69].mxu1  ;;  %v2956_v52 = vpack.c.bf16 %v2950_v13, %v2950_v13 }
0x1901   : > { %v2953_v17 = vpop.f32.mrb[70].mxu1 }
0x1902   : > { %v4935_v18 = vpop.f32.mrb[71].mxu1 }
0x1907   : > { %v3067_v20 = vpop.f32.mrb[72].mxu1 }
0x1908   : > { %v3068_v21 = vadd.f32 %v4480_v19, %v3067_v20  ;;  %v4950_v22 = vpop.f32.mrb[73].mxu1  ;;  %v4492_v19 = vld [vmem:[%s6108_s30 + $0x6] ss:$0 sm:$0xff] }
0x1909   : > { %v3070_v23 = vpop.f32.mrb[74].mxu1 }
0x190a   : > { %v3132_v24 = vpack.c.bf16 %v3068_v21, %v3068_v21  ;;  %v4951_v25 = vpop.f32.mrb[75].mxu1 }
0x190c   : > { %v3137_v27 = vsel %vm1240_vm6, %v3132_v24, 0 }
0x190d   : > { %4961 = vmatpush3.bf16.xpose.msra.mxu1 %v3137_v27 }
0x190e   : > { %4972 = vmatprep.subr.bf16.mxu1 %v5203_v1 }
0x1914   : > { %4963 = vmatmul.mubr.msk.bf16.vlgmr.msra.gmra.mrb[76].mxu1 %vm1240_vm6, %v3131_v29 }
0x1915   : > { %4974 = vmatprep.mubr.msk.bf16.mxu1 %vm5204_vm0, %v5203_v1  ;;  %4973 = vmatpush3.bf16.msra.mxu1 %v3246_v44 }
0x1916   : > { %4984 = vmatprep.subr.bf16.mxu1 %v5203_v1 }
0x19e7   : > { %v3173_v35 = vpop.f32.mrb[76].mxu1 }
0x19e8   : > { %v3179_v30 = vmul.f32 0.35355338, %v3173_v35  ;;  %v4964_v31 = vpop.f32.mrb[77].mxu1 }
0x19e9   : > { %v3176_v32 = vpop.f32.mrb[78].mxu1 }
0x19ea   : > { %v4965_v33 = vpop.f32.mrb[79].mxu1  ;;  %v3180_v34 = vsel %vm5484_vm8, %v3179_v30, -1e+30 }
0x19eb   : > { %v3181_v36 = vsel %vm1240_vm6, %v3180_v34, -inf }
0x19ec   : > { %3182 = vmax.xlane.f32.xlu0 %v3181_v36 }
0x1a79   : > { %v3183_v38 = vpop.xlane.xlu0 %3182 }
0x1a7a   : > { %v3184_v40 = vsub.f32 %v3180_v34, %v3183_v38 }
0x1a7c   : > { %v3185_v37 = vmul.f32 1.442695, %v3184_v40 }
0x1a7e   : > { %5179 = vpow2.f32 %v3185_v37 }
0x1a88   : > { %v5180_v41 = vpop.eup %5179 }
0x1a89   : > { %v3187_v42 = vsel %vm1240_vm6, %v5180_v41, 0.0 }
0x1a8a   : > { %3188 = vadd.xlane.f32.xlu1 %v3187_v42 }
0x1b17   : > { %v3189_v45 = vpop.xlane.xlu1 %3188 }
0x1b18   : > { %5181 = vrcp.f32 %v3189_v45 }
0x1b22   : > { %v5182_v46 = vpop.eup %5181 }
0x1b23   : > { %v3192_v48 = vmul.f32 %v5182_v46, %v5180_v41 }
0x1b25   : > { %v3193_v49 = vpack.c.bf16 %v3192_v48, %v3192_v48  ;;  %v3623_v48 = vsel %vm1306_vm7, %v4459_v47, 0 }
0x1b27   : > { %4969 = vmatmul.mubr.msk.bf16.vlgmr.msra.gmra.mrb[72].mxu0 %vm1240_vm6, %v3193_v49 }
0x1b28   : > { %4979 = vmatpush3.bf16.msra.mxu0 %v3292_v50  ;;  %4980 = vmatprep.mubr.msk.bf16.mxu0 %vm5204_vm0, %v5203_v1 }
0x1b29   : > { %4992 = vmatprep.subr.bf16.mxu0 %v5203_v1 }
0x1b2f   : > { %4981 = vmatmul.mubr.msk.bf16.vlgmr.msra.gmra.mrb[76].mxu0 %vm1240_vm6, %v2956_v52  ;;  %v5145_v52 = vld [vmem:[%s6105_s8 + $0x70] sm:$0xff]  }
0x1b30   : > { %4993 = vmatpush3.bf16.msra.mxu0 %v5139_v51  ;;  %4996 = vmatprep.mubr.msk.bf16.mxu0 %vm5204_vm0, %v5203_v1 }
0x1b31   : > { %4994 = vmatprep.subr.bf16.mxu0 %v5203_v1 }
0x1b34   : > { %4995 = vmatpush3.bf16.msra.mxu0 %v5140_v39 }
0x1b35   : > { %5008 = vmatprep.subr.bf16.mxu0 %v5203_v1 }
0x1b37   : > { %4997 = vmatmul.mubr.msk.bf16.vlgmr.msra.gmra.mrb[80].mxu0 %vm1078_vm5, %v5754_v16 }
0x1b38   : > { %5010 = vmatprep.mubr.msk.bf16.mxu0 %vm5204_vm0, %v5203_v1 }
0x1bfa   : > { %v3235_v53 = vpop.f32.mrb[72].mxu0 }
0x1bfb   : > { %v3241_v55 = vpack.c.bf16 %v3235_v53, %v3235_v53  ;;  %v4970_v56 = vpop.f32.mrb[73].mxu0  ;;  %v5146_v53 = vld [vmem:[%s6105_s8 + $0x78] sm:$0xff]  }
0x1bfc   : > { %v3238_v57 = vpop.f32.mrb[74].mxu0 }
0x1bfd   : > { %v4971_v58 = vpop.f32.mrb[75].mxu0  ;;  %4975 = vmatmul.mubr.msk.bf16.vlgmr.msra.gmra.mrb[80].mxu1 %vm1240_vm6, %v3241_v55  ;;  %v5148_v55 = vld [vmem:[%s6070_s12 + $0x78] sm:$0xff]   ;;  %v5149_v57 = vld [vmem:[%s6068_s10 + $0x70] sm:$0xff]  }
0x1bfe   : > { %4985 = vmatpush3.bf16.msra.mxu1 %v5141_v54  ;;  %4988 = vmatprep.mubr.msk.bf16.mxu1 %vm5204_vm0, %v5203_v1  ;;  %v5147_v54 = vld [vmem:[%s6070_s12 + $0x70] sm:$0xff]  }
0x1bff   : > { %4986 = vmatprep.subr.bf16.mxu1 %v5203_v1 }
0x1c02   : > { %v3328_v60 = vpop.f32.mrb[76].mxu0  ;;  %4987 = vmatpush3.bf16.msra.mxu1 %v5142_v59 }
0x1c03   : > { %v4982_v62 = vpop.f32.mrb[77].mxu0  ;;  %5000 = vmatprep.subr.bf16.mxu1 %v5203_v1 }
0x1c04   : > { %v3331_v63 = vpop.f32.mrb[78].mxu0  ;;  %v5150_v62 = vld [vmem:[%s6068_s10 + $0x78] sm:$0xff]  }
0x1c05   : > { %v4983_v0 = vpop.f32.mrb[79].mxu0  ;;  %4989 = vmatmul.mubr.msk.bf16.vlgmr.msra.gmra.mrb[84].mxu1 %vm1078_vm5, %v5754_v16 }
0x1c06   : > { %5001 = vmatpush3.bf16.msra.mxu1 %v5143_v61  ;;  %5004 = vmatprep.mubr.msk.bf16.mxu1 %vm5204_vm0, %v5203_v1 }
0x1c07   : > { %5002 = vmatprep.subr.bf16.mxu1 %v5203_v1 }
0x1c0a   : > { %v3444_v4 = vpop.f32.mrb[80].mxu0  ;;  %5003 = vmatpush3.bf16.msra.mxu1 %v5144_v2 }
0x1c0b   : > { %v3445_v5 = vadd.f32 %v4496_v3, %v3444_v4  ;;  %v4998_v6 = vpop.f32.mrb[81].mxu0  ;;  %5014 = vmatprep.subr.bf16.mxu1 %v5203_v1  ;;  %v4515_v4 = vld [vmem:[%s6071_s13 + $0x7] ss:$0 sm:$0xff] }
0x1c0c   : > { %v3447_v8 = vpop.f32.mrb[82].mxu0 }
0x1c0d   : > { %v3509_v9 = vpack.c.bf16 %v3445_v5, %v3445_v5  ;;  %v4999_v10 = vpop.f32.mrb[83].mxu0  ;;  %5005 = vmatmul.mubr.msk.bf16.vlgmr.msra.gmra.mrb[88].mxu1 %vm1078_vm5, %v5754_v16 }
0x1c0e   : > { %5016 = vmatprep.mubr.msk.bf16.mxu1 %vm5204_vm0, %v5203_v1 }
0x1c0f   : > { %v3514_v11 = vsel %vm1240_vm6, %v3509_v9, 0 }
0x1c10   : > { %5009 = vmatpush3.bf16.xpose.msra.mxu0 %v3514_v11 }
0x1c11   : > { %5020 = vmatprep.subr.bf16.mxu0 %v5203_v1 }
0x1cd0   : > { %v3282_v12 = vpop.f32.mrb[80].mxu1 }
0x1cd1   : > { %v5912_v13 = vadd.f32 %v3328_v60, %v3282_v12  ;;  %v4976_v15 = vpop.f32.mrb[81].mxu1 }
0x1cd2   : > { %v3285_v17 = vpop.f32.mrb[82].mxu1 }
0x1cd3   : > { %v4977_v18 = vpop.f32.mrb[83].mxu1 }
0x1cd8   : > { %v3386_v20 = vpop.f32.mrb[84].mxu1 }
0x1cd9   : > { %v3387_v21 = vadd.f32 %v4492_v19, %v3386_v20  ;;  %v4990_v22 = vpop.f32.mrb[85].mxu1  ;;  %v4511_v20 = vld [vmem:[%s6069_s11 + $0x7] ss:$0 sm:$0xff] }
0x1cda   : > { %v3389_v23 = vpop.f32.mrb[86].mxu1 }
0x1cdb   : > { %v3508_v24 = vpack.c.bf16 %v3387_v21, %v3387_v21  ;;  %v4991_v25 = vpop.f32.mrb[87].mxu1 }
0x1cdd   : > { %5011 = vmatmul.mubr.msk.bf16.vlgmr.msra.gmra.mrb[84].mxu0 %vm1240_vm6, %v3508_v24 }
0x1cde   : > { %5022 = vmatprep.mubr.msk.bf16.mxu0 %vm5204_vm0, %v5203_v1  ;;  %5021 = vmatpush3.bf16.msra.mxu0 %v3623_v48 }
0x1cdf   : > { %5034 = vmatprep.subr.bf16.mxu0 %v5203_v1 }
0x1ce0   : > { %v3502_v27 = vpop.f32.mrb[88].mxu1 }
0x1ce1   : > { %v3503_v28 = vadd.f32 %v4500_v26, %v3502_v27  ;;  %v5006_v29 = vpop.f32.mrb[89].mxu1  ;;  %v4507_v27 = vld [vmem:[%s6108_s30 + $0x7] ss:$0 sm:$0xff] }
0x1ce2   : > { %v3505_v35 = vpop.f32.mrb[90].mxu1 }
0x1ce3   : > { %v3571_v30 = vpack.c.bf16 %v3503_v28, %v3503_v28  ;;  %v5007_v31 = vpop.f32.mrb[91].mxu1 }
0x1ce5   : > { %v3576_v32 = vsel %vm1306_vm7, %v3571_v30, 0 }
0x1ce6   : > { %5015 = vmatpush3.bf16.msra.mxu1 %v3576_v32 }
0x1ce7   : > { %5026 = vmatprep.subr.bf16.mxu1 %v5203_v1 }
0x1db0   : > { %v3550_v33 = vpop.f32.mrb[84].mxu0 }
0x1db1   : > { %v3556_v34 = vmul.f32 0.35355338, %v3550_v33  ;;  %v5012_v36 = vpop.f32.mrb[85].mxu0 }
0x1db2   : > { %v3553_v38 = vpop.f32.mrb[86].mxu0 }
0x1db3   : > { %v5013_v40 = vpop.f32.mrb[87].mxu0  ;;  %v3557_v37 = vsel %vm5484_vm8, %v3556_v34, -1e+30 }
0x1db4   : > { %v3558_v41 = vsel %vm1240_vm6, %v3557_v37, -inf }
0x1db5   : > { %3559 = vmax.xlane.f32.xlu0 %v3558_v41 }
0x1e42   : > { %v3560_v42 = vpop.xlane.xlu0 %3559 }
0x1e43   : > { %v3561_v43 = vsub.f32 %v3557_v37, %v3560_v42 }
0x1e45   : > { %v3562_v44 = vmul.f32 1.442695, %v3561_v43  ;;  %v4460_v43 = vld [vmem:[%s6072_s14 + $0x1c] sm:$0xf] }
0x1e47   : > { %5183 = vpow2.f32 %v3562_v44  ;;  %v3955_v44 = vsel %vm1306_vm7, %v4460_v43, 0  ;;  %v4547_v43 = vld [vmem:[%s6080_s22 + $0x1] ss:$0 sm:$0xff] }
0x1e51   : > { %v5184_v45 = vpop.eup %5183 }
0x1e52   : > { %v3564_v46 = vsel %vm1240_vm6, %v5184_v45, 0.0 }
0x1e53   : > { %3565 = vadd.xlane.f32.xlu1 %v3564_v46 }
0x1ee0   : > { %v3566_v49 = vpop.xlane.xlu1 %3565 }
0x1ee1   : > { %5185 = vrcp.f32 %v3566_v49 }
0x1eeb   : > { %v5186_v50 = vpop.eup %5185 }
0x1eec   : > { %v3569_v51 = vmul.f32 %v5186_v50, %v5184_v45 }
0x1eee   : > { %v3570_v39 = vpack.c.bf16 %v3569_v51, %v3569_v51 }
0x1ef0   : > { %5017 = vmatmul.mubr.msk.bf16.vlgmr.msra.gmra.mrb[92].mxu1 %vm1240_vm6, %v3570_v39  ;;  %v4522_v39 = vld [vmem:[%s6073_s15 + $0x1] ss:$0 sm:$0xff] }
0x1ef1   : > { %5027 = vmatpush3.bf16.msra.mxu1 %v5145_v52  ;;  %5030 = vmatprep.mubr.msk.bf16.mxu1 %vm5204_vm0, %v5203_v1 }
0x1ef2   : > { %5028 = vmatprep.subr.bf16.mxu1 %v5203_v1 }
0x1ef5   : > { %5029 = vmatpush3.bf16.msra.mxu1 %v5146_v53 }
0x1ef6   : > { %5042 = vmatprep.subr.bf16.mxu1 %v5203_v1 }
0x1ef8   : > { %5031 = vmatmul.mubr.msk.bf16.vlgmr.msra.gmra.mrb[96].mxu1 %vm1078_vm5, %v5754_v16 }
0x1ef9   : > { %5043 = vmatpush3.bf16.msra.mxu1 %v5147_v54  ;;  %5046 = vmatprep.mubr.msk.bf16.mxu1 %vm5204_vm0, %v5203_v1 }
0x1efa   : > { %5044 = vmatprep.subr.bf16.mxu1 %v5203_v1 }
0x1efd   : > { %5045 = vmatpush3.bf16.msra.mxu1 %v5148_v55 }
0x1efe   : > { %5056 = vmatprep.subr.bf16.mxu1 %v5203_v1 }
0x1f00   : > { %5047 = vmatmul.mubr.msk.bf16.vlgmr.msra.gmra.mrb[100].mxu1 %vm1078_vm5, %v5754_v16 }
0x1f01   : > { %5058 = vmatprep.mubr.msk.bf16.mxu1 %vm5204_vm0, %v5203_v1 }
0x1fc3   : > { %v3612_v56 = vpop.f32.mrb[92].mxu1 }
0x1fc4   : > { %v3618_v58 = vpack.c.bf16 %v3612_v56, %v3612_v56  ;;  %v5018_v59 = vpop.f32.mrb[93].mxu1 }
0x1fc5   : > { %v3615_v60 = vpop.f32.mrb[94].mxu1 }
0x1fc6   : > { %v5019_v61 = vpop.f32.mrb[95].mxu1  ;;  %5023 = vmatmul.mubr.msk.bf16.vlgmr.msra.gmra.mrb[88].mxu0 %vm1240_vm6, %v3618_v58 }
0x1fc7   : > { %5035 = vmatpush3.bf16.msra.mxu0 %v5149_v57  ;;  %5038 = vmatprep.mubr.msk.bf16.mxu0 %vm5204_vm0, %v5203_v1 }
0x1fc8   : > { %5036 = vmatprep.subr.bf16.mxu0 %v5203_v1 }
0x1fcb   : > { %v3718_v63 = vpop.f32.mrb[96].mxu1  ;;  %5037 = vmatpush3.bf16.msra.mxu0 %v5150_v62 }
0x1fcc   : > { %v5032_v0 = vpop.f32.mrb[97].mxu1  ;;  %5050 = vmatprep.subr.bf16.mxu0 %v5203_v1 }
0x1fcd   : > { %v3721_v2 = vpop.f32.mrb[98].mxu1 }
0x1fce   : > { %v5033_v3 = vpop.f32.mrb[99].mxu1  ;;  %5039 = vmatmul.mubr.msk.bf16.vlgmr.msra.gmra.mrb[92].mxu0 %vm1078_vm5, %v5754_v16 }
0x1fcf   : > { %5052 = vmatprep.mubr.msk.bf16.mxu0 %vm5204_vm0, %v5203_v1  ;;  %v5151_v3 = vld [vmem:[%s6076_s18 + $0x10] sm:$0xff]  }
0x1fd3   : > { %v3834_v5 = vpop.f32.mrb[100].mxu1 }
0x1fd4   : > { %v3835_v6 = vadd.f32 %v4515_v4, %v3834_v5  ;;  %v5048_v8 = vpop.f32.mrb[101].mxu1 }
0x1fd5   : > { %v3837_v9 = vpop.f32.mrb[102].mxu1 }
0x1fd6   : > { %v3903_v10 = vpack.c.bf16 %v3835_v6, %v3835_v6  ;;  %v5049_v11 = vpop.f32.mrb[103].mxu1  ;;  %v4525_v9 = vld [vmem:[%s6074_s16 + $0x1] ss:$0 sm:$0xff] }
0x1fd7   : > { %v4526_v11 = vld [vmem:[%s6075_s17 + $0x1] ss:$0 sm:$0xff] }
0x1fd8   : > { %v3908_v12 = vsel %vm1306_vm7, %v3903_v10, 0 }
0x1fd9   : > { %5057 = vmatpush3.bf16.msra.mxu1 %v3908_v12 }
0x1fda   : > { %5068 = vmatprep.subr.bf16.mxu1 %v5203_v1 }
0x2099   : > { %v3659_v15 = vpop.f32.mrb[88].mxu0 }
0x209a   : > { %v3665_v16 = vadd.f32 %v3659_v15, %v5912_v13  ;;  %v5024_v17 = vpop.f32.mrb[89].mxu0  ;;  %v3719_v13 = vadd.f32 %v4507_v27, %v3718_v63 }
0x209b   : > { %v3662_v18 = vpop.f32.mrb[90].mxu0  ;;  %v5153_v17 = vld [vmem:[%s6078_s20 + $0x10] sm:$0xff]  }
0x209c   : > { %v5025_v19 = vpop.f32.mrb[91].mxu0  ;;  %v3840_v29 = vpack.c.bf16 %v3719_v13, %v3719_v13  ;;  %v5154_v18 = vld [vmem:[%s6078_s20 + $0x18] sm:$0xff]  }
0x209d   : > { %v4537_v19 = vld [vmem:[%s6077_s19 + $0x1] ss:$0 sm:$0xff] }
0x20a1   : > { %v3776_v21 = vpop.f32.mrb[92].mxu0 }
0x20a2   : > { %v3777_v22 = vadd.f32 %v4511_v20, %v3776_v21  ;;  %v5040_v23 = vpop.f32.mrb[93].mxu0 }
0x20a3   : > { %v3779_v24 = vpop.f32.mrb[94].mxu0 }
0x20a4   : > { %v3841_v25 = vpack.c.bf16 %v3777_v22, %v3777_v22  ;;  %v5041_v26 = vpop.f32.mrb[95].mxu0 }
0x20a6   : > { %v3846_v28 = vsel %vm1240_vm6, %v3841_v25, 0 }
0x20a7   : > { %5051 = vmatpush3.bf16.xpose.msra.mxu0 %v3846_v28 }
0x20a8   : > { %5062 = vmatprep.subr.bf16.mxu0 %v5203_v1 }
0x20ae   : > { %5053 = vmatmul.mubr.msk.bf16.vlgmr.msra.gmra.mrb[96].mxu0 %vm1240_vm6, %v3840_v29 }
0x20af   : > { %5064 = vmatprep.mubr.msk.bf16.mxu0 %vm5204_vm0, %v5203_v1  ;;  %5063 = vmatpush3.bf16.msra.mxu0 %v3955_v44 }
0x20b0   : > { %5076 = vmatprep.subr.bf16.mxu0 %v5203_v1 }
0x2181   : > { %v3882_v35 = vpop.f32.mrb[96].mxu0 }
0x2182   : > { %v3888_v30 = vmul.f32 0.35355338, %v3882_v35  ;;  %v5054_v31 = vpop.f32.mrb[97].mxu0 }
0x2183   : > { %v3885_v32 = vpop.f32.mrb[98].mxu0 }
0x2184   : > { %v5055_v33 = vpop.f32.mrb[99].mxu0  ;;  %v3889_v34 = vsel %vm5484_vm8, %v3888_v30, -1e+30 }
0x2185   : > { %v3890_v36 = vsel %vm1240_vm6, %v3889_v34, -inf }
0x2186   : > { %3891 = vmax.xlane.f32.xlu0 %v3890_v36 }
0x2213   : > { %v3892_v38 = vpop.xlane.xlu0 %3891 }
0x2214   : > { %v3893_v40 = vsub.f32 %v3889_v34, %v3892_v38 }
0x2216   : > { %v3894_v37 = vmul.f32 1.442695, %v3893_v40 }
0x2218   : > { %5187 = vpow2.f32 %v3894_v37 }
0x2222   : > { %v5188_v41 = vpop.eup %5187 }
0x2223   : > { %v3896_v42 = vsel %vm1240_vm6, %v5188_v41, 0.0 }
0x2224   : > { %3897 = vadd.xlane.f32.xlu1 %v3896_v42 }
0x22b1   : > { %v3898_v7 = vpop.xlane.xlu1 %3897 }
0x22b2   : > { %5189 = vrcp.f32 %v3898_v7  ;;  %v4548_v7 = vld [vmem:[%s6081_s23 + $0x1] ss:$0 sm:$0xff] }
0x22bc   : > { %v5190_v45 = vpop.eup %5189 }
0x22bd   : > { %v3901_v46 = vmul.f32 %v5190_v45, %v5188_v41 }
0x22bf   : > { %v3902_v47 = vpack.c.bf16 %v3901_v46, %v3901_v46 }
0x22c1   : > { %5059 = vmatmul.mubr.msk.bf16.vlgmr.msra.gmra.mrb[104].mxu1 %vm1240_vm6, %v3902_v47 }
0x22c2   : > { %5072 = vmatprep.mubr.msk.bf16.mxu1 %vm5204_vm0, %v5203_v1  ;;  %5069 = vmatpush3.bf16.msra.mxu1 %v5151_v3 }
0x22c3   : > { %5070 = vmatprep.subr.bf16.mxu1 %v5203_v1 }
0x2394   : > { %v3944_v48 = vpop.f32.mrb[104].mxu1 }
0x2395   : > { %v3950_v49 = vpack.c.bf16 %v3944_v48, %v3944_v48  ;;  %v5060_v50 = vpop.f32.mrb[105].mxu1 }
0x2396   : > { %v3947_v51 = vpop.f32.mrb[106].mxu1 }
0x2397   : > { %v5061_v52 = vpop.f32.mrb[107].mxu1  ;;  %5065 = vmatmul.mubr.msk.bf16.vlgmr.msra.gmra.mrb[100].mxu0 %vm1240_vm6, %v3950_v49 }
0x2398   : > { %5080 = vmatprep.mubr.msk.bf16.mxu0 %vm5204_vm0, %v5203_v1  ;;  %5077 = vmatpush3.bf16.msra.mxu0 %v5153_v17 }
0x2399   : > { %5078 = vmatprep.subr.bf16.mxu0 %v5203_v1  ;;  %v4541_v1 = vld [vmem:[%s6079_s21 + $0x1] ss:$0 sm:$0xff] }
0x239c   : > { %5079 = vmatpush3.bf16.msra.mxu0 %v5154_v18 }
0x246a   : > { %v3991_v53 = vpop.f32.mrb[100].mxu0 }
0x246b   : > { %v3997_v54 = vadd.f32 %v3991_v53, %v3665_v16  ;;  %v5066_v55 = vpop.f32.mrb[101].mxu0 }
0x246c   : > { %v3994_v56 = vpop.f32.mrb[102].mxu0 }
0x246d   : > { %v4004_v57 = vadd.f32 %v4522_v39, %v3997_v54  ;;  %v5067_v58 = vpop.f32.mrb[103].mxu0 }
0x246f   : > { %v4005_v59 = vadd.f32 %v4004_v57, %v5747_v14  ;;  %v5152_v14 = vld [vmem:[%s6076_s18 + $0x18] sm:$0xff]  }
0x2470   : > { %5071 = vmatpush3.bf16.msra.mxu1 %v5152_v14 }
0x2471   : > { %v4010_v60 = vsel %vm1078_vm5, %v4005_v59, 0.0 }
0x2472   : > { %4011 = vadd.xlane.f32.xlu0 %v4010_v60 }
0x24ff   : > { %v4012_v61 = vpop.xlane.xlu0 %4011 }
0x2500   : > { %v4013_v62 = vmul.f32 0.03125, %v4012_v61 }
0x2502   : > { %v4014_v63 = vsub.f32 %v4005_v59, %v4013_v62 }
0x2504   : > { %v4015_v0 = vmul.f32 %v4014_v63, %v4014_v63 }
0x2506   : > { %v4016_v2 = vsel %vm1078_vm5, %v4015_v0, 0.0 }
0x2507   : > { %4017 = vadd.xlane.f32.xlu1 %v4016_v2 }
0x2594   : > { %v4018_v4 = vpop.xlane.xlu1 %4017 }
0x2595   : > { %v4019_v5 = vmul.f32 0.03125, %v4018_v4 }
0x2597   : > { %v4020_v6 = vadd.f32 1e-05, %v4019_v5 }
0x2599   : > { %5191 = vrsqrt.f32 %v4020_v6 }
0x25a3   : > { %v5192_v8 = vpop.eup %5191 }
0x25a4   : > { %v4022_v10 = vmul.f32 %v5192_v8, %v4014_v63 }
0x25a6   : > { %v4029_v12 = vmul.f32 %v4525_v9, %v4022_v10 }
0x25a8   : > { %v4036_v15 = vadd.f32 %v4526_v11, %v4029_v12 }
0x25aa   : > { %v4051_v16 = vpack.c.bf16 %v4036_v15, %v4036_v15 }
0x25ac   : > { %5073 = vmatmul.mubr.msk.bf16.vlgmr.msra.gmra.mrb[108].mxu1 %vm1078_vm5, %v4051_v16 }
0x267f   : > { %v4107_v20 = vpop.f32.mrb[108].mxu1 }
0x2680   : > { %v4108_v21 = vadd.f32 %v4537_v19, %v4107_v20  ;;  %v5074_v22 = vpop.f32.mrb[109].mxu1 }
0x2681   : > { %v4110_v23 = vpop.f32.mrb[110].mxu1 }
0x2682   : > { %v4113_v24 = vmax.f32 %v4108_v21, 0.0  ;;  %v5075_v25 = vpop.f32.mrb[111].mxu1 }
0x2684   : > { %v4114_v26 = vpack.c.bf16 %v4113_v24, %v4113_v24 }
0x2686   : > { %5081 = vmatmul.mubr.msk.bf16.vlgmr.msra.gmra.mrb[104].mxu0 %vm1078_vm5, %v4114_v26 }
0x2759   : > { %v4170_v27 = vpop.f32.mrb[104].mxu0 }
0x275a   : > { %v4171_v28 = vadd.f32 %v4541_v1, %v4170_v27  ;;  %v5082_v13 = vpop.f32.mrb[105].mxu0 }
0x275b   : > { %v4173_v29 = vpop.f32.mrb[106].mxu0 }
0x275c   : > { %v5083_v35 = vpop.f32.mrb[107].mxu0  ;;  %v4176_v30 = vadd.f32 %v4171_v28, %v4036_v15 }
0x275e   : > { %v4181_v31 = vsel %vm1078_vm5, %v4176_v30, 0.0 }
0x275f   : > { %4182 = vadd.xlane.f32.xlu0 %v4181_v31 }
0x27ec   : > { %v4183_v32 = vpop.xlane.xlu0 %4182 }
0x27ed   : > { %v4184_v33 = vmul.f32 0.03125, %v4183_v32 }
0x27ef   : > { %v4185_v34 = vsub.f32 %v4176_v30, %v4184_v33 }
0x27f1   : > { %v4186_v36 = vmul.f32 %v4185_v34, %v4185_v34 }
0x27f3   : > { %v4187_v38 = vsel %vm1078_vm5, %v4186_v36, 0.0 }
0x27f4   : > { %4188 = vadd.xlane.f32.xlu1 %v4187_v38 }
0x2881   : > { %v4189_v40 = vpop.xlane.xlu1 %4188 }
0x2882   : > { %v4190_v37 = vmul.f32 0.03125, %v4189_v40 }
0x2884   : > { %v4191_v41 = vadd.f32 1e-05, %v4190_v37 }
0x2886   : > { %5193 = vrsqrt.f32 %v4191_v41 }
0x2890   : > { %v5194_v42 = vpop.eup %5193 }
0x2891   : > { %v4193_v44 = vmul.f32 %v5194_v42, %v4185_v34 }
0x2893   : > { %v4200_v45 = vmul.f32 %v4547_v43, %v4193_v44 }
0x2895   : > { %v4207_v46 = vadd.f32 %v4548_v7, %v4200_v45 }
0x2897   : > { %4208 = vst.msk [vmem:[%s787_s27] sm:$0xff] %vm1078_vm5, %v4207_v46 }
0x2898 PF: > { %s6111_s2 = sld [smem:[#allocation2_spill]] }
0x289e   : > { %s36_s29 = sadd.s32 1, %s6111_s2  }
0x289f   : > { %p33_p4 = scmp.ge.s32.totalorder %s36_s29, 4  }
0x28a1   :  { %35 = sbr.rel (!%p33_p4) target bundleno = 11 (0xb), region = 177 }

// kernel: forward.3
= control target key start
LH: loop header
LB: loop body
LE: loop exit
PB: predicated region body
PF: predicated region fallthrough
CT: control target
= control target key end

     0   :  { %s8994_s6 = smov 1   ;;  %s8995_s10 = smov 2   ;;  %s10111_s0 = inlined_call_operand.smem [shape: u32[34], index: -1, kind: input, shape index: {}] }
   0x1   :  { %s9037_s5 = sld [smem:[%s10111_s0]]   ;;  %s8996_s14 = smov 3  }
   0x2   :  { %s9042_s9 = sld [smem:[%s10111_s0 + %s8994_s6]]   ;;  %s8997_s18 = smov 4  }
   0x3   :  { %s9047_s13 = sld [smem:[%s10111_s0 + %s8995_s10]]   ;;  %s8998_s22 = smov 5  }
   0x4   :  { %s9052_s17 = sld [smem:[%s10111_s0 + %s8996_s14]]   ;;  %s8999_s26 = smov 6  }
   0x5   :  { %s9057_s21 = sld [smem:[%s10111_s0 + %s8997_s18]]   ;;  %s9000_s30 = smov 7  }
   0x6   :  { %s9062_s25 = sld [smem:[%s10111_s0 + %s8998_s22]]   ;;  %s9001_s4 = smov 8  }
   0x7   :  { %10129 = sst [smem:[#allocation2_spill]] %s9037_s5  ;;  %s9002_s10 = smov 9  }
   0x8   :  { %10130 = sst [smem:[#allocation3_spill]] %s9042_s9  ;;  %s9003_s15 = smov 10  }
   0x9   :  { %10131 = sst [smem:[#allocation4_spill]] %s9047_s13  ;;  %s9004_s20 = smov 11  }
   0xa   :  { %10132 = sst [smem:[#allocation5_spill]] %s9052_s17  ;;  %s9006_s1 = smov 13  }
   0xb   :  { %10133 = sst [smem:[#allocation6_spill]] %s9057_s21  ;;  %s9007_s7 = smov 14  }
   0xc   :  { %s9067_s29 = sld [smem:[%s10111_s0 + %s8999_s26]]   ;;  %s9005_s26 = smov 12  }
   0xd   :  { %s9072_s3 = sld [smem:[%s10111_s0 + %s9000_s30]]   ;;  %s9009_s22 = smov 16  }
   0xe   :  { %s9077_s8 = sld [smem:[%s10111_s0 + %s9001_s4]]   ;;  %s9010_s28 = smov 17  }
   0xf   :  { %s9082_s14 = sld [smem:[%s10111_s0 + %s9002_s10]]  }
  0x10   :  { %s9087_s19 = sld [smem:[%s10111_s0 + %s9003_s15]]   ;;  %s9008_s15 = smov 15  }
  0x11   :  { %s9092_s24 = sld [smem:[%s10111_s0 + %s9004_s20]]  }
  0x12   :  { %s9097_s30 = sld [smem:[%s10111_s0 + %s9005_s26]]  }
  0x13   :  { %s9102_s6 = sld [smem:[%s10111_s0 + %s9006_s1]]  }
  0x14   :  { %s9107_s12 = sld [smem:[%s10111_s0 + %s9007_s7]]   ;;  %s9011_s7 = smov 18  }
  0x15   :  { %s9112_s20 = sld [smem:[%s10111_s0 + %s9008_s15]]   ;;  %s9012_s15 = smov 19  }
  0x16   :  { %s9117_s27 = sld [smem:[%s10111_s0 + %s9009_s22]]   ;;  %s9013_s22 = smov 20  }
  0x17   :  { %s9122_s4 = sld [smem:[%s10111_s0 + %s9010_s28]]   ;;  %s9014_s28 = smov 21  }
  0x19   :  { %10134 = sst [smem:[#allocation7_spill]] %s9102_s6 }
  0x1a   :  { %10135 = sst [smem:[#allocation8_spill]] %s9107_s12 }
  0x1b   :  { %10136 = sst [smem:[#allocation9_spill]] %s9112_s20 }
  0x1c   :  { %10137 = sst [smem:[#allocation10_spill]] %s9117_s27 }
  0x1d   :  { %s9127_s12 = sld [smem:[%s10111_s0 + %s9011_s7]]   ;;  %s9015_s7 = smov 22  }
  0x1e   :  { %s9132_s6 = sld [smem:[%s10111_s0 + %s9012_s15]]   ;;  %s9016_s15 = smov 23  }
  0x1f   :  { %s9137_s27 = sld [smem:[%s10111_s0 + %s9013_s22]]   ;;  %s9017_s22 = smov 24  }
  0x20   :  { %s9142_s20 = sld [smem:[%s10111_s0 + %s9014_s28]]   ;;  %s9018_s28 = smov 25  }
  0x23   :  { %10138 = sst [smem:[#allocation11_spill]] %s9127_s12 }
  0x24   :  { %10139 = sst [smem:[#allocation12_spill]] %s9132_s6 }
  0x25   :  { %10140 = sst [smem:[#allocation13_spill]] %s9137_s27 }
  0x26   :  { %10141 = sst [smem:[#allocation14_spill]] %s9142_s20 }
  0x27   :  { %s9147_s12 = sld [smem:[%s10111_s0 + %s9015_s7]]   ;;  %s9019_s7 = smov 26  }
  0x28   :  { %s9152_s6 = sld [smem:[%s10111_s0 + %s9016_s15]]   ;;  %s9020_s15 = smov 27  }
  0x29   :  { %s9157_s27 = sld [smem:[%s10111_s0 + %s9017_s22]]   ;;  %s9021_s22 = smov 28  }
  0x2a   :  { %s9162_s20 = sld [smem:[%s10111_s0 + %s9018_s28]]   ;;  %s9022_s28 = smov 29  }
  0x2d   :  { %10142 = sst [smem:[#allocation15_spill]] %s9147_s12 }
  0x2e   :  { %10143 = sst [smem:[#allocation16_spill]] %s9152_s6 }
  0x2f   :  { %10144 = sst [smem:[#allocation17_spill]] %s9157_s27 }
  0x30   :  { %10145 = sst [smem:[#allocation18_spill]] %s9162_s20 }
  0x31   :  { %s9167_s12 = sld [smem:[%s10111_s0 + %s9019_s7]]   ;;  %s9023_s7 = smov 30  }
  0x32   :  { %s9172_s6 = sld [smem:[%s10111_s0 + %s9020_s15]]   ;;  %s9024_s15 = smov 31  }
  0x33   :  { %s9177_s27 = sld [smem:[%s10111_s0 + %s9021_s22]]   ;;  %s9025_s22 = smov 32  }
  0x34   :  { %s9182_s20 = sld [smem:[%s10111_s0 + %s9022_s28]]   ;;  %s9026_s28 = smov 33  }
  0x37   :  { %10146 = sst [smem:[#allocation19_spill]] %s9167_s12 }
  0x38   :  { %10147 = sst [smem:[#allocation20_spill]] %s9172_s6 }
  0x39   :  { %10148 = sst [smem:[#allocation21_spill]] %s9177_s27 }
  0x3a   :  { %10149 = sst [smem:[#allocation22_spill]] %s9182_s20 }
  0x3b   :  { %s9187_s12 = sld [smem:[%s10111_s0 + %s9023_s7]]   ;;  %s9204_s7 = smov 0  }
  0x3c   :  { %s9192_s6 = sld [smem:[%s10111_s0 + %s9024_s15]]  }
  0x3d   :  { %s9197_s27 = sld [smem:[%s10111_s0 + %s9025_s22]]  }
  0x3e   :  { %s9202_s20 = sld [smem:[%s10111_s0 + %s9026_s28]]  }
  0x3f LB: > { %s7352_s10 = sadd.s32 4294967295, %s8992_s7   ;;  %p7356_p0 = scmp.ge.s32.totalorder %s8992_s7, 1  ;;  %s8992_s7 = sphi %s9204_s7, %s77_s7  }
  0x40   : > { %p929_p1 = scmp.lt.s32.totalorder %s8992_s7, 3 }
  0x42   : > { %p930_p2 = pnand %p7356_p0, %p929_p1 }
  0x43   : > { %s10150_s13 = sld [smem:[#allocation4_spill]] (!%p930_p2)  ;;  %s10151_s5 = sld [smem:[#allocation2_spill]] (!%p930_p2)  ;;  %vm1043_vm0 = vcmask (!%p930_p2), 1041408   ;;  %v9027_v1 = vmov (!%p930_p2), 0.0   ;;  %vm9028_vm1 = vmmov (!%p930_p2), 0   ;;  %vm1039_vm2 = vcmask (!%p930_p2), 31744  }
  0x44   : > { %933 = sbr.rel (%p930_p2) target bundleno = 18840 (0x4998), region = 152  ;;  %p1015_p3 = scmp.lt.s32.totalorder (!%p930_p2), %s7352_s10, 1  ;;  %8043 = vmatprep.subr.bf16.mxu0 (!%p930_p2), %v9027_v1  ;;  %8045 = vmatprep.mubr.msk.bf16.mxu0 (!%p930_p2), %vm9028_vm1, %v9027_v1  ;;  %v8804_v5 = vld [vmem:[%s9062_s25] sm:$0xff] (!%p930_p2)   ;;  %v8806_v7 = vld [vmem:[%s9062_s25 + $0x8] sm:$0xff] (!%p930_p2)   ;;  %vm1178_vm3 = vcmask (!%p930_p2), 261120   ;;  %vm1340_vm4 = vcmask (!%p930_p2), 64512   ;;  %v1089_v47 = vlaneseq (!%p930_p2) }
  0x45   : > { %8049 = vmatprep.subr.bf16.mxu1 (!%p930_p2), %v9027_v1  ;;  %8053 = vmatprep.mubr.msk.bf16.mxu1 (!%p930_p2), %vm9028_vm1, %v9027_v1  ;;  %s10152_s17 = sld [smem:[#allocation5_spill]] (!%p930_p2)  ;;  %s10153_s21 = sld [smem:[#allocation6_spill]] (!%p930_p2)  ;;  %v8805_v6 = vld [vmem:[%s9072_s3] sm:$0xff] (!%p930_p2)   ;;  %v8807_v8 = vld [vmem:[%s9072_s3 + $0x8] sm:$0xff] (!%p930_p2)   ;;  %vm1406_vm5 = vcmask (!%p930_p2), 1043456   ;;  %v8810_v39 = vld [vmem:[%s9062_s25 + $0x10] sm:$0xff] (!%p930_p2)  }
  0x46   : > { %8050 = vmatpush3.bf16.msra.mxu1 (!%p930_p2), %v8804_v5  ;;  %v8808_v17 = vld [vmem:[%s9082_s14] sm:$0xff] (!%p930_p2)   ;;  %v8809_v19 = vld [vmem:[%s9082_s14 + $0x8] sm:$0xff] (!%p930_p2)   ;;  %v8811_v44 = vld [vmem:[%s9062_s25 + $0x18] sm:$0xff] (!%p930_p2)   ;;  %v1090_v48 = vshrl.u32 (!%p930_p2), %v1089_v47, 7  ;;  %v1092_v49 = vand.u32 (!%p930_p2), 127, %v1089_v47  ;;  %s10156_s9 = sld [smem:[#allocation3_spill]] (!%p930_p2) }
  0x47   : > { %8051 = vmatprep.subr.bf16.mxu1 (!%p930_p2), %v9027_v1  ;;  %v7366_v20 = vld [vmem:[%s9077_s8] ss:$0 sm:$0xff] (!%p930_p2)  ;;  %v8812_v45 = vld [vmem:[%s9082_s14 + $0x10] sm:$0xff] (!%p930_p2)   ;;  %v8813_v46 = vld [vmem:[%s9082_s14 + $0x18] sm:$0xff] (!%p930_p2)   ;;  %s10157_s15 = sld [smem:[#allocation9_spill]] (!%p930_p2)  ;;  %s10158_s18 = sld [smem:[#allocation7_spill]] (!%p930_p2) }
  0x48   : > { %v7362_v31 = vld [vmem:[%s9067_s29] ss:$0 sm:$0xff] (!%p930_p2)  ;;  %vm9285_vm6 = vcmp.le.s32.totalorder (!%p930_p2), %v1092_v49, %v1090_v48  ;;  %v7384_v62 = vld [vmem:[%s9087_s19 + $0x1] ss:$0 sm:$0xff] (!%p930_p2)  ;;  %v1155_v47 = vld [vmem:[%s9092_s24 + $0x4] sm:$0xf] (!%p930_p2) }
  0x49   : > { %v1031_v0 = vld [vmem:[%s10150_s13] sm:$0x3] (!%p930_p2)  ;;  %v1740_v48 = vsel (!%p930_p2), %vm1406_vm5, %v1155_v47, 0  ;;  %s10159_s22 = sld [smem:[#allocation8_spill]] (!%p930_p2)  ;;  %s10160_s23 = sld [smem:[#allocation11_spill]] (!%p930_p2) }
  0x4a   : > { %v1045_v2 = vsel (!%p930_p2), %vm1043_vm0, %v1031_v0, 0  ;;  %8052 = vmatpush3.bf16.msra.mxu1 (!%p930_p2), %v8806_v7  ;;  %v7370_v33 = vld [vmem:[%s9087_s19] ss:$0 sm:$0xff] (!%p930_p2)  ;;  %s10161_s26 = sld [smem:[#allocation10_spill]] (!%p930_p2)  ;;  %s10162_s28 = sld [smem:[#allocation12_spill]] (!%p930_p2) }
  0x4b   : > { %8044 = vmatpush3.bf16.msra.mxu0 %v1045_v2  ;;  %s10174_s10 = smov (!%p1015_p3, %s7352_s10), 1  ;;  %8065 = vmatprep.subr.bf16.mxu1 %v9027_v1  ;;  %v7360_v9 = vld [vmem:[%s10152_s17] ss:$0 sm:$0xff]  ;;  %s10163_s1 = sld [smem:[#allocation13_spill]] }
  0x4c   : > { %8057 = vmatprep.subr.bf16.mxu0 %v9027_v1  ;;  %s9220_s0 = sshll.u32 %s10174_s10, 3  ;;  %v1087_v11 = vld [vmem:[%s10153_s21] sm:$0xff]  ;;  %s10164_s2 = sld [smem:[#allocation14_spill]] }
  0x4d   : > { %s1018_s11 = scalar_lea.vmem %s10151_s5, %s9220_s0  ;;  %s1022_s16 = scalar_lea.vmem %s10156_s9, %s9220_s0 }
  0x4e   : > { %v1028_v3 = vld [vmem:[%s1018_s11] sm:$0xff]  ;;  %s10165_s10 = sld [smem:[#allocation15_spill]]  ;;  %s10166_s11 = sld [smem:[#allocation18_spill]] }
  0x4f   : > { %v1030_v4 = vpack.c.bf16 %v1028_v3, %v1028_v3  ;;  %s10168_s5 = sld [smem:[#allocation17_spill]]  ;;  %s10169_s9 = sld [smem:[#allocation20_spill]] }
  0x50   : > { %s10170_s13 = sld [smem:[#allocation19_spill]]  ;;  %s10171_s17 = sld [smem:[#allocation21_spill]] }
  0x51   : > { %8046 = vmatmul.mubr.msk.bf16.vlgmr.msra.gmra.mrb[0].mxu0 %vm1039_vm2, %v1030_v4  ;;  %s10172_s21 = sld [smem:[#allocation22_spill]] }
  0x52   : > { %8061 = vmatprep.mubr.msk.bf16.mxu0 %vm9028_vm1, %v9027_v1  ;;  %8058 = vmatpush3.bf16.msra.mxu0 %v8805_v6 }
  0x53   : > { %8059 = vmatprep.subr.bf16.mxu0 %v9027_v1 }
  0x56   : > { %8060 = vmatpush3.bf16.msra.mxu0 %v8807_v8 }
  0x57   : > { %8073 = vmatprep.subr.bf16.mxu0 %v9027_v1 }
 0x124   : > { %v1081_v10 = vpop.f32.mrb[0].mxu0 }
 0x125   : > { %v1082_v12 = vadd.f32 %v7360_v9, %v1081_v10  ;;  %v8047_v13 = vpop.f32.mrb[1].mxu0 }
 0x126   : > { %v1084_v14 = vpop.f32.mrb[2].mxu0 }
 0x127   : > { %v9237_v15 = vadd.f32 %v1087_v11, %v1082_v12  ;;  %v8048_v16 = vpop.f32.mrb[3].mxu0 }
 0x128   : > { %v8814_v16 = vld [vmem:[%s9072_s3 + $0x10] sm:$0xff]  }
 0x129   : > { %v9242_v18 = vpack.c.bf16 %v9237_v15, %v9237_v15 }
 0x12b   : > { %8054 = vmatmul.mubr.msk.bf16.vlgmr.msra.gmra.mrb[0].mxu1 %vm1178_vm3, %v9242_v18  ;;  %8062 = vmatmul.mubr.msk.bf16.vlgmr.msra.gmra.mrb[4].mxu0 %vm1178_vm3, %v9242_v18 }
 0x12c   : > { %8066 = vmatpush3.bf16.msra.mxu1 %v8808_v17  ;;  %8069 = vmatprep.mubr.msk.bf16.mxu1 %vm9028_vm1, %v9027_v1 }
 0x12d   : > { %8067 = vmatprep.subr.bf16.mxu1 %v9027_v1  ;;  %8075 = vmatprep.mubr.msk.bf16.mxu0 %vm9028_vm1, %v9027_v1 }
 0x130   : > { %8068 = vmatpush3.bf16.msra.mxu1 %v8809_v19  ;;  %v8815_v19 = vld [vmem:[%s9072_s3 + $0x18] sm:$0xff]  }
 0x131   : > { %8079 = vmatprep.subr.bf16.mxu1 %v9027_v1 }
 0x133   : > { %8070 = vmatmul.mubr.msk.bf16.vlgmr.msra.gmra.mrb[4].mxu1 %vm1178_vm3, %v9242_v18 }
 0x134   : > { %8081 = vmatprep.mubr.msk.bf16.mxu1 %vm9028_vm1, %v9027_v1 }
 0x1fe   : > { %v1216_v21 = vpop.f32.mrb[0].mxu1  ;;  %v1274_v22 = vpop.f32.mrb[4].mxu0 }
 0x1ff   : > { %v1275_v23 = vadd.f32 %v7366_v20, %v1274_v22  ;;  %v8055_v24 = vpop.f32.mrb[1].mxu1  ;;  %v8063_v25 = vpop.f32.mrb[5].mxu0  ;;  %v1217_v34 = vadd.f32 %v7362_v31, %v1216_v21  ;;  %v7376_v31 = vld [vmem:[%s9067_s29 + $0x1] ss:$0 sm:$0xff] }
 0x200   : > { %v1219_v26 = vpop.f32.mrb[2].mxu1  ;;  %v1277_v27 = vpop.f32.mrb[6].mxu0  ;;  %v7380_v24 = vld [vmem:[%s9077_s8 + $0x1] ss:$0 sm:$0xff] }
 0x201   : > { %v1339_v28 = vpack.c.bf16 %v1275_v23, %v1275_v23  ;;  %v8056_v29 = vpop.f32.mrb[3].mxu1  ;;  %v8064_v30 = vpop.f32.mrb[7].mxu0  ;;  %v1338_v40 = vpack.c.bf16 %v1217_v34, %v1217_v34 }
 0x203   : > { %v1345_v32 = vsel %vm1340_vm4, %v1339_v28, 0 }
 0x204   : > { %8074 = vmatpush3.bf16.xpose.msra.mxu0 %v1345_v32 }
 0x205   : > { %8085 = vmatprep.subr.bf16.mxu0 %v9027_v1 }
 0x206   : > { %v1332_v35 = vpop.f32.mrb[4].mxu1 }
 0x207   : > { %v1333_v36 = vadd.f32 %v7370_v33, %v1332_v35  ;;  %v8071_v37 = vpop.f32.mrb[5].mxu1 }
 0x208   : > { %v1335_v38 = vpop.f32.mrb[6].mxu1 }
 0x209   : > { %v1402_v41 = vpack.c.bf16 %v1333_v36, %v1333_v36  ;;  %v8072_v42 = vpop.f32.mrb[7].mxu1 }
 0x20b   : > { %v1408_v43 = vsel %vm1406_vm5, %v1402_v41, 0  ;;  %8076 = vmatmul.mubr.msk.bf16.vlgmr.msra.gmra.mrb[8].mxu0 %vm1340_vm4, %v1338_v40 }
 0x20c   : > { %8080 = vmatpush3.bf16.msra.mxu1 %v1408_v43  ;;  %8086 = vmatpush3.bf16.msra.mxu0 %v8810_v39 }
 0x20d   : > { %8087 = vmatprep.subr.bf16.mxu0 %v9027_v1  ;;  %8089 = vmatprep.mubr.msk.bf16.mxu0 %vm9028_vm1, %v9027_v1 }
 0x20e   : > { %8093 = vmatprep.subr.bf16.mxu1 %v9027_v1 }
 0x210   : > { %8088 = vmatpush3.bf16.msra.mxu0 %v8811_v44 }
 0x211   : > { %8101 = vmatprep.subr.bf16.mxu0 %v9027_v1 }
 0x213   : > { %8090 = vmatmul.mubr.msk.bf16.vlgmr.msra.gmra.mrb[12].mxu0 %vm1178_vm3, %v9242_v18 }
 0x214   : > { %8102 = vmatpush3.bf16.msra.mxu0 %v8812_v45  ;;  %8105 = vmatprep.mubr.msk.bf16.mxu0 %vm9028_vm1, %v9027_v1 }
 0x215   : > { %8103 = vmatprep.subr.bf16.mxu0 %v9027_v1 }
 0x218   : > { %8104 = vmatpush3.bf16.msra.mxu0 %v8813_v46 }
 0x219   : > { %8115 = vmatprep.subr.bf16.mxu0 %v9027_v1 }
 0x21b   : > { %8106 = vmatmul.mubr.msk.bf16.vlgmr.msra.gmra.mrb[16].mxu0 %vm1178_vm3, %v9242_v18 }
 0x21c   : > { %8117 = vmatprep.mubr.msk.bf16.mxu0 %vm9028_vm1, %v9027_v1 }
 0x2de   : > { %v1381_v50 = vpop.f32.mrb[8].mxu0 }
 0x2df   : > { %v1387_v52 = vmul.f32 0.35355338, %v1381_v50  ;;  %v8077_v53 = vpop.f32.mrb[9].mxu0 }
 0x2e0   : > { %v1384_v54 = vpop.f32.mrb[10].mxu0 }
 0x2e1   : > { %v8078_v55 = vpop.f32.mrb[11].mxu0  ;;  %v1388_v56 = vsel %vm9285_vm6, %v1387_v52, -1e+30  ;;  %v1154_v52 = vld [vmem:[%s9092_s24] sm:$0xf] }
 0x2e2   : > { %v1389_v57 = vsel %vm1340_vm4, %v1388_v56, -inf  ;;  %v1786_v55 = vsel %vm1406_vm5, %v1154_v52, 0  ;;  %v1156_v52 = vld [vmem:[%s9092_s24 + $0x8] sm:$0xf] }
 0x2e3   : > { %1390 = vmax.xlane.f32.xlu0 %v1389_v57 }
 0x2e6   : > { %v1503_v58 = vpop.f32.mrb[12].mxu0 }
 0x2e7   : > { %v8091_v59 = vpop.f32.mrb[13].mxu0  ;;  %v1504_v33 = vadd.f32 %v7376_v31, %v1503_v58  ;;  %v8817_v58 = vld [vmem:[%s9072_s3 + $0x28] sm:$0xff]   ;;  %v7400_v31 = vld [vmem:[%s9087_s19 + $0x2] ss:$0 sm:$0xff] }
 0x2e8   : > { %v1506_v60 = vpop.f32.mrb[14].mxu0 }
 0x2e9   : > { %v8092_v61 = vpop.f32.mrb[15].mxu0  ;;  %v1625_v34 = vpack.c.bf16 %v1504_v33, %v1504_v33  ;;  %v8818_v60 = vld [vmem:[%s9062_s25 + $0x20] sm:$0xff]  }
 0x2ee   : > { %v1619_v63 = vpop.f32.mrb[16].mxu0 }
 0x2ef   : > { %v1620_v0 = vadd.f32 %v7384_v62, %v1619_v63  ;;  %v8107_v2 = vpop.f32.mrb[17].mxu0 }
 0x2f0   : > { %v1622_v3 = vpop.f32.mrb[18].mxu0  ;;  %v8819_v2 = vld [vmem:[%s9062_s25 + $0x28] sm:$0xff]  }
 0x2f1   : > { %v1688_v4 = vpack.c.bf16 %v1620_v0, %v1620_v0  ;;  %v8108_v5 = vpop.f32.mrb[19].mxu0 }
 0x2f3   : > { %v1693_v6 = vsel %vm1406_vm5, %v1688_v4, 0  ;;  %v8820_v4 = vld [vmem:[%s9082_s14 + $0x20] sm:$0xff]  }
 0x2f4   : > { %8116 = vmatpush3.bf16.msra.mxu0 %v1693_v6 }
 0x2f5   : > { %8127 = vmatprep.subr.bf16.mxu0 %v9027_v1 }
 0x370   : > { %v1391_v7 = vpop.xlane.xlu0 %1390 }
 0x371   : > { %v1392_v8 = vsub.f32 %v1388_v56, %v1391_v7  ;;  %v8816_v56 = vld [vmem:[%s9072_s3 + $0x20] sm:$0xff]  }
 0x373   : > { %v1393_v9 = vmul.f32 1.442695, %v1392_v8  ;;  %v8821_v8 = vld [vmem:[%s9082_s14 + $0x28] sm:$0xff]  }
 0x375   : > { %8910 = vpow2.f32 %v1393_v9  ;;  %v7396_v9 = vld [vmem:[%s9077_s8 + $0x2] ss:$0 sm:$0xff] }
 0x37f   : > { %v8911_v10 = vpop.eup %8910 }
 0x380   : > { %v1395_v11 = vsel %vm1340_vm4, %v8911_v10, 0.0 }
 0x381   : > { %1396 = vadd.xlane.f32.xlu0 %v1395_v11 }
 0x40e   : > { %v1397_v12 = vpop.xlane.xlu0 %1396 }
 0x40f   : > { %8912 = vrcp.f32 %v1397_v12 }
 0x419   : > { %v8913_v13 = vpop.eup %8912 }
 0x41a   : > { %v1400_v14 = vmul.f32 %v8913_v13, %v8911_v10 }
 0x41c   : > { %v1401_v17 = vpack.c.bf16 %v1400_v14, %v1400_v14 }
 0x41e   : > { %8082 = vmatmul.mubr.msk.bf16.vlgmr.msra.gmra.mrb[8].mxu1 %vm1340_vm4, %v1401_v17 }
 0x41f   : > { %8094 = vmatpush3.bf16.msra.mxu1 %v8814_v16  ;;  %8097 = vmatprep.mubr.msk.bf16.mxu1 %vm9028_vm1, %v9027_v1 }
 0x420   : > { %8095 = vmatprep.subr.bf16.mxu1 %v9027_v1 }
 0x423   : > { %8096 = vmatpush3.bf16.msra.mxu1 %v8815_v19 }
 0x424   : > { %8109 = vmatprep.subr.bf16.mxu1 %v9027_v1 }
 0x426   : > { %8098 = vmatmul.mubr.msk.bf16.vlgmr.msra.gmra.mrb[12].mxu1 %vm1178_vm3, %v9242_v18 }
 0x427   : > { %8111 = vmatprep.mubr.msk.bf16.mxu1 %vm9028_vm1, %v9027_v1 }
 0x4f1   : > { %v1444_v20 = vpop.f32.mrb[8].mxu1 }
 0x4f2   : > { %v8083_v21 = vpop.f32.mrb[9].mxu1  ;;  %v1450_v57 = vpack.c.bf16 %v1444_v20, %v1444_v20 }
 0x4f3   : > { %v1447_v22 = vpop.f32.mrb[10].mxu1 }
 0x4f4   : > { %v8084_v23 = vpop.f32.mrb[11].mxu1 }
 0x4f9   : > { %v1561_v25 = vpop.f32.mrb[12].mxu1 }
 0x4fa   : > { %v1562_v26 = vadd.f32 %v7380_v24, %v1561_v25  ;;  %v8099_v27 = vpop.f32.mrb[13].mxu1  ;;  %v7392_v24 = vld [vmem:[%s9067_s29 + $0x2] ss:$0 sm:$0xff] }
 0x4fb   : > { %v1564_v28 = vpop.f32.mrb[14].mxu1 }
 0x4fc   : > { %v1626_v29 = vpack.c.bf16 %v1562_v26, %v1562_v26  ;;  %v8100_v30 = vpop.f32.mrb[15].mxu1 }
 0x4fe   : > { %v1631_v32 = vsel %vm1340_vm4, %v1626_v29, 0 }
 0x4ff   : > { %8110 = vmatpush3.bf16.xpose.msra.mxu1 %v1631_v32 }
 0x500   : > { %8121 = vmatprep.subr.bf16.mxu1 %v9027_v1 }
 0x506   : > { %8112 = vmatmul.mubr.msk.bf16.vlgmr.msra.gmra.mrb[16].mxu1 %vm1340_vm4, %v1625_v34 }
 0x507   : > { %8123 = vmatprep.mubr.msk.bf16.mxu1 %vm9028_vm1, %v9027_v1  ;;  %8122 = vmatpush3.bf16.msra.mxu1 %v1740_v48 }
 0x508   : > { %8133 = vmatprep.subr.bf16.mxu1 %v9027_v1 }
 0x5d9   : > { %v1667_v35 = vpop.f32.mrb[16].mxu1 }
 0x5da   : > { %v1673_v36 = vmul.f32 0.35355338, %v1667_v35  ;;  %v8113_v37 = vpop.f32.mrb[17].mxu1 }
 0x5db   : > { %v1670_v38 = vpop.f32.mrb[18].mxu1 }
 0x5dc   : > { %v8114_v39 = vpop.f32.mrb[19].mxu1  ;;  %v1674_v40 = vsel %vm9285_vm6, %v1673_v36, -1e+30 }
 0x5dd   : > { %v1675_v41 = vsel %vm1340_vm4, %v1674_v40, -inf }
 0x5de   : > { %1676 = vmax.xlane.f32.xlu1 %v1675_v41 }
 0x66b   : > { %v1677_v42 = vpop.xlane.xlu1 %1676 }
 0x66c   : > { %v1678_v43 = vsub.f32 %v1674_v40, %v1677_v42 }
 0x66e   : > { %v1679_v44 = vmul.f32 1.442695, %v1678_v43 }
 0x670   : > { %8914 = vpow2.f32 %v1679_v44 }
 0x67a   : > { %v8915_v45 = vpop.eup %8914 }
 0x67b   : > { %v1681_v46 = vsel %vm1340_vm4, %v8915_v45, 0.0 }
 0x67c   : > { %1682 = vadd.xlane.f32.xlu1 %v1681_v46 }
 0x709   : > { %v1683_v49 = vpop.xlane.xlu1 %1682 }
 0x70a   : > { %8916 = vrcp.f32 %v1683_v49 }
 0x714   : > { %v8917_v50 = vpop.eup %8916 }
 0x715   : > { %v1686_v53 = vmul.f32 %v8917_v50, %v8915_v45 }
 0x717   : > { %v1687_v54 = vpack.c.bf16 %v1686_v53, %v1686_v53  ;;  %v2117_v53 = vsel %vm1406_vm5, %v1156_v52, 0 }
 0x719   : > { %8118 = vmatmul.mubr.msk.bf16.vlgmr.msra.gmra.mrb[20].mxu0 %vm1340_vm4, %v1687_v54 }
 0x71a   : > { %8128 = vmatpush3.bf16.msra.mxu0 %v1786_v55  ;;  %8129 = vmatprep.mubr.msk.bf16.mxu0 %vm9028_vm1, %v9027_v1 }
 0x71b   : > { %8141 = vmatprep.subr.bf16.mxu0 %v9027_v1 }
 0x721   : > { %8130 = vmatmul.mubr.msk.bf16.vlgmr.msra.gmra.mrb[24].mxu0 %vm1340_vm4, %v1450_v57  ;;  %v8822_v57 = vld [vmem:[%s9062_s25 + $0x30] sm:$0xff]  }
 0x722   : > { %8142 = vmatpush3.bf16.msra.mxu0 %v8816_v56  ;;  %8145 = vmatprep.mubr.msk.bf16.mxu0 %vm9028_vm1, %v9027_v1 }
 0x723   : > { %8143 = vmatprep.subr.bf16.mxu0 %v9027_v1 }
 0x726   : > { %8144 = vmatpush3.bf16.msra.mxu0 %v8817_v58 }
 0x727   : > { %8157 = vmatprep.subr.bf16.mxu0 %v9027_v1 }
 0x729   : > { %8146 = vmatmul.mubr.msk.bf16.vlgmr.msra.gmra.mrb[28].mxu0 %vm1178_vm3, %v9242_v18 }
 0x72a   : > { %8159 = vmatprep.mubr.msk.bf16.mxu0 %vm9028_vm1, %v9027_v1 }
 0x7ec   : > { %v1729_v59 = vpop.f32.mrb[20].mxu0 }
 0x7ed   : > { %v1735_v61 = vpack.c.bf16 %v1729_v59, %v1729_v59  ;;  %v8119_v62 = vpop.f32.mrb[21].mxu0  ;;  %v8823_v59 = vld [vmem:[%s9062_s25 + $0x38] sm:$0xff]  }
 0x7ee   : > { %v1732_v63 = vpop.f32.mrb[22].mxu0 }
 0x7ef   : > { %v8120_v0 = vpop.f32.mrb[23].mxu0  ;;  %8124 = vmatmul.mubr.msk.bf16.vlgmr.msra.gmra.mrb[20].mxu1 %vm1340_vm4, %v1735_v61  ;;  %v8825_v61 = vld [vmem:[%s9082_s14 + $0x38] sm:$0xff]   ;;  %v8826_v63 = vld [vmem:[%s9072_s3 + $0x30] sm:$0xff]  }
 0x7f0   : > { %8134 = vmatpush3.bf16.msra.mxu1 %v8818_v60  ;;  %8137 = vmatprep.mubr.msk.bf16.mxu1 %vm9028_vm1, %v9027_v1  ;;  %v8824_v60 = vld [vmem:[%s9082_s14 + $0x30] sm:$0xff]  }
 0x7f1   : > { %8135 = vmatprep.subr.bf16.mxu1 %v9027_v1 }
 0x7f4   : > { %v1822_v3 = vpop.f32.mrb[24].mxu0  ;;  %8136 = vmatpush3.bf16.msra.mxu1 %v8819_v2 }
 0x7f5   : > { %v8131_v5 = vpop.f32.mrb[25].mxu0  ;;  %8149 = vmatprep.subr.bf16.mxu1 %v9027_v1 }
 0x7f6   : > { %v1825_v6 = vpop.f32.mrb[26].mxu0  ;;  %v8827_v5 = vld [vmem:[%s9072_s3 + $0x38] sm:$0xff]  }
 0x7f7   : > { %v8132_v7 = vpop.f32.mrb[27].mxu0  ;;  %8138 = vmatmul.mubr.msk.bf16.vlgmr.msra.gmra.mrb[24].mxu1 %vm1178_vm3, %v9242_v18 }
 0x7f8   : > { %8150 = vmatpush3.bf16.msra.mxu1 %v8820_v4  ;;  %8153 = vmatprep.mubr.msk.bf16.mxu1 %vm9028_vm1, %v9027_v1 }
 0x7f9   : > { %8151 = vmatprep.subr.bf16.mxu1 %v9027_v1 }
 0x7fc   : > { %v1938_v10 = vpop.f32.mrb[28].mxu0  ;;  %8152 = vmatpush3.bf16.msra.mxu1 %v8821_v8 }
 0x7fd   : > { %v1939_v11 = vadd.f32 %v7396_v9, %v1938_v10  ;;  %v8147_v12 = vpop.f32.mrb[29].mxu0  ;;  %8163 = vmatprep.subr.bf16.mxu1 %v9027_v1  ;;  %v7415_v10 = vld [vmem:[%s9087_s19 + $0x3] ss:$0 sm:$0xff] }
 0x7fe   : > { %v1941_v13 = vpop.f32.mrb[30].mxu0 }
 0x7ff   : > { %v2003_v14 = vpack.c.bf16 %v1939_v11, %v1939_v11  ;;  %v8148_v16 = vpop.f32.mrb[31].mxu0  ;;  %8154 = vmatmul.mubr.msk.bf16.vlgmr.msra.gmra.mrb[28].mxu1 %vm1178_vm3, %v9242_v18 }
 0x800   : > { %8165 = vmatprep.mubr.msk.bf16.mxu1 %vm9028_vm1, %v9027_v1 }
 0x801   : > { %v2008_v17 = vsel %vm1340_vm4, %v2003_v14, 0 }
 0x802   : > { %8158 = vmatpush3.bf16.xpose.msra.mxu0 %v2008_v17 }
 0x803   : > { %8169 = vmatprep.subr.bf16.mxu0 %v9027_v1 }
 0x8c2   : > { %v1776_v19 = vpop.f32.mrb[20].mxu1 }
 0x8c3   : > { %v9360_v20 = vadd.f32 %v1822_v3, %v1776_v19  ;;  %v8125_v21 = vpop.f32.mrb[21].mxu1 }
 0x8c4   : > { %v1779_v22 = vpop.f32.mrb[22].mxu1 }
 0x8c5   : > { %v8126_v23 = vpop.f32.mrb[23].mxu1 }
 0x8ca   : > { %v1880_v25 = vpop.f32.mrb[24].mxu1 }
 0x8cb   : > { %v1881_v26 = vadd.f32 %v7392_v24, %v1880_v25  ;;  %v8139_v27 = vpop.f32.mrb[25].mxu1  ;;  %v7411_v25 = vld [vmem:[%s9077_s8 + $0x3] ss:$0 sm:$0xff] }
 0x8cc   : > { %v1883_v28 = vpop.f32.mrb[26].mxu1 }
 0x8cd   : > { %v2002_v29 = vpack.c.bf16 %v1881_v26, %v1881_v26  ;;  %v8140_v30 = vpop.f32.mrb[27].mxu1 }
 0x8cf   : > { %8160 = vmatmul.mubr.msk.bf16.vlgmr.msra.gmra.mrb[32].mxu0 %vm1340_vm4, %v2002_v29 }
 0x8d0   : > { %8171 = vmatprep.mubr.msk.bf16.mxu0 %vm9028_vm1, %v9027_v1  ;;  %8170 = vmatpush3.bf16.msra.mxu0 %v2117_v53 }
 0x8d1   : > { %8183 = vmatprep.subr.bf16.mxu0 %v9027_v1 }
 0x8d2   : > { %v1996_v32 = vpop.f32.mrb[28].mxu1 }
 0x8d3   : > { %v1997_v33 = vadd.f32 %v7400_v31, %v1996_v32  ;;  %v8155_v34 = vpop.f32.mrb[29].mxu1  ;;  %v7407_v32 = vld [vmem:[%s9067_s29 + $0x3] ss:$0 sm:$0xff] }
 0x8d4   : > { %v1999_v35 = vpop.f32.mrb[30].mxu1 }
 0x8d5   : > { %v2065_v36 = vpack.c.bf16 %v1997_v33, %v1997_v33  ;;  %v8156_v37 = vpop.f32.mrb[31].mxu1 }
 0x8d7   : > { %v2070_v38 = vsel %vm1406_vm5, %v2065_v36, 0 }
 0x8d8   : > { %8164 = vmatpush3.bf16.msra.mxu1 %v2070_v38 }
 0x8d9   : > { %8175 = vmatprep.subr.bf16.mxu1 %v9027_v1 }
 0x9a2   : > { %v2044_v39 = vpop.f32.mrb[32].mxu0 }
 0x9a3   : > { %v2050_v40 = vmul.f32 0.35355338, %v2044_v39  ;;  %v8161_v41 = vpop.f32.mrb[33].mxu0 }
 0x9a4   : > { %v2047_v42 = vpop.f32.mrb[34].mxu0 }
 0x9a5   : > { %v8162_v43 = vpop.f32.mrb[35].mxu0  ;;  %v2051_v44 = vsel %vm9285_vm6, %v2050_v40, -1e+30 }
 0x9a6   : > { %v2052_v45 = vsel %vm1340_vm4, %v2051_v44, -inf }
 0x9a7   : > { %2053 = vmax.xlane.f32.xlu0 %v2052_v45 }
 0xa34   : > { %v2054_v46 = vpop.xlane.xlu0 %2053 }
 0xa35   : > { %v2055_v47 = vsub.f32 %v2051_v44, %v2054_v46 }
 0xa37   : > { %v2056_v48 = vmul.f32 1.442695, %v2055_v47  ;;  %v1157_v47 = vld [vmem:[%s9092_s24 + $0xc] sm:$0xf] }
 0xa39   : > { %8918 = vpow2.f32 %v2056_v48  ;;  %v2449_v48 = vsel %vm1406_vm5, %v1157_v47, 0 }
 0xa43   : > { %v8919_v49 = vpop.eup %8918 }
 0xa44   : > { %v2058_v50 = vsel %vm1340_vm4, %v8919_v49, 0.0 }
 0xa45   : > { %2059 = vadd.xlane.f32.xlu1 %v2058_v50 }
 0xad2   : > { %v2060_v54 = vpop.xlane.xlu1 %2059 }
 0xad3   : > { %8920 = vrcp.f32 %v2060_v54 }
 0xadd   : > { %v8921_v55 = vpop.eup %8920 }
 0xade   : > { %v2063_v56 = vmul.f32 %v8921_v55, %v8919_v49 }
 0xae0   : > { %v2064_v58 = vpack.c.bf16 %v2063_v56, %v2063_v56 }
 0xae2   : > { %8166 = vmatmul.mubr.msk.bf16.vlgmr.msra.gmra.mrb[32].mxu1 %vm1340_vm4, %v2064_v58 }
 0xae3   : > { %8176 = vmatpush3.bf16.msra.mxu1 %v8822_v57  ;;  %8179 = vmatprep.mubr.msk.bf16.mxu1 %vm9028_vm1, %v9027_v1 }
 0xae4   : > { %8177 = vmatprep.subr.bf16.mxu1 %v9027_v1 }
 0xae7   : > { %8178 = vmatpush3.bf16.msra.mxu1 %v8823_v59  ;;  %v7422_v59 = vld [vmem:[%s9097_s30] ss:$0 sm:$0xff] }
 0xae8   : > { %8191 = vmatprep.subr.bf16.mxu1 %v9027_v1 }
 0xaea   : > { %8180 = vmatmul.mubr.msk.bf16.vlgmr.msra.gmra.mrb[36].mxu1 %vm1178_vm3, %v9242_v18 }
 0xaeb   : > { %8192 = vmatpush3.bf16.msra.mxu1 %v8824_v60  ;;  %8195 = vmatprep.mubr.msk.bf16.mxu1 %vm9028_vm1, %v9027_v1 }
 0xaec   : > { %8193 = vmatprep.subr.bf16.mxu1 %v9027_v1 }
 0xaef   : > { %8194 = vmatpush3.bf16.msra.mxu1 %v8825_v61 }
 0xaf0   : > { %8205 = vmatprep.subr.bf16.mxu1 %v9027_v1 }
 0xaf2   : > { %8196 = vmatmul.mubr.msk.bf16.vlgmr.msra.gmra.mrb[40].mxu1 %vm1178_vm3, %v9242_v18 }
 0xaf3   : > { %8207 = vmatprep.mubr.msk.bf16.mxu1 %vm9028_vm1, %v9027_v1 }
 0xbb5   : > { %v2106_v62 = vpop.f32.mrb[32].mxu1 }
 0xbb6   : > { %v2112_v0 = vpack.c.bf16 %v2106_v62, %v2106_v62  ;;  %v8167_v2 = vpop.f32.mrb[33].mxu1 }
 0xbb7   : > { %v2109_v3 = vpop.f32.mrb[34].mxu1 }
 0xbb8   : > { %v8168_v4 = vpop.f32.mrb[35].mxu1  ;;  %8172 = vmatmul.mubr.msk.bf16.vlgmr.msra.gmra.mrb[36].mxu0 %vm1340_vm4, %v2112_v0 }
 0xbb9   : > { %8184 = vmatpush3.bf16.msra.mxu0 %v8826_v63  ;;  %8187 = vmatprep.mubr.msk.bf16.mxu0 %vm9028_vm1, %v9027_v1 }
 0xbba   : > { %8185 = vmatprep.subr.bf16.mxu0 %v9027_v1 }
 0xbbd   : > { %v2212_v6 = vpop.f32.mrb[36].mxu1  ;;  %8186 = vmatpush3.bf16.msra.mxu0 %v8827_v5 }
 0xbbe   : > { %v8181_v7 = vpop.f32.mrb[37].mxu1  ;;  %8199 = vmatprep.subr.bf16.mxu0 %v9027_v1  ;;  %v2213_v34 = vadd.f32 %v7407_v32, %v2212_v6 }
 0xbbf   : > { %v2215_v8 = vpop.f32.mrb[38].mxu1 }
 0xbc0   : > { %v8182_v9 = vpop.f32.mrb[39].mxu1  ;;  %8188 = vmatmul.mubr.msk.bf16.vlgmr.msra.gmra.mrb[40].mxu0 %vm1178_vm3, %v9242_v18  ;;  %v2334_v35 = vpack.c.bf16 %v2213_v34, %v2213_v34 }
 0xbc1   : > { %8201 = vmatprep.mubr.msk.bf16.mxu0 %vm9028_vm1, %v9027_v1 }
 0xbc5   : > { %v2328_v11 = vpop.f32.mrb[40].mxu1 }
 0xbc6   : > { %v2329_v12 = vadd.f32 %v7415_v10, %v2328_v11  ;;  %v8197_v13 = vpop.f32.mrb[41].mxu1  ;;  %v8828_v10 = vld [vmem:[%s9122_s4] sm:$0xff]  }
 0xbc7   : > { %v2331_v14 = vpop.f32.mrb[42].mxu1  ;;  %v1029_v11 = vld [vmem:[%s1022_s16] sm:$0xff]  ;;  %s10167_s16 = sld [smem:[#allocation16_spill]] }
 0xbc8   : > { %v2397_v16 = vpack.c.bf16 %v2329_v12, %v2329_v12  ;;  %v8198_v17 = vpop.f32.mrb[43].mxu1  ;;  %v8829_v12 = vld [vmem:[%s9122_s4 + $0x8] sm:$0xff]   ;;  %v8830_v13 = vld [vmem:[%s10157_s15] sm:$0xff]  }
 0xbc9   : > { %v8831_v14 = vld [vmem:[%s10157_s15 + $0x8] sm:$0xff]  }
 0xbca   : > { %v2402_v19 = vsel %vm1406_vm5, %v2397_v16, 0 }
 0xbcb   : > { %8206 = vmatpush3.bf16.msra.mxu1 %v2402_v19 }
 0xbcc   : > { %8217 = vmatprep.subr.bf16.mxu1 %v9027_v1 }
 0xc8b   : > { %v2153_v21 = vpop.f32.mrb[36].mxu0 }
 0xc8c   : > { %v2159_v18 = vadd.f32 %v2153_v21, %v9360_v20  ;;  %v8173_v22 = vpop.f32.mrb[37].mxu0 }
 0xc8d   : > { %v2156_v23 = vpop.f32.mrb[38].mxu0 }
 0xc8e   : > { %v8174_v24 = vpop.f32.mrb[39].mxu0  ;;  %v7424_v23 = vld [vmem:[%s10159_s22] ss:$0 sm:$0xff] }
 0xc93   : > { %v2270_v26 = vpop.f32.mrb[40].mxu0 }
 0xc94   : > { %v2271_v27 = vadd.f32 %v7411_v25, %v2270_v26  ;;  %v8189_v28 = vpop.f32.mrb[41].mxu0 }
 0xc95   : > { %v2273_v29 = vpop.f32.mrb[42].mxu0 }
 0xc96   : > { %v2335_v30 = vpack.c.bf16 %v2271_v27, %v2271_v27  ;;  %v8190_v31 = vpop.f32.mrb[43].mxu0  ;;  %v7429_v27 = vld [vmem:[%s10160_s23] ss:$0 sm:$0xff] }
 0xc98   : > { %v2340_v33 = vsel %vm1340_vm4, %v2335_v30, 0 }
 0xc99   : > { %8200 = vmatpush3.bf16.xpose.msra.mxu0 %v2340_v33 }
 0xc9a   : > { %8211 = vmatprep.subr.bf16.mxu0 %v9027_v1 }
 0xca0   : > { %8202 = vmatmul.mubr.msk.bf16.vlgmr.msra.gmra.mrb[44].mxu0 %vm1340_vm4, %v2334_v35  ;;  %v7425_v35 = vld [vmem:[%s10161_s26] ss:$0 sm:$0xff] }
 0xca1   : > { %8213 = vmatprep.mubr.msk.bf16.mxu0 %vm9028_vm1, %v9027_v1  ;;  %8212 = vmatpush3.bf16.msra.mxu0 %v2449_v48 }
 0xca2   : > { %8225 = vmatprep.subr.bf16.mxu0 %v9027_v1 }
 0xd73   : > { %v2376_v20 = vpop.f32.mrb[44].mxu0 }
 0xd74   : > { %v2382_v36 = vmul.f32 0.35355338, %v2376_v20  ;;  %v8203_v37 = vpop.f32.mrb[45].mxu0 }
 0xd75   : > { %v2379_v38 = vpop.f32.mrb[46].mxu0 }
 0xd76   : > { %v8204_v39 = vpop.f32.mrb[47].mxu0  ;;  %v2383_v40 = vsel %vm9285_vm6, %v2382_v36, -1e+30 }
 0xd77   : > { %v2384_v41 = vsel %vm1340_vm4, %v2383_v40, -inf  ;;  %v8832_v39 = vld [vmem:[%s10157_s15 + $0x10] sm:$0xff]  }
 0xd78   : > { %2385 = vmax.xlane.f32.xlu0 %v2384_v41 }
 0xe05   : > { %v2386_v42 = vpop.xlane.xlu0 %2385 }
 0xe06   : > { %v2387_v43 = vsub.f32 %v2383_v40, %v2386_v42  ;;  %v8833_v42 = vld [vmem:[%s10157_s15 + $0x18] sm:$0xff]  }
 0xe08   : > { %v2388_v44 = vmul.f32 1.442695, %v2387_v43  ;;  %v8834_v43 = vld [vmem:[%s10162_s28] sm:$0xff]  }
 0xe0a   : > { %8922 = vpow2.f32 %v2388_v44  ;;  %v8835_v44 = vld [vmem:[%s10162_s28 + $0x8] sm:$0xff]  }
 0xe14   : > { %v8923_v45 = vpop.eup %8922 }
 0xe15   : > { %v2390_v46 = vsel %vm1340_vm4, %v8923_v45, 0.0 }
 0xe16   : > { %2391 = vadd.xlane.f32.xlu1 %v2390_v46 }
 0xea3   : > { %v2392_v49 = vpop.xlane.xlu1 %2391 }
 0xea4   : > { %8924 = vrcp.f32 %v2392_v49 }
 0xeae   : > { %v8925_v50 = vpop.eup %8924 }
 0xeaf   : > { %v2395_v52 = vmul.f32 %v8925_v50, %v8923_v45 }
 0xeb1   : > { %v2396_v53 = vpack.c.bf16 %v2395_v52, %v2395_v52 }
 0xeb3   : > { %8208 = vmatmul.mubr.msk.bf16.vlgmr.msra.gmra.mrb[44].mxu1 %vm1340_vm4, %v2396_v53 }
 0xeb4   : > { %8221 = vmatprep.mubr.msk.bf16.mxu1 %vm9028_vm1, %v9027_v1  ;;  %8218 = vmatpush3.bf16.msra.mxu1 %v8830_v13 }
 0xeb5   : > { %8219 = vmatprep.subr.bf16.mxu1 %v9027_v1 }
 0xeb8   : > { %8220 = vmatpush3.bf16.msra.mxu1 %v8831_v14 }
 0xeb9   : > { %8233 = vmatprep.subr.bf16.mxu1 %v9027_v1 }
 0xf86   : > { %v2438_v54 = vpop.f32.mrb[44].mxu1 }
 0xf87   : > { %v2444_v55 = vpack.c.bf16 %v2438_v54, %v2438_v54  ;;  %v8209_v56 = vpop.f32.mrb[45].mxu1 }
 0xf88   : > { %v2441_v57 = vpop.f32.mrb[46].mxu1 }
 0xf89   : > { %v8210_v58 = vpop.f32.mrb[47].mxu1  ;;  %8214 = vmatmul.mubr.msk.bf16.vlgmr.msra.gmra.mrb[48].mxu0 %vm1340_vm4, %v2444_v55  ;;  %v7433_v57 = vld [vmem:[%s10163_s1] ss:$0 sm:$0xff] }
 0xf8a   : > { %8229 = vmatprep.mubr.msk.bf16.mxu0 %vm9028_vm1, %v9027_v1  ;;  %8226 = vmatpush3.bf16.msra.mxu0 %v8828_v10  ;;  %v8836_v10 = vld [vmem:[%s9122_s4 + $0x10] sm:$0xff]  }
 0xf8b   : > { %8227 = vmatprep.subr.bf16.mxu0 %v9027_v1 }
 0xf8e   : > { %8228 = vmatpush3.bf16.msra.mxu0 %v8829_v12  ;;  %v8837_v12 = vld [vmem:[%s9122_s4 + $0x18] sm:$0xff]  }
 0xf8f   : > { %8241 = vmatprep.subr.bf16.mxu0 %v9027_v1 }
0x105c   : > { %v2485_v60 = vpop.f32.mrb[48].mxu0 }
0x105d   : > { %v2491_v61 = vadd.f32 %v2485_v60, %v2159_v18  ;;  %v8215_v62 = vpop.f32.mrb[49].mxu0  ;;  %v7423_v18 = vld [vmem:[%s10158_s18] ss:$0 sm:$0xff] }
0x105e   : > { %v2488_v63 = vpop.f32.mrb[50].mxu0 }
0x105f   : > { %v2498_v0 = vadd.f32 %v7422_v59, %v2491_v61  ;;  %v8216_v2 = vpop.f32.mrb[51].mxu0 }
0x1061   : > { %v2499_v3 = vadd.f32 %v2498_v0, %v9237_v15  ;;  %v9439_v15 = vpack.c.bf16 %v1029_v11, %v1029_v11 }
0x1063   : > { %v2502_v4 = vsel %vm1178_vm3, %v2499_v3, 0.0  ;;  %8230 = vmatmul.mubr.msk.bf16.vlgmr.msra.gmra.mrb[52].mxu0 %vm1178_vm3, %v9439_v15 }
0x1064   : > { %2503 = vadd.xlane.f32.xlu0 %v2502_v4  ;;  %8243 = vmatprep.mubr.msk.bf16.mxu0 %vm9028_vm1, %v9027_v1 }
0x10f1   : > { %v2504_v5 = vpop.xlane.xlu0 %2503 }
0x10f2   : > { %v2506_v6 = vmul.f32 0.03125, %v2504_v5 }
0x10f4   : > { %v2507_v7 = vsub.f32 %v2499_v3, %v2506_v6 }
0x10f6   : > { %v2508_v8 = vmul.f32 %v2507_v7, %v2507_v7 }
0x10f8   : > { %v2509_v9 = vsel %vm1178_vm3, %v2508_v8, 0.0 }
0x10f9   : > { %2510 = vadd.xlane.f32.xlu1 %v2509_v9 }
0x1136   : > { %v2713_v28 = vpop.f32.mrb[52].mxu0 }
0x1137   : > { %v2714_v29 = vadd.f32 %v7429_v27, %v2713_v28  ;;  %v8231_v30 = vpop.f32.mrb[53].mxu0  ;;  %v7439_v28 = vld [vmem:[%s10161_s26 + $0x1] ss:$0 sm:$0xff] }
0x1138   : > { %v2716_v31 = vpop.f32.mrb[54].mxu0 }
0x1139   : > { %v2778_v32 = vpack.c.bf16 %v2714_v29, %v2714_v29  ;;  %v8232_v33 = vpop.f32.mrb[55].mxu0 }
0x113a   : > { %v8839_v33 = vld [vmem:[%s10162_s28 + $0x18] sm:$0xff]  }
0x113b   : > { %v2783_v34 = vsel %vm1340_vm4, %v2778_v32, 0  ;;  %v8838_v32 = vld [vmem:[%s10162_s28 + $0x10] sm:$0xff]  }
0x113c   : > { %8242 = vmatpush3.bf16.xpose.msra.mxu0 %v2783_v34 }
0x113d   : > { %8253 = vmatprep.subr.bf16.mxu0 %v9027_v1 }
0x1186   : > { %v2511_v16 = vpop.xlane.xlu1 %2510 }
0x1187   : > { %v2512_v17 = vmul.f32 0.03125, %v2511_v16 }
0x1189   : > { %v2513_v19 = vadd.f32 1e-05, %v2512_v17 }
0x118b   : > { %8926 = vrsqrt.f32 %v2513_v19  ;;  %v7443_v19 = vld [vmem:[%s10160_s23 + $0x1] ss:$0 sm:$0xff] }
0x1195   : > { %v8927_v21 = vpop.eup %8926 }
0x1196   : > { %v2515_v22 = vmul.f32 %v8927_v21, %v2507_v7 }
0x1198   : > { %v2522_v24 = vmul.f32 %v7423_v18, %v2515_v22 }
0x119a   : > { %v9452_v25 = vadd.f32 %v7424_v23, %v2522_v24 }
0x119c   : > { %v9456_v26 = vpack.c.bf16 %v9452_v25, %v9452_v25 }
0x119e   : > { %8222 = vmatmul.mubr.msk.bf16.vlgmr.msra.gmra.mrb[48].mxu1 %vm1178_vm3, %v9456_v26 }
0x119f   : > { %8237 = vmatprep.mubr.msk.bf16.mxu1 %vm9028_vm1, %v9027_v1  ;;  %8234 = vmatpush3.bf16.msra.mxu1 %v8834_v43 }
0x11a0   : > { %8235 = vmatprep.subr.bf16.mxu1 %v9027_v1 }
0x11a3   : > { %8236 = vmatpush3.bf16.msra.mxu1 %v8835_v44 }
0x11a4   : > { %8247 = vmatprep.subr.bf16.mxu1 %v9027_v1 }
0x11a6   : > { %8238 = vmatmul.mubr.msk.bf16.vlgmr.msra.gmra.mrb[52].mxu1 %vm1178_vm3, %v9439_v15 }
0x11a7   : > { %8249 = vmatprep.mubr.msk.bf16.mxu1 %vm9028_vm1, %v9027_v1 }
0x1271   : > { %v2652_v20 = vpop.f32.mrb[48].mxu1 }
0x1272   : > { %v2653_v36 = vadd.f32 %v7425_v35, %v2652_v20  ;;  %v8223_v37 = vpop.f32.mrb[49].mxu1 }
0x1273   : > { %v2655_v38 = vpop.f32.mrb[50].mxu1 }
0x1274   : > { %v2777_v40 = vpack.c.bf16 %v2653_v36, %v2653_v36  ;;  %v8224_v41 = vpop.f32.mrb[51].mxu1 }
0x1276   : > { %8244 = vmatmul.mubr.msk.bf16.vlgmr.msra.gmra.mrb[56].mxu0 %vm1340_vm4, %v2777_v40 }
0x1277   : > { %8254 = vmatpush3.bf16.msra.mxu0 %v8832_v39  ;;  %8257 = vmatprep.mubr.msk.bf16.mxu0 %vm9028_vm1, %v9027_v1 }
0x1278   : > { %8255 = vmatprep.subr.bf16.mxu0 %v9027_v1 }
0x1279   : > { %v2771_v58 = vpop.f32.mrb[52].mxu1 }
0x127a   : > { %v2772_v59 = vadd.f32 %v7433_v57, %v2771_v58  ;;  %v8239_v60 = vpop.f32.mrb[53].mxu1  ;;  %v2590_v58 = vld [vmem:[%s10164_s2] sm:$0xf] }
0x127b   : > { %8256 = vmatpush3.bf16.msra.mxu0 %v8833_v42  ;;  %v2774_v61 = vpop.f32.mrb[54].mxu1 }
0x127c   : > { %8269 = vmatprep.subr.bf16.mxu0 %v9027_v1  ;;  %v2840_v62 = vpack.c.bf16 %v2772_v59, %v2772_v59  ;;  %v8240_v63 = vpop.f32.mrb[55].mxu1  ;;  %v3223_v61 = vsel %vm1406_vm5, %v2590_v58, 0 }
0x127e   : > { %8258 = vmatmul.mubr.msk.bf16.vlgmr.msra.gmra.mrb[60].mxu0 %vm1178_vm3, %v9456_v26  ;;  %v2845_v0 = vsel %vm1406_vm5, %v2840_v62, 0  ;;  %v8840_v62 = vld [vmem:[%s9122_s4 + $0x20] sm:$0xff]  }
0x127f   : > { %8273 = vmatprep.mubr.msk.bf16.mxu0 %vm9028_vm1, %v9027_v1  ;;  %8248 = vmatpush3.bf16.msra.mxu1 %v2845_v0  ;;  %v8841_v0 = vld [vmem:[%s9122_s4 + $0x28] sm:$0xff]  }
0x1280   : > { %8261 = vmatprep.subr.bf16.mxu1 %v9027_v1  ;;  %8270 = vmatpush3.bf16.msra.mxu0 %v8838_v32 }
0x1281   : > { %8271 = vmatprep.subr.bf16.mxu0 %v9027_v1 }
0x1284   : > { %8272 = vmatpush3.bf16.msra.mxu0 %v8839_v33 }
0x1285   : > { %8283 = vmatprep.subr.bf16.mxu0 %v9027_v1 }
0x1287   : > { %8274 = vmatmul.mubr.msk.bf16.vlgmr.msra.gmra.mrb[64].mxu0 %vm1178_vm3, %v9439_v15 }
0x1288   : > { %8285 = vmatprep.mubr.msk.bf16.mxu0 %vm9028_vm1, %v9027_v1 }
0x1349   : > { %v2819_v45 = vpop.f32.mrb[56].mxu0 }
0x134a   : > { %v2825_v46 = vmul.f32 0.35355338, %v2819_v45  ;;  %v8245_v47 = vpop.f32.mrb[57].mxu0 }
0x134b   : > { %v2822_v48 = vpop.f32.mrb[58].mxu0 }
0x134c   : > { %v8246_v49 = vpop.f32.mrb[59].mxu0  ;;  %v2826_v50 = vsel %vm9285_vm6, %v2825_v46, -1e+30  ;;  %v7447_v48 = vld [vmem:[%s10163_s1 + $0x1] ss:$0 sm:$0xff] }
0x134d   : > { %v2827_v52 = vsel %vm1340_vm4, %v2826_v50, -inf }
0x134e   : > { %2828 = vmax.xlane.f32.xlu0 %v2827_v52 }
0x1351   : > { %v2940_v53 = vpop.f32.mrb[60].mxu0 }
0x1352   : > { %v8259_v54 = vpop.f32.mrb[61].mxu0  ;;  %v2941_v30 = vadd.f32 %v7439_v28, %v2940_v53 }
0x1353   : > { %v2943_v55 = vpop.f32.mrb[62].mxu0  ;;  %v2591_v54 = vld [vmem:[%s10164_s2 + $0x4] sm:$0xf] }
0x1354   : > { %v8260_v56 = vpop.f32.mrb[63].mxu0  ;;  %v3062_v31 = vpack.c.bf16 %v2941_v30, %v2941_v30  ;;  %v3177_v55 = vsel %vm1406_vm5, %v2591_v54, 0  ;;  %v7455_v30 = vld [vmem:[%s10161_s26 + $0x2] ss:$0 sm:$0xff] }
0x135a   : > { %v3056_v45 = vpop.f32.mrb[64].mxu0 }
0x135b   : > { %v8275_v46 = vpop.f32.mrb[65].mxu0 }
0x135c   : > { %v3059_v47 = vpop.f32.mrb[66].mxu0 }
0x135d   : > { %v8276_v49 = vpop.f32.mrb[67].mxu0 }
0x13db   : > { %v2829_v2 = vpop.xlane.xlu0 %2828 }
0x13dc   : > { %v2830_v3 = vsub.f32 %v2826_v50, %v2829_v2  ;;  %v3057_v50 = vadd.f32 %v7447_v48, %v3056_v45  ;;  %v7463_v45 = vld [vmem:[%s10163_s1 + $0x2] ss:$0 sm:$0xff] }
0x13de   : > { %v2831_v4 = vmul.f32 1.442695, %v2830_v3  ;;  %v3125_v52 = vpack.c.bf16 %v3057_v50, %v3057_v50  ;;  %v8842_v3 = vld [vmem:[%s10157_s15 + $0x20] sm:$0xff]  }
0x13e0   : > { %8928 = vpow2.f32 %v2831_v4  ;;  %v3130_v53 = vsel %vm1406_vm5, %v3125_v52, 0 }
0x13e1   : > { %8284 = vmatpush3.bf16.msra.mxu0 %v3130_v53 }
0x13e2   : > { %8295 = vmatprep.subr.bf16.mxu0 %v9027_v1 }
0x13ea   : > { %v8929_v5 = vpop.eup %8928 }
0x13eb   : > { %v2833_v6 = vsel %vm1340_vm4, %v8929_v5, 0.0 }
0x13ec   : > { %2834 = vadd.xlane.f32.xlu1 %v2833_v6 }
0x1479   : > { %v2835_v7 = vpop.xlane.xlu1 %2834 }
0x147a   : > { %8930 = vrcp.f32 %v2835_v7 }
0x1484   : > { %v8931_v8 = vpop.eup %8930 }
0x1485   : > { %v2838_v9 = vmul.f32 %v8931_v8, %v8929_v5  ;;  %v8843_v8 = vld [vmem:[%s10157_s15 + $0x28] sm:$0xff]  }
0x1487   : > { %v2839_v11 = vpack.c.bf16 %v2838_v9, %v2838_v9 }
0x1489   : > { %8250 = vmatmul.mubr.msk.bf16.vlgmr.msra.gmra.mrb[56].mxu1 %vm1340_vm4, %v2839_v11 }
0x148a   : > { %8262 = vmatpush3.bf16.msra.mxu1 %v8836_v10  ;;  %8265 = vmatprep.mubr.msk.bf16.mxu1 %vm9028_vm1, %v9027_v1 }
0x148b   : > { %8263 = vmatprep.subr.bf16.mxu1 %v9027_v1 }
0x148e   : > { %8264 = vmatpush3.bf16.msra.mxu1 %v8837_v12 }
0x148f   : > { %8277 = vmatprep.subr.bf16.mxu1 %v9027_v1 }
0x1491   : > { %8266 = vmatmul.mubr.msk.bf16.vlgmr.msra.gmra.mrb[60].mxu1 %vm1178_vm3, %v9439_v15 }
0x1492   : > { %8279 = vmatprep.mubr.msk.bf16.mxu1 %vm9028_vm1, %v9027_v1 }
0x155c   : > { %v9503_v13 = vpop.f32.mrb[56].mxu1 }
0x155d   : > { %v8251_v14 = vpop.f32.mrb[57].mxu1  ;;  %v2887_v63 = vpack.c.bf16 %v9503_v13, %v9503_v13  ;;  %v7459_v13 = vld [vmem:[%s10160_s23 + $0x2] ss:$0 sm:$0xff] }
0x155e   : > { %v2884_v16 = vpop.f32.mrb[58].mxu1 }
0x155f   : > { %v8252_v17 = vpop.f32.mrb[59].mxu1 }
0x1564   : > { %v2998_v21 = vpop.f32.mrb[60].mxu1 }
0x1565   : > { %v2999_v18 = vadd.f32 %v7443_v19, %v2998_v21  ;;  %v8267_v22 = vpop.f32.mrb[61].mxu1 }
0x1566   : > { %v3001_v23 = vpop.f32.mrb[62].mxu1 }
0x1567   : > { %v3063_v24 = vpack.c.bf16 %v2999_v18, %v2999_v18  ;;  %v8268_v27 = vpop.f32.mrb[63].mxu1 }
0x1569   : > { %v3068_v29 = vsel %vm1340_vm4, %v3063_v24, 0 }
0x156a   : > { %8278 = vmatpush3.bf16.xpose.msra.mxu1 %v3068_v29 }
0x156b   : > { %8289 = vmatprep.subr.bf16.mxu1 %v9027_v1 }
0x1571   : > { %8280 = vmatmul.mubr.msk.bf16.vlgmr.msra.gmra.mrb[64].mxu1 %vm1340_vm4, %v3062_v31 }
0x1572   : > { %8291 = vmatprep.mubr.msk.bf16.mxu1 %vm9028_vm1, %v9027_v1  ;;  %8290 = vmatpush3.bf16.msra.mxu1 %v3177_v55 }
0x1573   : > { %8301 = vmatprep.subr.bf16.mxu1 %v9027_v1 }
0x1644   : > { %v3104_v34 = vpop.f32.mrb[64].mxu1 }
0x1645   : > { %v3110_v35 = vmul.f32 0.35355338, %v3104_v34  ;;  %v8281_v20 = vpop.f32.mrb[65].mxu1 }
0x1646   : > { %v3107_v36 = vpop.f32.mrb[66].mxu1 }
0x1647   : > { %v8282_v37 = vpop.f32.mrb[67].mxu1  ;;  %v3111_v38 = vsel %vm9285_vm6, %v3110_v35, -1e+30  ;;  %v8844_v36 = vld [vmem:[%s10162_s28 + $0x20] sm:$0xff]  }
0x1648   : > { %v3112_v39 = vsel %vm1340_vm4, %v3111_v38, -inf  ;;  %v8845_v37 = vld [vmem:[%s10162_s28 + $0x28] sm:$0xff]  }
0x1649   : > { %3113 = vmax.xlane.f32.xlu0 %v3112_v39 }
0x16d6   : > { %v3114_v40 = vpop.xlane.xlu0 %3113 }
0x16d7   : > { %v3115_v41 = vsub.f32 %v3111_v38, %v3114_v40 }
0x16d9   : > { %v3116_v42 = vmul.f32 1.442695, %v3115_v41 }
0x16db   : > { %8932 = vpow2.f32 %v3116_v42 }
0x16e5   : > { %v8933_v43 = vpop.eup %8932 }
0x16e6   : > { %v3118_v44 = vsel %vm1340_vm4, %v8933_v43, 0.0 }
0x16e7   : > { %3119 = vadd.xlane.f32.xlu1 %v3118_v44 }
0x1774   : > { %v3120_v56 = vpop.xlane.xlu1 %3119 }
0x1775   : > { %8934 = vrcp.f32 %v3120_v56 }
0x177f   : > { %v8935_v57 = vpop.eup %8934 }
0x1780   : > { %v3123_v59 = vmul.f32 %v8935_v57, %v8933_v43 }
0x1782   : > { %v3124_v60 = vpack.c.bf16 %v3123_v59, %v3123_v59  ;;  %v2592_v59 = vld [vmem:[%s10164_s2 + $0x8] sm:$0xf] }
0x1784   : > { %8286 = vmatmul.mubr.msk.bf16.vlgmr.msra.gmra.mrb[68].mxu0 %vm1340_vm4, %v3124_v60  ;;  %v3554_v60 = vsel %vm1406_vm5, %v2592_v59, 0 }
0x1785   : > { %8296 = vmatpush3.bf16.msra.mxu0 %v3223_v61  ;;  %8297 = vmatprep.mubr.msk.bf16.mxu0 %vm9028_vm1, %v9027_v1 }
0x1786   : > { %8309 = vmatprep.subr.bf16.mxu0 %v9027_v1 }
0x178c   : > { %8298 = vmatmul.mubr.msk.bf16.vlgmr.msra.gmra.mrb[72].mxu0 %vm1340_vm4, %v2887_v63 }
0x178d   : > { %8310 = vmatpush3.bf16.msra.mxu0 %v8840_v62  ;;  %8313 = vmatprep.mubr.msk.bf16.mxu0 %vm9028_vm1, %v9027_v1 }
0x178e   : > { %8311 = vmatprep.subr.bf16.mxu0 %v9027_v1 }
0x1791   : > { %8312 = vmatpush3.bf16.msra.mxu0 %v8841_v0  ;;  %v8846_v0 = vld [vmem:[%s10157_s15 + $0x30] sm:$0xff]  }
0x1792   : > { %8325 = vmatprep.subr.bf16.mxu0 %v9027_v1 }
0x1794   : > { %8314 = vmatmul.mubr.msk.bf16.vlgmr.msra.gmra.mrb[76].mxu0 %vm1178_vm3, %v9439_v15 }
0x1795   : > { %8327 = vmatprep.mubr.msk.bf16.mxu0 %vm9028_vm1, %v9027_v1 }
0x1857   : > { %v3166_v2 = vpop.f32.mrb[68].mxu0 }
0x1858   : > { %v3172_v4 = vpack.c.bf16 %v3166_v2, %v3166_v2  ;;  %v8287_v5 = vpop.f32.mrb[69].mxu0 }
0x1859   : > { %v3169_v6 = vpop.f32.mrb[70].mxu0  ;;  %v8848_v5 = vld [vmem:[%s9122_s4 + $0x30] sm:$0xff]  }
0x185a   : > { %v8288_v7 = vpop.f32.mrb[71].mxu0  ;;  %8292 = vmatmul.mubr.msk.bf16.vlgmr.msra.gmra.mrb[68].mxu1 %vm1340_vm4, %v3172_v4 }
0x185b   : > { %8302 = vmatpush3.bf16.msra.mxu1 %v8842_v3  ;;  %8305 = vmatprep.mubr.msk.bf16.mxu1 %vm9028_vm1, %v9027_v1  ;;  %v8847_v3 = vld [vmem:[%s10157_s15 + $0x38] sm:$0xff]  }
0x185c   : > { %8303 = vmatprep.subr.bf16.mxu1 %v9027_v1 }
0x185f   : > { %v3259_v9 = vpop.f32.mrb[72].mxu0  ;;  %8304 = vmatpush3.bf16.msra.mxu1 %v8843_v8 }
0x1860   : > { %v8299_v10 = vpop.f32.mrb[73].mxu0  ;;  %8317 = vmatprep.subr.bf16.mxu1 %v9027_v1 }
0x1861   : > { %v3262_v11 = vpop.f32.mrb[74].mxu0  ;;  %v8849_v10 = vld [vmem:[%s9122_s4 + $0x38] sm:$0xff]  }
0x1862   : > { %v8300_v12 = vpop.f32.mrb[75].mxu0  ;;  %8306 = vmatmul.mubr.msk.bf16.vlgmr.msra.gmra.mrb[72].mxu1 %vm1178_vm3, %v9456_v26 }
0x1863   : > { %8321 = vmatprep.mubr.msk.bf16.mxu1 %vm9028_vm1, %v9027_v1  ;;  %8318 = vmatpush3.bf16.msra.mxu1 %v8844_v36 }
0x1864   : > { %8319 = vmatprep.subr.bf16.mxu1 %v9027_v1 }
0x1867   : > { %v3375_v14 = vpop.f32.mrb[76].mxu0  ;;  %8320 = vmatpush3.bf16.msra.mxu1 %v8845_v37 }
0x1868   : > { %v3376_v16 = vadd.f32 %v7459_v13, %v3375_v14  ;;  %v8315_v17 = vpop.f32.mrb[77].mxu0  ;;  %8331 = vmatprep.subr.bf16.mxu1 %v9027_v1 }
0x1869   : > { %v3378_v19 = vpop.f32.mrb[78].mxu0 }
0x186a   : > { %v3440_v21 = vpack.c.bf16 %v3376_v16, %v3376_v16  ;;  %v8316_v18 = vpop.f32.mrb[79].mxu0  ;;  %8322 = vmatmul.mubr.msk.bf16.vlgmr.msra.gmra.mrb[76].mxu1 %vm1178_vm3, %v9439_v15 }
0x186b   : > { %8333 = vmatprep.mubr.msk.bf16.mxu1 %vm9028_vm1, %v9027_v1  ;;  %v7474_v18 = vld [vmem:[%s10160_s23 + $0x3] ss:$0 sm:$0xff] }
0x186c   : > { %v3445_v22 = vsel %vm1340_vm4, %v3440_v21, 0 }
0x186d   : > { %8326 = vmatpush3.bf16.xpose.msra.mxu0 %v3445_v22 }
0x186e   : > { %8337 = vmatprep.subr.bf16.mxu0 %v9027_v1 }
0x192d   : > { %v3213_v23 = vpop.f32.mrb[68].mxu1 }
0x192e   : > { %v9563_v24 = vadd.f32 %v3259_v9, %v3213_v23  ;;  %v8293_v27 = vpop.f32.mrb[69].mxu1 }
0x192f   : > { %v3216_v28 = vpop.f32.mrb[70].mxu1 }
0x1930   : > { %v8294_v29 = vpop.f32.mrb[71].mxu1 }
0x1935   : > { %v3317_v31 = vpop.f32.mrb[72].mxu1 }
0x1936   : > { %v3318_v32 = vadd.f32 %v7455_v30, %v3317_v31  ;;  %v8307_v33 = vpop.f32.mrb[73].mxu1  ;;  %v7470_v31 = vld [vmem:[%s10161_s26 + $0x3] ss:$0 sm:$0xff] }
0x1937   : > { %v3320_v34 = vpop.f32.mrb[74].mxu1 }
0x1938   : > { %v3439_v35 = vpack.c.bf16 %v3318_v32, %v3318_v32  ;;  %v8308_v20 = vpop.f32.mrb[75].mxu1  ;;  %v8850_v34 = vld [vmem:[%s10162_s28 + $0x30] sm:$0xff]  }
0x193a   : > { %8328 = vmatmul.mubr.msk.bf16.vlgmr.msra.gmra.mrb[80].mxu0 %vm1340_vm4, %v3439_v35  ;;  %v8851_v35 = vld [vmem:[%s10162_s28 + $0x38] sm:$0xff]  }
0x193b   : > { %8339 = vmatprep.mubr.msk.bf16.mxu0 %vm9028_vm1, %v9027_v1  ;;  %8338 = vmatpush3.bf16.msra.mxu0 %v3554_v60 }
0x193c   : > { %8351 = vmatprep.subr.bf16.mxu0 %v9027_v1 }
0x193d   : > { %v3433_v46 = vpop.f32.mrb[76].mxu1 }
0x193e   : > { %v3434_v47 = vadd.f32 %v7463_v45, %v3433_v46  ;;  %v8323_v48 = vpop.f32.mrb[77].mxu1 }
0x193f   : > { %v3436_v49 = vpop.f32.mrb[78].mxu1 }
0x1940   : > { %v3502_v50 = vpack.c.bf16 %v3434_v47, %v3434_v47  ;;  %v8324_v52 = vpop.f32.mrb[79].mxu1 }
0x1942   : > { %v3507_v53 = vsel %vm1406_vm5, %v3502_v50, 0 }
0x1943   : > { %8332 = vmatpush3.bf16.msra.mxu1 %v3507_v53 }
0x1944   : > { %8343 = vmatprep.subr.bf16.mxu1 %v9027_v1 }
0x1a0d   : > { %v3481_v38 = vpop.f32.mrb[80].mxu0 }
0x1a0e   : > { %v3487_v39 = vmul.f32 0.35355338, %v3481_v38  ;;  %v8329_v40 = vpop.f32.mrb[81].mxu0 }
0x1a0f   : > { %v3484_v41 = vpop.f32.mrb[82].mxu0 }
0x1a10   : > { %v8330_v42 = vpop.f32.mrb[83].mxu0  ;;  %v3488_v43 = vsel %vm9285_vm6, %v3487_v39, -1e+30 }
0x1a11   : > { %v3489_v44 = vsel %vm1340_vm4, %v3488_v43, -inf  ;;  %v7478_v42 = vld [vmem:[%s10163_s1 + $0x3] ss:$0 sm:$0xff] }
0x1a12   : > { %3490 = vmax.xlane.f32.xlu0 %v3489_v44 }
0x1a9f   : > { %v3491_v54 = vpop.xlane.xlu0 %3490 }
0x1aa0   : > { %v3492_v55 = vsub.f32 %v3488_v43, %v3491_v54 }
0x1aa2   : > { %v3493_v56 = vmul.f32 1.442695, %v3492_v55 }
0x1aa4   : > { %8936 = vpow2.f32 %v3493_v56  ;;  %v2593_v56 = vld [vmem:[%s10164_s2 + $0xc] sm:$0xf] }
0x1aae   : > { %v8937_v57 = vpop.eup %8936 }
0x1aaf   : > { %v3495_v58 = vsel %vm1340_vm4, %v8937_v57, 0.0 }
0x1ab0   : > { %3496 = vadd.xlane.f32.xlu1 %v3495_v58 }
0x1b3d   : > { %v3497_v61 = vpop.xlane.xlu1 %3496 }
0x1b3e   : > { %8938 = vrcp.f32 %v3497_v61 }
0x1b48   : > { %v8939_v62 = vpop.eup %8938 }
0x1b49   : > { %v3500_v63 = vmul.f32 %v8939_v62, %v8937_v57  ;;  %v3886_v57 = vsel %vm1406_vm5, %v2593_v56, 0  ;;  %v8857_v56 = vld [vmem:[%s9072_s3 + $0x40] sm:$0xff]  }
0x1b4b   : > { %v3501_v2 = vpack.c.bf16 %v3500_v63, %v3500_v63 }
0x1b4d   : > { %8334 = vmatmul.mubr.msk.bf16.vlgmr.msra.gmra.mrb[80].mxu1 %vm1340_vm4, %v3501_v2 }
0x1b4e   : > { %8344 = vmatpush3.bf16.msra.mxu1 %v8846_v0  ;;  %8347 = vmatprep.mubr.msk.bf16.mxu1 %vm9028_vm1, %v9027_v1 }
0x1b4f   : > { %8345 = vmatprep.subr.bf16.mxu1 %v9027_v1 }
0x1b52   : > { %8346 = vmatpush3.bf16.msra.mxu1 %v8847_v3 }
0x1b53   : > { %8359 = vmatprep.subr.bf16.mxu1 %v9027_v1 }
0x1b55   : > { %8348 = vmatmul.mubr.msk.bf16.vlgmr.msra.gmra.mrb[84].mxu1 %vm1178_vm3, %v9456_v26 }
0x1b56   : > { %8363 = vmatprep.mubr.msk.bf16.mxu1 %vm9028_vm1, %v9027_v1  ;;  %8360 = vmatpush3.bf16.msra.mxu1 %v8850_v34  ;;  %v7488_v34 = vld [vmem:[%s10170_s13] ss:$0 sm:$0xff] }
0x1b57   : > { %8361 = vmatprep.subr.bf16.mxu1 %v9027_v1 }
0x1b5a   : > { %8362 = vmatpush3.bf16.msra.mxu1 %v8851_v35 }
0x1b5b   : > { %8373 = vmatprep.subr.bf16.mxu1 %v9027_v1 }
0x1b5d   : > { %8364 = vmatmul.mubr.msk.bf16.vlgmr.msra.gmra.mrb[88].mxu1 %vm1178_vm3, %v9439_v15 }
0x1b5e   : > { %8375 = vmatprep.mubr.msk.bf16.mxu1 %vm9028_vm1, %v9027_v1 }
0x1c20   : > { %v3543_v4 = vpop.f32.mrb[80].mxu1 }
0x1c21   : > { %v3549_v6 = vpack.c.bf16 %v3543_v4, %v3543_v4  ;;  %v8335_v7 = vpop.f32.mrb[81].mxu1  ;;  %v7485_v4 = vld [vmem:[%s10165_s10] ss:$0 sm:$0xff] }
0x1c22   : > { %v3546_v8 = vpop.f32.mrb[82].mxu1 }
0x1c23   : > { %v8336_v9 = vpop.f32.mrb[83].mxu1  ;;  %8340 = vmatmul.mubr.msk.bf16.vlgmr.msra.gmra.mrb[84].mxu0 %vm1340_vm4, %v3549_v6 }
0x1c24   : > { %8352 = vmatpush3.bf16.msra.mxu0 %v8848_v5  ;;  %8355 = vmatprep.mubr.msk.bf16.mxu0 %vm9028_vm1, %v9027_v1 }
0x1c25   : > { %8353 = vmatprep.subr.bf16.mxu0 %v9027_v1 }
0x1c28   : > { %v3649_v26 = vpop.f32.mrb[84].mxu1  ;;  %8354 = vmatpush3.bf16.msra.mxu0 %v8849_v10 }
0x1c29   : > { %v8349_v11 = vpop.f32.mrb[85].mxu1  ;;  %8367 = vmatprep.subr.bf16.mxu0 %v9027_v1  ;;  %v3650_v33 = vadd.f32 %v7470_v31, %v3649_v26 }
0x1c2a   : > { %v3652_v12 = vpop.f32.mrb[86].mxu1 }
0x1c2b   : > { %v8350_v13 = vpop.f32.mrb[87].mxu1  ;;  %8356 = vmatmul.mubr.msk.bf16.vlgmr.msra.gmra.mrb[88].mxu0 %vm1178_vm3, %v9439_v15 }
0x1c2c   : > { %8369 = vmatprep.mubr.msk.bf16.mxu0 %vm9028_vm1, %v9027_v1 }
0x1c30   : > { %v3765_v43 = vpop.f32.mrb[88].mxu1 }
0x1c31   : > { %v3766_v44 = vadd.f32 %v7478_v42, %v3765_v43  ;;  %v8365_v45 = vpop.f32.mrb[89].mxu1 }
0x1c32   : > { %v3768_v46 = vpop.f32.mrb[90].mxu1 }
0x1c33   : > { %v3834_v47 = vpack.c.bf16 %v3766_v44, %v3766_v44  ;;  %v8366_v48 = vpop.f32.mrb[91].mxu1 }
0x1c35   : > { %v3839_v49 = vsel %vm1406_vm5, %v3834_v47, 0 }
0x1c36   : > { %8374 = vmatpush3.bf16.msra.mxu1 %v3839_v49 }
0x1c37   : > { %8385 = vmatprep.subr.bf16.mxu1 %v9027_v1 }
0x1cf6   : > { %v3590_v14 = vpop.f32.mrb[84].mxu0 }
0x1cf7   : > { %v9610_v16 = vadd.f32 %v3590_v14, %v9563_v24  ;;  %v8341_v17 = vpop.f32.mrb[85].mxu0  ;;  %v3771_v24 = vpack.c.bf16 %v3650_v33, %v3650_v33  ;;  %v8854_v33 = vld [vmem:[%s10169_s9] sm:$0xff]  }
0x1cf8   : > { %v3593_v19 = vpop.f32.mrb[86].mxu0 }
0x1cf9   : > { %v8342_v21 = vpop.f32.mrb[87].mxu0 }
0x1cfa   : > { %v8853_v21 = vld [vmem:[%s10166_s11 + $0x8] sm:$0xff]  }
0x1cfe   : > { %v3707_v22 = vpop.f32.mrb[88].mxu0 }
0x1cff   : > { %v3708_v23 = vadd.f32 %v7474_v18, %v3707_v22  ;;  %v8357_v27 = vpop.f32.mrb[89].mxu0 }
0x1d00   : > { %v3710_v28 = vpop.f32.mrb[90].mxu0  ;;  %v7486_v27 = vld [vmem:[%s10167_s16] ss:$0 sm:$0xff] }
0x1d01   : > { %v3772_v29 = vpack.c.bf16 %v3708_v23, %v3708_v23  ;;  %v8358_v30 = vpop.f32.mrb[91].mxu0 }
0x1d03   : > { %v3777_v32 = vsel %vm1340_vm4, %v3772_v29, 0  ;;  %v7487_v29 = vld [vmem:[%s10168_s5] ss:$0 sm:$0xff] }
0x1d04   : > { %8368 = vmatpush3.bf16.xpose.msra.mxu0 %v3777_v32 }
0x1d05   : > { %8379 = vmatprep.subr.bf16.mxu0 %v9027_v1 }
0x1d0b   : > { %8370 = vmatmul.mubr.msk.bf16.vlgmr.msra.gmra.mrb[92].mxu0 %vm1340_vm4, %v3771_v24  ;;  %v8855_v24 = vld [vmem:[%s10169_s9 + $0x8] sm:$0xff]  }
0x1d0c   : > { %8381 = vmatprep.mubr.msk.bf16.mxu0 %vm9028_vm1, %v9027_v1  ;;  %8380 = vmatpush3.bf16.msra.mxu0 %v3886_v57  ;;  %v8858_v57 = vld [vmem:[%s9062_s25 + $0x48] sm:$0xff]  }
0x1d0d   : > { %8393 = vmatprep.subr.bf16.mxu0 %v9027_v1 }
0x1dde   : > { %v3813_v20 = vpop.f32.mrb[92].mxu0 }
0x1ddf   : > { %v3819_v36 = vmul.f32 0.35355338, %v3813_v20  ;;  %v8371_v37 = vpop.f32.mrb[93].mxu0 }
0x1de0   : > { %v3816_v38 = vpop.f32.mrb[94].mxu0 }
0x1de1   : > { %v8372_v39 = vpop.f32.mrb[95].mxu0  ;;  %v3820_v40 = vsel %vm9285_vm6, %v3819_v36, -1e+30 }
0x1de2   : > { %v3821_v41 = vsel %vm1340_vm4, %v3820_v40, -inf }
0x1de3   : > { %3822 = vmax.xlane.f32.xlu0 %v3821_v41  ;;  %v7492_v41 = vld [vmem:[%s10171_s17] ss:$0 sm:$0xff] }
0x1e70   : > { %v3823_v50 = vpop.xlane.xlu0 %3822 }
0x1e71   : > { %v3824_v52 = vsub.f32 %v3820_v40, %v3823_v50 }
0x1e73   : > { %v3825_v53 = vmul.f32 1.442695, %v3824_v52 }
0x1e75   : > { %8940 = vpow2.f32 %v3825_v53 }
0x1e7f   : > { %v8941_v54 = vpop.eup %8940 }
0x1e80   : > { %v3827_v55 = vsel %vm1340_vm4, %v8941_v54, 0.0 }
0x1e81   : > { %3828 = vadd.xlane.f32.xlu1 %v3827_v55  ;;  %v8856_v55 = vld [vmem:[%s9062_s25 + $0x40] sm:$0xff]  }
0x1f0e   : > { %v3829_v58 = vpop.xlane.xlu1 %3828 }
0x1f0f   : > { %8942 = vrcp.f32 %v3829_v58  ;;  %v8859_v58 = vld [vmem:[%s9072_s3 + $0x48] sm:$0xff]  }
0x1f19   : > { %v8943_v59 = vpop.eup %8942 }
0x1f1a   : > { %v3832_v60 = vmul.f32 %v8943_v59, %v8941_v54 }
0x1f1c   : > { %v3833_v61 = vpack.c.bf16 %v3832_v60, %v3832_v60 }
0x1f1e   : > { %8376 = vmatmul.mubr.msk.bf16.vlgmr.msra.gmra.mrb[92].mxu1 %vm1340_vm4, %v3833_v61 }
0x1f1f   : > { %8389 = vmatprep.mubr.msk.bf16.mxu1 %vm9028_vm1, %v9027_v1 }
0x1ff1   : > { %v3875_v62 = vpop.f32.mrb[92].mxu1 }
0x1ff2   : > { %v3881_v63 = vpack.c.bf16 %v3875_v62, %v3875_v62  ;;  %v8377_v0 = vpop.f32.mrb[93].mxu1 }
0x1ff3   : > { %v3878_v2 = vpop.f32.mrb[94].mxu1 }
0x1ff4   : > { %v8378_v3 = vpop.f32.mrb[95].mxu1  ;;  %8382 = vmatmul.mubr.msk.bf16.vlgmr.msra.gmra.mrb[96].mxu0 %vm1340_vm4, %v3881_v63  ;;  %v7496_v63 = vld [vmem:[%s10172_s21] ss:$0 sm:$0xff] }
0x1ff5   : > { %8397 = vmatprep.mubr.msk.bf16.mxu0 %vm9028_vm1, %v9027_v1  ;;  %8394 = vmatpush3.bf16.msra.mxu0 %v8854_v33  ;;  %v7497_v2 = vld [vmem:[%s9187_s12] ss:$0 sm:$0xff] }
0x1ff6   : > { %8395 = vmatprep.subr.bf16.mxu0 %v9027_v1 }
0x1ff9   : > { %8396 = vmatpush3.bf16.msra.mxu0 %v8855_v24 }
0x1ffa   : > { %8409 = vmatprep.subr.bf16.mxu0 %v9027_v1 }
0x20c7   : > { %v3922_v5 = vpop.f32.mrb[96].mxu0 }
0x20c8   : > { %v3928_v6 = vadd.f32 %v3922_v5, %v9610_v16  ;;  %v8383_v7 = vpop.f32.mrb[97].mxu0  ;;  %v8852_v16 = vld [vmem:[%s10166_s11] sm:$0xff]  }
0x20c9   : > { %v3925_v8 = vpop.f32.mrb[98].mxu0  ;;  %8386 = vmatpush3.bf16.msra.mxu1 %v8852_v16  ;;  %v8860_v5 = vld [vmem:[%s9082_s14 + $0x40] sm:$0xff]   ;;  %v8861_v7 = vld [vmem:[%s9082_s14 + $0x48] sm:$0xff]  }
0x20ca   : > { %v3935_v9 = vadd.f32 %v7485_v4, %v3928_v6  ;;  %v8384_v10 = vpop.f32.mrb[99].mxu0  ;;  %8387 = vmatprep.subr.bf16.mxu1 %v9027_v1  ;;  %v7567_v8 = vld [vmem:[%s9077_s8 + $0x4] ss:$0 sm:$0xff] }
0x20cc   : > { %v3936_v26 = vadd.f32 %v3935_v9, %v9452_v25 }
0x20cd   : > { %8388 = vmatpush3.bf16.msra.mxu1 %v8853_v21  ;;  %v7563_v21 = vld [vmem:[%s9067_s29 + $0x4] ss:$0 sm:$0xff] }
0x20ce   : > { %v3939_v11 = vsel %vm1178_vm3, %v3936_v26, 0.0  ;;  %8401 = vmatprep.subr.bf16.mxu1 %v9027_v1 }
0x20cf   : > { %3940 = vadd.xlane.f32.xlu0 %v3939_v11 }
0x215c   : > { %v3941_v12 = vpop.xlane.xlu0 %3940 }
0x215d   : > { %v3942_v13 = vmul.f32 0.03125, %v3941_v12 }
0x215f   : > { %v3943_v14 = vsub.f32 %v3936_v26, %v3942_v13 }
0x2161   : > { %v3944_v17 = vmul.f32 %v3943_v14, %v3943_v14 }
0x2163   : > { %v3945_v19 = vsel %vm1178_vm3, %v3944_v17, 0.0 }
0x2164   : > { %3946 = vadd.xlane.f32.xlu1 %v3945_v19 }
0x21f1   : > { %v3947_v25 = vpop.xlane.xlu1 %3946 }
0x21f2   : > { %v3948_v18 = vmul.f32 0.03125, %v3947_v25 }
0x21f4   : > { %v3949_v22 = vadd.f32 1e-05, %v3948_v18  ;;  %v7571_v18 = vld [vmem:[%s9087_s19 + $0x4] ss:$0 sm:$0xff] }
0x21f6   : > { %8944 = vrsqrt.f32 %v3949_v22 }
0x2200   : > { %v8945_v23 = vpop.eup %8944 }
0x2201   : > { %v3951_v28 = vmul.f32 %v8945_v23, %v3943_v14 }
0x2203   : > { %v3958_v30 = vmul.f32 %v7486_v27, %v3951_v28 }
0x2205   : > { %v3965_v31 = vadd.f32 %v7487_v29, %v3958_v30  ;;  %v8862_v30 = vld [vmem:[%s9062_s25 + $0x50] sm:$0xff]  }
0x2207   : > { %v3976_v32 = vpack.c.bf16 %v3965_v31, %v3965_v31 }
0x2209   : > { %8390 = vmatmul.mubr.msk.bf16.vlgmr.msra.gmra.mrb[96].mxu1 %vm1178_vm3, %v3976_v32 }
0x220a   : > { %8405 = vmatprep.mubr.msk.bf16.mxu1 %vm9028_vm1, %v9027_v1  ;;  %8402 = vmatpush3.bf16.msra.mxu1 %v8856_v55 }
0x220b   : > { %8403 = vmatprep.subr.bf16.mxu1 %v9027_v1 }
0x220e   : > { %8404 = vmatpush3.bf16.msra.mxu1 %v8858_v57 }
0x220f   : > { %8417 = vmatprep.subr.bf16.mxu1 %v9027_v1 }
0x22dc   : > { %v4032_v35 = vpop.f32.mrb[96].mxu1 }
0x22dd   : > { %v4033_v20 = vadd.f32 %v7488_v34, %v4032_v35  ;;  %v8391_v36 = vpop.f32.mrb[97].mxu1  ;;  %v8863_v34 = vld [vmem:[%s9062_s25 + $0x58] sm:$0xff]   ;;  %v8864_v35 = vld [vmem:[%s9082_s14 + $0x50] sm:$0xff]  }
0x22de   : > { %v4035_v37 = vpop.f32.mrb[98].mxu1 }
0x22df   : > { %v4038_v38 = vmax.f32 %v4033_v20, 0.0  ;;  %v8392_v39 = vpop.f32.mrb[99].mxu1  ;;  %v8865_v20 = vld [vmem:[%s9082_s14 + $0x58] sm:$0xff]  }
0x22e1   : > { %v4039_v40 = vpack.c.bf16 %v4038_v38, %v4038_v38 }
0x22e3   : > { %8398 = vmatmul.mubr.msk.bf16.vlgmr.msra.gmra.mrb[100].mxu0 %vm1178_vm3, %v4039_v40 }
0x22e4   : > { %8413 = vmatprep.mubr.msk.bf16.mxu0 %vm9028_vm1, %v9027_v1  ;;  %8410 = vmatpush3.bf16.msra.mxu0 %v8857_v56 }
0x22e5   : > { %8411 = vmatprep.subr.bf16.mxu0 %v9027_v1 }
0x22e8   : > { %8412 = vmatpush3.bf16.msra.mxu0 %v8859_v58 }
0x22e9   : > { %8425 = vmatprep.subr.bf16.mxu0 %v9027_v1 }
0x23b6   : > { %v4095_v42 = vpop.f32.mrb[100].mxu0 }
0x23b7   : > { %v4096_v43 = vadd.f32 %v7492_v41, %v4095_v42  ;;  %v8399_v44 = vpop.f32.mrb[101].mxu0 }
0x23b8   : > { %v4098_v45 = vpop.f32.mrb[102].mxu0 }
0x23b9   : > { %v8400_v46 = vpop.f32.mrb[103].mxu0  ;;  %v4101_v47 = vadd.f32 %v4096_v43, %v3965_v31 }
0x23bb   : > { %v4104_v48 = vsel %vm1178_vm3, %v4101_v47, 0.0 }
0x23bc   : > { %4105 = vadd.xlane.f32.xlu0 %v4104_v48 }
0x2449   : > { %v4106_v49 = vpop.xlane.xlu0 %4105 }
0x244a   : > { %v4107_v50 = vmul.f32 0.03125, %v4106_v49 }
0x244c   : > { %v4108_v52 = vsub.f32 %v4101_v47, %v4107_v50  ;;  %v7585_v47 = vld [vmem:[%s9087_s19 + $0x5] ss:$0 sm:$0xff] }
0x244e   : > { %v4109_v53 = vmul.f32 %v4108_v52, %v4108_v52 }
0x2450   : > { %v4110_v54 = vsel %vm1178_vm3, %v4109_v53, 0.0 }
0x2451   : > { %4111 = vadd.xlane.f32.xlu1 %v4110_v54 }
0x24de   : > { %v4112_v59 = vpop.xlane.xlu1 %4111 }
0x24df   : > { %v4113_v60 = vmul.f32 0.03125, %v4112_v59 }
0x24e1   : > { %v4114_v61 = vadd.f32 1e-05, %v4113_v60 }
0x24e3   : > { %8946 = vrsqrt.f32 %v4114_v61 }
0x24ed   : > { %v8947_v62 = vpop.eup %8946 }
0x24ee   : > { %v4116_v0 = vmul.f32 %v8947_v62, %v4108_v52 }
0x24f0   : > { %v4123_v3 = vmul.f32 %v7496_v63, %v4116_v0  ;;  %v8866_v0 = vld [vmem:[%s9072_s3 + $0x50] sm:$0xff]  }
0x24f2   : > { %v9678_v4 = vadd.f32 %v7497_v2, %v4123_v3  ;;  %v8867_v3 = vld [vmem:[%s9072_s3 + $0x58] sm:$0xff]  }
0x24f4   : > { %v9683_v6 = vpack.c.bf16 %v9678_v4, %v9678_v4 }
0x24f6   : > { %8406 = vmatmul.mubr.msk.bf16.vlgmr.msra.gmra.mrb[100].mxu1 %vm1178_vm3, %v9683_v6  ;;  %8414 = vmatmul.mubr.msk.bf16.vlgmr.msra.gmra.mrb[104].mxu0 %vm1178_vm3, %v9683_v6 }
0x24f7   : > { %8418 = vmatpush3.bf16.msra.mxu1 %v8860_v5  ;;  %8421 = vmatprep.mubr.msk.bf16.mxu1 %vm9028_vm1, %v9027_v1 }
0x24f8   : > { %8419 = vmatprep.subr.bf16.mxu1 %v9027_v1  ;;  %8427 = vmatprep.mubr.msk.bf16.mxu0 %vm9028_vm1, %v9027_v1 }
0x24fb   : > { %8420 = vmatpush3.bf16.msra.mxu1 %v8861_v7 }
0x24fc   : > { %8431 = vmatprep.subr.bf16.mxu1 %v9027_v1 }
0x24fe   : > { %8422 = vmatmul.mubr.msk.bf16.vlgmr.msra.gmra.mrb[104].mxu1 %vm1178_vm3, %v9683_v6 }
0x24ff   : > { %8433 = vmatprep.mubr.msk.bf16.mxu1 %vm9028_vm1, %v9027_v1 }
0x25c9   : > { %v4260_v9 = vpop.f32.mrb[100].mxu1  ;;  %v4318_v10 = vpop.f32.mrb[104].mxu0 }
0x25ca   : > { %v4319_v26 = vadd.f32 %v7567_v8, %v4318_v10  ;;  %v8407_v11 = vpop.f32.mrb[101].mxu1  ;;  %v8415_v12 = vpop.f32.mrb[105].mxu0  ;;  %v4261_v22 = vadd.f32 %v7563_v21, %v4260_v9  ;;  %v7581_v10 = vld [vmem:[%s9077_s8 + $0x5] ss:$0 sm:$0xff] }
0x25cb   : > { %v4263_v13 = vpop.f32.mrb[102].mxu1  ;;  %v4321_v14 = vpop.f32.mrb[106].mxu0 }
0x25cc   : > { %v4383_v17 = vpack.c.bf16 %v4319_v26, %v4319_v26  ;;  %v8408_v19 = vpop.f32.mrb[103].mxu1  ;;  %v8416_v16 = vpop.f32.mrb[107].mxu0  ;;  %v4382_v31 = vpack.c.bf16 %v4261_v22, %v4261_v22 }
0x25cd   : > { %v7577_v19 = vld [vmem:[%s9067_s29 + $0x5] ss:$0 sm:$0xff] }
0x25ce   : > { %v4388_v25 = vsel %vm1340_vm4, %v4383_v17, 0 }
0x25cf   : > { %8426 = vmatpush3.bf16.xpose.msra.mxu0 %v4388_v25 }
0x25d0   : > { %8437 = vmatprep.subr.bf16.mxu0 %v9027_v1 }
0x25d1   : > { %v4376_v23 = vpop.f32.mrb[104].mxu1 }
0x25d2   : > { %v4377_v27 = vadd.f32 %v7571_v18, %v4376_v23  ;;  %v8423_v28 = vpop.f32.mrb[105].mxu1 }
0x25d3   : > { %v4379_v29 = vpop.f32.mrb[106].mxu1 }
0x25d4   : > { %v4445_v32 = vpack.c.bf16 %v4377_v27, %v4377_v27  ;;  %v8424_v33 = vpop.f32.mrb[107].mxu1 }
0x25d6   : > { %v4450_v24 = vsel %vm1406_vm5, %v4445_v32, 0  ;;  %8428 = vmatmul.mubr.msk.bf16.vlgmr.msra.gmra.mrb[108].mxu0 %vm1340_vm4, %v4382_v31 }
0x25d7   : > { %8432 = vmatpush3.bf16.msra.mxu1 %v4450_v24  ;;  %8438 = vmatpush3.bf16.msra.mxu0 %v8862_v30 }
0x25d8   : > { %8439 = vmatprep.subr.bf16.mxu0 %v9027_v1  ;;  %8441 = vmatprep.mubr.msk.bf16.mxu0 %vm9028_vm1, %v9027_v1 }
0x25d9   : > { %8445 = vmatprep.subr.bf16.mxu1 %v9027_v1 }
0x25db   : > { %8440 = vmatpush3.bf16.msra.mxu0 %v8863_v34 }
0x25dc   : > { %8453 = vmatprep.subr.bf16.mxu0 %v9027_v1 }
0x25de   : > { %8442 = vmatmul.mubr.msk.bf16.vlgmr.msra.gmra.mrb[112].mxu0 %vm1178_vm3, %v9683_v6 }
0x25df   : > { %8454 = vmatpush3.bf16.msra.mxu0 %v8864_v35  ;;  %8457 = vmatprep.mubr.msk.bf16.mxu0 %vm9028_vm1, %v9027_v1  ;;  %v7559_v35 = vld [vmem:[%s9092_s24 + $0x14] sm:$0xf] }
0x25e0   : > { %8455 = vmatprep.subr.bf16.mxu0 %v9027_v1 }
0x25e3   : > { %8456 = vmatpush3.bf16.msra.mxu0 %v8865_v20  ;;  %v4782_v20 = vsel %vm1406_vm5, %v7559_v35, 0 }
0x25e4   : > { %8467 = vmatprep.subr.bf16.mxu0 %v9027_v1 }
0x25e6   : > { %8458 = vmatmul.mubr.msk.bf16.vlgmr.msra.gmra.mrb[116].mxu0 %vm1178_vm3, %v9683_v6 }
0x25e7   : > { %8469 = vmatprep.mubr.msk.bf16.mxu0 %vm9028_vm1, %v9027_v1 }
0x26a9   : > { %v4424_v36 = vpop.f32.mrb[108].mxu0 }
0x26aa   : > { %v4430_v37 = vmul.f32 0.35355338, %v4424_v36  ;;  %v8429_v38 = vpop.f32.mrb[109].mxu0 }
0x26ab   : > { %v4427_v39 = vpop.f32.mrb[110].mxu0  ;;  %v7558_v38 = vld [vmem:[%s9092_s24 + $0x10] sm:$0xf] }
0x26ac   : > { %v8430_v40 = vpop.f32.mrb[111].mxu0  ;;  %v4431_v41 = vsel %vm9285_vm6, %v4430_v37, -1e+30 }
0x26ad   : > { %v4432_v42 = vsel %vm1340_vm4, %v4431_v41, -inf }
0x26ae   : > { %4433 = vmax.xlane.f32.xlu0 %v4432_v42  ;;  %v8868_v42 = vld [vmem:[%s9072_s3 + $0x60] sm:$0xff]  }
0x26b1   : > { %v4545_v43 = vpop.f32.mrb[112].mxu0 }
0x26b2   : > { %v8443_v44 = vpop.f32.mrb[113].mxu0  ;;  %v4546_v21 = vadd.f32 %v7577_v19, %v4545_v43 }
0x26b3   : > { %v4548_v45 = vpop.f32.mrb[114].mxu0  ;;  %v8869_v44 = vld [vmem:[%s9072_s3 + $0x68] sm:$0xff]  }
0x26b4   : > { %v8444_v46 = vpop.f32.mrb[115].mxu0  ;;  %v4667_v25 = vpack.c.bf16 %v4546_v21, %v4546_v21 }
0x26b5   : > { %v8870_v46 = vld [vmem:[%s9062_s25 + $0x60] sm:$0xff]  }
0x26b9   : > { %v4661_v48 = vpop.f32.mrb[116].mxu0 }
0x26ba   : > { %v4662_v49 = vadd.f32 %v7585_v47, %v4661_v48  ;;  %v8459_v50 = vpop.f32.mrb[117].mxu0 }
0x26bb   : > { %v4664_v52 = vpop.f32.mrb[118].mxu0 }
0x26bc   : > { %v4730_v53 = vpack.c.bf16 %v4662_v49, %v4662_v49  ;;  %v8460_v54 = vpop.f32.mrb[119].mxu0  ;;  %v8871_v52 = vld [vmem:[%s9062_s25 + $0x68] sm:$0xff]  }
0x26bd   : > { %v8872_v54 = vld [vmem:[%s9082_s14 + $0x60] sm:$0xff]  }
0x26be   : > { %v4735_v55 = vsel %vm1406_vm5, %v4730_v53, 0 }
0x26bf   : > { %8468 = vmatpush3.bf16.msra.mxu0 %v4735_v55 }
0x26c0   : > { %8479 = vmatprep.subr.bf16.mxu0 %v9027_v1 }
0x273b   : > { %v4434_v56 = vpop.xlane.xlu0 %4433 }
0x273c   : > { %v4435_v57 = vsub.f32 %v4431_v41, %v4434_v56  ;;  %v4828_v41 = vsel %vm1406_vm5, %v7558_v38, 0 }
0x273e   : > { %v4436_v58 = vmul.f32 1.442695, %v4435_v57 }
0x2740   : > { %8948 = vpow2.f32 %v4436_v58  ;;  %v8873_v58 = vld [vmem:[%s9082_s14 + $0x68] sm:$0xff]  }
0x274a   : > { %v8949_v59 = vpop.eup %8948 }
0x274b   : > { %v4438_v60 = vsel %vm1340_vm4, %v8949_v59, 0.0 }
0x274c   : > { %4439 = vadd.xlane.f32.xlu1 %v4438_v60 }
0x27d9   : > { %v4440_v61 = vpop.xlane.xlu1 %4439 }
0x27da   : > { %8950 = vrcp.f32 %v4440_v61 }
0x27e4   : > { %v8951_v62 = vpop.eup %8950 }
0x27e5   : > { %v4443_v63 = vmul.f32 %v8951_v62, %v8949_v59  ;;  %v7597_v59 = vld [vmem:[%s9077_s8 + $0x6] ss:$0 sm:$0xff] }
0x27e7   : > { %v4444_v2 = vpack.c.bf16 %v4443_v63, %v4443_v63 }
0x27e9   : > { %8434 = vmatmul.mubr.msk.bf16.vlgmr.msra.gmra.mrb[108].mxu1 %vm1340_vm4, %v4444_v2 }
0x27ea   : > { %8446 = vmatpush3.bf16.msra.mxu1 %v8866_v0  ;;  %8449 = vmatprep.mubr.msk.bf16.mxu1 %vm9028_vm1, %v9027_v1 }
0x27eb   : > { %8447 = vmatprep.subr.bf16.mxu1 %v9027_v1 }
0x27ee   : > { %8448 = vmatpush3.bf16.msra.mxu1 %v8867_v3 }
0x27ef   : > { %8461 = vmatprep.subr.bf16.mxu1 %v9027_v1 }
0x27f1   : > { %8450 = vmatmul.mubr.msk.bf16.vlgmr.msra.gmra.mrb[112].mxu1 %vm1178_vm3, %v9683_v6 }
0x27f2   : > { %8463 = vmatprep.mubr.msk.bf16.mxu1 %vm9028_vm1, %v9027_v1 }
0x28bc   : > { %v4486_v5 = vpop.f32.mrb[108].mxu1 }
0x28bd   : > { %v8435_v7 = vpop.f32.mrb[109].mxu1  ;;  %v4492_v43 = vpack.c.bf16 %v4486_v5, %v4486_v5 }
0x28be   : > { %v4489_v8 = vpop.f32.mrb[110].mxu1 }
0x28bf   : > { %v8436_v9 = vpop.f32.mrb[111].mxu1 }
0x28c4   : > { %v4603_v26 = vpop.f32.mrb[112].mxu1 }
0x28c5   : > { %v4604_v11 = vadd.f32 %v7581_v10, %v4603_v26  ;;  %v8451_v12 = vpop.f32.mrb[113].mxu1  ;;  %v7593_v26 = vld [vmem:[%s9067_s29 + $0x6] ss:$0 sm:$0xff] }
0x28c6   : > { %v4606_v13 = vpop.f32.mrb[114].mxu1 }
0x28c7   : > { %v4668_v14 = vpack.c.bf16 %v4604_v11, %v4604_v11  ;;  %v8452_v17 = vpop.f32.mrb[115].mxu1 }
0x28c9   : > { %v4673_v16 = vsel %vm1340_vm4, %v4668_v14, 0 }
0x28ca   : > { %8462 = vmatpush3.bf16.xpose.msra.mxu1 %v4673_v16  ;;  %v7601_v16 = vld [vmem:[%s9087_s19 + $0x6] ss:$0 sm:$0xff] }
0x28cb   : > { %8473 = vmatprep.subr.bf16.mxu1 %v9027_v1 }
0x28d1   : > { %8464 = vmatmul.mubr.msk.bf16.vlgmr.msra.gmra.mrb[116].mxu1 %vm1340_vm4, %v4667_v25 }
0x28d2   : > { %8475 = vmatprep.mubr.msk.bf16.mxu1 %vm9028_vm1, %v9027_v1  ;;  %8474 = vmatpush3.bf16.msra.mxu1 %v4782_v20 }
0x28d3   : > { %8485 = vmatprep.subr.bf16.mxu1 %v9027_v1 }
0x29a4   : > { %v4709_v18 = vpop.f32.mrb[116].mxu1 }
0x29a5   : > { %v4715_v22 = vmul.f32 0.35355338, %v4709_v18  ;;  %v8465_v23 = vpop.f32.mrb[117].mxu1 }
0x29a6   : > { %v4712_v27 = vpop.f32.mrb[118].mxu1 }
0x29a7   : > { %v8466_v28 = vpop.f32.mrb[119].mxu1  ;;  %v4716_v29 = vsel %vm9285_vm6, %v4715_v22, -1e+30 }
0x29a8   : > { %v4717_v30 = vsel %vm1340_vm4, %v4716_v29, -inf }
0x29a9   : > { %4718 = vmax.xlane.f32.xlu0 %v4717_v30 }
0x2a36   : > { %v4719_v31 = vpop.xlane.xlu0 %4718 }
0x2a37   : > { %v4720_v32 = vsub.f32 %v4716_v29, %v4719_v31 }
0x2a39   : > { %v4721_v33 = vmul.f32 1.442695, %v4720_v32 }
0x2a3b   : > { %8952 = vpow2.f32 %v4721_v33 }
0x2a45   : > { %v8953_v24 = vpop.eup %8952 }
0x2a46   : > { %v4723_v34 = vsel %vm1340_vm4, %v8953_v24, 0.0 }
0x2a47   : > { %4724 = vadd.xlane.f32.xlu1 %v4723_v34 }
0x2ad4   : > { %v4725_v36 = vpop.xlane.xlu1 %4724 }
0x2ad5   : > { %8954 = vrcp.f32 %v4725_v36 }
0x2adf   : > { %v8955_v37 = vpop.eup %8954 }
0x2ae0   : > { %v4728_v39 = vmul.f32 %v8955_v37, %v8953_v24 }
0x2ae2   : > { %v4729_v40 = vpack.c.bf16 %v4728_v39, %v4728_v39  ;;  %v7560_v39 = vld [vmem:[%s9092_s24 + $0x18] sm:$0xf] }
0x2ae4   : > { %8470 = vmatmul.mubr.msk.bf16.vlgmr.msra.gmra.mrb[120].mxu0 %vm1340_vm4, %v4729_v40  ;;  %v5159_v40 = vsel %vm1406_vm5, %v7560_v39, 0 }
0x2ae5   : > { %8480 = vmatpush3.bf16.msra.mxu0 %v4828_v41  ;;  %8481 = vmatprep.mubr.msk.bf16.mxu0 %vm9028_vm1, %v9027_v1 }
0x2ae6   : > { %8493 = vmatprep.subr.bf16.mxu0 %v9027_v1 }
0x2aec   : > { %8482 = vmatmul.mubr.msk.bf16.vlgmr.msra.gmra.mrb[124].mxu0 %vm1340_vm4, %v4492_v43 }
0x2aed   : > { %8494 = vmatpush3.bf16.msra.mxu0 %v8868_v42  ;;  %8497 = vmatprep.mubr.msk.bf16.mxu0 %vm9028_vm1, %v9027_v1 }
0x2aee   : > { %8495 = vmatprep.subr.bf16.mxu0 %v9027_v1 }
0x2af1   : > { %8496 = vmatpush3.bf16.msra.mxu0 %v8869_v44  ;;  %v8874_v44 = vld [vmem:[%s9062_s25 + $0x70] sm:$0xff]  }
0x2af2   : > { %8509 = vmatprep.subr.bf16.mxu0 %v9027_v1 }
0x2af4   : > { %8498 = vmatmul.mubr.msk.bf16.vlgmr.msra.gmra.mrb[128].mxu0 %vm1178_vm3, %v9683_v6 }
0x2af5   : > { %8511 = vmatprep.mubr.msk.bf16.mxu0 %vm9028_vm1, %v9027_v1 }
0x2bb7   : > { %v4771_v45 = vpop.f32.mrb[120].mxu0 }
0x2bb8   : > { %v4777_v47 = vpack.c.bf16 %v4771_v45, %v4771_v45  ;;  %v8471_v48 = vpop.f32.mrb[121].mxu0 }
0x2bb9   : > { %v4774_v49 = vpop.f32.mrb[122].mxu0  ;;  %v8877_v48 = vld [vmem:[%s9082_s14 + $0x78] sm:$0xff]  }
0x2bba   : > { %v8472_v50 = vpop.f32.mrb[123].mxu0  ;;  %8476 = vmatmul.mubr.msk.bf16.vlgmr.msra.gmra.mrb[120].mxu1 %vm1340_vm4, %v4777_v47  ;;  %v8876_v47 = vld [vmem:[%s9082_s14 + $0x70] sm:$0xff]  }
0x2bbb   : > { %8486 = vmatpush3.bf16.msra.mxu1 %v8870_v46  ;;  %8489 = vmatprep.mubr.msk.bf16.mxu1 %vm9028_vm1, %v9027_v1  ;;  %v8875_v46 = vld [vmem:[%s9062_s25 + $0x78] sm:$0xff]   ;;  %v8878_v50 = vld [vmem:[%s9072_s3 + $0x70] sm:$0xff]  }
0x2bbc   : > { %8487 = vmatprep.subr.bf16.mxu1 %v9027_v1 }
0x2bbf   : > { %v4864_v53 = vpop.f32.mrb[124].mxu0  ;;  %8488 = vmatpush3.bf16.msra.mxu1 %v8871_v52 }
0x2bc0   : > { %v8483_v55 = vpop.f32.mrb[125].mxu0  ;;  %8501 = vmatprep.subr.bf16.mxu1 %v9027_v1 }
0x2bc1   : > { %v4867_v56 = vpop.f32.mrb[126].mxu0 }
0x2bc2   : > { %v8484_v57 = vpop.f32.mrb[127].mxu0  ;;  %8490 = vmatmul.mubr.msk.bf16.vlgmr.msra.gmra.mrb[124].mxu1 %vm1178_vm3, %v9683_v6  ;;  %v8879_v56 = vld [vmem:[%s9072_s3 + $0x78] sm:$0xff]  }
0x2bc3   : > { %8502 = vmatpush3.bf16.msra.mxu1 %v8872_v54  ;;  %8505 = vmatprep.mubr.msk.bf16.mxu1 %vm9028_vm1, %v9027_v1 }
0x2bc4   : > { %8503 = vmatprep.subr.bf16.mxu1 %v9027_v1 }
0x2bc7   : > { %v4980_v60 = vpop.f32.mrb[128].mxu0  ;;  %8504 = vmatpush3.bf16.msra.mxu1 %v8873_v58 }
0x2bc8   : > { %v4981_v61 = vadd.f32 %v7597_v59, %v4980_v60  ;;  %v8499_v62 = vpop.f32.mrb[129].mxu0  ;;  %8515 = vmatprep.subr.bf16.mxu1 %v9027_v1 }
0x2bc9   : > { %v4983_v63 = vpop.f32.mrb[130].mxu0 }
0x2bca   : > { %v5045_v0 = vpack.c.bf16 %v4981_v61, %v4981_v61  ;;  %v8500_v2 = vpop.f32.mrb[131].mxu0  ;;  %8506 = vmatmul.mubr.msk.bf16.vlgmr.msra.gmra.mrb[128].mxu1 %vm1178_vm3, %v9683_v6  ;;  %v7616_v61 = vld [vmem:[%s9087_s19 + $0x7] ss:$0 sm:$0xff] }
0x2bcb   : > { %8517 = vmatprep.mubr.msk.bf16.mxu1 %vm9028_vm1, %v9027_v1 }
0x2bcc   : > { %v5050_v3 = vsel %vm1340_vm4, %v5045_v0, 0 }
0x2bcd   : > { %8510 = vmatpush3.bf16.xpose.msra.mxu0 %v5050_v3 }
0x2bce   : > { %8521 = vmatprep.subr.bf16.mxu0 %v9027_v1 }
0x2c8d   : > { %v4818_v5 = vpop.f32.mrb[120].mxu1 }
0x2c8e   : > { %v9797_v7 = vadd.f32 %v4864_v53, %v4818_v5  ;;  %v8477_v8 = vpop.f32.mrb[121].mxu1 }
0x2c8f   : > { %v4821_v9 = vpop.f32.mrb[122].mxu1 }
0x2c90   : > { %v8478_v10 = vpop.f32.mrb[123].mxu1 }
0x2c95   : > { %v4922_v11 = vpop.f32.mrb[124].mxu1 }
0x2c96   : > { %v4923_v12 = vadd.f32 %v7593_v26, %v4922_v11  ;;  %v8491_v13 = vpop.f32.mrb[125].mxu1 }
0x2c97   : > { %v4925_v14 = vpop.f32.mrb[126].mxu1 }
0x2c98   : > { %v5044_v17 = vpack.c.bf16 %v4923_v12, %v4923_v12  ;;  %v8492_v19 = vpop.f32.mrb[127].mxu1  ;;  %v7612_v12 = vld [vmem:[%s9077_s8 + $0x7] ss:$0 sm:$0xff] }
0x2c9a   : > { %8512 = vmatmul.mubr.msk.bf16.vlgmr.msra.gmra.mrb[132].mxu0 %vm1340_vm4, %v5044_v17 }
0x2c9b   : > { %8523 = vmatprep.mubr.msk.bf16.mxu0 %vm9028_vm1, %v9027_v1  ;;  %8522 = vmatpush3.bf16.msra.mxu0 %v5159_v40 }
0x2c9c   : > { %8535 = vmatprep.subr.bf16.mxu0 %v9027_v1 }
0x2c9d   : > { %v5038_v21 = vpop.f32.mrb[128].mxu1 }
0x2c9e   : > { %v5039_v25 = vadd.f32 %v7601_v16, %v5038_v21  ;;  %v8507_v18 = vpop.f32.mrb[129].mxu1 }
0x2c9f   : > { %v5041_v22 = vpop.f32.mrb[130].mxu1 }
0x2ca0   : > { %v5107_v23 = vpack.c.bf16 %v5039_v25, %v5039_v25  ;;  %v8508_v27 = vpop.f32.mrb[131].mxu1  ;;  %v7608_v25 = vld [vmem:[%s9067_s29 + $0x7] ss:$0 sm:$0xff] }
0x2ca2   : > { %v5112_v28 = vsel %vm1406_vm5, %v5107_v23, 0 }
0x2ca3   : > { %8516 = vmatpush3.bf16.msra.mxu1 %v5112_v28 }
0x2ca4   : > { %8527 = vmatprep.subr.bf16.mxu1 %v9027_v1 }
0x2d6d   : > { %v5086_v29 = vpop.f32.mrb[132].mxu0 }
0x2d6e   : > { %v5092_v30 = vmul.f32 0.35355338, %v5086_v29  ;;  %v8513_v31 = vpop.f32.mrb[133].mxu0 }
0x2d6f   : > { %v5089_v32 = vpop.f32.mrb[134].mxu0 }
0x2d70   : > { %v8514_v33 = vpop.f32.mrb[135].mxu0  ;;  %v5093_v24 = vsel %vm9285_vm6, %v5092_v30, -1e+30 }
0x2d71   : > { %v5094_v34 = vsel %vm1340_vm4, %v5093_v24, -inf }
0x2d72   : > { %5095 = vmax.xlane.f32.xlu0 %v5094_v34 }
0x2dff   : > { %v5096_v35 = vpop.xlane.xlu0 %5095 }
0x2e00   : > { %v5097_v20 = vsub.f32 %v5093_v24, %v5096_v35 }
0x2e02   : > { %v5098_v36 = vmul.f32 1.442695, %v5097_v20 }
0x2e04   : > { %8956 = vpow2.f32 %v5098_v36  ;;  %v7561_v36 = vld [vmem:[%s9092_s24 + $0x1c] sm:$0xf] }
0x2e0e   : > { %v8957_v37 = vpop.eup %8956 }
0x2e0f   : > { %v5100_v38 = vsel %vm1340_vm4, %v8957_v37, 0.0 }
0x2e10   : > { %5101 = vadd.xlane.f32.xlu1 %v5100_v38 }
0x2e9d   : > { %v5102_v41 = vpop.xlane.xlu1 %5101 }
0x2e9e   : > { %8958 = vrcp.f32 %v5102_v41 }
0x2ea8   : > { %v8959_v42 = vpop.eup %8958 }
0x2ea9   : > { %v5105_v43 = vmul.f32 %v8959_v42, %v8957_v37  ;;  %v5491_v37 = vsel %vm1406_vm5, %v7561_v36, 0 }
0x2eab   : > { %v5106_v45 = vpack.c.bf16 %v5105_v43, %v5105_v43 }
0x2ead   : > { %8518 = vmatmul.mubr.msk.bf16.vlgmr.msra.gmra.mrb[132].mxu1 %vm1340_vm4, %v5106_v45 }
0x2eae   : > { %8528 = vmatpush3.bf16.msra.mxu1 %v8874_v44  ;;  %8531 = vmatprep.mubr.msk.bf16.mxu1 %vm9028_vm1, %v9027_v1 }
0x2eaf   : > { %8529 = vmatprep.subr.bf16.mxu1 %v9027_v1 }
0x2eb2   : > { %8530 = vmatpush3.bf16.msra.mxu1 %v8875_v46 }
0x2eb3   : > { %8543 = vmatprep.subr.bf16.mxu1 %v9027_v1 }
0x2eb5   : > { %8532 = vmatmul.mubr.msk.bf16.vlgmr.msra.gmra.mrb[136].mxu1 %vm1178_vm3, %v9683_v6 }
0x2eb6   : > { %8544 = vmatpush3.bf16.msra.mxu1 %v8876_v47  ;;  %8547 = vmatprep.mubr.msk.bf16.mxu1 %vm9028_vm1, %v9027_v1  ;;  %v7623_v47 = vld [vmem:[%s9097_s30 + $0x1] ss:$0 sm:$0xff] }
0x2eb7   : > { %8545 = vmatprep.subr.bf16.mxu1 %v9027_v1 }
0x2eba   : > { %8546 = vmatpush3.bf16.msra.mxu1 %v8877_v48 }
0x2ebb   : > { %8557 = vmatprep.subr.bf16.mxu1 %v9027_v1 }
0x2ebd   : > { %8548 = vmatmul.mubr.msk.bf16.vlgmr.msra.gmra.mrb[140].mxu1 %vm1178_vm3, %v9683_v6 }
0x2ebe   : > { %8559 = vmatprep.mubr.msk.bf16.mxu1 %vm9028_vm1, %v9027_v1 }
0x2f80   : > { %v5148_v49 = vpop.f32.mrb[132].mxu1 }
0x2f81   : > { %v5154_v52 = vpack.c.bf16 %v5148_v49, %v5148_v49  ;;  %v8519_v53 = vpop.f32.mrb[133].mxu1 }
0x2f82   : > { %v5151_v54 = vpop.f32.mrb[134].mxu1 }
0x2f83   : > { %v8520_v55 = vpop.f32.mrb[135].mxu1  ;;  %8524 = vmatmul.mubr.msk.bf16.vlgmr.msra.gmra.mrb[136].mxu0 %vm1340_vm4, %v5154_v52 }
0x2f84   : > { %8536 = vmatpush3.bf16.msra.mxu0 %v8878_v50  ;;  %8539 = vmatprep.mubr.msk.bf16.mxu0 %vm9028_vm1, %v9027_v1 }
0x2f85   : > { %8537 = vmatprep.subr.bf16.mxu0 %v9027_v1 }
0x2f88   : > { %v5254_v57 = vpop.f32.mrb[136].mxu1  ;;  %8538 = vmatpush3.bf16.msra.mxu0 %v8879_v56 }
0x2f89   : > { %v8533_v58 = vpop.f32.mrb[137].mxu1  ;;  %8551 = vmatprep.subr.bf16.mxu0 %v9027_v1  ;;  %v5255_v22 = vadd.f32 %v7608_v25, %v5254_v57 }
0x2f8a   : > { %v5257_v59 = vpop.f32.mrb[138].mxu1 }
0x2f8b   : > { %v8534_v60 = vpop.f32.mrb[139].mxu1  ;;  %8540 = vmatmul.mubr.msk.bf16.vlgmr.msra.gmra.mrb[140].mxu0 %vm1178_vm3, %v9683_v6  ;;  %v5376_v23 = vpack.c.bf16 %v5255_v22, %v5255_v22  ;;  %v7693_v22 = vld [vmem:[%s10161_s26 + $0x4] ss:$0 sm:$0xff] }
0x2f8c   : > { %8553 = vmatprep.mubr.msk.bf16.mxu0 %vm9028_vm1, %v9027_v1 }
0x2f90   : > { %v5370_v62 = vpop.f32.mrb[140].mxu1 }
0x2f91   : > { %v5371_v63 = vadd.f32 %v7616_v61, %v5370_v62  ;;  %v8549_v0 = vpop.f32.mrb[141].mxu1  ;;  %v8880_v62 = vld [vmem:[%s9122_s4 + $0x40] sm:$0xff]  }
0x2f92   : > { %v5373_v2 = vpop.f32.mrb[142].mxu1  ;;  %v8883_v0 = vld [vmem:[%s10157_s15 + $0x48] sm:$0xff]  }
0x2f93   : > { %v5439_v3 = vpack.c.bf16 %v5371_v63, %v5371_v63  ;;  %v8550_v5 = vpop.f32.mrb[143].mxu1  ;;  %v8881_v63 = vld [vmem:[%s9122_s4 + $0x48] sm:$0xff]  }
0x2f95   : > { %v5444_v8 = vsel %vm1406_vm5, %v5439_v3, 0 }
0x2f96   : > { %8558 = vmatpush3.bf16.msra.mxu1 %v5444_v8 }
0x2f97   : > { %8569 = vmatprep.subr.bf16.mxu1 %v9027_v1 }
0x3056   : > { %v5195_v9 = vpop.f32.mrb[136].mxu0 }
0x3057   : > { %v5201_v6 = vadd.f32 %v5195_v9, %v9797_v7  ;;  %v8525_v10 = vpop.f32.mrb[137].mxu0  ;;  %v7626_v9 = vld [vmem:[%s10158_s18 + $0x1] ss:$0 sm:$0xff] }
0x3058   : > { %v5198_v26 = vpop.f32.mrb[138].mxu0  ;;  %v7627_v10 = vld [vmem:[%s10159_s22 + $0x1] ss:$0 sm:$0xff] }
0x3059   : > { %v8526_v11 = vpop.f32.mrb[139].mxu0 }
0x305e   : > { %v5312_v13 = vpop.f32.mrb[140].mxu0 }
0x305f   : > { %v5313_v14 = vadd.f32 %v7612_v12, %v5312_v13  ;;  %v8541_v17 = vpop.f32.mrb[141].mxu0  ;;  %v7697_v13 = vld [vmem:[%s10160_s23 + $0x4] ss:$0 sm:$0xff] }
0x3060   : > { %v5315_v19 = vpop.f32.mrb[142].mxu0 }
0x3061   : > { %v5377_v16 = vpack.c.bf16 %v5313_v14, %v5313_v14  ;;  %v8542_v21 = vpop.f32.mrb[143].mxu0 }
0x3063   : > { %v5382_v18 = vsel %vm1340_vm4, %v5377_v16, 0 }
0x3064   : > { %8552 = vmatpush3.bf16.xpose.msra.mxu0 %v5382_v18 }
0x3065   : > { %8563 = vmatprep.subr.bf16.mxu0 %v9027_v1 }
0x306b   : > { %8554 = vmatmul.mubr.msk.bf16.vlgmr.msra.gmra.mrb[144].mxu0 %vm1340_vm4, %v5376_v23 }
0x306c   : > { %8565 = vmatprep.mubr.msk.bf16.mxu0 %vm9028_vm1, %v9027_v1  ;;  %8564 = vmatpush3.bf16.msra.mxu0 %v5491_v37 }
0x306d   : > { %8577 = vmatprep.subr.bf16.mxu0 %v9027_v1 }
0x313e   : > { %v5418_v7 = vpop.f32.mrb[144].mxu0 }
0x313f   : > { %v5424_v27 = vmul.f32 0.35355338, %v5418_v7  ;;  %v8555_v28 = vpop.f32.mrb[145].mxu0 }
0x3140   : > { %v5421_v29 = vpop.f32.mrb[146].mxu0 }
0x3141   : > { %v8556_v30 = vpop.f32.mrb[147].mxu0  ;;  %v5425_v31 = vsel %vm9285_vm6, %v5424_v27, -1e+30  ;;  %v8884_v29 = vld [vmem:[%s10157_s15 + $0x50] sm:$0xff]  }
0x3142   : > { %v5426_v32 = vsel %vm1340_vm4, %v5425_v31, -inf }
0x3143   : > { %5427 = vmax.xlane.f32.xlu0 %v5426_v32  ;;  %v8885_v32 = vld [vmem:[%s10157_s15 + $0x58] sm:$0xff]  }
0x31d0   : > { %v5428_v33 = vpop.xlane.xlu0 %5427 }
0x31d1   : > { %v5429_v24 = vsub.f32 %v5425_v31, %v5428_v33  ;;  %v8886_v33 = vld [vmem:[%s10162_s28 + $0x40] sm:$0xff]  }
0x31d3   : > { %v5430_v34 = vmul.f32 1.442695, %v5429_v24  ;;  %v8887_v24 = vld [vmem:[%s10162_s28 + $0x48] sm:$0xff]  }
0x31d5   : > { %8960 = vpow2.f32 %v5430_v34 }
0x31df   : > { %v8961_v35 = vpop.eup %8960 }
0x31e0   : > { %v5432_v20 = vsel %vm1340_vm4, %v8961_v35, 0.0 }
0x31e1   : > { %5433 = vadd.xlane.f32.xlu1 %v5432_v20 }
0x326e   : > { %v5434_v38 = vpop.xlane.xlu1 %5433 }
0x326f   : > { %8962 = vrcp.f32 %v5434_v38 }
0x3279   : > { %v8963_v39 = vpop.eup %8962 }
0x327a   : > { %v5437_v40 = vmul.f32 %v8963_v39, %v8961_v35 }
0x327c   : > { %v5438_v41 = vpack.c.bf16 %v5437_v40, %v5437_v40 }
0x327e   : > { %8560 = vmatmul.mubr.msk.bf16.vlgmr.msra.gmra.mrb[144].mxu1 %vm1340_vm4, %v5438_v41 }
0x327f   : > { %8573 = vmatprep.mubr.msk.bf16.mxu1 %vm9028_vm1, %v9027_v1 }
0x3351   : > { %v5480_v42 = vpop.f32.mrb[144].mxu1 }
0x3352   : > { %v5486_v43 = vpack.c.bf16 %v5480_v42, %v5480_v42  ;;  %v8561_v44 = vpop.f32.mrb[145].mxu1 }
0x3353   : > { %v5483_v45 = vpop.f32.mrb[146].mxu1  ;;  %v7701_v44 = vld [vmem:[%s10163_s1 + $0x4] ss:$0 sm:$0xff] }
0x3354   : > { %v8562_v46 = vpop.f32.mrb[147].mxu1  ;;  %8566 = vmatmul.mubr.msk.bf16.vlgmr.msra.gmra.mrb[148].mxu0 %vm1340_vm4, %v5486_v43 }
0x3355   : > { %8581 = vmatprep.mubr.msk.bf16.mxu0 %vm9028_vm1, %v9027_v1  ;;  %8578 = vmatpush3.bf16.msra.mxu0 %v8880_v62 }
0x3356   : > { %8579 = vmatprep.subr.bf16.mxu0 %v9027_v1 }
0x3359   : > { %8580 = vmatpush3.bf16.msra.mxu0 %v8881_v63  ;;  %v8889_v63 = vld [vmem:[%s9122_s4 + $0x58] sm:$0xff]  }
0x335a   : > { %8593 = vmatprep.subr.bf16.mxu0 %v9027_v1 }
0x335c   : > { %8582 = vmatmul.mubr.msk.bf16.vlgmr.msra.gmra.mrb[152].mxu0 %vm1178_vm3, %v9439_v15 }
0x335d   : > { %8595 = vmatprep.mubr.msk.bf16.mxu0 %vm9028_vm1, %v9027_v1 }
0x3427   : > { %v5527_v48 = vpop.f32.mrb[148].mxu0 }
0x3428   : > { %v5533_v49 = vadd.f32 %v5527_v48, %v5201_v6  ;;  %v8567_v50 = vpop.f32.mrb[149].mxu0 }
0x3429   : > { %v5530_v52 = vpop.f32.mrb[150].mxu0 }
0x342a   : > { %v5540_v53 = vadd.f32 %v7623_v47, %v5533_v49  ;;  %v8568_v54 = vpop.f32.mrb[151].mxu0 }
0x342c   : > { %v5541_v55 = vadd.f32 %v5540_v53, %v9678_v4  ;;  %v8882_v4 = vld [vmem:[%s10157_s15 + $0x40] sm:$0xff]  }
0x342d   : > { %8570 = vmatpush3.bf16.msra.mxu1 %v8882_v4 }
0x342e   : > { %v5546_v56 = vsel %vm1178_vm3, %v5541_v55, 0.0  ;;  %8571 = vmatprep.subr.bf16.mxu1 %v9027_v1 }
0x342f   : > { %5547 = vadd.xlane.f32.xlu0 %v5546_v56  ;;  %v5760_v14 = vpop.f32.mrb[152].mxu0 }
0x3430   : > { %v5761_v17 = vadd.f32 %v7697_v13, %v5760_v14  ;;  %v8583_v19 = vpop.f32.mrb[153].mxu0  ;;  %v7707_v14 = vld [vmem:[%s10161_s26 + $0x5] ss:$0 sm:$0xff] }
0x3431   : > { %8572 = vmatpush3.bf16.msra.mxu1 %v8883_v0  ;;  %v5763_v16 = vpop.f32.mrb[154].mxu0 }
0x3432   : > { %8585 = vmatprep.subr.bf16.mxu1 %v9027_v1  ;;  %v5825_v21 = vpack.c.bf16 %v5761_v17, %v5761_v17  ;;  %v8584_v25 = vpop.f32.mrb[155].mxu0 }
0x3433   : > { %v8891_v25 = vld [vmem:[%s10162_s28 + $0x58] sm:$0xff]  }
0x3434   : > { %v5830_v18 = vsel %vm1340_vm4, %v5825_v21, 0  ;;  %v8890_v21 = vld [vmem:[%s10162_s28 + $0x50] sm:$0xff]  }
0x3435   : > { %8594 = vmatpush3.bf16.xpose.msra.mxu0 %v5830_v18 }
0x3436   : > { %8605 = vmatprep.subr.bf16.mxu0 %v9027_v1 }
0x34bc   : > { %v5548_v57 = vpop.xlane.xlu0 %5547 }
0x34bd   : > { %v5549_v58 = vmul.f32 0.03125, %v5548_v57 }
0x34bf   : > { %v5550_v59 = vsub.f32 %v5541_v55, %v5549_v58 }
0x34c1   : > { %v5551_v60 = vmul.f32 %v5550_v59, %v5550_v59 }
0x34c3   : > { %v5552_v61 = vsel %vm1178_vm3, %v5551_v60, 0.0 }
0x34c4   : > { %5553 = vadd.xlane.f32.xlu1 %v5552_v61  ;;  %v8888_v61 = vld [vmem:[%s9122_s4 + $0x50] sm:$0xff]  }
0x3551   : > { %v5554_v2 = vpop.xlane.xlu1 %5553 }
0x3552   : > { %v5555_v3 = vmul.f32 0.03125, %v5554_v2 }
0x3554   : > { %v5556_v5 = vadd.f32 1e-05, %v5555_v3 }
0x3556   : > { %8964 = vrsqrt.f32 %v5556_v5  ;;  %v7711_v5 = vld [vmem:[%s10160_s23 + $0x5] ss:$0 sm:$0xff] }
0x3560   : > { %v8965_v8 = vpop.eup %8964 }
0x3561   : > { %v5558_v6 = vmul.f32 %v8965_v8, %v5550_v59 }
0x3563   : > { %v5565_v26 = vmul.f32 %v7626_v9, %v5558_v6 }
0x3565   : > { %v9885_v11 = vadd.f32 %v7627_v10, %v5565_v26 }
0x3567   : > { %v9889_v12 = vpack.c.bf16 %v9885_v11, %v9885_v11 }
0x3569   : > { %8574 = vmatmul.mubr.msk.bf16.vlgmr.msra.gmra.mrb[148].mxu1 %vm1178_vm3, %v9889_v12 }
0x356a   : > { %8589 = vmatprep.mubr.msk.bf16.mxu1 %vm9028_vm1, %v9027_v1  ;;  %8586 = vmatpush3.bf16.msra.mxu1 %v8886_v33 }
0x356b   : > { %8587 = vmatprep.subr.bf16.mxu1 %v9027_v1 }
0x356e   : > { %8588 = vmatpush3.bf16.msra.mxu1 %v8887_v24 }
0x356f   : > { %8599 = vmatprep.subr.bf16.mxu1 %v9027_v1 }
0x3571   : > { %8590 = vmatmul.mubr.msk.bf16.vlgmr.msra.gmra.mrb[152].mxu1 %vm1178_vm3, %v9439_v15 }
0x3572   : > { %8601 = vmatprep.mubr.msk.bf16.mxu1 %vm9028_vm1, %v9027_v1 }
0x363c   : > { %v5702_v23 = vpop.f32.mrb[148].mxu1 }
0x363d   : > { %v5703_v7 = vadd.f32 %v7693_v22, %v5702_v23  ;;  %v8575_v27 = vpop.f32.mrb[149].mxu1 }
0x363e   : > { %v5705_v28 = vpop.f32.mrb[150].mxu1 }
0x363f   : > { %v5824_v30 = vpack.c.bf16 %v5703_v7, %v5703_v7  ;;  %v8576_v31 = vpop.f32.mrb[151].mxu1 }
0x3641   : > { %8596 = vmatmul.mubr.msk.bf16.vlgmr.msra.gmra.mrb[156].mxu0 %vm1340_vm4, %v5824_v30 }
0x3642   : > { %8606 = vmatpush3.bf16.msra.mxu0 %v8884_v29  ;;  %8609 = vmatprep.mubr.msk.bf16.mxu0 %vm9028_vm1, %v9027_v1 }
0x3643   : > { %8607 = vmatprep.subr.bf16.mxu0 %v9027_v1 }
0x3644   : > { %v5818_v45 = vpop.f32.mrb[152].mxu1 }
0x3645   : > { %v5819_v46 = vadd.f32 %v7701_v44, %v5818_v45  ;;  %v8591_v47 = vpop.f32.mrb[153].mxu1  ;;  %v7688_v45 = vld [vmem:[%s10164_s2 + $0x10] sm:$0xf] }
0x3646   : > { %8608 = vmatpush3.bf16.msra.mxu0 %v8885_v32  ;;  %v5821_v48 = vpop.f32.mrb[154].mxu1 }
0x3647   : > { %8621 = vmatprep.subr.bf16.mxu0 %v9027_v1  ;;  %v5887_v49 = vpack.c.bf16 %v5819_v46, %v5819_v46  ;;  %v8592_v50 = vpop.f32.mrb[155].mxu1  ;;  %v6270_v48 = vsel %vm1406_vm5, %v7688_v45, 0 }
0x3649   : > { %8610 = vmatmul.mubr.msk.bf16.vlgmr.msra.gmra.mrb[160].mxu0 %vm1178_vm3, %v9889_v12  ;;  %v5892_v52 = vsel %vm1406_vm5, %v5887_v49, 0  ;;  %v8892_v49 = vld [vmem:[%s9122_s4 + $0x60] sm:$0xff]  }
0x364a   : > { %8625 = vmatprep.mubr.msk.bf16.mxu0 %vm9028_vm1, %v9027_v1  ;;  %8600 = vmatpush3.bf16.msra.mxu1 %v5892_v52  ;;  %v8893_v52 = vld [vmem:[%s9122_s4 + $0x68] sm:$0xff]  }
0x364b   : > { %8613 = vmatprep.subr.bf16.mxu1 %v9027_v1  ;;  %8622 = vmatpush3.bf16.msra.mxu0 %v8890_v21 }
0x364c   : > { %8623 = vmatprep.subr.bf16.mxu0 %v9027_v1 }
0x364f   : > { %8624 = vmatpush3.bf16.msra.mxu0 %v8891_v25 }
0x3650   : > { %8635 = vmatprep.subr.bf16.mxu0 %v9027_v1 }
0x3652   : > { %8626 = vmatmul.mubr.msk.bf16.vlgmr.msra.gmra.mrb[164].mxu0 %vm1178_vm3, %v9439_v15 }
0x3653   : > { %8637 = vmatprep.mubr.msk.bf16.mxu0 %vm9028_vm1, %v9027_v1 }
0x3714   : > { %v5866_v34 = vpop.f32.mrb[156].mxu0 }
0x3715   : > { %v5872_v35 = vmul.f32 0.35355338, %v5866_v34  ;;  %v8597_v20 = vpop.f32.mrb[157].mxu0 }
0x3716   : > { %v5869_v36 = vpop.f32.mrb[158].mxu0 }
0x3717   : > { %v8598_v37 = vpop.f32.mrb[159].mxu0  ;;  %v5873_v38 = vsel %vm9285_vm6, %v5872_v35, -1e+30  ;;  %v7715_v36 = vld [vmem:[%s10163_s1 + $0x5] ss:$0 sm:$0xff] }
0x3718   : > { %v5874_v39 = vsel %vm1340_vm4, %v5873_v38, -inf }
0x3719   : > { %5875 = vmax.xlane.f32.xlu0 %v5874_v39 }
0x371c   : > { %v5987_v40 = vpop.f32.mrb[160].mxu0 }
0x371d   : > { %v8611_v41 = vpop.f32.mrb[161].mxu0  ;;  %v5988_v19 = vadd.f32 %v7707_v14, %v5987_v40 }
0x371e   : > { %v5990_v42 = vpop.f32.mrb[162].mxu0  ;;  %v7689_v41 = vld [vmem:[%s10164_s2 + $0x14] sm:$0xf] }
0x371f   : > { %v8612_v43 = vpop.f32.mrb[163].mxu0  ;;  %v6109_v16 = vpack.c.bf16 %v5988_v19, %v5988_v19  ;;  %v6224_v42 = vsel %vm1406_vm5, %v7689_v41, 0  ;;  %v7723_v19 = vld [vmem:[%s10161_s26 + $0x6] ss:$0 sm:$0xff] }
0x3725   : > { %v6103_v34 = vpop.f32.mrb[164].mxu0 }
0x3726   : > { %v8627_v35 = vpop.f32.mrb[165].mxu0 }
0x3727   : > { %v6106_v20 = vpop.f32.mrb[166].mxu0 }
0x3728   : > { %v8628_v37 = vpop.f32.mrb[167].mxu0 }
0x37a6   : > { %v5876_v53 = vpop.xlane.xlu0 %5875 }
0x37a7   : > { %v5877_v54 = vsub.f32 %v5873_v38, %v5876_v53  ;;  %v6104_v38 = vadd.f32 %v7715_v36, %v6103_v34  ;;  %v7731_v34 = vld [vmem:[%s10163_s1 + $0x6] ss:$0 sm:$0xff] }
0x37a9   : > { %v5878_v55 = vmul.f32 1.442695, %v5877_v54  ;;  %v6172_v39 = vpack.c.bf16 %v6104_v38, %v6104_v38  ;;  %v8894_v54 = vld [vmem:[%s10157_s15 + $0x60] sm:$0xff]  }
0x37ab   : > { %8966 = vpow2.f32 %v5878_v55  ;;  %v6177_v40 = vsel %vm1406_vm5, %v6172_v39, 0 }
0x37ac   : > { %8636 = vmatpush3.bf16.msra.mxu0 %v6177_v40 }
0x37ad   : > { %8647 = vmatprep.subr.bf16.mxu0 %v9027_v1 }
0x37b5   : > { %v8967_v56 = vpop.eup %8966 }
0x37b6   : > { %v5880_v57 = vsel %vm1340_vm4, %v8967_v56, 0.0 }
0x37b7   : > { %5881 = vadd.xlane.f32.xlu1 %v5880_v57 }
0x3844   : > { %v5882_v58 = vpop.xlane.xlu1 %5881 }
0x3845   : > { %8968 = vrcp.f32 %v5882_v58 }
0x384f   : > { %v8969_v59 = vpop.eup %8968 }
0x3850   : > { %v5885_v60 = vmul.f32 %v8969_v59, %v8967_v56  ;;  %v8895_v59 = vld [vmem:[%s10157_s15 + $0x68] sm:$0xff]  }
0x3852   : > { %v5886_v62 = vpack.c.bf16 %v5885_v60, %v5885_v60 }
0x3854   : > { %8602 = vmatmul.mubr.msk.bf16.vlgmr.msra.gmra.mrb[156].mxu1 %vm1340_vm4, %v5886_v62 }
0x3855   : > { %8614 = vmatpush3.bf16.msra.mxu1 %v8888_v61  ;;  %8617 = vmatprep.mubr.msk.bf16.mxu1 %vm9028_vm1, %v9027_v1 }
0x3856   : > { %8615 = vmatprep.subr.bf16.mxu1 %v9027_v1 }
0x3859   : > { %8616 = vmatpush3.bf16.msra.mxu1 %v8889_v63 }
0x385a   : > { %8629 = vmatprep.subr.bf16.mxu1 %v9027_v1 }
0x385c   : > { %8618 = vmatmul.mubr.msk.bf16.vlgmr.msra.gmra.mrb[160].mxu1 %vm1178_vm3, %v9439_v15 }
0x385d   : > { %8631 = vmatprep.mubr.msk.bf16.mxu1 %vm9028_vm1, %v9027_v1 }
0x3927   : > { %v9936_v4 = vpop.f32.mrb[156].mxu1 }
0x3928   : > { %v8603_v0 = vpop.f32.mrb[157].mxu1  ;;  %v5934_v50 = vpack.c.bf16 %v9936_v4, %v9936_v4  ;;  %v7727_v4 = vld [vmem:[%s10160_s23 + $0x6] ss:$0 sm:$0xff] }
0x3929   : > { %v5931_v2 = vpop.f32.mrb[158].mxu1 }
0x392a   : > { %v8604_v3 = vpop.f32.mrb[159].mxu1 }
0x392f   : > { %v6045_v8 = vpop.f32.mrb[160].mxu1 }
0x3930   : > { %v6046_v9 = vadd.f32 %v7711_v5, %v6045_v8  ;;  %v8619_v6 = vpop.f32.mrb[161].mxu1 }
0x3931   : > { %v6048_v10 = vpop.f32.mrb[162].mxu1 }
0x3932   : > { %v6110_v26 = vpack.c.bf16 %v6046_v9, %v6046_v9  ;;  %v8620_v13 = vpop.f32.mrb[163].mxu1 }
0x3934   : > { %v6115_v17 = vsel %vm1340_vm4, %v6110_v26, 0 }
0x3935   : > { %8630 = vmatpush3.bf16.xpose.msra.mxu1 %v6115_v17 }
0x3936   : > { %8641 = vmatprep.subr.bf16.mxu1 %v9027_v1 }
0x393c   : > { %8632 = vmatmul.mubr.msk.bf16.vlgmr.msra.gmra.mrb[164].mxu1 %vm1340_vm4, %v6109_v16 }
0x393d   : > { %8643 = vmatprep.mubr.msk.bf16.mxu1 %vm9028_vm1, %v9027_v1  ;;  %8642 = vmatpush3.bf16.msra.mxu1 %v6224_v42 }
0x393e   : > { %8653 = vmatprep.subr.bf16.mxu1 %v9027_v1 }
0x3a0f   : > { %v6151_v18 = vpop.f32.mrb[164].mxu1 }
0x3a10   : > { %v6157_v22 = vmul.f32 0.35355338, %v6151_v18  ;;  %v8633_v23 = vpop.f32.mrb[165].mxu1 }
0x3a11   : > { %v6154_v7 = vpop.f32.mrb[166].mxu1 }
0x3a12   : > { %v8634_v27 = vpop.f32.mrb[167].mxu1  ;;  %v6158_v28 = vsel %vm9285_vm6, %v6157_v22, -1e+30  ;;  %v8896_v7 = vld [vmem:[%s10162_s28 + $0x60] sm:$0xff]  }
0x3a13   : > { %v6159_v29 = vsel %vm1340_vm4, %v6158_v28, -inf  ;;  %v8897_v27 = vld [vmem:[%s10162_s28 + $0x68] sm:$0xff]  }
0x3a14   : > { %6160 = vmax.xlane.f32.xlu0 %v6159_v29 }
0x3aa1   : > { %v6161_v30 = vpop.xlane.xlu0 %6160 }
0x3aa2   : > { %v6162_v31 = vsub.f32 %v6158_v28, %v6161_v30 }
0x3aa4   : > { %v6163_v32 = vmul.f32 1.442695, %v6162_v31 }
0x3aa6   : > { %8970 = vpow2.f32 %v6163_v32 }
0x3ab0   : > { %v8971_v33 = vpop.eup %8970 }
0x3ab1   : > { %v6165_v24 = vsel %vm1340_vm4, %v8971_v33, 0.0 }
0x3ab2   : > { %6166 = vadd.xlane.f32.xlu1 %v6165_v24 }
0x3b3f   : > { %v6167_v43 = vpop.xlane.xlu1 %6166 }
0x3b40   : > { %8972 = vrcp.f32 %v6167_v43 }
0x3b4a   : > { %v8973_v44 = vpop.eup %8972 }
0x3b4b   : > { %v6170_v46 = vmul.f32 %v8973_v44, %v8971_v33 }
0x3b4d   : > { %v6171_v47 = vpack.c.bf16 %v6170_v46, %v6170_v46  ;;  %v7690_v46 = vld [vmem:[%s10164_s2 + $0x18] sm:$0xf] }
0x3b4f   : > { %8638 = vmatmul.mubr.msk.bf16.vlgmr.msra.gmra.mrb[168].mxu0 %vm1340_vm4, %v6171_v47  ;;  %v6601_v47 = vsel %vm1406_vm5, %v7690_v46, 0 }
0x3b50   : > { %8648 = vmatpush3.bf16.msra.mxu0 %v6270_v48  ;;  %8649 = vmatprep.mubr.msk.bf16.mxu0 %vm9028_vm1, %v9027_v1 }
0x3b51   : > { %8661 = vmatprep.subr.bf16.mxu0 %v9027_v1 }
0x3b57   : > { %8650 = vmatmul.mubr.msk.bf16.vlgmr.msra.gmra.mrb[172].mxu0 %vm1340_vm4, %v5934_v50 }
0x3b58   : > { %8662 = vmatpush3.bf16.msra.mxu0 %v8892_v49  ;;  %8665 = vmatprep.mubr.msk.bf16.mxu0 %vm9028_vm1, %v9027_v1 }
0x3b59   : > { %8663 = vmatprep.subr.bf16.mxu0 %v9027_v1 }
0x3b5c   : > { %8664 = vmatpush3.bf16.msra.mxu0 %v8893_v52  ;;  %v8898_v52 = vld [vmem:[%s10157_s15 + $0x70] sm:$0xff]  }
0x3b5d   : > { %8677 = vmatprep.subr.bf16.mxu0 %v9027_v1 }
0x3b5f   : > { %8666 = vmatmul.mubr.msk.bf16.vlgmr.msra.gmra.mrb[176].mxu0 %vm1178_vm3, %v9439_v15 }
0x3b60   : > { %8679 = vmatprep.mubr.msk.bf16.mxu0 %vm9028_vm1, %v9027_v1 }
0x3c22   : > { %v6213_v53 = vpop.f32.mrb[168].mxu0 }
0x3c23   : > { %v6219_v55 = vpack.c.bf16 %v6213_v53, %v6213_v53  ;;  %v8639_v56 = vpop.f32.mrb[169].mxu0 }
0x3c24   : > { %v6216_v57 = vpop.f32.mrb[170].mxu0  ;;  %v8900_v56 = vld [vmem:[%s9122_s4 + $0x70] sm:$0xff]  }
0x3c25   : > { %v8640_v58 = vpop.f32.mrb[171].mxu0  ;;  %8644 = vmatmul.mubr.msk.bf16.vlgmr.msra.gmra.mrb[168].mxu1 %vm1340_vm4, %v6219_v55 }
0x3c26   : > { %8654 = vmatpush3.bf16.msra.mxu1 %v8894_v54  ;;  %8657 = vmatprep.mubr.msk.bf16.mxu1 %vm9028_vm1, %v9027_v1  ;;  %v8899_v54 = vld [vmem:[%s10157_s15 + $0x78] sm:$0xff]  }
0x3c27   : > { %8655 = vmatprep.subr.bf16.mxu1 %v9027_v1 }
0x3c2a   : > { %v6306_v60 = vpop.f32.mrb[172].mxu0  ;;  %8656 = vmatpush3.bf16.msra.mxu1 %v8895_v59 }
0x3c2b   : > { %v8651_v61 = vpop.f32.mrb[173].mxu0  ;;  %8669 = vmatprep.subr.bf16.mxu1 %v9027_v1 }
0x3c2c   : > { %v6309_v62 = vpop.f32.mrb[174].mxu0  ;;  %v8901_v61 = vld [vmem:[%s9122_s4 + $0x78] sm:$0xff]  }
0x3c2d   : > { %v8652_v63 = vpop.f32.mrb[175].mxu0  ;;  %8658 = vmatmul.mubr.msk.bf16.vlgmr.msra.gmra.mrb[172].mxu1 %vm1178_vm3, %v9889_v12 }
0x3c2e   : > { %8673 = vmatprep.mubr.msk.bf16.mxu1 %vm9028_vm1, %v9027_v1  ;;  %8670 = vmatpush3.bf16.msra.mxu1 %v8896_v7 }
0x3c2f   : > { %8671 = vmatprep.subr.bf16.mxu1 %v9027_v1 }
0x3c32   : > { %v6422_v0 = vpop.f32.mrb[176].mxu0  ;;  %8672 = vmatpush3.bf16.msra.mxu1 %v8897_v27 }
0x3c33   : > { %v6423_v2 = vadd.f32 %v7727_v4, %v6422_v0  ;;  %v8667_v3 = vpop.f32.mrb[177].mxu0  ;;  %8683 = vmatprep.subr.bf16.mxu1 %v9027_v1 }
0x3c34   : > { %v6425_v5 = vpop.f32.mrb[178].mxu0 }
0x3c35   : > { %v6487_v8 = vpack.c.bf16 %v6423_v2, %v6423_v2  ;;  %v8668_v9 = vpop.f32.mrb[179].mxu0  ;;  %8674 = vmatmul.mubr.msk.bf16.vlgmr.msra.gmra.mrb[176].mxu1 %vm1178_vm3, %v9439_v15 }
0x3c36   : > { %8685 = vmatprep.mubr.msk.bf16.mxu1 %vm9028_vm1, %v9027_v1  ;;  %v7742_v9 = vld [vmem:[%s10160_s23 + $0x7] ss:$0 sm:$0xff] }
0x3c37   : > { %v6492_v6 = vsel %vm1340_vm4, %v6487_v8, 0 }
0x3c38   : > { %8678 = vmatpush3.bf16.xpose.msra.mxu0 %v6492_v6 }
0x3c39   : > { %8689 = vmatprep.subr.bf16.mxu0 %v9027_v1 }
0x3cf8   : > { %v6260_v10 = vpop.f32.mrb[168].mxu1 }
0x3cf9   : > { %v9996_v26 = vadd.f32 %v6306_v60, %v6260_v10  ;;  %v8645_v13 = vpop.f32.mrb[169].mxu1 }
0x3cfa   : > { %v6263_v14 = vpop.f32.mrb[170].mxu1 }
0x3cfb   : > { %v8646_v17 = vpop.f32.mrb[171].mxu1 }
0x3d00   : > { %v6364_v16 = vpop.f32.mrb[172].mxu1 }
0x3d01   : > { %v6365_v21 = vadd.f32 %v7723_v19, %v6364_v16  ;;  %v8659_v25 = vpop.f32.mrb[173].mxu1  ;;  %v7738_v16 = vld [vmem:[%s10161_s26 + $0x7] ss:$0 sm:$0xff] }
0x3d02   : > { %v6367_v18 = vpop.f32.mrb[174].mxu1 }
0x3d03   : > { %v6486_v22 = vpack.c.bf16 %v6365_v21, %v6365_v21  ;;  %v8660_v23 = vpop.f32.mrb[175].mxu1  ;;  %v8902_v18 = vld [vmem:[%s10162_s28 + $0x70] sm:$0xff]  }
0x3d05   : > { %8680 = vmatmul.mubr.msk.bf16.vlgmr.msra.gmra.mrb[180].mxu0 %vm1340_vm4, %v6486_v22  ;;  %v8903_v22 = vld [vmem:[%s10162_s28 + $0x78] sm:$0xff]  }
0x3d06   : > { %8691 = vmatprep.mubr.msk.bf16.mxu0 %vm9028_vm1, %v9027_v1  ;;  %8690 = vmatpush3.bf16.msra.mxu0 %v6601_v47 }
0x3d07   : > { %8703 = vmatprep.subr.bf16.mxu0 %v9027_v1 }
0x3d08   : > { %v6480_v35 = vpop.f32.mrb[176].mxu1 }
0x3d09   : > { %v6481_v20 = vadd.f32 %v7731_v34, %v6480_v35  ;;  %v8675_v36 = vpop.f32.mrb[177].mxu1 }
0x3d0a   : > { %v6483_v37 = vpop.f32.mrb[178].mxu1 }
0x3d0b   : > { %v6549_v38 = vpack.c.bf16 %v6481_v20, %v6481_v20  ;;  %v8676_v39 = vpop.f32.mrb[179].mxu1 }
0x3d0d   : > { %v6554_v40 = vsel %vm1406_vm5, %v6549_v38, 0 }
0x3d0e   : > { %8684 = vmatpush3.bf16.msra.mxu1 %v6554_v40 }
0x3d0f   : > { %8695 = vmatprep.subr.bf16.mxu1 %v9027_v1 }
0x3dd8   : > { %v6528_v28 = vpop.f32.mrb[180].mxu0 }
0x3dd9   : > { %v6534_v29 = vmul.f32 0.35355338, %v6528_v28  ;;  %v8681_v30 = vpop.f32.mrb[181].mxu0 }
0x3dda   : > { %v6531_v31 = vpop.f32.mrb[182].mxu0 }
0x3ddb   : > { %v8682_v32 = vpop.f32.mrb[183].mxu0  ;;  %v6535_v33 = vsel %vm9285_vm6, %v6534_v29, -1e+30 }
0x3ddc   : > { %v6536_v24 = vsel %vm1340_vm4, %v6535_v33, -inf  ;;  %v7746_v32 = vld [vmem:[%s10163_s1 + $0x7] ss:$0 sm:$0xff]  ;;  %s1026_s1 = scalar_lea.vmem %s9202_s20, %s9220_s0 }
0x3ddd   : > { %6537 = vmax.xlane.f32.xlu0 %v6536_v24 }
0x3e6a   : > { %v6538_v41 = vpop.xlane.xlu0 %6537 }
0x3e6b   : > { %v6539_v42 = vsub.f32 %v6535_v33, %v6538_v41  ;;  %v7691_v41 = vld [vmem:[%s10164_s2 + $0x1c] sm:$0xf] }
0x3e6d   : > { %v6540_v43 = vmul.f32 1.442695, %v6539_v42  ;;  %v6933_v42 = vsel %vm1406_vm5, %v7691_v41, 0 }
0x3e6f   : > { %8974 = vpow2.f32 %v6540_v43 }
0x3e79   : > { %v8975_v44 = vpop.eup %8974 }
0x3e7a   : > { %v6542_v45 = vsel %vm1340_vm4, %v8975_v44, 0.0 }
0x3e7b   : > { %6543 = vadd.xlane.f32.xlu1 %v6542_v45 }
0x3f08   : > { %v6544_v48 = vpop.xlane.xlu1 %6543 }
0x3f09   : > { %8976 = vrcp.f32 %v6544_v48 }
0x3f13   : > { %v8977_v49 = vpop.eup %8976 }
0x3f14   : > { %v6547_v50 = vmul.f32 %v8977_v49, %v8975_v44 }
0x3f16   : > { %v6548_v53 = vpack.c.bf16 %v6547_v50, %v6547_v50 }
0x3f18   : > { %8686 = vmatmul.mubr.msk.bf16.vlgmr.msra.gmra.mrb[180].mxu1 %vm1340_vm4, %v6548_v53  ;;  %v7753_v53 = vld [vmem:[%s10165_s10 + $0x1] ss:$0 sm:$0xff] }
0x3f19   : > { %8696 = vmatpush3.bf16.msra.mxu1 %v8898_v52  ;;  %8699 = vmatprep.mubr.msk.bf16.mxu1 %vm9028_vm1, %v9027_v1 }
0x3f1a   : > { %8697 = vmatprep.subr.bf16.mxu1 %v9027_v1 }
0x3f1d   : > { %8698 = vmatpush3.bf16.msra.mxu1 %v8899_v54 }
0x3f1e   : > { %8711 = vmatprep.subr.bf16.mxu1 %v9027_v1 }
0x3f20   : > { %8700 = vmatmul.mubr.msk.bf16.vlgmr.msra.gmra.mrb[184].mxu1 %vm1178_vm3, %v9889_v12 }
0x3f21   : > { %8715 = vmatprep.mubr.msk.bf16.mxu1 %vm9028_vm1, %v9027_v1  ;;  %8712 = vmatpush3.bf16.msra.mxu1 %v8902_v18 }
0x3f22   : > { %8713 = vmatprep.subr.bf16.mxu1 %v9027_v1 }
0x3f25   : > { %8714 = vmatpush3.bf16.msra.mxu1 %v8903_v22 }
0x3f26   : > { %8725 = vmatprep.subr.bf16.mxu1 %v9027_v1 }
0x3f28   : > { %8716 = vmatmul.mubr.msk.bf16.vlgmr.msra.gmra.mrb[188].mxu1 %vm1178_vm3, %v9439_v15 }
0x3f29   : > { %8727 = vmatprep.mubr.msk.bf16.mxu1 %vm9028_vm1, %v9027_v1 }
0x3feb   : > { %v6590_v55 = vpop.f32.mrb[180].mxu1 }
0x3fec   : > { %v6596_v57 = vpack.c.bf16 %v6590_v55, %v6590_v55  ;;  %v8687_v58 = vpop.f32.mrb[181].mxu1 }
0x3fed   : > { %v6593_v59 = vpop.f32.mrb[182].mxu1 }
0x3fee   : > { %v8688_v60 = vpop.f32.mrb[183].mxu1  ;;  %8692 = vmatmul.mubr.msk.bf16.vlgmr.msra.gmra.mrb[184].mxu0 %vm1340_vm4, %v6596_v57 }
0x3fef   : > { %8704 = vmatpush3.bf16.msra.mxu0 %v8900_v56  ;;  %8707 = vmatprep.mubr.msk.bf16.mxu0 %vm9028_vm1, %v9027_v1 }
0x3ff0   : > { %8705 = vmatprep.subr.bf16.mxu0 %v9027_v1 }
0x3ff3   : > { %v6696_v12 = vpop.f32.mrb[184].mxu1  ;;  %8706 = vmatpush3.bf16.msra.mxu0 %v8901_v61 }
0x3ff4   : > { %v8701_v62 = vpop.f32.mrb[185].mxu1  ;;  %8719 = vmatprep.subr.bf16.mxu0 %v9027_v1  ;;  %v6697_v25 = vadd.f32 %v7738_v16, %v6696_v12  ;;  %v8906_v16 = vld [vmem:[%s10169_s9 + $0x10] sm:$0xff]  }
0x3ff5   : > { %v6699_v63 = vpop.f32.mrb[186].mxu1 }
0x3ff6   : > { %v8702_v4 = vpop.f32.mrb[187].mxu1  ;;  %8708 = vmatmul.mubr.msk.bf16.vlgmr.msra.gmra.mrb[188].mxu0 %vm1178_vm3, %v9439_v15 }
0x3ff7   : > { %8721 = vmatprep.mubr.msk.bf16.mxu0 %vm9028_vm1, %v9027_v1 }
0x3ffb   : > { %v6812_v33 = vpop.f32.mrb[188].mxu1 }
0x3ffc   : > { %v6813_v24 = vadd.f32 %v7746_v32, %v6812_v33  ;;  %v8717_v34 = vpop.f32.mrb[189].mxu1 }
0x3ffd   : > { %v6815_v15 = vpop.f32.mrb[190].mxu1 }
0x3ffe   : > { %v6881_v35 = vpack.c.bf16 %v6813_v24, %v6813_v24  ;;  %v8718_v20 = vpop.f32.mrb[191].mxu1 }
0x4000   : > { %v6886_v36 = vsel %vm1406_vm5, %v6881_v35, 0 }
0x4001   : > { %8726 = vmatpush3.bf16.msra.mxu1 %v6886_v36 }
0x4002   : > { %8737 = vmatprep.subr.bf16.mxu1 %v9027_v1 }
0x40c1   : > { %v6637_v0 = vpop.f32.mrb[184].mxu0 }
0x40c2   : > { %v10043_v2 = vadd.f32 %v6637_v0, %v9996_v26  ;;  %v8693_v3 = vpop.f32.mrb[185].mxu0  ;;  %v6818_v26 = vpack.c.bf16 %v6697_v25, %v6697_v25  ;;  %v7768_v25 = vld [vmem:[%s10170_s13 + $0x1] ss:$0 sm:$0xff] }
0x40c3   : > { %v6640_v5 = vpop.f32.mrb[186].mxu0  ;;  %v8905_v3 = vld [vmem:[%s10166_s11 + $0x18] sm:$0xff]  }
0x40c4   : > { %v8694_v8 = vpop.f32.mrb[187].mxu0 }
0x40c9   : > { %v6754_v6 = vpop.f32.mrb[188].mxu0 }
0x40ca   : > { %v6755_v10 = vadd.f32 %v7742_v9, %v6754_v6  ;;  %v8709_v13 = vpop.f32.mrb[189].mxu0  ;;  %v7756_v6 = vld [vmem:[%s10167_s16 + $0x1] ss:$0 sm:$0xff] }
0x40cb   : > { %v6757_v14 = vpop.f32.mrb[190].mxu0  ;;  %v7757_v13 = vld [vmem:[%s10168_s5 + $0x1] ss:$0 sm:$0xff] }
0x40cc   : > { %v6819_v17 = vpack.c.bf16 %v6755_v10, %v6755_v10  ;;  %v8710_v19 = vpop.f32.mrb[191].mxu0 }
0x40ce   : > { %v6824_v21 = vsel %vm1340_vm4, %v6819_v17, 0 }
0x40cf   : > { %8720 = vmatpush3.bf16.xpose.msra.mxu0 %v6824_v21  ;;  %v8907_v21 = vld [vmem:[%s10169_s9 + $0x18] sm:$0xff]  }
0x40d0   : > { %8731 = vmatprep.subr.bf16.mxu0 %v9027_v1 }
0x40d6   : > { %8722 = vmatmul.mubr.msk.bf16.vlgmr.msra.gmra.mrb[192].mxu0 %vm1340_vm4, %v6818_v26 }
0x40d7   : > { %8733 = vmatprep.mubr.msk.bf16.mxu0 %vm9028_vm1, %v9027_v1  ;;  %8732 = vmatpush3.bf16.msra.mxu0 %v6933_v42 }
0x40d8   : > { %8745 = vmatprep.subr.bf16.mxu0 %v9027_v1 }
0x41a9   : > { %v6860_v23 = vpop.f32.mrb[192].mxu0 }
0x41aa   : > { %v6866_v7 = vmul.f32 0.35355338, %v6860_v23  ;;  %v8723_v27 = vpop.f32.mrb[193].mxu0 }
0x41ab   : > { %v6863_v28 = vpop.f32.mrb[194].mxu0 }
0x41ac   : > { %v8724_v29 = vpop.f32.mrb[195].mxu0  ;;  %v6867_v30 = vsel %vm9285_vm6, %v6866_v7, -1e+30 }
0x41ad   : > { %v6868_v31 = vsel %vm1340_vm4, %v6867_v30, -inf  ;;  %v7772_v29 = vld [vmem:[%s10171_s17 + $0x1] ss:$0 sm:$0xff] }
0x41ae   : > { %6869 = vmax.xlane.f32.xlu0 %v6868_v31 }
0x423b   : > { %v6870_v37 = vpop.xlane.xlu0 %6869 }
0x423c   : > { %v6871_v38 = vsub.f32 %v6867_v30, %v6870_v37 }
0x423e   : > { %v6872_v51 = vmul.f32 1.442695, %v6871_v38 }
0x4240   : > { %8978 = vpow2.f32 %v6872_v51  ;;  %v8908_v51 = vld [vmem:[%s9192_s6] sm:$0xff]  }
0x424a   : > { %v8979_v39 = vpop.eup %8978 }
0x424b   : > { %v6874_v40 = vsel %vm1340_vm4, %v8979_v39, 0.0 }
0x424c   : > { %6875 = vadd.xlane.f32.xlu1 %v6874_v40 }
0x42d9   : > { %v6876_v43 = vpop.xlane.xlu1 %6875 }
0x42da   : > { %8980 = vrcp.f32 %v6876_v43 }
0x42e4   : > { %v8981_v44 = vpop.eup %8980 }
0x42e5   : > { %v6879_v45 = vmul.f32 %v8981_v44, %v8979_v39  ;;  %v8909_v39 = vld [vmem:[%s9192_s6 + $0x8] sm:$0xff]   ;;  %v7778_v44 = vld [vmem:[%s10172_s21 + $0x1] ss:$0 sm:$0xff] }
0x42e7   : > { %v6880_v46 = vpack.c.bf16 %v6879_v45, %v6879_v45 }
0x42e9   : > { %8728 = vmatmul.mubr.msk.bf16.vlgmr.msra.gmra.mrb[192].mxu1 %vm1340_vm4, %v6880_v46  ;;  %v7779_v46 = vld [vmem:[%s9187_s12 + $0x1] ss:$0 sm:$0xff] }
0x42ea   : > { %8741 = vmatprep.mubr.msk.bf16.mxu1 %vm9028_vm1, %v9027_v1 }
0x43bc   : > { %v6922_v47 = vpop.f32.mrb[192].mxu1 }
0x43bd   : > { %v6928_v48 = vpack.c.bf16 %v6922_v47, %v6922_v47  ;;  %v8729_v49 = vpop.f32.mrb[193].mxu1 }
0x43be   : > { %v6925_v50 = vpop.f32.mrb[194].mxu1 }
0x43bf   : > { %v8730_v52 = vpop.f32.mrb[195].mxu1  ;;  %8734 = vmatmul.mubr.msk.bf16.vlgmr.msra.gmra.mrb[196].mxu0 %vm1340_vm4, %v6928_v48  ;;  %v7780_v50 = vld [vmem:[%s9197_s27] ss:$0 sm:$0xff] }
0x43c0   : > { %8749 = vmatprep.mubr.msk.bf16.mxu0 %vm9028_vm1, %v9027_v1  ;;  %8746 = vmatpush3.bf16.msra.mxu0 %v8906_v16 }
0x43c1   : > { %8747 = vmatprep.subr.bf16.mxu0 %v9027_v1 }
0x43c4   : > { %8748 = vmatpush3.bf16.msra.mxu0 %v8907_v21 }
0x4492   : > { %v6969_v54 = vpop.f32.mrb[196].mxu0 }
0x4493   : > { %v6975_v55 = vadd.f32 %v6969_v54, %v10043_v2  ;;  %v8735_v56 = vpop.f32.mrb[197].mxu0  ;;  %v8904_v2 = vld [vmem:[%s10166_s11 + $0x10] sm:$0xff]  }
0x4494   : > { %v6972_v57 = vpop.f32.mrb[198].mxu0  ;;  %8738 = vmatpush3.bf16.msra.mxu1 %v8904_v2 }
0x4495   : > { %v6982_v58 = vadd.f32 %v7753_v53, %v6975_v55  ;;  %v8736_v59 = vpop.f32.mrb[199].mxu0  ;;  %8739 = vmatprep.subr.bf16.mxu1 %v9027_v1 }
0x4497   : > { %v6983_v60 = vadd.f32 %v6982_v58, %v9885_v11 }
0x4498   : > { %8740 = vmatpush3.bf16.msra.mxu1 %v8905_v3 }
0x4499   : > { %v6988_v61 = vsel %vm1178_vm3, %v6983_v60, 0.0  ;;  %8753 = vmatprep.subr.bf16.mxu1 %v9027_v1 }
0x449a   : > { %6989 = vadd.xlane.f32.xlu0 %v6988_v61 }
0x4527   : > { %v6990_v12 = vpop.xlane.xlu0 %6989 }
0x4528   : > { %v6991_v62 = vmul.f32 0.03125, %v6990_v12 }
0x452a   : > { %v6992_v63 = vsub.f32 %v6983_v60, %v6991_v62 }
0x452c   : > { %v6993_v4 = vmul.f32 %v6992_v63, %v6992_v63 }
0x452e   : > { %v6994_v0 = vsel %vm1178_vm3, %v6993_v4, 0.0 }
0x452f   : > { %6995 = vadd.xlane.f32.xlu1 %v6994_v0 }
0x45bc   : > { %v6996_v11 = vpop.xlane.xlu1 %6995 }
0x45bd   : > { %v6997_v5 = vmul.f32 0.03125, %v6996_v11 }
0x45bf   : > { %v6998_v8 = vadd.f32 1e-05, %v6997_v5 }
0x45c1   : > { %8982 = vrsqrt.f32 %v6998_v8 }
0x45cb   : > { %v8983_v9 = vpop.eup %8982 }
0x45cc   : > { %v7000_v10 = vmul.f32 %v8983_v9, %v6992_v63 }
0x45ce   : > { %v7007_v14 = vmul.f32 %v7756_v6, %v7000_v10 }
0x45d0   : > { %v7014_v17 = vadd.f32 %v7757_v13, %v7007_v14 }
0x45d2   : > { %v7029_v19 = vpack.c.bf16 %v7014_v17, %v7014_v17 }
0x45d4   : > { %8742 = vmatmul.mubr.msk.bf16.vlgmr.msra.gmra.mrb[196].mxu1 %vm1178_vm3, %v7029_v19 }
0x45d5   : > { %8757 = vmatprep.mubr.msk.bf16.mxu1 %vm9028_vm1, %v9027_v1  ;;  %8754 = vmatpush3.bf16.msra.mxu1 %v8908_v51 }
0x45d6   : > { %8755 = vmatprep.subr.bf16.mxu1 %v9027_v1 }
0x45d9   : > { %8756 = vmatpush3.bf16.msra.mxu1 %v8909_v39 }
0x46a7   : > { %v7085_v26 = vpop.f32.mrb[196].mxu1 }
0x46a8   : > { %v7086_v18 = vadd.f32 %v7768_v25, %v7085_v26  ;;  %v8743_v22 = vpop.f32.mrb[197].mxu1 }
0x46a9   : > { %v7088_v23 = vpop.f32.mrb[198].mxu1 }
0x46aa   : > { %v7091_v7 = vmax.f32 %v7086_v18, 0.0  ;;  %v8744_v27 = vpop.f32.mrb[199].mxu1 }
0x46ac   : > { %v7092_v28 = vpack.c.bf16 %v7091_v7, %v7091_v7 }
0x46ae   : > { %8750 = vmatmul.mubr.msk.bf16.vlgmr.msra.gmra.mrb[200].mxu0 %vm1178_vm3, %v7092_v28 }
0x4781   : > { %v7148_v30 = vpop.f32.mrb[200].mxu0 }
0x4782   : > { %v7149_v31 = vadd.f32 %v7772_v29, %v7148_v30  ;;  %v8751_v32 = vpop.f32.mrb[201].mxu0 }
0x4783   : > { %v7151_v33 = vpop.f32.mrb[202].mxu0 }
0x4784   : > { %v8752_v24 = vpop.f32.mrb[203].mxu0  ;;  %v7154_v34 = vadd.f32 %v7149_v31, %v7014_v17 }
0x4786   : > { %v7159_v15 = vsel %vm1178_vm3, %v7154_v34, 0.0 }
0x4787   : > { %7160 = vadd.xlane.f32.xlu0 %v7159_v15 }
0x4814   : > { %v7161_v35 = vpop.xlane.xlu0 %7160 }
0x4815   : > { %v7162_v20 = vmul.f32 0.03125, %v7161_v35 }
0x4817   : > { %v7163_v36 = vsub.f32 %v7154_v34, %v7162_v20 }
0x4819   : > { %v7164_v37 = vmul.f32 %v7163_v36, %v7163_v36 }
0x481b   : > { %v7165_v38 = vsel %vm1178_vm3, %v7164_v37, 0.0 }
0x481c   : > { %7166 = vadd.xlane.f32.xlu1 %v7165_v38 }
0x48a9   : > { %v7167_v40 = vpop.xlane.xlu1 %7166 }
0x48aa   : > { %v7168_v41 = vmul.f32 0.03125, %v7167_v40 }
0x48ac   : > { %v7169_v42 = vadd.f32 1e-05, %v7168_v41 }
0x48ae   : > { %8984 = vrsqrt.f32 %v7169_v42 }
0x48b8   : > { %v8985_v43 = vpop.eup %8984 }
0x48b9   : > { %v7171_v45 = vmul.f32 %v8985_v43, %v7163_v36 }
0x48bb   : > { %v7178_v47 = vmul.f32 %v7778_v44, %v7171_v45 }
0x48bd   : > { %v7185_v48 = vadd.f32 %v7779_v46, %v7178_v47 }
0x48bf   : > { %v7186_v49 = vpack.c.bf16 %v7185_v48, %v7185_v48 }
0x48c1   : > { %8758 = vmatmul.mubr.msk.bf16.vlgmr.msra.gmra.mrb[200].mxu1 %vm1178_vm3, %v7186_v49 }
0x4994   : > { %v7247_v1 = vpop.f32.mrb[200].mxu1 }
0x4995   : > { %v7248_v52 = vadd.f32 %v7780_v50, %v7247_v1  ;;  %v8759_v53 = vpop.f32.mrb[201].mxu1 }
0x4996   : > { %v7250_v54 = vpop.f32.mrb[202].mxu1 }
0x4997   : > { %7253 = vst.msk [vmem:[%s1026_s1] sm:$0xff] %vm1039_vm2, %v7248_v52  ;;  %v8760_v55 = vpop.f32.mrb[203].mxu1 }
0x4998 PF: > { %s77_s7 = sadd.s32 1, %s8992_s7  }
0x4999   : > { %p74_p4 = scmp.ge.s32.totalorder %s77_s7, 4  }
0x499b   :  { %76 = sbr.rel (!%p74_p4) target bundleno = 63 (0x3f), region = 244 }

</bundles_post_ra>
